<compile_context>
chip_gen: v7x
topology: tpu7x:2x2x1
jax: 0.10.0
libtpu: 0.0.40
codegen_flags: <defaults>
</compile_context>

<pallas_src>
import functools
import numpy as np
import jax
import jax.numpy as jnp
from jax.experimental import pallas as pl
from jax.experimental.pallas import tpu as pltpu

EPS = 1e-6
SCALES = (1, 2, 3, 6)
NUM_SCALES = len(SCALES)
_S2 = tuple(s * s for s in SCALES)                           # (1, 4, 9, 36)
_OFFS = tuple(int(o) for o in np.cumsum((0,) + _S2[:-1]))    # (0, 1, 5, 14)
PP = 128                                  # pooled axis padded to lane width
assert sum(_S2) <= PP

_HIGH = jax.lax.Precision.HIGHEST


def _round_up(x, m):
    return -(-x // m) * m


# ------------------------------------------------------------------ helpers --
def adaptive_pool_matrix(in_size: int, out_size: int) -> np.ndarray:
    """P[out_size, in_size] reproducing torch AdaptiveAvgPool2d bin semantics."""
    P = np.zeros((out_size, in_size), dtype=np.float32)
    for i in range(out_size):
        start = (i * in_size) // out_size
        end = -(-((i + 1) * in_size) // out_size)  # ceil
        P[i, start:end] = 1.0 / (end - start)
    return P


def bilinear_matrix(out_size: int, in_size: int) -> np.ndarray:
    """M[out_size, in_size]: torch F.interpolate bilinear, align_corners=False."""
    M = np.zeros((out_size, in_size), dtype=np.float32)
    scale = in_size / out_size
    for i in range(out_size):
        src = max((i + 0.5) * scale - 0.5, 0.0)
        x0 = min(int(np.floor(src)), in_size - 1)
        x1 = min(x0 + 1, in_size - 1)
        lam = src - x0
        M[i, x0] += 1.0 - lam
        M[i, x1] += lam
    return M


def interp_weight_table(H: int, W: int) -> np.ndarray:
    """(H*W, PP) f32: per-pixel bilinear weights onto each scale's pooled grid,
    concatenated over scales and zero-padded to the 128-lane width."""
    cols = []
    for s, s2 in zip(SCALES, _S2):
        Uh = bilinear_matrix(H, s)
        Uw = bilinear_matrix(W, s)
        cols.append(np.einsum("hi,wj->hwij", Uh, Uw).reshape(H * W, s2))
    t = np.concatenate(cols, axis=1).astype(np.float32)      # (HW, 50)
    return np.pad(t, ((0, 0), (0, PP - t.shape[1])))


# ------------------------------------------------------------------- kernel --
def contextual_kernel(f_ref, wp_ref, rhs_ref, wn_ref, bn_ref, w1_ref, w2_ref,
                      bb_ref, o_ref, *, cp, matmul_dtype, exact_div):
    feat = f_ref[0]                                          # (TM, Cp)  f32
    feat_mm = feat.astype(matmul_dtype)

    # One fused K=128 MXU call reconstructs, for all 4 scales at once, both the
    # bilinearly upsampled map up_s and its weight_net image up_s @ Wn (the
    # latter precomputed on the tiny pooled maps in the wrapper):
    #   combo[:, si*Cp:(si+1)*Cp]       = up_si
    #   combo[:, (S+si)*Cp:(S+si+1)*Cp] = up_si @ Wn
    combo = jnp.dot(wp_ref[...], rhs_ref[0],
                    preferred_element_type=jnp.float32)      # (TM, 2*S*Cp)

    # weight_net applied once; per-scale logits via algebraic factoring:
    #   (feat - up_s) @ Wn + bn = (feat @ Wn + bn) - up_s @ Wn
    f_wn = jnp.dot(feat_mm, wn_ref[...],
                   preferred_element_type=jnp.float32) + bn_ref[...]

    num = jnp.zeros_like(feat)
    den = jnp.zeros_like(feat)
    for si in range(NUM_SCALES):
        up_s = combo[:, si * cp:(si + 1) * cp]
        upwn_s = combo[:, (NUM_SCALES + si) * cp:(NUM_SCALES + si + 1) * cp]
        w_s = jax.nn.sigmoid(f_wn - upwn_s)                  # f32 (EUP)
        num = num + up_s * w_s
        den = den + w_s
    if exact_div:
        ms = num / (den + jnp.float32(EPS))
    else:
        ms = num * pl.reciprocal(den + jnp.float32(EPS), approx=True)

    # Bottleneck: two accumulated matmuls, no (TM, 2*Cp) lane concat.
    out = jnp.dot(ms.astype(matmul_dtype), w1_ref[...],
                  preferred_element_type=jnp.float32)
    out = out + jnp.dot(feat_mm, w2_ref[...],
                        preferred_element_type=jnp.float32)
    out = out + bb_ref[...]
    o_ref[0] = jnp.maximum(out, 0.0).astype(o_ref.dtype)


# --------------------------------------------------------------- VMEM sizing --
def _vmem_capacity_bytes():
    try:
        cap = int(getattr(pltpu.get_tpu_info(), "vmem_capacity_bytes", 0) or 0)
        if cap > 0:
            return cap
    except Exception:
        pass
    return 64 << 20            # conservative: v7x per-TensorCore VMEM


def _choose_tile(hw, batch, cp, coutp, mm_bytes, vmem_bytes):
    # Fixed (grid-invariant) VMEM: block-diag conv RHS + weight/bias blocks
    # (counted double-buffered to stay safe if single-buffering is rejected).
    fixed = 2 * (PP * 2 * NUM_SCALES * cp * mm_bytes)
    fixed += 2 * (cp * cp * mm_bytes + 2 * cp * coutp * mm_bytes
                  + 4 * cp + 4 * coutp)
    budget = max((vmem_bytes // 2) - fixed, 2 << 20)
    per_row = (2 * 4 * cp                      # feature stream, f32, 2 buffers
               + 2 * PP * mm_bytes             # interp-weight stream, 2 buffers
               + 2 * 4 * coutp                 # output stream, f32, 2 buffers
               + 4 * 2 * NUM_SCALES * cp       # fused up / up@Wn result (f32)
               + 4 * 6 * cp                    # f_wn / num / den / ms / w_s / casts
               + 4 * coutp)                    # bottleneck accumulator
    tm = int(budget // per_row)
    tm = max(64, min(tm, 4096))
    tm = min(tm, _round_up(hw, 8))

    # v7x has 2 TensorCores: keep >=2 (ideally >=4) parallel grid steps.
    def steps(t):
        return batch * (-(-hw // t))
    while tm > 64 and steps(tm) < 2:
        tm = max(64, _round_up(tm // 2, 8))
    while tm > 512 and steps(tm) < 4:
        tm = max(512, _round_up(tm // 2, 8))
    return _round_up(tm, 8)


# --------------------------------------------------------------- pallas call --
def _pallas_forward(f_flat, wp, rhs_bd, wn_p, bn_p, w1_p, w2_p, bb_p, *,
                    TM, Cp, CoutP, B, NP, vmem_limit, matmul_dtype, exact_div,
                    single_buffer_consts):
    kernel = functools.partial(contextual_kernel, cp=Cp,
                               matmul_dtype=matmul_dtype, exact_div=exact_div)
    # Grid-invariant weight blocks only need one VMEM buffer.
    const_kw = ({"pipeline_mode": pl.Buffered(1)}
                if single_buffer_consts else {})
    lane_rhs = 2 * NUM_SCALES * Cp

    grid_spec = pltpu.PrefetchScalarGridSpec(
        num_scalar_prefetch=0,
        # Pixel-tile axis outer, batch inner: the interp-weight block (i, 0)
        # is constant across the inner axis and is fetched once per tile.
        grid=(NP // TM, B),
        in_specs=[
            pl.BlockSpec((1, TM, Cp), lambda i, b: (b, i, 0)),        # feature
            pl.BlockSpec((TM, PP), lambda i, b: (i, 0)),              # interp wts
            pl.BlockSpec((1, PP, lane_rhs), lambda i, b: (b, 0, 0)),  # conv / conv@Wn (block-diag)
            pl.BlockSpec((Cp, Cp), lambda i, b: (0, 0), **const_kw),      # weight_net W
            pl.BlockSpec((1, Cp), lambda i, b: (0, 0), **const_kw),       # weight_net b
            pl.BlockSpec((Cp, CoutP), lambda i, b: (0, 0), **const_kw),   # bottleneck W (ms half)
            pl.BlockSpec((Cp, CoutP), lambda i, b: (0, 0), **const_kw),   # bottleneck W (feat half)
            pl.BlockSpec((1, CoutP), lambda i, b: (0, 0), **const_kw),    # bottleneck b
        ],
        out_specs=pl.BlockSpec((1, TM, CoutP), lambda i, b: (b, i, 0)),
    )
    return pl.pallas_call(
        kernel,
        out_shape=jax.ShapeDtypeStruct((B, NP, CoutP), jnp.float32),
        grid_spec=grid_spec,
        compiler_params=pltpu.CompilerParams(
            dimension_semantics=("parallel", "parallel"),
            vmem_limit_bytes=vmem_limit),
    )(f_flat, wp, rhs_bd, wn_p, bn_p, w1_p, w2_p, bb_p)


# ------------------------------------------------------------------ wrapper --
def contextual_module_nhwc(x_nhwc, params, *, tile_m=None,
                           matmul_dtype=jnp.bfloat16, exact_div=False,
                           single_buffer_consts=True):
    """x_nhwc: (B, H, W, C) float32. Returns (B, H, W, Cout).

    matmul_dtype=bfloat16 (default) feeds bf16 operands to the MXU; all
    elementwise math (sigmoid / accumulate / reciprocal) stays f32.  Use
    matmul_dtype=jnp.float32 (+ exact_div=True) for strict numerical parity.
    """
    B, H, W, C = x_nhwc.shape
    Cout = params["bottleneck_b"].shape[-1]
    Cp = _round_up(C, 128)
    CoutP = _round_up(Cout, 128)
    HW = H * W
    mm_bytes = jnp.dtype(matmul_dtype).itemsize

    # ---- pad channels to lane width (zeros are semantically inert) ----------
    x = x_nhwc.astype(jnp.float32)
    if Cp > C:
        x = jnp.pad(x, ((0, 0), (0, 0), (0, 0), (0, Cp - C)))

    def pad2(w, r, c):
        w = w.astype(jnp.float32)
        return jnp.pad(w, ((0, r - w.shape[0]), (0, c - w.shape[1])))

    wn_f32 = pad2(params["weight_net_w"], Cp, Cp)
    bn_p = pad2(params["weight_net_b"], 1, Cp)
    w1_f32 = pad2(params["bottleneck_w1"], Cp, CoutP)
    w2_f32 = pad2(params["bottleneck_w2"], Cp, CoutP)
    bb_p = pad2(params["bottleneck_b"], 1, CoutP)

    # ---- tiny multiscale glue (<=36 px/scale): adaptive pool + bias-free 1x1
    #      conv + precomputed conv@Wn, packed into one block-diagonal RHS so a
    #      single K=128 MXU call reconstructs every upsampled map and its
    #      weight_net image inside the kernel.
    # TODO(synk): AdaptiveAvgPool2d is a global (all-pixel) reduction that does
    # not tile with the per-pixel grid; kept as tiny JAX einsums.
    rhs_bd = jnp.zeros((B, PP, 2 * NUM_SCALES * Cp), jnp.float32)
    for si, (s, s2, off, Ws) in enumerate(zip(SCALES, _S2, _OFFS,
                                              params["scale_w"])):
        Ph = jnp.asarray(adaptive_pool_matrix(H, s))
        Pw = jnp.asarray(adaptive_pool_matrix(W, s))
        pooled = jnp.einsum("ih,bhwc,jw->bijc", Ph, x, Pw,
                            precision=_HIGH)                       # (B,s,s,Cp)
        conv = jnp.einsum("bijc,co->bijo", pooled, pad2(Ws, Cp, Cp),
                          precision=_HIGH).reshape(B, s2, Cp)
        conv_wn = jnp.einsum("bpc,co->bpo", conv, wn_f32, precision=_HIGH)
        rhs_bd = rhs_bd.at[:, off:off + s2, si * Cp:(si + 1) * Cp].set(conv)
        rhs_bd = rhs_bd.at[:, off:off + s2,
                           (NUM_SCALES + si) * Cp:
                           (NUM_SCALES + si + 1) * Cp].set(conv_wn)

    wp = jnp.asarray(interp_weight_table(H, W))                    # (HW, PP)

    # Pre-cast constant MXU operands once in the wrapper (no per-step casts,
    # halved DMA bytes when bf16).
    rhs_bd = rhs_bd.astype(matmul_dtype)
    wn_p = wn_f32.astype(matmul_dtype)
    w1_p = w1_f32.astype(matmul_dtype)
    w2_p = w2_f32.astype(matmul_dtype)
    wp = wp.astype(matmul_dtype)

    # ---- pixel tiling (VMEM-capacity aware, keeps >=2 parallel grid steps) --
    vmem_cap = _vmem_capacity_bytes()
    TM = tile_m if tile_m is not None else _choose_tile(
        HW, B, Cp, CoutP, mm_bytes, vmem_cap)
    TM = min(_round_up(TM, 8), _round_up(HW, 8))
    NP = _round_up(HW, TM)

    f_flat = x.reshape(B, HW, Cp)
    if NP > HW:
        f_flat = jnp.pad(f_flat, ((0, 0), (0, NP - HW), (0, 0)))
        wp = jnp.pad(wp, ((0, NP - HW), (0, 0)))

    vmem_limit = int(min(max(vmem_cap * 3 // 4, 32 << 20), 100 << 20))

    run = functools.partial(
        _pallas_forward, f_flat, wp, rhs_bd, wn_p, bn_p, w1_p, w2_p, bb_p,
        TM=TM, Cp=Cp, CoutP=CoutP, B=B, NP=NP, vmem_limit=vmem_limit,
        matmul_dtype=matmul_dtype, exact_div=exact_div)
    try:
        out_flat = run(single_buffer_consts=single_buffer_consts)
    except Exception:
        if not single_buffer_consts:
            raise
        # pl.Buffered(1) not accepted by this JAX build -> default buffering.
        out_flat = run(single_buffer_consts=False)

    return out_flat[:, :HW, :Cout].reshape(B, H, W, Cout)


def contextual_module(feature_nchw, params, **kw):
    """NCHW wrapper matching the PyTorch module's convention."""
    x = jnp.transpose(feature_nchw, (0, 2, 3, 1))
    out = contextual_module_nhwc(x, params, **kw)
    return jnp.transpose(out, (0, 3, 1, 2))


# ---------------------------------------------------- pure-JAX reference ----
def contextual_module_ref(feature_nchw, params):
    B, C, H, W = feature_nchw.shape
    x = jnp.transpose(feature_nchw, (0, 2, 3, 1))
    num = 0.0
    den = 0.0
    for s, Ws in zip(SCALES, params["scale_w"]):
        Ph, Pw = adaptive_pool_matrix(H, s), adaptive_pool_matrix(W, s)
        pooled = jnp.einsum("ih,bhwc,jw->bijc", Ph, x, Pw, precision=_HIGH)
        conv = jnp.einsum("bijc,co->bijo", pooled, Ws, precision=_HIGH)
        Uh, Uw = bilinear_matrix(H, s), bilinear_matrix(W, s)
        up = jnp.einsum("hi,bijc,wj->bhwc", Uh, conv, Uw, precision=_HIGH)
        w = jax.nn.sigmoid(
            jnp.einsum("bhwc,co->bhwo", x - up, params["weight_net_w"],
                       precision=_HIGH)
            + params["weight_net_b"][0])
        num = num + up * w
        den = den + w
    ms = num / (den + EPS)
    out = (jnp.einsum("bhwc,co->bhwo", ms, params["bottleneck_w1"],
                      precision=_HIGH)
           + jnp.einsum("bhwc,co->bhwo", x, params["bottleneck_w2"],
                        precision=_HIGH)
           + params["bottleneck_b"][0])
    out = jnp.maximum(out, 0.0)
    return jnp.transpose(out, (0, 3, 1, 2))


# -------------------------------------------------------------------- main --
def init_params(key, in_channels, out_channels):
    ks = jax.random.split(key, 8)
    C, Cout = in_channels, out_channels
    return {
        # 1x1 bias-free convs after adaptive pooling (one per scale), (C_in, C_out)
        "scale_w": [0.1 * jax.random.normal(ks[i], (C, C), jnp.float32)
                    for i in range(NUM_SCALES)],
        # weight_net: Conv2d(C, C, 1) with bias, stored as (C_in, C_out)
        "weight_net_w": 0.1 * jax.random.normal(ks[4], (C, C), jnp.float32),
        "weight_net_b": 0.1 * jax.random.normal(ks[5], (1, C), jnp.float32),
        # bottleneck: Conv2d(2C, Cout, 1) split into [ms | feature] halves
        "bottleneck_w1": 0.1 * jax.random.normal(ks[6], (C, Cout), jnp.float32),
        "bottleneck_w2": 0.1 * jax.random.normal(ks[7], (C, Cout), jnp.float32),
        "bottleneck_b": 0.05 * jnp.ones((1, Cout), jnp.float32),
    }


if __name__ == "__main__":
    B, C, H, W = 2, 4, 16, 16
    OUT_CHANNELS = 8

    key = jax.random.PRNGKey(0)
    k_x, k_p = jax.random.split(key)
    x = jax.random.normal(k_x, (B, C, H, W), jnp.float32)
    params = init_params(k_p, C, OUT_CHANNELS)

    ref = jax.block_until_ready(contextual_module_ref(x, params))

    # (1) f32 MXU operands + exact division: parity path.
    out_f32 = jax.block_until_ready(
        contextual_module(x, params, matmul_dtype=jnp.float32, exact_div=True))
    assert out_f32.shape == (B, OUT_CHANNELS, H, W)
    np.testing.assert_allclose(np.asarray(out_f32), np.asarray(ref),
                               rtol=5e-3, atol=5e-3)

    # (2) Default fast path: bf16 MXU operands, approx reciprocal.
    out_bf16 = jax.block_until_ready(contextual_module(x, params))
    np.testing.assert_allclose(np.asarray(out_bf16), np.asarray(ref),
                               rtol=3e-2, atol=3e-2)

    # (3) Multi-tile + ragged padding path (HW=256 not a multiple of TM=96).
    out_tiled = jax.block_until_ready(
        contextual_module(x, params, matmul_dtype=jnp.float32, tile_m=96))
    np.testing.assert_allclose(np.asarray(out_tiled), np.asarray(ref),
                               rtol=5e-3, atol=5e-3)

    print("KERNEL_OK")
</pallas_src>

<mosaic_0001>
module attributes {stable_mosaic.version = 11 : i64} {
  func.func @contextual_kernel(%arg0: i32, %arg1: i32, %arg2: memref<1x256x128xf32, #tpu.memory_space<vmem>>, %arg3: memref<256x128xf32, #tpu.memory_space<vmem>>, %arg4: memref<1x128x1024xf32, #tpu.memory_space<vmem>>, %arg5: memref<128x128xf32, #tpu.memory_space<vmem>>, %arg6: memref<1x128xf32, #tpu.memory_space<vmem>>, %arg7: memref<128x128xf32, #tpu.memory_space<vmem>>, %arg8: memref<128x128xf32, #tpu.memory_space<vmem>>, %arg9: memref<1x128xf32, #tpu.memory_space<vmem>>, %arg10: memref<1x256x128xf32, #tpu.memory_space<vmem>>) attributes {dimension_semantics = [#tpu.dimension_semantics<parallel>, #tpu.dimension_semantics<parallel>], iteration_bounds = array<i64: 1, 2>, scalar_prefetch = 0 : i64, scratch_operands = 0 : i64, tpu.core_type = #tpu.core_type<tc>, window_params = [{transform_indices = @transform_0, window_bounds = array<i64: 1, 256, 128>}, {transform_indices = @transform_1, window_bounds = array<i64: 256, 128>}, {transform_indices = @transform_2, window_bounds = array<i64: 1, 128, 1024>}, {pipeline_mode = #tpu.pipeline_mode<synchronous>, transform_indices = @transform_3, window_bounds = array<i64: 128, 128>}, {pipeline_mode = #tpu.pipeline_mode<synchronous>, transform_indices = @transform_4, window_bounds = array<i64: 1, 128>}, {pipeline_mode = #tpu.pipeline_mode<synchronous>, transform_indices = @transform_5, window_bounds = array<i64: 128, 128>}, {pipeline_mode = #tpu.pipeline_mode<synchronous>, transform_indices = @transform_6, window_bounds = array<i64: 128, 128>}, {pipeline_mode = #tpu.pipeline_mode<synchronous>, transform_indices = @transform_7, window_bounds = array<i64: 1, 128>}, {transform_indices = @transform_8, window_bounds = array<i64: 1, 256, 128>}]} {
    %c0 = arith.constant 0 : index
    %c0_0 = arith.constant 0 : index
    %c0_1 = arith.constant 0 : index
    %0 = vector.load %arg2[%c0, %c0_0, %c0_1] : memref<1x256x128xf32, #tpu.memory_space<vmem>>, vector<1x256x128xf32>
    %1 = vector.shape_cast %0 : vector<1x256x128xf32> to vector<256x128xf32>
    %c0_2 = arith.constant 0 : index
    %c0_3 = arith.constant 0 : index
    %2 = vector.load %arg3[%c0_2, %c0_3] : memref<256x128xf32, #tpu.memory_space<vmem>>, vector<256x128xf32>
    %c0_4 = arith.constant 0 : index
    %c0_5 = arith.constant 0 : index
    %c0_6 = arith.constant 0 : index
    %3 = vector.load %arg4[%c0_4, %c0_5, %c0_6] : memref<1x128x1024xf32, #tpu.memory_space<vmem>>, vector<1x128x1024xf32>
    %4 = vector.shape_cast %3 : vector<1x128x1024xf32> to vector<128x1024xf32>
    %cst = arith.constant dense<0.000000e+00> : vector<256x1024xf32>
    %5 = tpu.matmul %2, %4, %cst {dimension_numbers = #tpu.dot_dimension_numbers<[1], [0], [0], [1], [0, 0, 1, 1], [], []>} : vector<256x128xf32>, vector<128x1024xf32>, vector<256x1024xf32> -> vector<256x1024xf32>
    %c0_7 = arith.constant 0 : index
    %c0_8 = arith.constant 0 : index
    %6 = vector.load %arg5[%c0_7, %c0_8] : memref<128x128xf32, #tpu.memory_space<vmem>>, vector<128x128xf32>
    %cst_9 = arith.constant dense<0.000000e+00> : vector<256x128xf32>
    %7 = tpu.matmul %1, %6, %cst_9 {dimension_numbers = #tpu.dot_dimension_numbers<[1], [0], [0], [1], [0, 0, 1, 1], [], []>} : vector<256x128xf32>, vector<128x128xf32>, vector<256x128xf32> -> vector<256x128xf32>
    %c0_10 = arith.constant 0 : index
    %c0_11 = arith.constant 0 : index
    %8 = vector.load %arg6[%c0_10, %c0_11] : memref<1x128xf32, #tpu.memory_space<vmem>>, vector<1x128xf32>
    %9 = vector.broadcast %8 : vector<1x128xf32> to vector<256x128xf32>
    %10 = arith.addf %7, %9 : vector<256x128xf32>
    %cst_12 = arith.constant 0.000000e+00 : f32
    %11 = vector.broadcast %cst_12 : f32 to vector<256x128xf32>
    %cst_13 = arith.constant 0.000000e+00 : f32
    %12 = vector.broadcast %cst_13 : f32 to vector<256x128xf32>
    %13 = vector.extract_strided_slice %5 {offsets = [0, 0], sizes = [256, 128], strides = [1, 1]} : vector<256x1024xf32> to vector<256x128xf32>
    %14 = vector.extract_strided_slice %5 {offsets = [0, 512], sizes = [256, 128], strides = [1, 1]} : vector<256x1024xf32> to vector<256x128xf32>
    %15 = arith.subf %10, %14 : vector<256x128xf32>
    %16 = arith.negf %15 : vector<256x128xf32>
    %17 = math.exp %16 : vector<256x128xf32>
    %cst_14 = arith.constant 1.000000e+00 : f32
    %18 = vector.broadcast %cst_14 : f32 to vector<256x128xf32>
    %19 = arith.addf %18, %17 : vector<256x128xf32>
    %20 = arith.divf %18, %19 : vector<256x128xf32>
    %21 = arith.mulf %13, %20 : vector<256x128xf32>
    %22 = arith.addf %11, %21 : vector<256x128xf32>
    %23 = arith.addf %12, %20 : vector<256x128xf32>
    %24 = vector.extract_strided_slice %5 {offsets = [0, 128], sizes = [256, 128], strides = [1, 1]} : vector<256x1024xf32> to vector<256x128xf32>
    %25 = vector.extract_strided_slice %5 {offsets = [0, 640], sizes = [256, 128], strides = [1, 1]} : vector<256x1024xf32> to vector<256x128xf32>
    %26 = arith.subf %10, %25 : vector<256x128xf32>
    %27 = arith.negf %26 : vector<256x128xf32>
    %28 = math.exp %27 : vector<256x128xf32>
    %cst_15 = arith.constant 1.000000e+00 : f32
    %29 = vector.broadcast %cst_15 : f32 to vector<256x128xf32>
    %30 = arith.addf %29, %28 : vector<256x128xf32>
    %31 = arith.divf %29, %30 : vector<256x128xf32>
    %32 = arith.mulf %24, %31 : vector<256x128xf32>
    %33 = arith.addf %22, %32 : vector<256x128xf32>
    %34 = arith.addf %23, %31 : vector<256x128xf32>
    %35 = vector.extract_strided_slice %5 {offsets = [0, 256], sizes = [256, 128], strides = [1, 1]} : vector<256x1024xf32> to vector<256x128xf32>
    %36 = vector.extract_strided_slice %5 {offsets = [0, 768], sizes = [256, 128], strides = [1, 1]} : vector<256x1024xf32> to vector<256x128xf32>
    %37 = arith.subf %10, %36 : vector<256x128xf32>
    %38 = arith.negf %37 : vector<256x128xf32>
    %39 = math.exp %38 : vector<256x128xf32>
    %cst_16 = arith.constant 1.000000e+00 : f32
    %40 = vector.broadcast %cst_16 : f32 to vector<256x128xf32>
    %41 = arith.addf %40, %39 : vector<256x128xf32>
    %42 = arith.divf %40, %41 : vector<256x128xf32>
    %43 = arith.mulf %35, %42 : vector<256x128xf32>
    %44 = arith.addf %33, %43 : vector<256x128xf32>
    %45 = arith.addf %34, %42 : vector<256x128xf32>
    %46 = vector.extract_strided_slice %5 {offsets = [0, 384], sizes = [256, 128], strides = [1, 1]} : vector<256x1024xf32> to vector<256x128xf32>
    %47 = vector.extract_strided_slice %5 {offsets = [0, 896], sizes = [256, 128], strides = [1, 1]} : vector<256x1024xf32> to vector<256x128xf32>
    %48 = arith.subf %10, %47 : vector<256x128xf32>
    %49 = arith.negf %48 : vector<256x128xf32>
    %50 = math.exp %49 : vector<256x128xf32>
    %cst_17 = arith.constant 1.000000e+00 : f32
    %51 = vector.broadcast %cst_17 : f32 to vector<256x128xf32>
    %52 = arith.addf %51, %50 : vector<256x128xf32>
    %53 = arith.divf %51, %52 : vector<256x128xf32>
    %54 = arith.mulf %46, %53 : vector<256x128xf32>
    %55 = arith.addf %44, %54 : vector<256x128xf32>
    %56 = arith.addf %45, %53 : vector<256x128xf32>
    %cst_18 = arith.constant 9.99999997E-7 : f32
    %57 = vector.broadcast %cst_18 : f32 to vector<256x128xf32>
    %58 = arith.addf %56, %57 : vector<256x128xf32>
    %59 = arith.divf %55, %58 : vector<256x128xf32>
    %c0_19 = arith.constant 0 : index
    %c0_20 = arith.constant 0 : index
    %60 = vector.load %arg7[%c0_19, %c0_20] : memref<128x128xf32, #tpu.memory_space<vmem>>, vector<128x128xf32>
    %cst_21 = arith.constant dense<0.000000e+00> : vector<256x128xf32>
    %61 = tpu.matmul %59, %60, %cst_21 {dimension_numbers = #tpu.dot_dimension_numbers<[1], [0], [0], [1], [0, 0, 1, 1], [], []>} : vector<256x128xf32>, vector<128x128xf32>, vector<256x128xf32> -> vector<256x128xf32>
    %c0_22 = arith.constant 0 : index
    %c0_23 = arith.constant 0 : index
    %62 = vector.load %arg8[%c0_22, %c0_23] : memref<128x128xf32, #tpu.memory_space<vmem>>, vector<128x128xf32>
    %cst_24 = arith.constant dense<0.000000e+00> : vector<256x128xf32>
    %63 = tpu.matmul %1, %62, %cst_24 {dimension_numbers = #tpu.dot_dimension_numbers<[1], [0], [0], [1], [0, 0, 1, 1], [], []>} : vector<256x128xf32>, vector<128x128xf32>, vector<256x128xf32> -> vector<256x128xf32>
    %64 = arith.addf %61, %63 : vector<256x128xf32>
    %c0_25 = arith.constant 0 : index
    %c0_26 = arith.constant 0 : index
    %65 = vector.load %arg9[%c0_25, %c0_26] : memref<1x128xf32, #tpu.memory_space<vmem>>, vector<1x128xf32>
    %66 = vector.broadcast %65 : vector<1x128xf32> to vector<256x128xf32>
    %67 = arith.addf %64, %66 : vector<256x128xf32>
    %cst_27 = arith.constant 0.000000e+00 : f32
    %68 = vector.broadcast %cst_27 : f32 to vector<256x128xf32>
    %69 = arith.maximumf %67, %68 : vector<256x128xf32>
    %c0_28 = arith.constant 0 : index
    %c0_29 = arith.constant 0 : index
    %c0_30 = arith.constant 0 : index
    %70 = vector.load %arg10[%c0_28, %c0_29, %c0_30] : memref<1x256x128xf32, #tpu.memory_space<vmem>>, vector<1x256x128xf32>
    %71 = vector.shape_cast %70 : vector<1x256x128xf32> to vector<256x128xf32>
    %72 = vector.shape_cast %69 : vector<256x128xf32> to vector<1x256x128xf32>
    tpu.vector_store %arg10[%c0_28, %c0_29, %c0_30], %72 {strides = array<i32>} : memref<1x256x128xf32, #tpu.memory_space<vmem>>, vector<1x256x128xf32>,
    return
  }
  func.func @transform_0(%arg0: i32, %arg1: i32) -> (i32, i32, i32) {
    %c0_i32 = arith.constant 0 : i32
    %c0_i32_0 = arith.constant 0 : i32
    return %arg1, %arg0, %c0_i32 : i32, i32, i32
  }
  func.func @transform_1(%arg0: i32, %arg1: i32) -> (i32, i32) {
    %c0_i32 = arith.constant 0 : i32
    %c0_i32_0 = arith.constant 0 : i32
    return %arg0, %c0_i32 : i32, i32
  }
  func.func @transform_2(%arg0: i32, %arg1: i32) -> (i32, i32, i32) {
    %c0_i32 = arith.constant 0 : i32
    %c0_i32_0 = arith.constant 0 : i32
    %c0_i32_1 = arith.constant 0 : i32
    return %arg1, %c0_i32, %c0_i32_0 : i32, i32, i32
  }
  func.func @transform_3(%arg0: i32, %arg1: i32) -> (i32, i32) {
    %c0_i32 = arith.constant 0 : i32
    %c0_i32_0 = arith.constant 0 : i32
    %c0_i32_1 = arith.constant 0 : i32
    return %c0_i32, %c0_i32_0 : i32, i32
  }
  func.func @transform_4(%arg0: i32, %arg1: i32) -> (i32, i32) {
    %c0_i32 = arith.constant 0 : i32
    %c0_i32_0 = arith.constant 0 : i32
    %c0_i32_1 = arith.constant 0 : i32
    return %c0_i32, %c0_i32_0 : i32, i32
  }
  func.func @transform_5(%arg0: i32, %arg1: i32) -> (i32, i32) {
    %c0_i32 = arith.constant 0 : i32
    %c0_i32_0 = arith.constant 0 : i32
    %c0_i32_1 = arith.constant 0 : i32
    return %c0_i32, %c0_i32_0 : i32, i32
  }
  func.func @transform_6(%arg0: i32, %arg1: i32) -> (i32, i32) {
    %c0_i32 = arith.constant 0 : i32
    %c0_i32_0 = arith.constant 0 : i32
    %c0_i32_1 = arith.constant 0 : i32
    return %c0_i32, %c0_i32_0 : i32, i32
  }
  func.func @transform_7(%arg0: i32, %arg1: i32) -> (i32, i32) {
    %c0_i32 = arith.constant 0 : i32
    %c0_i32_0 = arith.constant 0 : i32
    %c0_i32_1 = arith.constant 0 : i32
    return %c0_i32, %c0_i32_0 : i32, i32
  }
  func.func @transform_8(%arg0: i32, %arg1: i32) -> (i32, i32, i32) {
    %c0_i32 = arith.constant 0 : i32
    %c0_i32_0 = arith.constant 0 : i32
    return %arg1, %arg0, %c0_i32 : i32, i32, i32
  }
}

module attributes {stable_mosaic.version = 11 : i64} {
  func.func @contextual_kernel(%arg0: i32, %arg1: i32, %arg2: memref<1x256x128xf32, #tpu.memory_space<vmem>>, %arg3: memref<256x128xf32, #tpu.memory_space<vmem>>, %arg4: memref<1x128x1024xf32, #tpu.memory_space<vmem>>, %arg5: memref<128x128xf32, #tpu.memory_space<vmem>>, %arg6: memref<1x128xf32, #tpu.memory_space<vmem>>, %arg7: memref<128x128xf32, #tpu.memory_space<vmem>>, %arg8: memref<128x128xf32, #tpu.memory_space<vmem>>, %arg9: memref<1x128xf32, #tpu.memory_space<vmem>>, %arg10: memref<1x256x128xf32, #tpu.memory_space<vmem>>) attributes {dimension_semantics = [#tpu.dimension_semantics<parallel>, #tpu.dimension_semantics<parallel>], iteration_bounds = array<i64: 1, 2>, scalar_prefetch = 0 : i64, scratch_operands = 0 : i64, tpu.core_type = #tpu.core_type<tc>, window_params = [{transform_indices = @transform_0, window_bounds = array<i64: 1, 256, 128>}, {transform_indices = @transform_1, window_bounds = array<i64: 256, 128>}, {transform_indices = @transform_2, window_bounds = array<i64: 1, 128, 1024>}, {pipeline_mode = #tpu.pipeline_mode<synchronous>, transform_indices = @transform_3, window_bounds = array<i64: 128, 128>}, {pipeline_mode = #tpu.pipeline_mode<synchronous>, transform_indices = @transform_4, window_bounds = array<i64: 1, 128>}, {pipeline_mode = #tpu.pipeline_mode<synchronous>, transform_indices = @transform_5, window_bounds = array<i64: 128, 128>}, {pipeline_mode = #tpu.pipeline_mode<synchronous>, transform_indices = @transform_6, window_bounds = array<i64: 128, 128>}, {pipeline_mode = #tpu.pipeline_mode<synchronous>, transform_indices = @transform_7, window_bounds = array<i64: 1, 128>}, {transform_indices = @transform_8, window_bounds = array<i64: 1, 256, 128>}]} {
    %c0 = arith.constant 0 : index
    %c0_0 = arith.constant 0 : index
    %c0_1 = arith.constant 0 : index
    %0 = vector.load %arg2[%c0, %c0_0, %c0_1] : memref<1x256x128xf32, #tpu.memory_space<vmem>>, vector<1x256x128xf32>
    %1 = vector.shape_cast %0 : vector<1x256x128xf32> to vector<256x128xf32>
    %c0_2 = arith.constant 0 : index
    %c0_3 = arith.constant 0 : index
    %2 = vector.load %arg3[%c0_2, %c0_3] : memref<256x128xf32, #tpu.memory_space<vmem>>, vector<256x128xf32>
    %c0_4 = arith.constant 0 : index
    %c0_5 = arith.constant 0 : index
    %c0_6 = arith.constant 0 : index
    %3 = vector.load %arg4[%c0_4, %c0_5, %c0_6] : memref<1x128x1024xf32, #tpu.memory_space<vmem>>, vector<1x128x1024xf32>
    %4 = vector.shape_cast %3 : vector<1x128x1024xf32> to vector<128x1024xf32>
    %cst = arith.constant dense<0.000000e+00> : vector<256x1024xf32>
    %5 = tpu.matmul %2, %4, %cst {dimension_numbers = #tpu.dot_dimension_numbers<[1], [0], [0], [1], [0, 0, 1, 1], [], []>} : vector<256x128xf32>, vector<128x1024xf32>, vector<256x1024xf32> -> vector<256x1024xf32>
    %c0_7 = arith.constant 0 : index
    %c0_8 = arith.constant 0 : index
    %6 = vector.load %arg5[%c0_7, %c0_8] : memref<128x128xf32, #tpu.memory_space<vmem>>, vector<128x128xf32>
    %cst_9 = arith.constant dense<0.000000e+00> : vector<256x128xf32>
    %7 = tpu.matmul %1, %6, %cst_9 {dimension_numbers = #tpu.dot_dimension_numbers<[1], [0], [0], [1], [0, 0, 1, 1], [], []>} : vector<256x128xf32>, vector<128x128xf32>, vector<256x128xf32> -> vector<256x128xf32>
    %c0_10 = arith.constant 0 : index
    %c0_11 = arith.constant 0 : index
    %8 = vector.load %arg6[%c0_10, %c0_11] : memref<1x128xf32, #tpu.memory_space<vmem>>, vector<1x128xf32>
    %9 = vector.broadcast %8 : vector<1x128xf32> to vector<256x128xf32>
    %10 = arith.addf %7, %9 : vector<256x128xf32>
    %cst_12 = arith.constant 0.000000e+00 : f32
    %11 = vector.broadcast %cst_12 : f32 to vector<256x128xf32>
    %cst_13 = arith.constant 0.000000e+00 : f32
    %12 = vector.broadcast %cst_13 : f32 to vector<256x128xf32>
    %13 = vector.extract_strided_slice %5 {offsets = [0, 0], sizes = [256, 128], strides = [1, 1]} : vector<256x1024xf32> to vector<256x128xf32>
    %14 = vector.extract_strided_slice %5 {offsets = [0, 512], sizes = [256, 128], strides = [1, 1]} : vector<256x1024xf32> to vector<256x128xf32>
    %15 = arith.subf %10, %14 : vector<256x128xf32>
    %16 = arith.negf %15 : vector<256x128xf32>
    %17 = math.exp %16 : vector<256x128xf32>
    %cst_14 = arith.constant 1.000000e+00 : f32
    %18 = vector.broadcast %cst_14 : f32 to vector<256x128xf32>
    %19 = arith.addf %18, %17 : vector<256x128xf32>
    %20 = arith.divf %18, %19 : vector<256x128xf32>
    %21 = arith.mulf %13, %20 : vector<256x128xf32>
    %22 = arith.addf %11, %21 : vector<256x128xf32>
    %23 = arith.addf %12, %20 : vector<256x128xf32>
    %24 = vector.extract_strided_slice %5 {offsets = [0, 128], sizes = [256, 128], strides = [1, 1]} : vector<256x1024xf32> to vector<256x128xf32>
    %25 = vector.extract_strided_slice %5 {offsets = [0, 640], sizes = [256, 128], strides = [1, 1]} : vector<256x1024xf32> to vector<256x128xf32>
    %26 = arith.subf %10, %25 : vector<256x128xf32>
    %27 = arith.negf %26 : vector<256x128xf32>
    %28 = math.exp %27 : vector<256x128xf32>
    %cst_15 = arith.constant 1.000000e+00 : f32
    %29 = vector.broadcast %cst_15 : f32 to vector<256x128xf32>
    %30 = arith.addf %29, %28 : vector<256x128xf32>
    %31 = arith.divf %29, %30 : vector<256x128xf32>
    %32 = arith.mulf %24, %31 : vector<256x128xf32>
    %33 = arith.addf %22, %32 : vector<256x128xf32>
    %34 = arith.addf %23, %31 : vector<256x128xf32>
    %35 = vector.extract_strided_slice %5 {offsets = [0, 256], sizes = [256, 128], strides = [1, 1]} : vector<256x1024xf32> to vector<256x128xf32>
    %36 = vector.extract_strided_slice %5 {offsets = [0, 768], sizes = [256, 128], strides = [1, 1]} : vector<256x1024xf32> to vector<256x128xf32>
    %37 = arith.subf %10, %36 : vector<256x128xf32>
    %38 = arith.negf %37 : vector<256x128xf32>
    %39 = math.exp %38 : vector<256x128xf32>
    %cst_16 = arith.constant 1.000000e+00 : f32
    %40 = vector.broadcast %cst_16 : f32 to vector<256x128xf32>
    %41 = arith.addf %40, %39 : vector<256x128xf32>
    %42 = arith.divf %40, %41 : vector<256x128xf32>
    %43 = arith.mulf %35, %42 : vector<256x128xf32>
    %44 = arith.addf %33, %43 : vector<256x128xf32>
    %45 = arith.addf %34, %42 : vector<256x128xf32>
    %46 = vector.extract_strided_slice %5 {offsets = [0, 384], sizes = [256, 128], strides = [1, 1]} : vector<256x1024xf32> to vector<256x128xf32>
    %47 = vector.extract_strided_slice %5 {offsets = [0, 896], sizes = [256, 128], strides = [1, 1]} : vector<256x1024xf32> to vector<256x128xf32>
    %48 = arith.subf %10, %47 : vector<256x128xf32>
    %49 = arith.negf %48 : vector<256x128xf32>
    %50 = math.exp %49 : vector<256x128xf32>
    %cst_17 = arith.constant 1.000000e+00 : f32
    %51 = vector.broadcast %cst_17 : f32 to vector<256x128xf32>
    %52 = arith.addf %51, %50 : vector<256x128xf32>
    %53 = arith.divf %51, %52 : vector<256x128xf32>
    %54 = arith.mulf %46, %53 : vector<256x128xf32>
    %55 = arith.addf %44, %54 : vector<256x128xf32>
    %56 = arith.addf %45, %53 : vector<256x128xf32>
    %cst_18 = arith.constant 9.99999997E-7 : f32
    %57 = vector.broadcast %cst_18 : f32 to vector<256x128xf32>
    %58 = arith.addf %56, %57 : vector<256x128xf32>
    %59 = arith.divf %55, %58 : vector<256x128xf32>
    %c0_19 = arith.constant 0 : index
    %c0_20 = arith.constant 0 : index
    %60 = vector.load %arg7[%c0_19, %c0_20] : memref<128x128xf32, #tpu.memory_space<vmem>>, vector<128x128xf32>
    %cst_21 = arith.constant dense<0.000000e+00> : vector<256x128xf32>
    %61 = tpu.matmul %59, %60, %cst_21 {dimension_numbers = #tpu.dot_dimension_numbers<[1], [0], [0], [1], [0, 0, 1, 1], [], []>} : vector<256x128xf32>, vector<128x128xf32>, vector<256x128xf32> -> vector<256x128xf32>
    %c0_22 = arith.constant 0 : index
    %c0_23 = arith.constant 0 : index
    %62 = vector.load %arg8[%c0_22, %c0_23] : memref<128x128xf32, #tpu.memory_space<vmem>>, vector<128x128xf32>
    %cst_24 = arith.constant dense<0.000000e+00> : vector<256x128xf32>
    %63 = tpu.matmul %1, %62, %cst_24 {dimension_numbers = #tpu.dot_dimension_numbers<[1], [0], [0], [1], [0, 0, 1, 1], [], []>} : vector<256x128xf32>, vector<128x128xf32>, vector<256x128xf32> -> vector<256x128xf32>
    %64 = arith.addf %61, %63 : vector<256x128xf32>
    %c0_25 = arith.constant 0 : index
    %c0_26 = arith.constant 0 : index
    %65 = vector.load %arg9[%c0_25, %c0_26] : memref<1x128xf32, #tpu.memory_space<vmem>>, vector<1x128xf32>
    %66 = vector.broadcast %65 : vector<1x128xf32> to vector<256x128xf32>
    %67 = arith.addf %64, %66 : vector<256x128xf32>
    %cst_27 = arith.constant 0.000000e+00 : f32
    %68 = vector.broadcast %cst_27 : f32 to vector<256x128xf32>
    %69 = arith.maximumf %67, %68 : vector<256x128xf32>
    %c0_28 = arith.constant 0 : index
    %c0_29 = arith.constant 0 : index
    %c0_30 = arith.constant 0 : index
    %70 = vector.load %arg10[%c0_28, %c0_29, %c0_30] : memref<1x256x128xf32, #tpu.memory_space<vmem>>, vector<1x256x128xf32>
    %71 = vector.shape_cast %70 : vector<1x256x128xf32> to vector<256x128xf32>
    %72 = vector.shape_cast %69 : vector<256x128xf32> to vector<1x256x128xf32>
    tpu.vector_store %arg10[%c0_28, %c0_29, %c0_30], %72 {strides = array<i32>} : memref<1x256x128xf32, #tpu.memory_space<vmem>>, vector<1x256x128xf32>,
    return
  }
  func.func @transform_0(%arg0: i32, %arg1: i32) -> (i32, i32, i32) {
    %c0_i32 = arith.constant 0 : i32
    %c0_i32_0 = arith.constant 0 : i32
    return %arg1, %arg0, %c0_i32 : i32, i32, i32
  }
  func.func @transform_1(%arg0: i32, %arg1: i32) -> (i32, i32) {
    %c0_i32 = arith.constant 0 : i32
    %c0_i32_0 = arith.constant 0 : i32
    return %arg0, %c0_i32 : i32, i32
  }
  func.func @transform_2(%arg0: i32, %arg1: i32) -> (i32, i32, i32) {
    %c0_i32 = arith.constant 0 : i32
    %c0_i32_0 = arith.constant 0 : i32
    %c0_i32_1 = arith.constant 0 : i32
    return %arg1, %c0_i32, %c0_i32_0 : i32, i32, i32
  }
  func.func @transform_3(%arg0: i32, %arg1: i32) -> (i32, i32) {
    %c0_i32 = arith.constant 0 : i32
    %c0_i32_0 = arith.constant 0 : i32
    %c0_i32_1 = arith.constant 0 : i32
    return %c0_i32, %c0_i32_0 : i32, i32
  }
  func.func @transform_4(%arg0: i32, %arg1: i32) -> (i32, i32) {
    %c0_i32 = arith.constant 0 : i32
    %c0_i32_0 = arith.constant 0 : i32
    %c0_i32_1 = arith.constant 0 : i32
    return %c0_i32, %c0_i32_0 : i32, i32
  }
  func.func @transform_5(%arg0: i32, %arg1: i32) -> (i32, i32) {
    %c0_i32 = arith.constant 0 : i32
    %c0_i32_0 = arith.constant 0 : i32
    %c0_i32_1 = arith.constant 0 : i32
    return %c0_i32, %c0_i32_0 : i32, i32
  }
  func.func @transform_6(%arg0: i32, %arg1: i32) -> (i32, i32) {
    %c0_i32 = arith.constant 0 : i32
    %c0_i32_0 = arith.constant 0 : i32
    %c0_i32_1 = arith.constant 0 : i32
    return %c0_i32, %c0_i32_0 : i32, i32
  }
  func.func @transform_7(%arg0: i32, %arg1: i32) -> (i32, i32) {
    %c0_i32 = arith.constant 0 : i32
    %c0_i32_0 = arith.constant 0 : i32
    %c0_i32_1 = arith.constant 0 : i32
    return %c0_i32, %c0_i32_0 : i32, i32
  }
  func.func @transform_8(%arg0: i32, %arg1: i32) -> (i32, i32, i32) {
    %c0_i32 = arith.constant 0 : i32
    %c0_i32_0 = arith.constant 0 : i32
    return %arg1, %arg0, %c0_i32 : i32, i32, i32
  }
}

</mosaic_0001>

<bundles_post_ra>
// kernel: tpu_custom_call.1
= control target key start
LH: loop header
LB: loop body
LE: loop exit
PB: predicated region body
PF: predicated region fallthrough
CT: control target
= control target key end

     0   :  { %s9130_s0 = inlined_call_operand.hbm [shape: f32[2,256,128], index: 0, kind: input, shape index: {}]   ;;  %s9131_s1 = inlined_call_operand.hbm [shape: f32[256,128], index: 1, kind: input, shape index: {}]   ;;  %s9132_s2 = inlined_call_operand.hbm [shape: f32[2,128,1024], index: 2, kind: input, shape index: {}]   ;;  %s9133_s3 = inlined_call_operand.hbm [shape: f32[128,128], index: 3, kind: input, shape index: {}]   ;;  %s9134_s4 = inlined_call_operand.vmem [shape: f32[1,128], index: 4, kind: input, shape index: {}]   ;;  %s9135_s5 = inlined_call_operand.hbm [shape: f32[128,128], index: 5, kind: input, shape index: {}]   ;;  %s9136_s6 = inlined_call_operand.hbm [shape: f32[128,128], index: 6, kind: input, shape index: {}]   ;;  %s9137_s7 = inlined_call_operand.vmem [shape: f32[1,128], index: 7, kind: input, shape index: {}]   ;;  %s9138_s8 = inlined_call_operand.hbm [shape: f32[2,256,128], index: 8, kind: output, shape index: {}]  }
   0x1   :  { %9299 = sst [smem:[#allocation237_spill]] %s9130_s0 }
   0x2   :  { %9300 = sst [smem:[#allocation238_spill]] %s9131_s1 }
   0x3   :  { %9301 = sst [smem:[#allocation239_spill]] %s9135_s5 }
   0x4   :  { %9302 = sst [smem:[#allocation240_spill]] %s9138_s8 }
   0x5   :  { %13 = vsyncpa [#allocation3], 0 }
   0x6   :  { %15 = vsyncpa [#allocation3 + $0x1], 0 }
   0x7   :  { %16 = vsyncpa [#allocation6], 0 }
   0x8   :  { %17 = vsyncpa [#allocation10], 0 }
   0x9   :  { %18 = vsyncpa [#allocation4], 0 }
   0xa   :  { %20 = vsyncpa [#allocation4 + $0x1], 0  ;;  %s5879_s27 = smov 0   ;;  %s5881_s28 = smov 0  }
   0xb   :  { %s5883_s29 = smov 0   ;;  %s5885_s30 = smov 0  }
   0xc   :  { %s5887_s9 = smov 0   ;;  %s5889_s10 = smov 0  }
   0xd LB: > { %9303 = sst [smem:[#allocation19_spill]] %s5798_s27  ;;  %s5910_s11 = sadd.s32 4294967295, %s5818_s10   ;;  %s5818_s10 = sphi %s5889_s10, %s26_s10   ;;  %s5814_s9 = sphi %s5887_s9, %s10076_s9   ;;  %s5810_s30 = sphi %s5885_s30, %s10075_s30   ;;  %s5806_s29 = sphi %s5883_s29, %s10071_s29   ;;  %s5802_s28 = sphi %s5881_s28, %s10074_s28   ;;  %s5798_s27 = sphi %s5879_s27, %s10073_s27  }
   0xe   : > { %9304 = sst [smem:[#allocation20_spill]] %s5806_s29  ;;  %s4041_s12 = sadd.s32 4294967294, %s5818_s10  }
   0xf   : > { %9305 = sst [smem:[#allocation21_spill]] %s5810_s30  ;;  %p60_p0 = scmp.ne.s32.totalorder %s5802_s28, %s5798_s27 }
  0x10   : > { %9306 = sst [smem:[#allocation22_spill]] %s5818_s10  ;;  %p9139_p1 = scmp.eq.s32.totalorder %s5910_s11, 0 }
  0x11   : > { %p249_p3 = scmp.eq.s32.totalorder %s4041_s12, 1  ;;  %p4042_p5 = scmp.ge.s32.totalorder %s5818_s10, 1 }
  0x12   : > { %p5919_p4 = por %p9139_p1, %p60_p0  ;;  %p256_p7 = scmp.lt.s32.totalorder %s5818_s10, 3 }
  0x13   : > { %p5924_p6 = por %p249_p3, %p60_p0  ;;  %s5820_s16 = smov [#allocation5]  }
  0x14   : > { %s9307_s13 = scalar_select %p5919_p4, 1, 0 }
  0x15   : > { %s9308_s14 = scalar_select %p5924_p6, 1, 0 }
  0x16   : > { %p5929_p8 = pnand %p4042_p5, %p256_p7  ;;  %s271_s17 = sshll.u32 %s5820_s16, 4  ;;  %s5933_s17 = int_to_ptr.vmem [resolvable:$true] %s271_s17 }
  0x17   : > { %9309 = sst [smem:[#allocation23_spill]] %s9308_s14  ;;  %s5821_s19 = smov [#allocation9]  }
  0x18   : > { %s9310_s15 = scalar_select %p5929_p8, 1, 0 }
  0x19   : > { %p4878_p9 = pneg %p5929_p8  ;;  %s300_s20 = sshll.u32 %s5821_s19, 4  ;;  %s5944_s20 = int_to_ptr.vmem [resolvable:$true] %s300_s20 }
  0x1a   : > { %s9312_s1 = sld [smem:[#allocation238_spill]] }
  0x1b   : > { %p5940_p11 = pnand %p4878_p9, %p9139_p1 }
  0x1d   : > { %s9311_s18 = scalar_select %p5940_p11, 1, 0 }
  0x1e   : > { %p5954_p13 = pneg %p5940_p11 }
  0x20   : > { %s5548_s23 = scalar_lea.hbm %s9312_s1, 4096 }
  0x21   : > { %p5549_p12 = scmp.ne.s32.totalorder %s9312_s1, %s5548_s23  ;;  %p5555_p5 = scmp.lt.u32.totalorder %s5548_s23, %s9312_s1 }
  0x23   : > { %p5551_p0 = pnand %p5954_p13, %p5549_p12 }
  0x25   : > { %p5552_p3 = pneg %p5551_p0 }
  0x27   : > { %p5557_p7 = pnand %p5555_p5, %p5552_p3 }
  0x29   : > { %5560 = shalt.err (!%p5557_p7)
}
  0x2a   : > { %s5561_s19 = scalar_lea.vmem %s5933_s17, 4096  ;;  %p5569_p2 = scmp.lt.s32.totalorder %s5933_s17, %s5933_s17 }
  0x2b   : > { %p5562_p9 = scmp.ne.s32.totalorder %s5933_s17, %s5561_s19  ;;  %p5570_p6 = scmp.lt.s32.totalorder %s5561_s19, %s5561_s19 }
  0x2d   : > { %p5564_p10 = pnand %p5562_p9, %p5954_p13  ;;  %p5571_p12 = por %p5570_p6, %p5569_p2 }
  0x2f   : > { %p5565_p1 = pneg %p5564_p10 }
  0x31   : > { %p5572_p0 = pnand %p5571_p12, %p5565_p1 }
  0x33   : > { %5575 = shalt.err (!%p5572_p0)
}
  0x34   : > { %s9143_s21 = smov 128   ;;  %s9145_s22 = smov 8  }
  0x35   : > { %4881 = dma.hbm_to_vmem [thread:$0]  (!%p5940_p11), %s9312_s1, 4096, %s5933_s17, [#allocation6], %s9143_s21, %s9143_s21, %s9145_s22  }
  0x36   : > { %s9314_s5 = sld [smem:[#allocation239_spill]] }
  0x3c   : > { %s5576_s16 = scalar_lea.hbm %s9314_s5, 2048 }
  0x3d   : > { %p5577_p1 = scmp.ne.s32.totalorder %s9314_s5, %s5576_s16  ;;  %p5583_p10 = scmp.lt.u32.totalorder %s5576_s16, %s9314_s5 }
  0x3f   : > { %p5579_p2 = pnand %p5577_p1, %p5954_p13 }
  0x41   : > { %p5580_p6 = pneg %p5579_p2 }
  0x43   : > { %p5585_p3 = pnand %p5583_p10, %p5580_p6 }
  0x45   : > { %5588 = shalt.err (!%p5585_p3)
}
  0x46   : > { %s5589_s17 = scalar_lea.vmem %s5944_s20, 2048  ;;  %p5597_p12 = scmp.lt.s32.totalorder %s5944_s20, %s5944_s20 }
  0x47   : > { %p5590_p5 = scmp.ne.s32.totalorder %s5944_s20, %s5589_s17  ;;  %p5598_p0 = scmp.lt.s32.totalorder %s5589_s17, %s5589_s17 }
  0x49   : > { %p5592_p7 = pnand %p5590_p5, %p5954_p13  ;;  %p5599_p1 = por %p5598_p0, %p5597_p12 }
  0x4b   : > { %p5593_p9 = pneg %p5592_p7 }
  0x4d   : > { %p5600_p2 = pnand %p5599_p1, %p5593_p9 }
  0x4f   : > { %5603 = shalt.err (!%p5600_p2)
}
  0x50   : > { %4887 = dma.hbm_to_vmem [thread:$0]  (!%p5940_p11), %s9314_s5, 2048, %s5944_s20, [#allocation10], %s9143_s21, %s9143_s21, %s9145_s22  }
  0x51   : > { %s35_s14 = sadd.s32 1, %s5814_s9  ;;  %s47_s23 = sadd.s32 1, %s5806_s29 }
  0x52   : > { %p36_p6 = scmp.ge.s32.totalorder %s35_s14, 2  ;;  %p54_p10 = scmp.ne.s32.totalorder %s5806_s29, %s5802_s28 }
  0x53   : > { %p55_p3 = scmp.eq.s32.totalorder %s5818_s10, 0  ;;  %p4906_p5 = scmp.lt.s32.totalorder %s5818_s10, 2 }
  0x54   : > { %s10078_s14 = smov (%p36_p6, %s35_s14), 0  ;;  %p9316_p9 = scmp.eq.s32.totalorder %s5910_s11, 1 }
  0x55   : > { %9315 = sst [smem:[#allocation24_spill]] %s10078_s14  ;;  %p56_p7 = por %p55_p3, %p54_p10 }
  0x56   : > { %p6014_p12 = por %p9316_p9, %p54_p10  ;;  %s42_s25 = ssub.s32 %s5814_s9, %s10078_s14 }
  0x57   : > { %s330_s12 = sand.u32 1, %s5818_s10   ;;  %p45_p0 = scmp.eq.s32.totalorder %s42_s25, 0 }
  0x58   : > { %s9317_s24 = scalar_select %p6014_p12, 1, 0 }
  0x59   : > { %s332_s16 = sand.u32 1, %s5806_s29   ;;  %s4197_s20 = sshll.u32 %s5814_s9, 12 }
  0x5a   : > { %9318 = sst [smem:[#allocation25_spill]] %s9317_s24  ;;  %s4048_s17 = sshll.u32 %s332_s16, 8 }
  0x5b   : > { %s6024_s19 = scalar_select %p45_p0, %s5806_s29, %s47_s23  }
  0x5c   : > { %s9320_s0 = sld [smem:[#allocation237_spill]]  ;;  %p6031_p1 = pnand %p4906_p5, %p56_p7 }
  0x5d   : > { %9319 = sst [smem:[#allocation26_spill]] %s6024_s19  ;;  %s334_s25 = scalar_lea.vmem [#allocation2], %s4048_s17 }
  0x5e   : > { %s9321_s22 = scalar_select %p6031_p1, 1, 0 }
  0x5f   : > { %s343_s1 = sshll.u32 %s334_s25, 4  ;;  %s6035_s23 = sshll.u32 %s332_s16, 10  ;;  %s6037_s1 = int_to_ptr.vmem [resolvable:$true] %s343_s1 }
  0x60   : > { %s6039_s5 = scalar_lea.sflag [#allocation3], %s330_s12  ;;  %p9158_p6 = pneg %p6031_p1 }
  0x62   : > { %s6029_s21 = scalar_lea.hbm %s9320_s0, %s4197_s20  ;;  %s5609_s14 = scalar_lea.hbm %s9320_s0, 8192 }
  0x63   : > { %s5604_s20 = scalar_lea.hbm %s6029_s21, 4096  ;;  %p5610_p5 = scmp.lt.u32.totalorder %s6029_s21, %s9320_s0 }
  0x64   : > { %p5605_p2 = scmp.ne.s32.totalorder %s6029_s21, %s5604_s20  ;;  %p5611_p7 = scmp.lt.u32.totalorder %s5609_s14, %s5604_s20 }
  0x65   : > { %p5613_p0 = scmp.lt.u32.totalorder %s5604_s20, %s6029_s21 }
  0x66   : > { %p5607_p10 = pnand %p9158_p6, %p5605_p2  ;;  %p5612_p9 = por %p5611_p7, %p5610_p5 }
  0x68   : > { %p5608_p3 = pneg %p5607_p10  ;;  %p5614_p12 = por %p5613_p0, %p5612_p9 }
  0x6a   : > { %p5615_p4 = pnand %p5614_p12, %p5608_p3 }
  0x6c   : > { %5618 = shalt.err (!%p5615_p4)
}
  0x6d   : > { %s5619_s12 = scalar_lea.vmem %s6037_s1, 4096  ;;  %s5824_s16 = smov [#allocation2]  }
  0x6e   : > { %p5620_p2 = scmp.ne.s32.totalorder %s6037_s1, %s5619_s12  ;;  %s5624_s8 = sshll.u32 %s5824_s16, 4  ;;  %s5625_s8 = int_to_ptr.vmem [resolvable:$false] %s5624_s8 }
  0x6f   : > { %s5626_s27 = scalar_lea.vmem %s5625_s8, 8192  ;;  %p5627_p11 = scmp.lt.s32.totalorder %s6037_s1, %s5625_s8 }
  0x70   : > { %p5622_p10 = pnand %p5620_p2, %p9158_p6  ;;  %p5628_p5 = scmp.lt.s32.totalorder %s5626_s27, %s5619_s12 }
  0x72   : > { %p5623_p8 = pneg %p5622_p10  ;;  %p5629_p7 = por %p5628_p5, %p5627_p11 }
  0x74   : > { %p5630_p9 = pnand %p5629_p7, %p5623_p8 }
  0x76   : > { %5633 = shalt.err (!%p5630_p9)
}
  0x77   : > { %s9322_s14 = smov 8   ;;  %s9323_s20 = smov 128  }
  0x78   : > { %4894 = dma.hbm_to_vmem [thread:$0]  (!%p6031_p1), %s6029_s21, 4096, %s6037_s1, %s6039_s5, %s9323_s20, %s9323_s20, %s9322_s14  }
  0x79   : > { %s357_s17 = scalar_lea.vmem [#allocation7], %s6035_s23  ;;  %s5825_s16 = smov [#allocation8]  }
  0x7a   : > { %s6071_s25 = sshll.u32 %s357_s17, 4  ;;  %s284_s8 = sshll.u32 %s5825_s16, 4  ;;  %s285_s8 = int_to_ptr.vmem [resolvable:$true] %s284_s8  ;;  %s6122_s25 = int_to_ptr.vmem [resolvable:$true] %s6071_s25 }
  0x7b   : > { %s5634_s0 = scalar_lea.hbm %s9133_s3, 2048 }
  0x7c   : > { %p5635_p4 = scmp.ne.s32.totalorder %s9133_s3, %s5634_s0  ;;  %p5641_p12 = scmp.lt.u32.totalorder %s5634_s0, %s9133_s3 }
  0x7e   : > { %p5637_p8 = pnand %p5635_p4, %p5954_p13 }
  0x80   : > { %p5638_p11 = pneg %p5637_p8 }
  0x82   : > { %p5643_p3 = pnand %p5641_p12, %p5638_p11 }
  0x84   : > { %5646 = shalt.err (!%p5643_p3)
}
  0x85   : > { %s5647_s1 = scalar_lea.vmem %s285_s8, 2048  ;;  %p5655_p5 = scmp.lt.s32.totalorder %s285_s8, %s285_s8 }
  0x86   : > { %p5648_p0 = scmp.ne.s32.totalorder %s285_s8, %s5647_s1  ;;  %p5656_p7 = scmp.lt.s32.totalorder %s5647_s1, %s5647_s1 }
  0x88   : > { %p5650_p2 = pnand %p5648_p0, %p5954_p13  ;;  %p5657_p9 = por %p5656_p7, %p5655_p5 }
  0x8a   : > { %p5651_p10 = pneg %p5650_p2 }
  0x8c   : > { %p5658_p6 = pnand %p5657_p9, %p5651_p10 }
  0x8e   : > { %5661 = shalt.err (!%p5658_p6)
}
  0x8f   : > { %p9324_p4 = scmp.ne.s32.totalorder %s9311_s18, 0  ;;  %s5826_s10 = smov [#allocation11]  }
  0x90   : > { %s313_s21 = sshll.u32 %s5826_s10, 4  ;;  %s4198_s24 = sshll.u32 %s5814_s9, 14  ;;  %s314_s21 = int_to_ptr.vmem [resolvable:$true] %s313_s21 }
  0x91   : > { %4884 = dma.hbm_to_vmem [thread:$0]  (!%p9324_p4), %s9133_s3, 2048, %s285_s8, [#allocation6], %s9323_s20, %s9323_s20, %s9322_s14  }
  0x92   : > { %s6098_s17 = scalar_lea.hbm %s9132_s2, %s4198_s24  ;;  %s5662_s27 = scalar_lea.hbm %s9136_s6, 2048 }
  0x93   : > { %p5663_p6 = scmp.ne.s32.totalorder %s9136_s6, %s5662_s27  ;;  %p5669_p12 = scmp.lt.u32.totalorder %s5662_s27, %s9136_s6 }
  0x95   : > { %p5665_p8 = pnand %p5663_p6, %p5954_p13 }
  0x97   : > { %p5666_p11 = pneg %p5665_p8 }
  0x99   : > { %p5671_p3 = pnand %p5669_p12, %p5666_p11 }
  0x9b   : > { %5674 = shalt.err (!%p5671_p3)
}
  0x9c   : > { %s5675_s0 = scalar_lea.vmem %s314_s21, 2048  ;;  %p5683_p5 = scmp.lt.s32.totalorder %s314_s21, %s314_s21 }
  0x9d   : > { %p5676_p0 = scmp.ne.s32.totalorder %s314_s21, %s5675_s0  ;;  %p5684_p7 = scmp.lt.s32.totalorder %s5675_s0, %s5675_s0 }
  0x9f   : > { %p5678_p2 = pnand %p5676_p0, %p5954_p13  ;;  %p5685_p9 = por %p5684_p7, %p5683_p5 }
  0xa1   : > { %p5679_p10 = pneg %p5678_p2 }
  0xa3   : > { %p5686_p1 = pnand %p5685_p9, %p5679_p10 }
  0xa5   : > { %5689 = shalt.err (!%p5686_p1)
}
  0xa6   : > { %4890 = dma.hbm_to_vmem [thread:$0]  (!%p9324_p4), %s9136_s6, 2048, %s314_s21, [#allocation10], %s9323_s20, %s9323_s20, %s9322_s14  }
  0xa7   : > { %s5690_s26 = scalar_lea.hbm %s6098_s17, 16384  ;;  %p9325_p1 = scmp.ne.s32.totalorder %s9321_s22, 0 }
  0xa8   : > { %p5691_p13 = scmp.ne.s32.totalorder %s6098_s17, %s5690_s26  ;;  %s5695_s19 = scalar_lea.hbm %s9132_s2, 32768 }
  0xa9   : > { %p9326_p6 = pneg %p9325_p1  ;;  %p5696_p12 = scmp.lt.u32.totalorder %s6098_s17, %s9132_s2 }
  0xaa   : > { %p5697_p3 = scmp.lt.u32.totalorder %s5695_s19, %s5690_s26  ;;  %p5699_p2 = scmp.lt.u32.totalorder %s5690_s26, %s6098_s17 }
  0xab   : > { %p5693_p8 = pnand %p5691_p13, %p9326_p6 }
  0xac   : > { %p5698_p0 = por %p5697_p3, %p5696_p12 }
  0xad   : > { %p5694_p11 = pneg %p5693_p8 }
  0xae   : > { %p5700_p4 = por %p5699_p2, %p5698_p0 }
  0xb0   : > { %p5701_p10 = pnand %p5700_p4, %p5694_p11 }
  0xb2   : > { %5704 = shalt.err (!%p5701_p10)
}
  0xb3   : > { %s5705_s14 = scalar_lea.vmem %s6122_s25, 16384  ;;  %p9327_p7 = pmov %p9326_p6 }
  0xb4   : > { %p5706_p5 = scmp.ne.s32.totalorder %s6122_s25, %s5705_s14  ;;  %s5827_s20 = smov [#allocation7]  }
  0xb5   : > { %s5710_s21 = sshll.u32 %s5827_s20, 4  ;;  %s5711_s21 = int_to_ptr.vmem [resolvable:$false] %s5710_s21 }
  0xb6   : > { %p5708_p9 = pnand %p5706_p5, %p9327_p7  ;;  %s5712_s12 = scalar_lea.vmem %s5711_s21, 32768 }
  0xb7   : > { %p5713_p6 = scmp.lt.s32.totalorder %s6122_s25, %s5711_s21  ;;  %p5714_p8 = scmp.lt.s32.totalorder %s5712_s12, %s5705_s14 }
  0xb8   : > { %p5709_p13 = pneg %p5708_p9 }
  0xb9   : > { %p5715_p12 = por %p5714_p8, %p5713_p6 }
  0xbb   : > { %p5716_p3 = pnand %p5715_p12, %p5709_p13 }
  0xbd   : > { %5719 = shalt.err (!%p5716_p3)
}
  0xbe   : > { %s5828_s27 = smov 1024   ;;  %s5829_s1 = smov 64  }
  0xbf   : > { %4897 = dma.hbm_to_vmem [thread:$0]  (!%p9325_p1), %s6098_s17, 16384, %s6122_s25, %s6039_s5, %s5828_s27, %s5828_s27, %s5829_s1  }
  0xc0   : > { %p9328_p11 = scmp.ne.s32.totalorder %s9310_s15, 0 }
  0xc2   : > { %376 = sbr.rel (%p9328_p11) target bundleno = 1325 (0x52d), region = 52 }
  0xc9   : > { %s378_s8 = sand.u32 1, %s5910_s11   ;;  %s6152_s29 = sand.u32 1, %s5802_s28  }
  0xca   : > { %s4055_s0 = sshll.u32 %s6152_s29, 8  ;;  %s379_s30 = scalar_lea.sflag [#allocation3], %s378_s8 }
  0xcb   : > { %s6157_s10 = scalar_lea.vmem [#allocation2], %s4055_s0  ;;  %p9329_p0 = scmp.ne.s32.totalorder %s9307_s13, 0 }
  0xcd   : > { %5773 = dma.done.wait (%p9329_p0), %s379_s30, 4096  }
  0xce   : > { %5775 = vsyncadd (%p9329_p0), %s379_s30, 4294963200  ;;  %p9330_p1 = scmp.eq.s32.totalorder %s5910_s11, 0 }
  0xd0   : > { %5777 = dma.done.wait (%p9330_p1), [#allocation6], 4096   ;;  %p9331_p2 = pmov %p9330_p1 }
  0xd1   : > { %s4057_s5 = sshll.u32 %s6152_s29, 10 }
  0xd2   : > { %5779 = vsyncadd (%p9331_p2), [#allocation6], 4294963200  ;;  %s6168_s15 = scalar_lea.vmem [#allocation7], %s4057_s5 }
  0xd3   : > { %5781 = dma.done.wait (%p9329_p0), %s379_s30, 16384  }
  0xd4   : > { %5783 = vsyncadd (%p9329_p0), %s379_s30, 4294950912  ;;  %p9332_p4 = pmov %p9330_p1 }
  0xd5   : > { %p9333_p10 = pmov %p9330_p1 }
  0xd6   : > { %5785 = dma.done.wait (%p9332_p4), [#allocation6], 2048  }
  0xd7   : > { %5787 = vsyncadd (%p9333_p10), [#allocation6], 4294965248  ;;  %p9334_p5 = pmov %p9330_p1 }
  0xd8   : > { %p9335_p7 = pmov %p9330_p1 }
  0xd9   : > { %5789 = dma.done.wait (%p9334_p5), [#allocation10], 4096  }
  0xda   : > { %5791 = vsyncadd (%p9335_p7), [#allocation10], 4294963200  ;;  %v5830_v0 = vmov 0.0   ;;  %v513_v1 = vld [vmem:[%s6168_s15 + $0x8] sm:$0xff]  ;;  %v512_v3 = vld [vmem:[%s6168_s15] sm:$0xff]  ;;  %s9010_s18 = scalar_lea.vmem [#allocation12], %s4055_s0 }
  0xdb   : > { %704 = vmatprep.mubr.f32.mxu0 %v5830_v0  ;;  %1009 = vmatprep.mubr.f32.mxu1 %v5830_v0  ;;  %v521_v2 = vld [vmem:[%s6168_s15 + $0x48] sm:$0xff]  ;;  %v520_v5 = vld [vmem:[%s6168_s15 + $0x40] sm:$0xff]  ;;  %v515_v26 = vld [vmem:[%s6168_s15 + $0x18] sm:$0xff]  ;;  %s10061_s24 = sld [smem:[#allocation21_spill]]  ;;  %s10062_s23 = sld [smem:[#allocation25_spill]] }
  0xdc   : > { %v4584_v4 = vpack.c.bf16 %v521_v2, %v513_v1  ;;  %v529_v6 = vld [vmem:[%s6168_s15 + $0x88] sm:$0xff]  ;;  %v4586_v8 = vpack.c.bf16 %v520_v5, %v512_v3  ;;  %v528_v10 = vld [vmem:[%s6168_s15 + $0x80] sm:$0xff]  ;;  %v523_v27 = vld [vmem:[%s6168_s15 + $0x58] sm:$0xff]  ;;  %s3893_s16 = sshll.u32 %s9010_s18, 4  ;;  %s10063_s21 = sld [smem:[#allocation240_spill]]  ;;  %s9079_s16 = int_to_ptr.vmem [resolvable:$true] %s3893_s16 }
  0xdd   : > { %v537_v7 = vld [vmem:[%s6168_s15 + $0xc8] sm:$0xff]  ;;  %v536_v11 = vld [vmem:[%s6168_s15 + $0xc0] sm:$0xff]  ;;  %v514_v28 = vld [vmem:[%s6168_s15 + $0x10] sm:$0xff]  ;;  %v6207_v32 = vpack.c.bf16 %v523_v27, %v515_v26  ;;  %s3878_s27 = scalar_lea.sflag [#allocation4], %s6152_s29  ;;  %s5720_s1 = scalar_lea.vmem %s9079_s16, 4096 }
  0xde   : > { %v4588_v9 = vpack.c.bf16 %v537_v7, %v529_v6  ;;  %v545_v12 = vld [vmem:[%s6168_s15 + $0x108] sm:$0xff]  ;;  %4585 = vmatprep.subr.bf16.mxu0 %v4584_v4  ;;  %v4590_v14 = vpack.c.bf16 %v536_v11, %v528_v10  ;;  %v544_v16 = vld [vmem:[%s6168_s15 + $0x100] sm:$0xff]  ;;  %v522_v33 = vld [vmem:[%s6168_s15 + $0x50] sm:$0xff]  ;;  %p5721_p9 = scmp.ne.s32.totalorder %s9079_s16, %s5720_s1  ;;  %s5831_s8 = smov [#allocation12]  }
  0xdf   : > { %v553_v13 = vld [vmem:[%s6168_s15 + $0x148] sm:$0xff]  ;;  %4587 = vmatpush1.bf16.msra.mxu0 %v4586_v8  ;;  %v552_v17 = vld [vmem:[%s6168_s15 + $0x140] sm:$0xff]  ;;  %v6212_v37 = vpack.c.bf16 %v522_v33, %v514_v28  ;;  %v531_v38 = vld [vmem:[%s6168_s15 + $0x98] sm:$0xff]  ;;  %4808 = vmatprep.subr.bf16.mxu1 %v6207_v32  ;;  %s5724_s0 = sshll.u32 %s5831_s8, 4  ;;  %s5725_s0 = int_to_ptr.vmem [resolvable:$false] %s5724_s0 }
  0xe0   : > { %4589 = vmatprep.subr.bf16.mxu0 %v4588_v9  ;;  %v4592_v15 = vpack.c.bf16 %v553_v13, %v545_v12  ;;  %v561_v18 = vld [vmem:[%s6168_s15 + $0x188] sm:$0xff]  ;;  %v4594_v20 = vpack.c.bf16 %v552_v17, %v544_v16  ;;  %v560_v22 = vld [vmem:[%s6168_s15 + $0x180] sm:$0xff]  ;;  %v539_v39 = vld [vmem:[%s6168_s15 + $0xd8] sm:$0xff]  ;;  %s5726_s30 = scalar_lea.vmem %s5725_s0, 8192  ;;  %p5727_p12 = scmp.lt.s32.totalorder %s9079_s16, %s5725_s0 }
  0xe1   : > { %v569_v19 = vld [vmem:[%s6168_s15 + $0x1c8] sm:$0xff]  ;;  %v568_v23 = vld [vmem:[%s6168_s15 + $0x1c0] sm:$0xff]  ;;  %v530_v40 = vld [vmem:[%s6168_s15 + $0x90] sm:$0xff]  ;;  %v6219_v42 = vpack.c.bf16 %v539_v39, %v531_v38  ;;  %4816 = vmatpush1.bf16.msra.mxu1 %v6212_v37  ;;  %s4199_s19 = sshll.u32 %s10061_s24, 12  ;;  %p10064_p13 = scmp.ne.s32.totalorder %s10062_s23, 0 }
  0xe2   : > { %v4596_v21 = vpack.c.bf16 %v569_v19, %v561_v18  ;;  %v577_v24 = vld [vmem:[%s6168_s15 + $0x208] sm:$0xff]  ;;  %v4598_v29 = vpack.c.bf16 %v568_v23, %v560_v22  ;;  %v576_v30 = vld [vmem:[%s6168_s15 + $0x200] sm:$0xff]  ;;  %v538_v41 = vld [vmem:[%s6168_s15 + $0xd0] sm:$0xff]  ;;  %s9077_s12 = scalar_lea.hbm %s10063_s21, %s4199_s19  ;;  %p5728_p3 = scmp.lt.s32.totalorder %s5726_s30, %s5720_s1 }
  0xe3   : > { %4591 = vmatpush1.bf16.msra.mxu0 %v4590_v14  ;;  %v585_v25 = vld [vmem:[%s6168_s15 + $0x248] sm:$0xff]  ;;  %v584_v31 = vld [vmem:[%s6168_s15 + $0x240] sm:$0xff]  ;;  %v6221_v43 = vpack.c.bf16 %v538_v41, %v530_v40  ;;  %v547_v46 = vld [vmem:[%s6168_s15 + $0x118] sm:$0xff]  ;;  %4809 = vmatprep.subr.bf16.mxu1 %v6219_v42  ;;  %p5722_p6 = pnand %p5721_p9, %p10064_p13 }
  0xe4   : > { %4593 = vmatprep.subr.bf16.mxu0 %v4592_v15  ;;  %v4600_v34 = vpack.c.bf16 %v585_v25, %v577_v24  ;;  %v593_v35 = vld [vmem:[%s6168_s15 + $0x288] sm:$0xff]  ;;  %v4602_v44 = vpack.c.bf16 %v584_v31, %v576_v30  ;;  %v592_v45 = vld [vmem:[%s6168_s15 + $0x280] sm:$0xff]  ;;  %v555_v47 = vld [vmem:[%s6168_s15 + $0x158] sm:$0xff]  ;;  %p5729_p11 = por %p5728_p3, %p5727_p12 }
  0xe5   : > { %v601_v36 = vld [vmem:[%s6168_s15 + $0x2c8] sm:$0xff]  ;;  %v600_v49 = vld [vmem:[%s6168_s15 + $0x2c0] sm:$0xff]  ;;  %v6228_v50 = vpack.c.bf16 %v555_v47, %v547_v46  ;;  %v546_v51 = vld [vmem:[%s6168_s15 + $0x110] sm:$0xff]  ;;  %4817 = vmatpush1.bf16.msra.mxu1 %v6221_v43  ;;  %p5723_p8 = pneg %p5722_p6 }
  0xe6   : > { %v4604_v48 = vpack.c.bf16 %v601_v36, %v593_v35  ;;  %v554_v52 = vld [vmem:[%s6168_s15 + $0x150] sm:$0xff]  ;;  %v609_v53 = vld [vmem:[%s6168_s15 + $0x308] sm:$0xff]  ;;  %v563_v56 = vld [vmem:[%s6168_s15 + $0x198] sm:$0xff]  ;;  %v4606_v58 = vpack.c.bf16 %v600_v49, %v592_v45 }
  0xe7   : > { %4595 = vmatpush1.bf16.msra.mxu0 %v4594_v20  ;;  %v617_v54 = vld [vmem:[%s6168_s15 + $0x348] sm:$0xff]  ;;  %v6235_v55 = vpack.c.bf16 %v554_v52, %v546_v51  ;;  %v571_v57 = vld [vmem:[%s6168_s15 + $0x1d8] sm:$0xff]  ;;  %v562_v60 = vld [vmem:[%s6168_s15 + $0x190] sm:$0xff]  ;;  %4810 = vmatprep.subr.bf16.mxu1 %v6228_v50  ;;  %p5730_p0 = pnand %p5729_p11, %p5723_p8 }
  0xe8   : > { %4597 = vmatprep.subr.bf16.mxu0 %v4596_v21  ;;  %v6240_v59 = vpack.c.bf16 %v571_v57, %v563_v56  ;;  %v570_v61 = vld [vmem:[%s6168_s15 + $0x1d0] sm:$0xff]  ;;  %v4608_v62 = vpack.c.bf16 %v617_v54, %v609_v53  ;;  %v608_v63 = vld [vmem:[%s6168_s15 + $0x300] sm:$0xff]  ;;  %v579_v2 = vld [vmem:[%s6168_s15 + $0x218] sm:$0xff] }
  0xe9   : > { %v616_v1 = vld [vmem:[%s6168_s15 + $0x340] sm:$0xff]  ;;  %v625_v3 = vld [vmem:[%s6168_s15 + $0x388] sm:$0xff]  ;;  %v587_v5 = vld [vmem:[%s6168_s15 + $0x258] sm:$0xff]  ;;  %v6251_v6 = vpack.c.bf16 %v570_v61, %v562_v60  ;;  %4818 = vmatpush1.bf16.msra.mxu1 %v6235_v55 }
  0xea   : > { %v633_v4 = vld [vmem:[%s6168_s15 + $0x3c8] sm:$0xff]  ;;  %v4610_v7 = vpack.c.bf16 %v616_v1, %v608_v63  ;;  %v624_v8 = vld [vmem:[%s6168_s15 + $0x380] sm:$0xff]  ;;  %v6255_v9 = vpack.c.bf16 %v587_v5, %v579_v2  ;;  %v578_v10 = vld [vmem:[%s6168_s15 + $0x210] sm:$0xff]  ;;  %4811 = vmatprep.subr.bf16.mxu1 %v6240_v59 }
  0xeb   : > { %4599 = vmatpush1.bf16.msra.mxu0 %v4598_v29  ;;  %v586_v11 = vld [vmem:[%s6168_s15 + $0x250] sm:$0xff]  ;;  %v4612_v12 = vpack.c.bf16 %v633_v4, %v625_v3  ;;  %v632_v13 = vld [vmem:[%s6168_s15 + $0x3c0] sm:$0xff]  ;;  %v595_v14 = vld [vmem:[%s6168_s15 + $0x298] sm:$0xff] }
  0xec   : > { %4601 = vmatprep.subr.bf16.mxu0 %v4600_v34  ;;  %v603_v15 = vld [vmem:[%s6168_s15 + $0x2d8] sm:$0xff]  ;;  %v6263_v16 = vpack.c.bf16 %v586_v11, %v578_v10  ;;  %v4614_v17 = vpack.c.bf16 %v632_v13, %v624_v8  ;;  %v594_v19 = vld [vmem:[%s6168_s15 + $0x290] sm:$0xff]  ;;  %v6276_v24 = vld [vmem:[#allocation5] sm:$0xff] }
  0xed   : > { %4819 = vmatpush1.bf16.msra.mxu1 %v6251_v6  ;;  %v6266_v18 = vpack.c.bf16 %v603_v15, %v595_v14  ;;  %v602_v20 = vld [vmem:[%s6168_s15 + $0x2d0] sm:$0xff]  ;;  %v611_v21 = vld [vmem:[%s6168_s15 + $0x318] sm:$0xff]  ;;  %v6292_v31 = vld [vmem:[#allocation5 + $0x8] sm:$0xff] }
  0xee   : > { %4812 = vmatprep.subr.bf16.mxu1 %v6255_v9  ;;  %v619_v22 = vld [vmem:[%s6168_s15 + $0x358] sm:$0xff]  ;;  %v6273_v23 = vpack.c.bf16 %v602_v20, %v594_v19  ;;  %v610_v25 = vld [vmem:[%s6168_s15 + $0x310] sm:$0xff]  ;;  %v6327_v45 = vld [vmem:[#allocation5 + $0x20] sm:$0xff] }
  0xef   : > { %4603 = vmatpush1.bf16.msra.mxu0 %v4602_v44  ;;  %v618_v26 = vld [vmem:[%s6168_s15 + $0x350] sm:$0xff]  ;;  %v6282_v27 = vpack.c.bf16 %v619_v22, %v611_v21  ;;  %v627_v28 = vld [vmem:[%s6168_s15 + $0x398] sm:$0xff]  ;;  %v6330_v46 = vld [vmem:[#allocation5 + $0x48] sm:$0xff] }
  0xf0   : > { %4605 = vmatprep.subr.bf16.mxu0 %v4604_v48  ;;  %v635_v29 = vld [vmem:[%s6168_s15 + $0x3d8] sm:$0xff]  ;;  %v6287_v30 = vpack.c.bf16 %v618_v26, %v610_v25  ;;  %v626_v33 = vld [vmem:[%s6168_s15 + $0x390] sm:$0xff]  ;;  %v6337_v47 = vld [vmem:[#allocation5 + $0x28] sm:$0xff] }
  0xf1   : > { %4820 = vmatpush1.bf16.msra.mxu1 %v6263_v16  ;;  %v6297_v34 = vpack.c.bf16 %v635_v29, %v627_v28  ;;  %v6305_v36 = vld [vmem:[#allocation5 + $0x10] sm:$0xff]  ;;  %v527_v38 = vld [vmem:[%s6168_s15 + $0x78] sm:$0xff]  ;;  %v517_v57 = vld [vmem:[%s6168_s15 + $0x28] sm:$0xff] }
  0xf2   : > { %4813 = vmatprep.subr.bf16.mxu1 %v6266_v18  ;;  %v518_v40 = vld [vmem:[%s6168_s15 + $0x30] sm:$0xff]  ;;  %v535_v48 = vld [vmem:[%s6168_s15 + $0xb8] sm:$0xff]  ;;  %v6366_v60 = vld [vmem:[#allocation5 + $0x60] sm:$0xff] }
  0xf3   : > { %4607 = vmatpush1.bf16.msra.mxu0 %v4606_v58  ;;  %v526_v41 = vld [vmem:[%s6168_s15 + $0x70] sm:$0xff]  ;;  %v543_v49 = vld [vmem:[%s6168_s15 + $0xf8] sm:$0xff]  ;;  %v525_v58 = vld [vmem:[%s6168_s15 + $0x68] sm:$0xff] }
  0xf4   : > { %4609 = vmatprep.subr.bf16.mxu0 %v4608_v62  ;;  %v4682_v44 = vpack.c.bf16 %v526_v41, %v518_v40  ;;  %v4684_v51 = vpack.c.bf16 %v543_v49, %v535_v48  ;;  %v534_v52 = vld [vmem:[%s6168_s15 + $0xb0] sm:$0xff]  ;;  %v4648_v61 = vpack.c.bf16 %v525_v58, %v517_v57  ;;  %v551_v62 = vld [vmem:[%s6168_s15 + $0x138] sm:$0xff]  ;;  %v6377_v2 = vld [vmem:[#allocation5 + $0x68] sm:$0xff] }
  0xf5   : > { %4821 = vmatpush1.bf16.msra.mxu1 %v6273_v23  ;;  %v542_v53 = vld [vmem:[%s6168_s15 + $0xf0] sm:$0xff]  ;;  %v559_v63 = vld [vmem:[%s6168_s15 + $0x178] sm:$0xff]  ;;  %v6400_v13 = vld [vmem:[#allocation5 + $0x80] sm:$0xff] }
  0xf6   : > { %4814 = vmatprep.subr.bf16.mxu1 %v6282_v27  ;;  %v6351_v54 = vld [vmem:[#allocation5 + $0x30] sm:$0xff]  ;;  %v4686_v56 = vpack.c.bf16 %v542_v53, %v534_v52  ;;  %v4688_v3 = vpack.c.bf16 %v559_v63, %v551_v62  ;;  %v567_v8 = vld [vmem:[%s6168_s15 + $0x1b8] sm:$0xff]  ;;  %v6406_v15 = vld [vmem:[#allocation5 + $0x88] sm:$0xff] }
  0xf7   : > { %4611 = vmatpush1.bf16.msra.mxu0 %v4610_v7  ;;  %v550_v1 = vld [vmem:[%s6168_s15 + $0x130] sm:$0xff]  ;;  %v6390_v7 = vld [vmem:[#allocation5 + $0x78] sm:$0xff]  ;;  %v6428_v25 = vld [vmem:[#allocation5 + $0xa0] sm:$0xff] }
  0xf8   : > { %4613 = vmatprep.subr.bf16.mxu0 %v4612_v12  ;;  %v558_v4 = vld [vmem:[%s6168_s15 + $0x170] sm:$0xff]  ;;  %v6422_v22 = vld [vmem:[#allocation5 + $0x98] sm:$0xff]  ;;  %v6434_v26 = vld [vmem:[#allocation5 + $0xa8] sm:$0xff] }
  0xf9   : > { %4822 = vmatpush1.bf16.msra.mxu1 %v6287_v30  ;;  %v4690_v5 = vpack.c.bf16 %v558_v4, %v550_v1  ;;  %v566_v11 = vld [vmem:[%s6168_s15 + $0x1b0] sm:$0xff]  ;;  %v607_v28 = vld [vmem:[%s6168_s15 + $0x2f8] sm:$0xff]  ;;  %v6466_v48 = vld [vmem:[#allocation5 + $0xc8] sm:$0xff] }
  0xfa   : > { %4815 = vmatprep.subr.bf16.mxu1 %v6297_v34  ;;  %v574_v12 = vld [vmem:[%s6168_s15 + $0x1f0] sm:$0xff]  ;;  %v6478_v52 = vld [vmem:[#allocation5 + $0xd8] sm:$0xff]  ;;  %v6486_v58 = vld [vmem:[#allocation5 + $0xe0] sm:$0xff] }
  0xfb   : > { %4615 = vmatpush1.bf16.msra.mxu0 %v4614_v17  ;;  %v4694_v14 = vpack.c.bf16 %v574_v12, %v566_v11  ;;  %v583_v17 = vld [vmem:[%s6168_s15 + $0x238] sm:$0xff]  ;;  %v582_v20 = vld [vmem:[%s6168_s15 + $0x230] sm:$0xff]  ;;  %v6494_v1 = vld [vmem:[#allocation5 + $0xe8] sm:$0xff] }
  0xfc   : > { %4617 = vmatprep.subr.bf16.mxu0 %v6207_v32  ;;  %v634_v32 = vld [vmem:[%s6168_s15 + $0x3d0] sm:$0xff]  ;;  %v631_v53 = vld [vmem:[%s6168_s15 + $0x3b8] sm:$0xff] }
  0xfd   : > { %v6301_v35 = vpack.c.bf16 %v634_v32, %v626_v33  ;;  %v590_v21 = vld [vmem:[%s6168_s15 + $0x270] sm:$0xff]  ;;  %v6506_v4 = vld [vmem:[#allocation5 + $0xf8] sm:$0xff] }
  0xfe   : > { %705 = vmatmul.mubr.f32.vlgmr.msra.gmra.mrb[0].mxu0 %v6276_v24  ;;  %v598_v29 = vld [vmem:[%s6168_s15 + $0x2b0] sm:$0xff] }
  0xff   : > { %4619 = vmatpush1.bf16.msra.mxu0 %v6212_v37  ;;  %710 = vmatprep.mubr.f32.mxu0 %v5830_v0  ;;  %v519_v37 = vld [vmem:[%s6168_s15 + $0x38] sm:$0xff]  ;;  %v6444_v33 = vld [vmem:[#allocation5 + $0xb0] sm:$0xff] }
 0x100   : > { %4621 = vmatprep.subr.bf16.mxu0 %v6219_v42  ;;  %v4680_v39 = vpack.c.bf16 %v527_v38, %v519_v37  ;;  %4823 = vmatpush1.bf16.msra.mxu1 %v6301_v35  ;;  %v6317_v42 = vld [vmem:[#allocation5 + $0x18] sm:$0xff]  ;;  %v6456_v37 = vld [vmem:[#allocation5 + $0xc0] sm:$0xff]  ;;  %v614_v41 = vld [vmem:[%s6168_s15 + $0x330] sm:$0xff] }
 0x101   : > { %v615_v38 = vld [vmem:[%s6168_s15 + $0x338] sm:$0xff]  ;;  %v638_v62 = vld [vmem:[%s6168_s15 + $0x3f0] sm:$0xff] }
 0x102   : > { %711 = vmatmul.mubr.f32.gmra.mrb[2].mxu0 %v6292_v31  ;;  %4681 = vmatprep.subr.bf16.mxu1 %v4680_v39  ;;  %v623_v39 = vld [vmem:[%s6168_s15 + $0x378] sm:$0xff] }
 0x103   : > { %716 = vmatprep.mubr.f32.mxu0 %v5830_v0  ;;  %4623 = vmatpush1.bf16.msra.mxu0 %v6221_v43  ;;  %v6320_v43 = vld [vmem:[#allocation5 + $0x40] sm:$0xff]  ;;  %v4704_v40 = vpack.c.bf16 %v623_v39, %v615_v38  ;;  %v581_v39 = vld [vmem:[%s6168_s15 + $0x228] sm:$0xff] }
 0x104   : > { %4625 = vmatprep.subr.bf16.mxu0 %v6228_v50  ;;  %1010 = vmatmul.mubr.f32.vlgmr.msra.gmra.mrb[0].mxu1 %v6320_v43  ;;  %v6342_v50 = vld [vmem:[#allocation5 + $0x50] sm:$0xff]  ;;  %v572_v38 = vld [vmem:[%s6168_s15 + $0x1e0] sm:$0xff] }
 0x105   : > { %1015 = vmatprep.mubr.f32.mxu1 %v5830_v0  ;;  %4683 = vmatpush1.bf16.msra.mxu1 %v4682_v44  ;;  %v622_v44 = vld [vmem:[%s6168_s15 + $0x370] sm:$0xff] }
 0x106   : > { %717 = vmatmul.mubr.f32.gmra.mrb[4].mxu0 %v6305_v36  ;;  %4685 = vmatprep.subr.bf16.mxu1 %v4684_v51  ;;  %v4706_v49 = vpack.c.bf16 %v622_v44, %v614_v41  ;;  %v6472_v51 = vld [vmem:[#allocation5 + $0xd0] sm:$0xff] }
 0x107   : > { %722 = vmatprep.mubr.f32.mxu0 %v5830_v0  ;;  %4627 = vmatpush1.bf16.msra.mxu0 %v6235_v55  ;;  %v6354_v55 = vld [vmem:[#allocation5 + $0x58] sm:$0xff] }
 0x108   : > { %4629 = vmatprep.subr.bf16.mxu0 %v6240_v59  ;;  %1016 = vmatmul.mubr.f32.gmra.mrb[2].mxu1 %v6330_v46  ;;  %v6363_v59 = vld [vmem:[#allocation5 + $0x38] sm:$0xff] }
 0x109   : > { %1021 = vmatprep.mubr.f32.mxu1 %v5830_v0  ;;  %4687 = vmatpush1.bf16.msra.mxu1 %v4686_v56  ;;  %v639_v56 = vld [vmem:[%s6168_s15 + $0x3f8] sm:$0xff] }
 0x10a   : > { %723 = vmatmul.mubr.f32.gmra.mrb[6].mxu0 %v6317_v42  ;;  %4689 = vmatprep.subr.bf16.mxu1 %v4688_v3  ;;  %v4708_v57 = vpack.c.bf16 %v639_v56, %v631_v53  ;;  %v6500_v3 = vld [vmem:[#allocation5 + $0xf0] sm:$0xff]  ;;  %v588_v53 = vld [vmem:[%s6168_s15 + $0x260] sm:$0xff]  ;;  %v597_v56 = vld [vmem:[%s6168_s15 + $0x2a8] sm:$0xff] }
 0x10b   : > { %728 = vmatprep.mubr.f32.mxu0 %v5830_v0  ;;  %4631 = vmatpush1.bf16.msra.mxu0 %v6251_v6  ;;  %v6384_v6 = vld [vmem:[#allocation5 + $0x70] sm:$0xff] }
 0x10c   : > { %4633 = vmatprep.subr.bf16.mxu0 %v6255_v9  ;;  %1022 = vmatmul.mubr.f32.gmra.mrb[4].mxu1 %v6342_v50  ;;  %v575_v9 = vld [vmem:[%s6168_s15 + $0x1f8] sm:$0xff] }
 0x10d   : > { %1027 = vmatprep.mubr.f32.mxu1 %v5830_v0  ;;  %4691 = vmatpush1.bf16.msra.mxu1 %v4690_v5  ;;  %v4692_v10 = vpack.c.bf16 %v575_v9, %v567_v8  ;;  %v516_v5 = vld [vmem:[%s6168_s15 + $0x20] sm:$0xff]  ;;  %v533_v9 = vld [vmem:[%s6168_s15 + $0xa8] sm:$0xff] }
 0x10e   : > { %729 = vmatmul.mubr.f32.gmra.mrb[8].mxu0 %v6327_v45  ;;  %v524_v8 = vld [vmem:[%s6168_s15 + $0x60] sm:$0xff] }
 0x10f   : > { %734 = vmatprep.mubr.f32.mxu0 %v5830_v0  ;;  %4635 = vmatpush1.bf16.msra.mxu0 %v6263_v16  ;;  %v6412_v16 = vld [vmem:[#allocation5 + $0x90] sm:$0xff]  ;;  %v4650_v11 = vpack.c.bf16 %v524_v8, %v516_v5  ;;  %v604_v5 = vld [vmem:[%s6168_s15 + $0x2e0] sm:$0xff]  ;;  %v613_v8 = vld [vmem:[%s6168_s15 + $0x328] sm:$0xff] }
 0x110   : > { %4637 = vmatprep.subr.bf16.mxu0 %v6266_v18  ;;  %1028 = vmatmul.mubr.f32.gmra.mrb[6].mxu1 %v6354_v55  ;;  %v591_v18 = vld [vmem:[%s6168_s15 + $0x278] sm:$0xff] }
 0x111   : > { %1033 = vmatprep.mubr.f32.mxu1 %v5830_v0  ;;  %4693 = vmatprep.subr.bf16.mxu1 %v4692_v10  ;;  %v4696_v19 = vpack.c.bf16 %v591_v18, %v583_v17  ;;  %v541_v10 = vld [vmem:[%s6168_s15 + $0xe8] sm:$0xff]  ;;  %v540_v17 = vld [vmem:[%s6168_s15 + $0xe0] sm:$0xff] }
 0x112   : > { %735 = vmatmul.mubr.f32.gmra.mrb[10].mxu0 %v6337_v47  ;;  %4695 = vmatpush1.bf16.msra.mxu1 %v4694_v14  ;;  %v4652_v12 = vpack.c.bf16 %v541_v10, %v533_v9  ;;  %v532_v14 = vld [vmem:[%s6168_s15 + $0xa0] sm:$0xff]  ;;  %v549_v18 = vld [vmem:[%s6168_s15 + $0x128] sm:$0xff] }
 0x113   : > { %740 = vmatprep.mubr.f32.mxu0 %v5830_v0  ;;  %4639 = vmatpush1.bf16.msra.mxu0 %v6273_v23  ;;  %v4698_v23 = vpack.c.bf16 %v590_v21, %v582_v20  ;;  %v4654_v20 = vpack.c.bf16 %v540_v17, %v532_v14  ;;  %v621_v9 = vld [vmem:[%s6168_s15 + $0x368] sm:$0xff]  ;;  %v620_v14 = vld [vmem:[%s6168_s15 + $0x360] sm:$0xff] }
 0x114   : > { %4641 = vmatprep.subr.bf16.mxu0 %v6282_v27  ;;  %1034 = vmatmul.mubr.f32.gmra.mrb[8].mxu1 %v6366_v60  ;;  %v599_v27 = vld [vmem:[%s6168_s15 + $0x2b8] sm:$0xff]  ;;  %v629_v17 = vld [vmem:[%s6168_s15 + $0x3a8] sm:$0xff] }
 0x115   : > { %1039 = vmatprep.mubr.f32.mxu1 %v5830_v0  ;;  %4697 = vmatprep.subr.bf16.mxu1 %v4696_v19  ;;  %v4700_v32 = vpack.c.bf16 %v607_v28, %v599_v27  ;;  %v557_v19 = vld [vmem:[%s6168_s15 + $0x168] sm:$0xff]  ;;  %v556_v27 = vld [vmem:[%s6168_s15 + $0x160] sm:$0xff] }
 0x116   : > { %741 = vmatmul.mubr.f32.gmra.mrb[12].mxu0 %v6351_v54  ;;  %4699 = vmatpush1.bf16.msra.mxu1 %v4698_v23  ;;  %v4656_v21 = vpack.c.bf16 %v557_v19, %v549_v18  ;;  %v548_v23 = vld [vmem:[%s6168_s15 + $0x120] sm:$0xff]  ;;  %v565_v28 = vld [vmem:[%s6168_s15 + $0x1a8] sm:$0xff] }
 0x117   : > { %746 = vmatprep.mubr.f32.mxu0 %v5830_v0  ;;  %4643 = vmatpush1.bf16.msra.mxu0 %v6287_v30  ;;  %v606_v30 = vld [vmem:[%s6168_s15 + $0x2f0] sm:$0xff]  ;;  %v637_v18 = vld [vmem:[%s6168_s15 + $0x3e8] sm:$0xff] }
 0x118   : > { %4645 = vmatprep.subr.bf16.mxu0 %v6297_v34  ;;  %1040 = vmatmul.mubr.f32.gmra.mrb[10].mxu1 %v6377_v2  ;;  %v4702_v34 = vpack.c.bf16 %v606_v30, %v598_v29  ;;  %v573_v29 = vld [vmem:[%s6168_s15 + $0x1e8] sm:$0xff]  ;;  %v4658_v30 = vpack.c.bf16 %v556_v27, %v548_v23  ;;  %v636_v23 = vld [vmem:[%s6168_s15 + $0x3e0] sm:$0xff] }
 0x119   : > { %1045 = vmatprep.mubr.f32.mxu1 %v5830_v0  ;;  %4701 = vmatprep.subr.bf16.mxu1 %v4700_v32  ;;  %v4660_v32 = vpack.c.bf16 %v573_v29, %v565_v28  ;;  %v1668_v27 = vld [vmem:[#allocation8] sm:$0xff]  ;;  %v1669_v28 = vld [vmem:[#allocation8 + $0x8] sm:$0xff] }
 0x11a   : > { %747 = vmatmul.mubr.f32.gmra.mrb[14].mxu0 %v6363_v59  ;;  %4703 = vmatpush1.bf16.msra.mxu1 %v4702_v34  ;;  %v564_v34 = vld [vmem:[%s6168_s15 + $0x1a0] sm:$0xff] }
 0x11b   : > { %752 = vmatprep.mubr.f32.mxu0 %v5830_v0  ;;  %4647 = vmatpush1.bf16.msra.mxu0 %v6301_v35  ;;  %v6450_v35 = vld [vmem:[#allocation5 + $0xb8] sm:$0xff]  ;;  %v4662_v41 = vpack.c.bf16 %v572_v38, %v564_v34 }
 0x11c   : > { %4649 = vmatprep.subr.bf16.mxu0 %v4648_v61  ;;  %1046 = vmatmul.mubr.f32.gmra.mrb[12].mxu1 %v6384_v6  ;;  %v630_v61 = vld [vmem:[%s6168_s15 + $0x3b0] sm:$0xff]  ;;  %v1671_v34 = vld [vmem:[#allocation8 + $0x18] sm:$0xff] }
 0x11d   : > { %1051 = vmatprep.mubr.f32.mxu1 %v5830_v0  ;;  %4705 = vmatprep.subr.bf16.mxu1 %v4704_v40  ;;  %v4710_v63 = vpack.c.bf16 %v638_v62, %v630_v61  ;;  %v589_v40 = vld [vmem:[%s6168_s15 + $0x268] sm:$0xff] }
 0x11e   : > { %753 = vmatmul.mubr.f32.gmra.mrb[16].mxu0 %v6320_v43  ;;  %4707 = vmatpush1.bf16.msra.mxu1 %v4706_v49  ;;  %v4664_v44 = vpack.c.bf16 %v589_v40, %v581_v39  ;;  %v580_v49 = vld [vmem:[%s6168_s15 + $0x220] sm:$0xff]  ;;  %v1673_v40 = vld [vmem:[#allocation8 + $0x28] sm:$0xff] }
 0x11f   : > { %758 = vmatprep.mubr.f32.mxu0 %v5830_v0  ;;  %4709 = vmatprep.subr.bf16.mxu1 %v4708_v57  ;;  %v605_v57 = vld [vmem:[%s6168_s15 + $0x2e8] sm:$0xff]  ;;  %v4666_v61 = vpack.c.bf16 %v588_v53, %v580_v49  ;;  %v1672_v39 = vld [vmem:[#allocation8 + $0x20] sm:$0xff]  ;;  %v1675_v49 = vld [vmem:[#allocation8 + $0x38] sm:$0xff] }
 0x120   : > { %1052 = vmatmul.mubr.f32.gmra.mrb[14].mxu1 %v6390_v7  ;;  %v4668_v62 = vpack.c.bf16 %v605_v57, %v597_v56  ;;  %v1676_v53 = vld [vmem:[#allocation8 + $0x40] sm:$0xff]  ;;  %v1677_v56 = vld [vmem:[#allocation8 + $0x48] sm:$0xff]  ;;  %v1678_v57 = vld [vmem:[#allocation8 + $0x50] sm:$0xff] }
 0x121   : > { %1057 = vmatprep.mubr.f32.mxu1 %v5830_v0 }
 0x122   : > { %759 = vmatmul.mubr.f32.gmra.mrb[18].mxu0 %v6330_v46  ;;  %4711 = vmatpush1.bf16.msra.mxu1 %v4710_v63  ;;  %v596_v63 = vld [vmem:[%s6168_s15 + $0x2a0] sm:$0xff] }
 0x123   : > { %764 = vmatprep.mubr.f32.mxu0 %v5830_v0  ;;  %v4670_v10 = vpack.c.bf16 %v604_v5, %v596_v63  ;;  %v1681_v63 = vld [vmem:[#allocation8 + $0x68] sm:$0xff]  ;;  %v1682_v5 = vld [vmem:[#allocation8 + $0x70] sm:$0xff] }
 0x124   : > { %1058 = vmatmul.mubr.f32.gmra.mrb[16].mxu1 %v6400_v13 }
 0x125   : > { %1063 = vmatprep.mubr.f32.mxu1 %v5830_v0 }
 0x126   : > { %765 = vmatmul.mubr.f32.gmra.mrb[20].mxu0 %v6342_v50 }
 0x127   : > { %770 = vmatprep.mubr.f32.mxu0 %v5830_v0 }
 0x128   : > { %1064 = vmatmul.mubr.f32.gmra.mrb[18].mxu1 %v6406_v15 }
 0x129   : > { %1069 = vmatprep.mubr.f32.mxu1 %v5830_v0 }
 0x12a   : > { %771 = vmatmul.mubr.f32.gmra.mrb[22].mxu0 %v6354_v55 }
 0x12b   : > { %776 = vmatprep.mubr.f32.mxu0 %v5830_v0 }
 0x12c   : > { %1070 = vmatmul.mubr.f32.gmra.mrb[20].mxu1 %v6412_v16 }
 0x12d   : > { %1075 = vmatprep.mubr.f32.mxu1 %v5830_v0 }
 0x12e   : > { %777 = vmatmul.mubr.f32.gmra.mrb[24].mxu0 %v6366_v60 }
 0x12f   : > { %782 = vmatprep.mubr.f32.mxu0 %v5830_v0 }
 0x130   : > { %1076 = vmatmul.mubr.f32.gmra.mrb[22].mxu1 %v6422_v22 }
 0x131   : > { %1081 = vmatprep.mubr.f32.mxu1 %v5830_v0 }
 0x132   : > { %783 = vmatmul.mubr.f32.gmra.mrb[26].mxu0 %v6377_v2 }
 0x133   : > { %788 = vmatprep.mubr.f32.mxu0 %v5830_v0 }
 0x134   : > { %1082 = vmatmul.mubr.f32.gmra.mrb[24].mxu1 %v6428_v25 }
 0x135   : > { %1087 = vmatprep.mubr.f32.mxu1 %v5830_v0 }
 0x136   : > { %789 = vmatmul.mubr.f32.gmra.mrb[28].mxu0 %v6384_v6 }
 0x137   : > { %794 = vmatprep.mubr.f32.mxu0 %v5830_v0 }
 0x138   : > { %1088 = vmatmul.mubr.f32.gmra.mrb[26].mxu1 %v6434_v26 }
 0x139   : > { %1093 = vmatprep.mubr.f32.mxu1 %v5830_v0 }
 0x13a   : > { %795 = vmatmul.mubr.f32.gmra.mrb[30].mxu0 %v6390_v7 }
 0x13b   : > { %800 = vmatprep.mubr.f32.mxu0 %v5830_v0 }
 0x13c   : > { %1094 = vmatmul.mubr.f32.gmra.mrb[28].mxu1 %v6444_v33 }
 0x13d   : > { %1099 = vmatprep.mubr.f32.mxu1 %v5830_v0 }
 0x13e   : > { %801 = vmatmul.mubr.f32.gmra.mrb[32].mxu0 %v6400_v13 }
 0x13f   : > { %806 = vmatprep.mubr.f32.mxu0 %v5830_v0 }
 0x140   : > { %1100 = vmatmul.mubr.f32.gmra.mrb[30].mxu1 %v6450_v35 }
 0x141   : > { %1105 = vmatprep.mubr.f32.mxu1 %v5830_v0 }
 0x142   : > { %807 = vmatmul.mubr.f32.gmra.mrb[34].mxu0 %v6406_v15 }
 0x143   : > { %812 = vmatprep.mubr.f32.mxu0 %v5830_v0 }
 0x144   : > { %1106 = vmatmul.mubr.f32.gmra.mrb[32].mxu1 %v6456_v37 }
 0x145   : > { %1111 = vmatprep.mubr.f32.mxu1 %v5830_v0 }
 0x146   : > { %813 = vmatmul.mubr.f32.gmra.mrb[36].mxu0 %v6412_v16 }
 0x147   : > { %818 = vmatprep.mubr.f32.mxu0 %v5830_v0 }
 0x148   : > { %1112 = vmatmul.mubr.f32.gmra.mrb[34].mxu1 %v6466_v48 }
 0x149   : > { %1117 = vmatprep.mubr.f32.mxu1 %v5830_v0 }
 0x14a   : > { %819 = vmatmul.mubr.f32.gmra.mrb[38].mxu0 %v6422_v22 }
 0x14b   : > { %824 = vmatprep.mubr.f32.mxu0 %v5830_v0 }
 0x14c   : > { %1118 = vmatmul.mubr.f32.gmra.mrb[36].mxu1 %v6472_v51 }
 0x14d   : > { %1123 = vmatprep.mubr.f32.mxu1 %v5830_v0 }
 0x14e   : > { %825 = vmatmul.mubr.f32.gmra.mrb[40].mxu0 %v6428_v25 }
 0x14f   : > { %830 = vmatprep.mubr.f32.mxu0 %v5830_v0 }
 0x150   : > { %1124 = vmatmul.mubr.f32.gmra.mrb[38].mxu1 %v6478_v52 }
 0x151   : > { %1129 = vmatprep.mubr.f32.mxu1 %v5830_v0 }
 0x152   : > { %831 = vmatmul.mubr.f32.gmra.mrb[42].mxu0 %v6434_v26 }
 0x153   : > { %836 = vmatprep.mubr.f32.mxu0 %v5830_v0 }
 0x154   : > { %1130 = vmatmul.mubr.f32.gmra.mrb[40].mxu1 %v6486_v58 }
 0x155   : > { %1135 = vmatprep.mubr.f32.mxu1 %v5830_v0 }
 0x156   : > { %837 = vmatmul.mubr.f32.gmra.mrb[44].mxu0 %v6444_v33 }
 0x157   : > { %842 = vmatprep.mubr.f32.mxu0 %v5830_v0 }
 0x158   : > { %1136 = vmatmul.mubr.f32.gmra.mrb[42].mxu1 %v6494_v1 }
 0x159   : > { %1141 = vmatprep.mubr.f32.mxu1 %v5830_v0 }
 0x15a   : > { %843 = vmatmul.mubr.f32.gmra.mrb[46].mxu0 %v6450_v35 }
 0x15b   : > { %848 = vmatprep.mubr.f32.mxu0 %v5830_v0 }
 0x15c   : > { %1142 = vmatmul.mubr.f32.gmra.mrb[44].mxu1 %v6500_v3 }
 0x15d   : > { %1147 = vmatprep.mubr.f32.mxu1 %v5830_v0 }
 0x15e   : > { %849 = vmatmul.mubr.f32.gmra.mrb[48].mxu0 %v6456_v37 }
 0x15f   : > { %854 = vmatprep.mubr.f32.mxu0 %v5830_v0 }
 0x160   : > { %1148 = vmatmul.mubr.f32.gmra.mrb[46].mxu1 %v6506_v4 }
 0x161   : > { %1475 = vmatprep.mubr.f32.mxu1 %v5830_v0 }
 0x162   : > { %855 = vmatmul.mubr.f32.gmra.mrb[50].mxu0 %v6466_v48 }
 0x163   : > { %860 = vmatprep.mubr.f32.mxu0 %v5830_v0 }
 0x164   : > { %1476 = vmatmul.mubr.f32.vlgmr.msra.gmra.mrb[48].mxu1 %v6276_v24 }
 0x165   : > { %1481 = vmatprep.mubr.f32.mxu1 %v5830_v0 }
 0x166   : > { %861 = vmatmul.mubr.f32.gmra.mrb[52].mxu0 %v6472_v51 }
 0x167   : > { %866 = vmatprep.mubr.f32.mxu0 %v5830_v0 }
 0x168   : > { %1482 = vmatmul.mubr.f32.gmra.mrb[50].mxu1 %v6292_v31 }
 0x169   : > { %1487 = vmatprep.mubr.f32.mxu1 %v5830_v0 }
 0x16a   : > { %867 = vmatmul.mubr.f32.gmra.mrb[54].mxu0 %v6478_v52 }
 0x16b   : > { %872 = vmatprep.mubr.f32.mxu0 %v5830_v0 }
 0x16c   : > { %1488 = vmatmul.mubr.f32.gmra.mrb[52].mxu1 %v6305_v36 }
 0x16d   : > { %1493 = vmatprep.mubr.f32.mxu1 %v5830_v0 }
 0x16e   : > { %873 = vmatmul.mubr.f32.gmra.mrb[56].mxu0 %v6486_v58 }
 0x16f   : > { %878 = vmatprep.mubr.f32.mxu0 %v5830_v0 }
 0x170   : > { %1494 = vmatmul.mubr.f32.gmra.mrb[54].mxu1 %v6317_v42 }
 0x171   : > { %1499 = vmatprep.mubr.f32.mxu1 %v5830_v0 }
 0x172   : > { %879 = vmatmul.mubr.f32.gmra.mrb[58].mxu0 %v6494_v1 }
 0x173   : > { %884 = vmatprep.mubr.f32.mxu0 %v5830_v0 }
 0x174   : > { %1500 = vmatmul.mubr.f32.gmra.mrb[56].mxu1 %v6327_v45 }
 0x175   : > { %1505 = vmatprep.mubr.f32.mxu1 %v5830_v0 }
 0x176   : > { %885 = vmatmul.mubr.f32.gmra.mrb[60].mxu0 %v6500_v3 }
 0x177   : > { %890 = vmatprep.mubr.f32.mxu0 %v5830_v0 }
 0x178   : > { %1506 = vmatmul.mubr.f32.gmra.mrb[58].mxu1 %v6337_v47 }
 0x179   : > { %1511 = vmatprep.mubr.f32.mxu1 %v5830_v0 }
 0x17a   : > { %891 = vmatmul.mubr.f32.gmra.mrb[62].mxu0 %v6506_v4 }
 0x17b   : > { %961 = vmatprep.mubr.f32.mxu0 %v5830_v0 }
 0x17c   : > { %1512 = vmatmul.mubr.f32.gmra.mrb[60].mxu1 %v6351_v54 }
 0x17d   : > { %1517 = vmatprep.mubr.f32.mxu1 %v5830_v0 }
 0x17e   : > { %962 = vmatmul.mubr.f32.vlgmr.msra.gmra.mrb[64].mxu0 %v6276_v24 }
 0x17f   : > { %4651 = vmatpush1.bf16.msra.mxu0 %v4650_v11  ;;  %967 = vmatprep.mubr.f32.mxu0 %v5830_v0  ;;  %v4672_v11 = vpack.c.bf16 %v621_v9, %v613_v8  ;;  %v1683_v8 = vld [vmem:[#allocation8 + $0x78] sm:$0xff] }
 0x180   : > { %4653 = vmatprep.subr.bf16.mxu0 %v4652_v12  ;;  %1518 = vmatmul.mubr.f32.gmra.mrb[62].mxu1 %v6363_v59  ;;  %v612_v12 = vld [vmem:[%s6168_s15 + $0x320] sm:$0xff] }
 0x181   : > { %1523 = vmatprep.mubr.f32.mxu1 %v5830_v0  ;;  %v4674_v19 = vpack.c.bf16 %v620_v14, %v612_v12  ;;  %v6699_v14 = vld [vmem:[%s6157_s10] sm:$0xff] }
 0x182   : > { %968 = vmatmul.mubr.f32.gmra.mrb[66].mxu0 %v6292_v31 }
 0x183   : > { %4655 = vmatpush1.bf16.msra.mxu0 %v4654_v20  ;;  %973 = vmatprep.mubr.f32.mxu0 %v5830_v0  ;;  %v4676_v20 = vpack.c.bf16 %v637_v18, %v629_v17 }
 0x184   : > { %4657 = vmatprep.subr.bf16.mxu0 %v4656_v21  ;;  %1524 = vmatmul.mubr.f32.gmra.mrb[64].mxu1 %v6320_v43  ;;  %v628_v21 = vld [vmem:[%s6168_s15 + $0x3a0] sm:$0xff] }
 0x185   : > { %1529 = vmatprep.mubr.f32.mxu1 %v5830_v0  ;;  %v4678_v29 = vpack.c.bf16 %v636_v23, %v628_v21 }
 0x186   : > { %974 = vmatmul.mubr.f32.gmra.mrb[68].mxu0 %v6305_v36 }
 0x187   : > { %4659 = vmatpush1.bf16.msra.mxu0 %v4658_v30  ;;  %979 = vmatprep.mubr.f32.mxu0 %v5830_v0  ;;  %v4712_v30 = vpack.c.bf16 %v1669_v28, %v1668_v27 }
 0x188   : > { %4661 = vmatprep.subr.bf16.mxu0 %v4660_v32  ;;  %1530 = vmatmul.mubr.f32.gmra.mrb[66].mxu1 %v6330_v46  ;;  %v1670_v32 = vld [vmem:[#allocation8 + $0x10] sm:$0xff] }
 0x189   : > { %1535 = vmatprep.mubr.f32.mxu1 %v5830_v0  ;;  %v4716_v38 = vpack.c.bf16 %v1671_v34, %v1670_v32 }
 0x18a   : > { %980 = vmatmul.mubr.f32.gmra.mrb[70].mxu0 %v6317_v42 }
 0x18b   : > { %4663 = vmatpush1.bf16.msra.mxu0 %v4662_v41  ;;  %985 = vmatprep.mubr.f32.mxu0 %v5830_v0  ;;  %v4720_v41 = vpack.c.bf16 %v1673_v40, %v1672_v39 }
 0x18c   : > { %4665 = vmatprep.subr.bf16.mxu0 %v4664_v44  ;;  %1536 = vmatmul.mubr.f32.gmra.mrb[68].mxu1 %v6342_v50  ;;  %v1674_v44 = vld [vmem:[#allocation8 + $0x30] sm:$0xff] }
 0x18d   : > { %1541 = vmatprep.mubr.f32.mxu1 %v5830_v0 }
 0x18e   : > { %986 = vmatmul.mubr.f32.gmra.mrb[72].mxu0 %v6327_v45 }
 0x18f   : > { %4667 = vmatpush1.bf16.msra.mxu0 %v4666_v61  ;;  %991 = vmatprep.mubr.f32.mxu0 %v5830_v0  ;;  %v1679_v61 = vld [vmem:[#allocation8 + $0x58] sm:$0xff] }
 0x190   : > { %4669 = vmatprep.subr.bf16.mxu0 %v4668_v62  ;;  %1542 = vmatmul.mubr.f32.gmra.mrb[70].mxu1 %v6354_v55  ;;  %v1680_v62 = vld [vmem:[#allocation8 + $0x60] sm:$0xff] }
 0x191   : > { %1547 = vmatprep.mubr.f32.mxu1 %v5830_v0 }
 0x192   : > { %992 = vmatmul.mubr.f32.gmra.mrb[74].mxu0 %v6337_v47 }
 0x193   : > { %4671 = vmatpush1.bf16.msra.mxu0 %v4670_v10  ;;  %997 = vmatprep.mubr.f32.mxu0 %v5830_v0 }
 0x194   : > { %4673 = vmatprep.subr.bf16.mxu0 %v4672_v11  ;;  %1548 = vmatmul.mubr.f32.gmra.mrb[72].mxu1 %v6366_v60 }
 0x195   : > { %1553 = vmatprep.mubr.f32.mxu1 %v5830_v0 }
 0x196   : > { %998 = vmatmul.mubr.f32.gmra.mrb[76].mxu0 %v6351_v54 }
 0x197   : > { %4675 = vmatpush1.bf16.msra.mxu0 %v4674_v19  ;;  %1003 = vmatprep.mubr.f32.mxu0 %v5830_v0  ;;  %v3308_v19 = vld [vmem:[#allocation11] sm:$0xff] }
 0x198   : > { %4677 = vmatprep.subr.bf16.mxu0 %v4676_v20  ;;  %1554 = vmatmul.mubr.f32.gmra.mrb[74].mxu1 %v6377_v2 }
 0x199   : > { %1559 = vmatprep.mubr.f32.mxu1 %v5830_v0 }
 0x19a   : > { %1004 = vmatmul.mubr.f32.gmra.mrb[78].mxu0 %v6363_v59 }
 0x19b   : > { %4679 = vmatpush1.bf16.msra.mxu0 %v4678_v29  ;;  %1218 = vmatprep.mubr.f32.mxu0 %v5830_v0 }
 0x19c   : > { %4713 = vmatprep.subr.bf16.mxu0 %v4712_v30  ;;  %1560 = vmatmul.mubr.f32.gmra.mrb[76].mxu1 %v6384_v6 }
 0x19d   : > { %1565 = vmatprep.mubr.f32.mxu1 %v5830_v0 }
 0x19e   : > { %1219 = vmatmul.mubr.f32.vlgmr.msra.gmra.mrb[80].mxu0 %v6276_v24  ;;  %v4724_v24 = vpack.c.bf16 %v1675_v49, %v1674_v44  ;;  %v3310_v49 = vld [vmem:[#allocation11 + $0x10] sm:$0xff] }
 0x19f   : > { %4715 = vmatpush3.bf16.msra.mxu0 %v4712_v30  ;;  %1224 = vmatprep.mubr.f32.mxu0 %v5830_v0 }
 0x1a0   : > { %4717 = vmatprep.subr.bf16.mxu0 %v4716_v38  ;;  %1566 = vmatmul.mubr.f32.gmra.mrb[78].mxu1 %v6390_v7 }
 0x1a1   : > { %1571 = vmatprep.mubr.f32.mxu1 %v5830_v0 }
 0x1a2   : > { %1225 = vmatmul.mubr.f32.gmra.mrb[82].mxu0 %v6292_v31  ;;  %v4728_v31 = vpack.c.bf16 %v1677_v56, %v1676_v53 }
 0x1a3   : > { %1230 = vmatprep.mubr.f32.mxu0 %v5830_v0  ;;  %4719 = vmatpush3.bf16.msra.mxu0 %v4716_v38 }
 0x1a4   : > { %4721 = vmatprep.subr.bf16.mxu0 %v4720_v41  ;;  %1572 = vmatmul.mubr.f32.gmra.mrb[80].mxu1 %v6400_v13 }
 0x1a5   : > { %1577 = vmatprep.mubr.f32.mxu1 %v5830_v0 }
 0x1a6   : > { %1231 = vmatmul.mubr.f32.gmra.mrb[84].mxu0 %v6305_v36  ;;  %v4732_v36 = vpack.c.bf16 %v1679_v61, %v1678_v57 }
 0x1a7   : > { %1236 = vmatprep.mubr.f32.mxu0 %v5830_v0  ;;  %4723 = vmatpush3.bf16.msra.mxu0 %v4720_v41 }
 0x1a8   : > { %4725 = vmatprep.subr.bf16.mxu0 %v4724_v24  ;;  %1578 = vmatmul.mubr.f32.gmra.mrb[82].mxu1 %v6406_v15 }
 0x1a9   : > { %1583 = vmatprep.mubr.f32.mxu1 %v5830_v0 }
 0x1aa   : > { %1237 = vmatmul.mubr.f32.gmra.mrb[86].mxu0 %v6317_v42  ;;  %v4736_v42 = vpack.c.bf16 %v1681_v63, %v1680_v62 }
 0x1ab   : > { %1242 = vmatprep.mubr.f32.mxu0 %v5830_v0  ;;  %4727 = vmatpush3.bf16.msra.mxu0 %v4724_v24  ;;  %v3311_v24 = vld [vmem:[#allocation11 + $0x18] sm:$0xff] }
 0x1ac   : > { %4729 = vmatprep.subr.bf16.mxu0 %v4728_v31  ;;  %1584 = vmatmul.mubr.f32.gmra.mrb[84].mxu1 %v6412_v16  ;;  %v4748_v53 = vpack.c.bf16 %v3311_v24, %v3310_v49 }
 0x1ad   : > { %1589 = vmatprep.mubr.f32.mxu1 %v5830_v0 }
 0x1ae   : > { %1243 = vmatmul.mubr.f32.gmra.mrb[88].mxu0 %v6327_v45  ;;  %v4740_v45 = vpack.c.bf16 %v1683_v8, %v1682_v5 }
 0x1af   : > { %1248 = vmatprep.mubr.f32.mxu0 %v5830_v0  ;;  %4731 = vmatpush3.bf16.msra.mxu0 %v4728_v31 }
 0x1b0   : > { %4733 = vmatprep.subr.bf16.mxu0 %v4732_v36  ;;  %1590 = vmatmul.mubr.f32.gmra.mrb[86].mxu1 %v6422_v22 }
 0x1b1   : > { %1595 = vmatprep.mubr.f32.mxu1 %v5830_v0 }
 0x1b2   : > { %1249 = vmatmul.mubr.f32.gmra.mrb[90].mxu0 %v6337_v47 }
 0x1b3   : > { %1254 = vmatprep.mubr.f32.mxu0 %v5830_v0  ;;  %4735 = vmatpush3.bf16.msra.mxu0 %v4732_v36 }
 0x1b4   : > { %4737 = vmatprep.subr.bf16.mxu0 %v4736_v42  ;;  %1596 = vmatmul.mubr.f32.gmra.mrb[88].mxu1 %v6428_v25 }
 0x1b5   : > { %1601 = vmatprep.mubr.f32.mxu1 %v5830_v0 }
 0x1b6   : > { %1255 = vmatmul.mubr.f32.gmra.mrb[92].mxu0 %v6351_v54 }
 0x1b7   : > { %1260 = vmatprep.mubr.f32.mxu0 %v5830_v0  ;;  %4739 = vmatpush3.bf16.msra.mxu0 %v4736_v42 }
 0x1b8   : > { %4741 = vmatprep.subr.bf16.mxu0 %v4740_v45  ;;  %1602 = vmatmul.mubr.f32.gmra.mrb[90].mxu1 %v6434_v26 }
 0x1b9   : > { %1607 = vmatprep.mubr.f32.mxu1 %v5830_v0 }
 0x1ba   : > { %1261 = vmatmul.mubr.f32.gmra.mrb[94].mxu0 %v6363_v59 }
 0x1bb   : > { %1266 = vmatprep.mubr.f32.mxu0 %v5830_v0  ;;  %4743 = vmatpush3.bf16.msra.mxu0 %v4740_v45 }
 0x1bc   : > { %1608 = vmatmul.mubr.f32.gmra.mrb[92].mxu1 %v6444_v33 }
 0x1bd   : > { %1613 = vmatprep.mubr.f32.mxu1 %v5830_v0 }
 0x1be   : > { %1267 = vmatmul.mubr.f32.gmra.mrb[96].mxu0 %v6320_v43 }
 0x1bf   : > { %1272 = vmatprep.mubr.f32.mxu0 %v5830_v0 }
 0x1c0   : > { %1614 = vmatmul.mubr.f32.gmra.mrb[94].mxu1 %v6450_v35 }
 0x1c1   : > { %1619 = vmatprep.mubr.f32.mxu1 %v5830_v0 }
 0x1c2   : > { %1273 = vmatmul.mubr.f32.gmra.mrb[98].mxu0 %v6330_v46 }
 0x1c3   : > { %1278 = vmatprep.mubr.f32.mxu0 %v5830_v0 }
 0x1c4   : > { %1620 = vmatmul.mubr.f32.gmra.mrb[96].mxu1 %v6456_v37 }
 0x1c5   : > { %1625 = vmatprep.mubr.f32.mxu1 %v5830_v0 }
 0x1c6   : > { %1279 = vmatmul.mubr.f32.gmra.mrb[100].mxu0 %v6342_v50 }
 0x1c7   : > { %1284 = vmatprep.mubr.f32.mxu0 %v5830_v0 }
 0x1c8   : > { %1626 = vmatmul.mubr.f32.gmra.mrb[98].mxu1 %v6466_v48 }
 0x1c9   : > { %1631 = vmatprep.mubr.f32.mxu1 %v5830_v0 }
 0x1ca   : > { %1285 = vmatmul.mubr.f32.gmra.mrb[102].mxu0 %v6354_v55 }
 0x1cb   : > { %1290 = vmatprep.mubr.f32.mxu0 %v5830_v0 }
 0x1cc   : > { %1632 = vmatmul.mubr.f32.gmra.mrb[100].mxu1 %v6472_v51 }
 0x1cd   : > { %1637 = vmatprep.mubr.f32.mxu1 %v5830_v0 }
 0x1ce   : > { %1291 = vmatmul.mubr.f32.gmra.mrb[104].mxu0 %v6366_v60 }
 0x1cf   : > { %1296 = vmatprep.mubr.f32.mxu0 %v5830_v0 }
 0x1d0   : > { %1638 = vmatmul.mubr.f32.gmra.mrb[102].mxu1 %v6478_v52 }
 0x1d1   : > { %v6646_v43 = vpop.f32.mrb[0].mxu0  ;;  %1643 = vmatprep.mubr.f32.mxu1 %v5830_v0 }
 0x1d2   : > { %9336 = vst [vmem:[#allocation27_spill] sm:$0xff] %v6646_v43  ;;  %v6649_v46 = vpop.f32.mrb[1].mxu0  ;;  %1297 = vmatmul.mubr.f32.gmra.mrb[106].mxu0 %v6377_v2 }
 0x1d3   : > { %9337 = vst [vmem:[#allocation28_spill] sm:$0xff] %v6649_v46  ;;  %1302 = vmatprep.mubr.f32.mxu0 %v5830_v0 }
 0x1d4   : > { %1644 = vmatmul.mubr.f32.gmra.mrb[104].mxu1 %v6486_v58 }
 0x1d5   : > { %v6654_v47 = vpop.f32.mrb[2].mxu0  ;;  %1649 = vmatprep.mubr.f32.mxu1 %v5830_v0 }
 0x1d6   : > { %9338 = vst [vmem:[#allocation29_spill] sm:$0xff] %v6654_v47  ;;  %v6657_v50 = vpop.f32.mrb[3].mxu0  ;;  %1303 = vmatmul.mubr.f32.gmra.mrb[108].mxu0 %v6384_v6 }
 0x1d7   : > { %9339 = vst [vmem:[#allocation30_spill] sm:$0xff] %v6657_v50  ;;  %1308 = vmatprep.mubr.f32.mxu0 %v5830_v0  ;;  %v6670_v59 = vpop.f32.mrb[0].mxu1 }
 0x1d8   : > { %9342 = vst [vmem:[#allocation33_spill] sm:$0xff] %v6670_v59  ;;  %1650 = vmatmul.mubr.f32.gmra.mrb[106].mxu1 %v6494_v1  ;;  %v6675_v2 = vpop.f32.mrb[1].mxu1 }
 0x1d9   : > { %v6662_v54 = vpop.f32.mrb[4].mxu0  ;;  %9344 = vst [vmem:[#allocation35_spill] sm:$0xff] %v6675_v2  ;;  %1655 = vmatprep.mubr.f32.mxu1 %v5830_v0 }
 0x1da   : > { %9340 = vst [vmem:[#allocation31_spill] sm:$0xff] %v6662_v54  ;;  %v6665_v55 = vpop.f32.mrb[5].mxu0  ;;  %1309 = vmatmul.mubr.f32.gmra.mrb[110].mxu0 %v6390_v7 }
 0x1db   : > { %9341 = vst [vmem:[#allocation32_spill] sm:$0xff] %v6665_v55  ;;  %1314 = vmatprep.mubr.f32.mxu0 %v5830_v0  ;;  %v6682_v7 = vpop.f32.mrb[2].mxu1 }
 0x1dc   : > { %9346 = vst [vmem:[#allocation37_spill] sm:$0xff] %v6682_v7  ;;  %1656 = vmatmul.mubr.f32.gmra.mrb[108].mxu1 %v6500_v3  ;;  %v6687_v10 = vpop.f32.mrb[3].mxu1 }
 0x1dd   : > { %v6672_v60 = vpop.f32.mrb[6].mxu0  ;;  %9348 = vst [vmem:[#allocation39_spill] sm:$0xff] %v6687_v10  ;;  %1661 = vmatprep.mubr.f32.mxu1 %v5830_v0 }
 0x1de   : > { %9343 = vst [vmem:[#allocation34_spill] sm:$0xff] %v6672_v60  ;;  %v6677_v6 = vpop.f32.mrb[7].mxu0  ;;  %1315 = vmatmul.mubr.f32.gmra.mrb[112].mxu0 %v6400_v13 }
 0x1df   : > { %9345 = vst [vmem:[#allocation36_spill] sm:$0xff] %v6677_v6  ;;  %1320 = vmatprep.mubr.f32.mxu0 %v5830_v0  ;;  %v6694_v13 = vpop.f32.mrb[4].mxu1 }
 0x1e0   : > { %9350 = vst [vmem:[#allocation41_spill] sm:$0xff] %v6694_v13  ;;  %1662 = vmatmul.mubr.f32.gmra.mrb[110].mxu1 %v6506_v4  ;;  %v6702_v17 = vpop.f32.mrb[5].mxu1  ;;  %v7032_v13 = vld [vmem:[%s6157_s10 + $0xc8] sm:$0xff] }
 0x1e1   : > { %v6684_v9 = vpop.f32.mrb[8].mxu0  ;;  %9352 = vst [vmem:[#allocation43_spill] sm:$0xff] %v6702_v17  ;;  %4456 = vmatprep.mubr.f32.mxu1 %v6699_v14 }
 0x1e2   : > { %9347 = vst [vmem:[#allocation38_spill] sm:$0xff] %v6684_v9  ;;  %v6689_v11 = vpop.f32.mrb[9].mxu0  ;;  %1321 = vmatmul.mubr.f32.gmra.mrb[114].mxu0 %v6406_v15  ;;  %v3309_v15 = vld [vmem:[#allocation11 + $0x8] sm:$0xff] }
 0x1e3   : > { %9349 = vst [vmem:[#allocation40_spill] sm:$0xff] %v6689_v11  ;;  %1326 = vmatprep.mubr.f32.mxu0 %v5830_v0  ;;  %v4744_v20 = vpack.c.bf16 %v3309_v15, %v3308_v19  ;;  %v6709_v21 = vpop.f32.mrb[6].mxu1  ;;  %v3312_v15 = vld [vmem:[#allocation11 + $0x20] sm:$0xff] }
 0x1e4   : > { %9354 = vst [vmem:[#allocation45_spill] sm:$0xff] %v6709_v21  ;;  %v6713_v27 = vpop.f32.mrb[7].mxu1 }
 0x1e5   : > { %v6696_v12 = vpop.f32.mrb[10].mxu0  ;;  %9356 = vst [vmem:[#allocation47_spill] sm:$0xff] %v6713_v27  ;;  %4745 = vmatprep.subr.bf16.mxu1 %v4744_v20  ;;  %v7016_v27 = vld [vmem:[%s6157_s10 + $0xb8] sm:$0xff] }
 0x1e6   : > { %9351 = vst [vmem:[#allocation42_spill] sm:$0xff] %v6696_v12  ;;  %v6704_v18 = vpop.f32.mrb[11].mxu0  ;;  %1327 = vmatmul.mubr.f32.gmra.mrb[116].mxu0 %v6412_v16  ;;  %4747 = vmatpush3.bf16.msra.mxu1 %v4744_v20  ;;  %v3313_v20 = vld [vmem:[#allocation11 + $0x28] sm:$0xff] }
 0x1e7   : > { %9353 = vst [vmem:[#allocation44_spill] sm:$0xff] %v6704_v18  ;;  %1332 = vmatprep.mubr.f32.mxu0 %v5830_v0  ;;  %v6719_v16 = vpop.f32.mrb[8].mxu1  ;;  %4749 = vmatprep.subr.bf16.mxu1 %v4748_v53  ;;  %v4752_v49 = vpack.c.bf16 %v3313_v20, %v3312_v15 }
 0x1e8   : > { %9358 = vst [vmem:[#allocation49_spill] sm:$0xff] %v6719_v16  ;;  %v6723_v30 = vpop.f32.mrb[9].mxu1 }
 0x1e9   : > { %v6711_v23 = vpop.f32.mrb[12].mxu0  ;;  %9360 = vst [vmem:[#allocation51_spill] sm:$0xff] %v6723_v30 }
 0x1ea   : > { %9355 = vst [vmem:[#allocation46_spill] sm:$0xff] %v6711_v23  ;;  %v6715_v28 = vpop.f32.mrb[13].mxu0  ;;  %1333 = vmatmul.mubr.f32.gmra.mrb[118].mxu0 %v6422_v22  ;;  %4751 = vmatpush3.bf16.msra.mxu1 %v4748_v53 }
 0x1eb   : > { %9357 = vst [vmem:[#allocation48_spill] sm:$0xff] %v6715_v28  ;;  %1338 = vmatprep.mubr.f32.mxu0 %v5830_v0  ;;  %v6729_v34 = vpop.f32.mrb[10].mxu1  ;;  %4753 = vmatprep.subr.bf16.mxu1 %v4752_v49  ;;  %v7080_v28 = vld [vmem:[%s6157_s10 + $0xf8] sm:$0xff] }
 0x1ec   : > { %9362 = vst [vmem:[#allocation53_spill] sm:$0xff] %v6729_v34  ;;  %v6733_v22 = vpop.f32.mrb[11].mxu1 }
 0x1ed   : > { %v6721_v29 = vpop.f32.mrb[14].mxu0  ;;  %9364 = vst [vmem:[#allocation55_spill] sm:$0xff] %v6733_v22 }
 0x1ee   : > { %9359 = vst [vmem:[#allocation50_spill] sm:$0xff] %v6721_v29  ;;  %v6725_v32 = vpop.f32.mrb[15].mxu0  ;;  %1339 = vmatmul.mubr.f32.gmra.mrb[120].mxu0 %v6428_v25  ;;  %4755 = vmatpush3.bf16.msra.mxu1 %v4752_v49  ;;  %v3323_v29 = vld [vmem:[#allocation11 + $0x78] sm:$0xff] }
 0x1ef   : > { %9361 = vst [vmem:[#allocation52_spill] sm:$0xff] %v6725_v32  ;;  %1344 = vmatprep.mubr.f32.mxu0 %v5830_v0  ;;  %v6739_v40 = vpop.f32.mrb[12].mxu1  ;;  %v3322_v32 = vld [vmem:[#allocation11 + $0x70] sm:$0xff] }
 0x1f0   : > { %9366 = vst [vmem:[#allocation57_spill] sm:$0xff] %v6739_v40  ;;  %v6743_v44 = vpop.f32.mrb[13].mxu1  ;;  %v4772_v23 = vpack.c.bf16 %v3323_v29, %v3322_v32 }
 0x1f1   : > { %v6731_v38 = vpop.f32.mrb[16].mxu0  ;;  %9368 = vst [vmem:[#allocation59_spill] sm:$0xff] %v6743_v44  ;;  %v6952_v44 = vld [vmem:[%s6157_s10 + $0x78] sm:$0xff] }
 0x1f2   : > { %9363 = vst [vmem:[#allocation54_spill] sm:$0xff] %v6731_v38  ;;  %v6735_v39 = vpop.f32.mrb[17].mxu0  ;;  %1345 = vmatmul.mubr.f32.gmra.mrb[122].mxu0 %v6434_v26 }
 0x1f3   : > { %9365 = vst [vmem:[#allocation56_spill] sm:$0xff] %v6735_v39  ;;  %1350 = vmatprep.mubr.f32.mxu0 %v5830_v0  ;;  %v6749_v56 = vpop.f32.mrb[14].mxu1 }
 0x1f4   : > { %9370 = vst [vmem:[#allocation61_spill] sm:$0xff] %v6749_v56  ;;  %v6753_v31 = vpop.f32.mrb[15].mxu1 }
 0x1f5   : > { %v6741_v41 = vpop.f32.mrb[18].mxu0  ;;  %9372 = vst [vmem:[#allocation63_spill] sm:$0xff] %v6753_v31 }
 0x1f6   : > { %9367 = vst [vmem:[#allocation58_spill] sm:$0xff] %v6741_v41  ;;  %v6745_v25 = vpop.f32.mrb[19].mxu0  ;;  %1351 = vmatmul.mubr.f32.gmra.mrb[124].mxu0 %v6444_v33  ;;  %v7067_v41 = vld [vmem:[%s6157_s10 + $0xf0] sm:$0xff] }
 0x1f7   : > { %9369 = vst [vmem:[#allocation60_spill] sm:$0xff] %v6745_v25  ;;  %1356 = vmatprep.mubr.f32.mxu0 %v5830_v0  ;;  %v6759_v33 = vpop.f32.mrb[16].mxu1 }
 0x1f8   : > { %9374 = vst [vmem:[#allocation65_spill] sm:$0xff] %v6759_v33  ;;  %v6763_v36 = vpop.f32.mrb[17].mxu1 }
 0x1f9   : > { %v6751_v26 = vpop.f32.mrb[20].mxu0  ;;  %9376 = vst [vmem:[#allocation67_spill] sm:$0xff] %v6763_v36 }
 0x1fa   : > { %9371 = vst [vmem:[#allocation62_spill] sm:$0xff] %v6751_v26  ;;  %v6755_v57 = vpop.f32.mrb[21].mxu0  ;;  %1357 = vmatmul.mubr.f32.gmra.mrb[126].mxu0 %v6450_v35 }
 0x1fb   : > { %9373 = vst [vmem:[#allocation64_spill] sm:$0xff] %v6755_v57  ;;  %1362 = vmatprep.mubr.f32.mxu0 %v5830_v0  ;;  %v6769_v63 = vpop.f32.mrb[18].mxu1 }
 0x1fc   : > { %9378 = vst [vmem:[#allocation69_spill] sm:$0xff] %v6769_v63  ;;  %v6773_v35 = vpop.f32.mrb[19].mxu1 }
 0x1fd   : > { %v6761_v61 = vpop.f32.mrb[22].mxu0  ;;  %9380 = vst [vmem:[#allocation71_spill] sm:$0xff] %v6773_v35 }
 0x1fe   : > { %9375 = vst [vmem:[#allocation66_spill] sm:$0xff] %v6761_v61  ;;  %v6765_v62 = vpop.f32.mrb[23].mxu0  ;;  %1363 = vmatmul.mubr.f32.gmra.mrb[128].mxu0 %v6456_v37 }
 0x1ff   : > { %9377 = vst [vmem:[#allocation68_spill] sm:$0xff] %v6765_v62  ;;  %1368 = vmatprep.mubr.f32.mxu0 %v5830_v0  ;;  %v6779_v8 = vpop.f32.mrb[20].mxu1  ;;  %v7019_v62 = vld [vmem:[%s6157_s10 + $0xc0] sm:$0xff] }
 0x200   : > { %9382 = vst [vmem:[#allocation73_spill] sm:$0xff] %v6779_v8  ;;  %v6783_v19 = vpop.f32.mrb[21].mxu1 }
 0x201   : > { %v6771_v42 = vpop.f32.mrb[24].mxu0  ;;  %9384 = vst [vmem:[#allocation75_spill] sm:$0xff] %v6783_v19 }
 0x202   : > { %9379 = vst [vmem:[#allocation70_spill] sm:$0xff] %v6771_v42  ;;  %v6775_v5 = vpop.f32.mrb[25].mxu0  ;;  %1369 = vmatmul.mubr.f32.gmra.mrb[130].mxu0 %v6466_v48  ;;  %v3321_v42 = vld [vmem:[#allocation11 + $0x68] sm:$0xff] }
 0x203   : > { %9381 = vst [vmem:[#allocation72_spill] sm:$0xff] %v6775_v5  ;;  %1374 = vmatprep.mubr.f32.mxu0 %v5830_v0  ;;  %v6789_v24 = vpop.f32.mrb[22].mxu1 }
 0x204   : > { %9386 = vst [vmem:[#allocation77_spill] sm:$0xff] %v6789_v24  ;;  %v6793_v53 = vpop.f32.mrb[23].mxu1 }
 0x205   : > { %v6781_v45 = vpop.f32.mrb[26].mxu0  ;;  %9388 = vst [vmem:[#allocation79_spill] sm:$0xff] %v6793_v53 }
 0x206   : > { %9383 = vst [vmem:[#allocation74_spill] sm:$0xff] %v6781_v45  ;;  %v6785_v37 = vpop.f32.mrb[27].mxu0  ;;  %1375 = vmatmul.mubr.f32.gmra.mrb[132].mxu0 %v6472_v51  ;;  %v7003_v45 = vld [vmem:[%s6157_s10 + $0xb0] sm:$0xff] }
 0x207   : > { %9385 = vst [vmem:[#allocation76_spill] sm:$0xff] %v6785_v37  ;;  %1380 = vmatprep.mubr.f32.mxu0 %v5830_v0  ;;  %v6799_v51 = vpop.f32.mrb[24].mxu1 }
 0x208   : > { %9390 = vst [vmem:[#allocation81_spill] sm:$0xff] %v6799_v51  ;;  %v6803_v35 = vpop.f32.mrb[25].mxu1 }
 0x209   : > { %v6791_v48 = vpop.f32.mrb[28].mxu0  ;;  %9392 = vst [vmem:[#allocation83_spill] sm:$0xff] %v6803_v35 }
 0x20a   : > { %9387 = vst [vmem:[#allocation78_spill] sm:$0xff] %v6791_v48  ;;  %v6795_v8 = vpop.f32.mrb[29].mxu0  ;;  %1381 = vmatmul.mubr.f32.gmra.mrb[134].mxu0 %v6478_v52  ;;  %v6968_v48 = vld [vmem:[%s6157_s10 + $0x88] sm:$0xff] }
 0x20b   : > { %9389 = vst [vmem:[#allocation80_spill] sm:$0xff] %v6795_v8  ;;  %1386 = vmatprep.mubr.f32.mxu0 %v5830_v0  ;;  %v6809_v20 = vpop.f32.mrb[26].mxu1  ;;  %v6955_v8 = vld [vmem:[%s6157_s10 + $0x80] sm:$0xff] }
 0x20c   : > { %9394 = vst [vmem:[#allocation85_spill] sm:$0xff] %v6809_v20  ;;  %v6813_v52 = vpop.f32.mrb[27].mxu1  ;;  %v3314_v20 = vld [vmem:[#allocation11 + $0x30] sm:$0xff] }
 0x20d   : > { %v6801_v19 = vpop.f32.mrb[30].mxu0  ;;  %9396 = vst [vmem:[#allocation87_spill] sm:$0xff] %v6813_v52  ;;  %v3315_v52 = vld [vmem:[#allocation11 + $0x38] sm:$0xff] }
 0x20e   : > { %9391 = vst [vmem:[#allocation82_spill] sm:$0xff] %v6801_v19  ;;  %v6805_v15 = vpop.f32.mrb[31].mxu0  ;;  %1387 = vmatmul.mubr.f32.gmra.mrb[136].mxu0 %v6486_v58  ;;  %v4756_v63 = vpack.c.bf16 %v3315_v52, %v3314_v20 }
 0x20f   : > { %9393 = vst [vmem:[#allocation84_spill] sm:$0xff] %v6805_v15  ;;  %1392 = vmatprep.mubr.f32.mxu0 %v5830_v0  ;;  %v6819_v51 = vpop.f32.mrb[28].mxu1 }
 0x210   : > { %9398 = vst [vmem:[#allocation89_spill] sm:$0xff] %v6819_v51  ;;  %v6823_v58 = vpop.f32.mrb[29].mxu1  ;;  %4757 = vmatprep.subr.bf16.mxu1 %v4756_v63 }
 0x211   : > { %v6811_v53 = vpop.f32.mrb[32].mxu0  ;;  %9400 = vst [vmem:[#allocation91_spill] sm:$0xff] %v6823_v58  ;;  %4759 = vmatpush3.bf16.msra.mxu1 %v4756_v63 }
 0x212   : > { %9395 = vst [vmem:[#allocation86_spill] sm:$0xff] %v6811_v53  ;;  %v6815_v49 = vpop.f32.mrb[33].mxu0  ;;  %1393 = vmatmul.mubr.f32.gmra.mrb[138].mxu0 %v6494_v1  ;;  %v6904_v53 = vld [vmem:[%s6157_s10 + $0x48] sm:$0xff] }
 0x213   : > { %9397 = vst [vmem:[#allocation88_spill] sm:$0xff] %v6815_v49  ;;  %1398 = vmatprep.mubr.f32.mxu0 %v5830_v0  ;;  %v6829_v1 = vpop.f32.mrb[30].mxu1  ;;  %v6891_v49 = vld [vmem:[%s6157_s10 + $0x40] sm:$0xff] }
 0x214   : > { %9402 = vst [vmem:[#allocation93_spill] sm:$0xff] %v6829_v1  ;;  %v6833_v51 = vpop.f32.mrb[31].mxu1 }
 0x215   : > { %v6821_v35 = vpop.f32.mrb[34].mxu0  ;;  %9404 = vst [vmem:[#allocation95_spill] sm:$0xff] %v6833_v51 }
 0x216   : > { %9399 = vst [vmem:[#allocation90_spill] sm:$0xff] %v6821_v35  ;;  %v6825_v24 = vpop.f32.mrb[35].mxu0  ;;  %1399 = vmatmul.mubr.f32.gmra.mrb[140].mxu0 %v6500_v3  ;;  %v6840_v3 = vld [vmem:[%s6157_s10 + $0x8] sm:$0xff]  ;;  %v6888_v35 = vld [vmem:[%s6157_s10 + $0x38] sm:$0xff] }
 0x217   : > { %9401 = vst [vmem:[#allocation92_spill] sm:$0xff] %v6825_v24  ;;  %1404 = vmatprep.mubr.f32.mxu0 %v5830_v0  ;;  %v6843_v0 = vld [vmem:[%s6157_s10 + $0x10] sm:$0xff]  ;;  %v6845_v20 = vpop.f32.mrb[32].mxu1 }
 0x218   : > { %9406 = vst [vmem:[#allocation97_spill] sm:$0xff] %v6845_v20  ;;  %v6849_v1 = vpop.f32.mrb[33].mxu1 }
 0x219   : > { %v6831_v36 = vpop.f32.mrb[36].mxu0  ;;  %9408 = vst [vmem:[#allocation99_spill] sm:$0xff] %v6849_v1  ;;  %v6872_v1 = vld [vmem:[%s6157_s10 + $0x28] sm:$0xff] }
 0x21a   : > { %9403 = vst [vmem:[#allocation94_spill] sm:$0xff] %v6831_v36  ;;  %v6835_v58 = vpop.f32.mrb[37].mxu0  ;;  %1405 = vmatmul.mubr.f32.gmra.mrb[142].mxu0 %v6506_v4  ;;  %v6856_v4 = vld [vmem:[%s6157_s10 + $0x18] sm:$0xff] }
 0x21b   : > { %9405 = vst [vmem:[#allocation96_spill] sm:$0xff] %v6835_v58  ;;  %4376 = vmatprep.mubr.f32.mxu0 %v6699_v14  ;;  %v6859_v14 = vld [vmem:[%s6157_s10 + $0x20] sm:$0xff]  ;;  %v6861_v63 = vpop.f32.mrb[34].mxu1 }
 0x21c   : > { %9410 = vst [vmem:[#allocation101_spill] sm:$0xff] %v6861_v63  ;;  %v6865_v20 = vpop.f32.mrb[35].mxu1 }
 0x21d   : > { %v6847_v52 = vpop.f32.mrb[38].mxu0  ;;  %9412 = vst [vmem:[#allocation103_spill] sm:$0xff] %v6865_v20  ;;  %v3316_v20 = vld [vmem:[#allocation11 + $0x40] sm:$0xff] }
 0x21e   : > { %9407 = vst [vmem:[#allocation98_spill] sm:$0xff] %v6847_v52  ;;  %v6851_v51 = vpop.f32.mrb[39].mxu0  ;;  %4377 = vmatmul.mubr.f32.vlgmr.msra.gmra.mrb[144].mxu0 %v6840_v3 }
 0x21f   : > { %9409 = vst [vmem:[#allocation100_spill] sm:$0xff] %v6851_v51  ;;  %4379 = vmatprep.mubr.f32.mxu0 %v6843_v0  ;;  %v6875_v51 = vld [vmem:[%s6157_s10 + $0x30] sm:$0xff]  ;;  %v6877_v36 = vpop.f32.mrb[36].mxu1 }
 0x220   : > { %9414 = vst [vmem:[#allocation105_spill] sm:$0xff] %v6877_v36  ;;  %v6881_v63 = vpop.f32.mrb[37].mxu1 }
 0x221   : > { %v6863_v58 = vpop.f32.mrb[40].mxu0  ;;  %9416 = vst [vmem:[#allocation107_spill] sm:$0xff] %v6881_v63 }
 0x222   : > { %9411 = vst [vmem:[#allocation102_spill] sm:$0xff] %v6863_v58  ;;  %v6867_v52 = vpop.f32.mrb[41].mxu0  ;;  %4380 = vmatmul.mubr.f32.gmra.mrb[146].mxu0 %v6856_v4 }
 0x223   : > { %9413 = vst [vmem:[#allocation104_spill] sm:$0xff] %v6867_v52  ;;  %4382 = vmatprep.mubr.f32.mxu0 %v6859_v14  ;;  %v3317_v52 = vld [vmem:[#allocation11 + $0x48] sm:$0xff]  ;;  %v6893_v36 = vpop.f32.mrb[38].mxu1 }
 0x224   : > { %v4760_v33 = vpack.c.bf16 %v3317_v52, %v3316_v20  ;;  %9418 = vst [vmem:[#allocation109_spill] sm:$0xff] %v6893_v36  ;;  %v6897_v63 = vpop.f32.mrb[39].mxu1  ;;  %v6907_v20 = vld [vmem:[%s6157_s10 + $0x50] sm:$0xff] }
 0x225   : > { %v6879_v24 = vpop.f32.mrb[42].mxu0  ;;  %9420 = vst [vmem:[#allocation111_spill] sm:$0xff] %v6897_v63 }
 0x226   : > { %9415 = vst [vmem:[#allocation106_spill] sm:$0xff] %v6879_v24  ;;  %v6883_v58 = vpop.f32.mrb[43].mxu0  ;;  %4383 = vmatmul.mubr.f32.gmra.mrb[148].mxu0 %v6872_v1  ;;  %4761 = vmatprep.subr.bf16.mxu1 %v4760_v33 }
 0x227   : > { %9417 = vst [vmem:[#allocation108_spill] sm:$0xff] %v6883_v58  ;;  %4385 = vmatprep.mubr.f32.mxu0 %v6875_v51  ;;  %4763 = vmatpush3.bf16.msra.mxu1 %v4760_v33  ;;  %v6909_v52 = vpop.f32.mrb[40].mxu1  ;;  %v6920_v33 = vld [vmem:[%s6157_s10 + $0x58] sm:$0xff] }
 0x228   : > { %9422 = vst [vmem:[#allocation113_spill] sm:$0xff] %v6909_v52 }
 0x229   : > { %v6895_v24 = vpop.f32.mrb[44].mxu0 }
 0x22a   : > { %9419 = vst [vmem:[#allocation110_spill] sm:$0xff] %v6895_v24  ;;  %v6899_v58 = vpop.f32.mrb[45].mxu0  ;;  %4386 = vmatmul.mubr.f32.gmra.mrb[150].mxu0 %v6888_v35  ;;  %v6913_v24 = vpop.f32.mrb[41].mxu1 }
 0x22b   : > { %9421 = vst [vmem:[#allocation112_spill] sm:$0xff] %v6899_v58  ;;  %4388 = vmatprep.mubr.f32.mxu0 %v6891_v49  ;;  %9424 = vst [vmem:[#allocation115_spill] sm:$0xff] %v6913_v24  ;;  %v6923_v58 = vld [vmem:[%s6157_s10 + $0x60] sm:$0xff]  ;;  %v6925_v31 = vpop.f32.mrb[42].mxu1  ;;  %v6936_v24 = vld [vmem:[%s6157_s10 + $0x68] sm:$0xff] }
 0x22c   : > { %9426 = vst [vmem:[#allocation117_spill] sm:$0xff] %v6925_v31  ;;  %v6929_v52 = vpop.f32.mrb[43].mxu1 }
 0x22d   : > { %v6911_v36 = vpop.f32.mrb[46].mxu0  ;;  %9428 = vst [vmem:[#allocation119_spill] sm:$0xff] %v6929_v52  ;;  %v3318_v52 = vld [vmem:[#allocation11 + $0x50] sm:$0xff] }
 0x22e   : > { %9423 = vst [vmem:[#allocation114_spill] sm:$0xff] %v6911_v36  ;;  %v6915_v63 = vpop.f32.mrb[47].mxu0  ;;  %4389 = vmatmul.mubr.f32.gmra.mrb[152].mxu0 %v6904_v53 }
 0x22f   : > { %9425 = vst [vmem:[#allocation116_spill] sm:$0xff] %v6915_v63  ;;  %4391 = vmatprep.mubr.f32.mxu0 %v6907_v20  ;;  %v6939_v63 = vld [vmem:[%s6157_s10 + $0x70] sm:$0xff]  ;;  %v6941_v15 = vpop.f32.mrb[44].mxu1 }
 0x230   : > { %9430 = vst [vmem:[#allocation121_spill] sm:$0xff] %v6941_v15  ;;  %v6945_v31 = vpop.f32.mrb[45].mxu1 }
 0x231   : > { %v6927_v56 = vpop.f32.mrb[48].mxu0  ;;  %9432 = vst [vmem:[#allocation123_spill] sm:$0xff] %v6945_v31 }
 0x232   : > { %9427 = vst [vmem:[#allocation118_spill] sm:$0xff] %v6927_v56  ;;  %v6931_v36 = vpop.f32.mrb[49].mxu0  ;;  %4392 = vmatmul.mubr.f32.gmra.mrb[154].mxu0 %v6920_v33 }
 0x233   : > { %9429 = vst [vmem:[#allocation120_spill] sm:$0xff] %v6931_v36  ;;  %4394 = vmatprep.mubr.f32.mxu0 %v6923_v58  ;;  %v3319_v36 = vld [vmem:[#allocation11 + $0x58] sm:$0xff]  ;;  %v6957_v15 = vpop.f32.mrb[46].mxu1 }
 0x234   : > { %v4764_v40 = vpack.c.bf16 %v3319_v36, %v3318_v52  ;;  %9434 = vst [vmem:[#allocation125_spill] sm:$0xff] %v6957_v15  ;;  %v6961_v31 = vpop.f32.mrb[47].mxu1  ;;  %v6971_v36 = vld [vmem:[%s6157_s10 + $0x90] sm:$0xff] }
 0x235   : > { %v6943_v19 = vpop.f32.mrb[50].mxu0  ;;  %9436 = vst [vmem:[#allocation127_spill] sm:$0xff] %v6961_v31 }
 0x236   : > { %9431 = vst [vmem:[#allocation122_spill] sm:$0xff] %v6943_v19  ;;  %v6947_v56 = vpop.f32.mrb[51].mxu0  ;;  %4395 = vmatmul.mubr.f32.gmra.mrb[156].mxu0 %v6936_v24  ;;  %4765 = vmatprep.subr.bf16.mxu1 %v4764_v40 }
 0x237   : > { %9433 = vst [vmem:[#allocation124_spill] sm:$0xff] %v6947_v56  ;;  %4397 = vmatprep.mubr.f32.mxu0 %v6939_v63  ;;  %4767 = vmatpush3.bf16.msra.mxu1 %v4764_v40  ;;  %v6973_v52 = vpop.f32.mrb[48].mxu1  ;;  %v6984_v40 = vld [vmem:[%s6157_s10 + $0x98] sm:$0xff] }
 0x239   : > { %v6959_v19 = vpop.f32.mrb[52].mxu0 }
 0x23a   : > { %9435 = vst [vmem:[#allocation126_spill] sm:$0xff] %v6959_v19  ;;  %v6963_v56 = vpop.f32.mrb[53].mxu0  ;;  %4398 = vmatmul.mubr.f32.gmra.mrb[158].mxu0 %v6952_v44  ;;  %v6977_v19 = vpop.f32.mrb[49].mxu1 }
 0x23b   : > { %9437 = vst [vmem:[#allocation128_spill] sm:$0xff] %v6963_v56  ;;  %4400 = vmatprep.mubr.f32.mxu0 %v6955_v8  ;;  %v6987_v56 = vld [vmem:[%s6157_s10 + $0xa0] sm:$0xff]  ;;  %v6989_v22 = vpop.f32.mrb[50].mxu1 }
 0x23c   : > { %v6993_v37 = vpop.f32.mrb[51].mxu1 }
 0x23d   : > { %v6975_v15 = vpop.f32.mrb[54].mxu0 }
 0x23e   : > { %9438 = vst [vmem:[#allocation129_spill] sm:$0xff] %v6975_v15  ;;  %v6979_v31 = vpop.f32.mrb[55].mxu0  ;;  %4401 = vmatmul.mubr.f32.gmra.mrb[160].mxu0 %v6968_v48 }
 0x23f   : > { %9439 = vst [vmem:[#allocation130_spill] sm:$0xff] %v6979_v31  ;;  %4403 = vmatprep.mubr.f32.mxu0 %v6971_v36  ;;  %v7000_v31 = vld [vmem:[%s6157_s10 + $0xa8] sm:$0xff]  ;;  %v7005_v30 = vpop.f32.mrb[52].mxu1 }
 0x240   : > { %v7009_v5 = vpop.f32.mrb[53].mxu1 }
 0x241   : > { %v6991_v34 = vpop.f32.mrb[56].mxu0 }
 0x242   : > { %9440 = vst [vmem:[#allocation131_spill] sm:$0xff] %v6991_v34  ;;  %v6995_v15 = vpop.f32.mrb[57].mxu0  ;;  %4404 = vmatmul.mubr.f32.gmra.mrb[162].mxu0 %v6984_v40 }
 0x243   : > { %9441 = vst [vmem:[#allocation132_spill] sm:$0xff] %v6995_v15  ;;  %4406 = vmatprep.mubr.f32.mxu0 %v6987_v56  ;;  %v3320_v15 = vld [vmem:[#allocation11 + $0x60] sm:$0xff]  ;;  %v7021_v61 = vpop.f32.mrb[54].mxu1 }
 0x244   : > { %v4768_v21 = vpack.c.bf16 %v3321_v42, %v3320_v15  ;;  %v7035_v42 = vld [vmem:[%s6157_s10 + $0xd0] sm:$0xff] }
 0x245   : > { %v7007_v16 = vpop.f32.mrb[58].mxu0 }
 0x246   : > { %9442 = vst [vmem:[#allocation133_spill] sm:$0xff] %v7007_v16  ;;  %v7011_v34 = vpop.f32.mrb[59].mxu0  ;;  %4407 = vmatmul.mubr.f32.gmra.mrb[164].mxu0 %v7000_v31  ;;  %4769 = vmatprep.subr.bf16.mxu1 %v4768_v21 }
 0x247   : > { %9443 = vst [vmem:[#allocation134_spill] sm:$0xff] %v7011_v34  ;;  %4409 = vmatprep.mubr.f32.mxu0 %v7003_v45  ;;  %v7025_v34 = vpop.f32.mrb[55].mxu1  ;;  %4771 = vmatpush3.bf16.msra.mxu1 %v4768_v21  ;;  %v7048_v21 = vld [vmem:[%s6157_s10 + $0xd8] sm:$0xff] }
 0x248   : > { %v7037_v15 = vpop.f32.mrb[56].mxu1  ;;  %4773 = vmatprep.subr.bf16.mxu1 %v4772_v23 }
 0x249   : > { %v7023_v16 = vpop.f32.mrb[60].mxu0  ;;  %v7041_v57 = vpop.f32.mrb[57].mxu1 }
 0x24a   : > { %9444 = vst [vmem:[#allocation135_spill] sm:$0xff] %v7023_v16  ;;  %v7027_v17 = vpop.f32.mrb[61].mxu0  ;;  %4410 = vmatmul.mubr.f32.gmra.mrb[166].mxu0 %v7016_v27 }
 0x24b   : > { %9445 = vst [vmem:[#allocation136_spill] sm:$0xff] %v7027_v17  ;;  %4412 = vmatprep.mubr.f32.mxu0 %v7019_v62  ;;  %v7051_v17 = vld [vmem:[%s6157_s10 + $0xe0] sm:$0xff]  ;;  %v7053_v10 = vpop.f32.mrb[58].mxu1  ;;  %4775 = vmatpush3.bf16.msra.mxu1 %v4772_v23 }
 0x24c   : > { %v7057_v25 = vpop.f32.mrb[59].mxu1 }
 0x24d   : > { %v7039_v16 = vpop.f32.mrb[62].mxu0 }
 0x24e   : > { %9446 = vst [vmem:[#allocation137_spill] sm:$0xff] %v7039_v16  ;;  %v7043_v26 = vpop.f32.mrb[63].mxu0  ;;  %4413 = vmatmul.mubr.f32.gmra.mrb[168].mxu0 %v7032_v13  ;;  %4457 = vmatmul.mubr.f32.vlgmr.msra.gmra.mrb[112].mxu1 %v6840_v3 }
 0x24f   : > { %9447 = vst [vmem:[#allocation138_spill] sm:$0xff] %v7043_v26  ;;  %4415 = vmatprep.mubr.f32.mxu0 %v7035_v42  ;;  %v7064_v26 = vld [vmem:[%s6157_s10 + $0xe8] sm:$0xff]  ;;  %v7069_v2 = vpop.f32.mrb[60].mxu1  ;;  %4459 = vmatprep.mubr.f32.mxu1 %v6843_v0 }
 0x250   : > { %v7073_v39 = vpop.f32.mrb[61].mxu1 }
 0x251   : > { %v7055_v7 = vpop.f32.mrb[64].mxu0 }
 0x252   : > { %9448 = vst [vmem:[#allocation139_spill] sm:$0xff] %v7055_v7  ;;  %v7059_v16 = vpop.f32.mrb[65].mxu0  ;;  %4416 = vmatmul.mubr.f32.gmra.mrb[170].mxu0 %v7048_v21  ;;  %4460 = vmatmul.mubr.f32.gmra.mrb[114].mxu1 %v6856_v4 }
 0x253   : > { %9449 = vst [vmem:[#allocation140_spill] sm:$0xff] %v7059_v16  ;;  %4418 = vmatprep.mubr.f32.mxu0 %v7051_v17  ;;  %v7082_v18 = vpop.f32.mrb[62].mxu1  ;;  %4462 = vmatprep.mubr.f32.mxu1 %v6859_v14 }
 0x254   : > { %v7086_v11 = vpop.f32.mrb[63].mxu1 }
 0x255   : > { %v7071_v59 = vpop.f32.mrb[66].mxu0 }
 0x256   : > { %9450 = vst [vmem:[#allocation141_spill] sm:$0xff] %v7071_v59  ;;  %v7075_v38 = vpop.f32.mrb[67].mxu0  ;;  %4419 = vmatmul.mubr.f32.gmra.mrb[172].mxu0 %v7064_v26  ;;  %4463 = vmatmul.mubr.f32.gmra.mrb[116].mxu1 %v6872_v1 }
 0x257   : > { %9451 = vst [vmem:[#allocation142_spill] sm:$0xff] %v7075_v38  ;;  %4421 = vmatprep.mubr.f32.mxu0 %v7067_v41  ;;  %v7091_v6 = vpop.f32.mrb[64].mxu1  ;;  %4465 = vmatprep.mubr.f32.mxu1 %v6875_v51 }
 0x258   : > { %v7095_v55 = vpop.f32.mrb[65].mxu1 }
 0x259   : > { %v7084_v12 = vpop.f32.mrb[68].mxu0 }
 0x25a   : > { %9452 = vst [vmem:[#allocation143_spill] sm:$0xff] %v7084_v12  ;;  %v7088_v9 = vpop.f32.mrb[69].mxu0  ;;  %4422 = vmatmul.mubr.f32.gmra.mrb[174].mxu0 %v7080_v28  ;;  %4466 = vmatmul.mubr.f32.gmra.mrb[118].mxu1 %v6888_v35 }
 0x25b   : > { %9453 = vst [vmem:[#allocation144_spill] sm:$0xff] %v7088_v9  ;;  %v7101_v32 = vpop.f32.mrb[66].mxu1  ;;  %4468 = vmatprep.mubr.f32.mxu1 %v6891_v49 }
 0x25c   : > { %v7105_v9 = vpop.f32.mrb[67].mxu1 }
 0x25d   : > { %v7093_v60 = vpop.f32.mrb[70].mxu0 }
 0x25e   : > { %9454 = vst [vmem:[#allocation145_spill] sm:$0xff] %v7093_v60  ;;  %v7098_v29 = vpop.f32.mrb[71].mxu0  ;;  %4469 = vmatmul.mubr.f32.gmra.mrb[120].mxu1 %v6904_v53 }
 0x25f   : > { %9455 = vst [vmem:[#allocation146_spill] sm:$0xff] %v7098_v29  ;;  %v7111_v60 = vpop.f32.mrb[68].mxu1  ;;  %v3292_v29 = vld [vmem:[#allocation9] sm:$0xff]  ;;  %4471 = vmatprep.mubr.f32.mxu1 %v6907_v20 }
 0x260   : > { %v7115_v3 = vpop.f32.mrb[69].mxu1 }
 0x261   : > { %v7103_v12 = vpop.f32.mrb[72].mxu0 }
 0x262   : > { %9456 = vst [vmem:[#allocation147_spill] sm:$0xff] %v7103_v12  ;;  %v7108_v23 = vpop.f32.mrb[73].mxu0  ;;  %v3293_v12 = vld [vmem:[#allocation9 + $0x8] sm:$0xff]  ;;  %4472 = vmatmul.mubr.f32.gmra.mrb[122].mxu1 %v6920_v33 }
 0x263   : > { %9457 = vst [vmem:[#allocation148_spill] sm:$0xff] %v7108_v23  ;;  %v4776_v38 = vpack.c.bf16 %v3293_v12, %v3292_v29  ;;  %v7121_v4 = vpop.f32.mrb[70].mxu1  ;;  %v3294_v29 = vld [vmem:[#allocation9 + $0x10] sm:$0xff]  ;;  %4474 = vmatprep.mubr.f32.mxu1 %v6923_v58 }
 0x264   : > { %v7125_v14 = vpop.f32.mrb[71].mxu1 }
 0x265   : > { %v7113_v54 = vpop.f32.mrb[74].mxu0  ;;  %4777 = vmatprep.subr.bf16.mxu1 %v4776_v38 }
 0x266   : > { %9458 = vst [vmem:[#allocation149_spill] sm:$0xff] %v7113_v54  ;;  %v7118_v0 = vpop.f32.mrb[75].mxu0  ;;  %4779 = vmatpush3.bf16.msra.mxu1 %v4776_v38 }
 0x267   : > { %9459 = vst [vmem:[#allocation150_spill] sm:$0xff] %v7118_v0  ;;  %v7131_v1 = vpop.f32.mrb[72].mxu1  ;;  %4475 = vmatmul.mubr.f32.gmra.mrb[124].mxu1 %v6936_v24 }
 0x268   : > { %9462 = vst [vmem:[#allocation153_spill] sm:$0xff] %v7131_v1  ;;  %v7135_v51 = vpop.f32.mrb[73].mxu1  ;;  %4477 = vmatprep.mubr.f32.mxu1 %v6939_v63 }
 0x269   : > { %v7123_v23 = vpop.f32.mrb[76].mxu0  ;;  %9464 = vst [vmem:[#allocation155_spill] sm:$0xff] %v7135_v51 }
 0x26a   : > { %9460 = vst [vmem:[#allocation151_spill] sm:$0xff] %v7123_v23  ;;  %v7128_v54 = vpop.f32.mrb[77].mxu0  ;;  %v3295_v23 = vld [vmem:[#allocation9 + $0x18] sm:$0xff] }
 0x26b   : > { %9461 = vst [vmem:[#allocation152_spill] sm:$0xff] %v7128_v54  ;;  %v4780_v35 = vpack.c.bf16 %v3295_v23, %v3294_v29  ;;  %v7141_v59 = vpop.f32.mrb[74].mxu1  ;;  %4478 = vmatmul.mubr.f32.gmra.mrb[126].mxu1 %v6952_v44 }
 0x26c   : > { %9466 = vst [vmem:[#allocation157_spill] sm:$0xff] %v7141_v59  ;;  %v7145_v49 = vpop.f32.mrb[75].mxu1  ;;  %4480 = vmatprep.mubr.f32.mxu1 %v6955_v8 }
 0x26d   : > { %v7133_v0 = vpop.f32.mrb[78].mxu0  ;;  %9467 = vst [vmem:[#allocation158_spill] sm:$0xff] %v7145_v49  ;;  %4781 = vmatprep.subr.bf16.mxu1 %v4780_v35 }
 0x26e   : > { %9463 = vst [vmem:[#allocation154_spill] sm:$0xff] %v7133_v0  ;;  %v7138_v12 = vpop.f32.mrb[79].mxu0  ;;  %4783 = vmatpush3.bf16.msra.mxu1 %v4780_v35 }
 0x26f   : > { %9465 = vst [vmem:[#allocation156_spill] sm:$0xff] %v7138_v12  ;;  %v7151_v53 = vpop.f32.mrb[76].mxu1  ;;  %4481 = vmatmul.mubr.f32.gmra.mrb[128].mxu1 %v6968_v48 }
 0x270   : > { %9468 = vst [vmem:[#allocation159_spill] sm:$0xff] %v7151_v53  ;;  %v7155_v20 = vpop.f32.mrb[77].mxu1  ;;  %4483 = vmatprep.mubr.f32.mxu1 %v6971_v36 }
 0x271   : > { %v7143_v38 = vpop.f32.mrb[80].mxu0  ;;  %9469 = vst [vmem:[#allocation160_spill] sm:$0xff] %v7155_v20 }
 0x272   : > { %v7148_v0 = vpop.f32.mrb[81].mxu0 }
 0x273   : > { %v7161_v29 = vpop.f32.mrb[78].mxu1  ;;  %4484 = vmatmul.mubr.f32.gmra.mrb[130].mxu1 %v6984_v40 }
 0x274   : > { %9470 = vst [vmem:[#allocation161_spill] sm:$0xff] %v7161_v29  ;;  %v7165_v54 = vpop.f32.mrb[79].mxu1  ;;  %4486 = vmatprep.mubr.f32.mxu1 %v6987_v56 }
 0x275   : > { %v7153_v12 = vpop.f32.mrb[82].mxu0  ;;  %9471 = vst [vmem:[#allocation162_spill] sm:$0xff] %v7165_v54 }
 0x276   : > { %v7158_v23 = vpop.f32.mrb[83].mxu0 }
 0x277   : > { %4487 = vmatmul.mubr.f32.gmra.mrb[132].mxu1 %v7000_v31  ;;  %v7197_v47 = vpop.f32.mrb[80].mxu1 }
 0x278   : > { %4489 = vmatprep.mubr.f32.mxu1 %v7003_v45  ;;  %9472 = vst [vmem:[#allocation163_spill] sm:$0xff] %v7197_v47  ;;  %v7202_v31 = vpop.f32.mrb[81].mxu1 }
 0x279   : > { %v7163_v33 = vpop.f32.mrb[84].mxu0  ;;  %9473 = vst [vmem:[#allocation164_spill] sm:$0xff] %v7202_v31  ;;  %v3296_v31 = vld [vmem:[#allocation9 + $0x20] sm:$0xff] }
 0x27a   : > { %v7168_v58 = vpop.f32.mrb[85].mxu0 }
 0x27b   : > { %4490 = vmatmul.mubr.f32.gmra.mrb[134].mxu1 %v7016_v27  ;;  %v7213_v16 = vpop.f32.mrb[82].mxu1 }
 0x27c   : > { %4492 = vmatprep.mubr.f32.mxu1 %v7019_v62  ;;  %9474 = vst [vmem:[#allocation165_spill] sm:$0xff] %v7213_v16  ;;  %v7218_v7 = vpop.f32.mrb[83].mxu1 }
 0x27d   : > { %v7171_v35 = vpop.f32.mrb[86].mxu0  ;;  %9475 = vst [vmem:[#allocation166_spill] sm:$0xff] %v7218_v7 }
 0x27e   : > { %v7174_v24 = vpop.f32.mrb[87].mxu0 }
 0x27f   : > { %4493 = vmatmul.mubr.f32.gmra.mrb[136].mxu1 %v7032_v13  ;;  %v7242_v53 = vpop.f32.mrb[84].mxu1 }
 0x280   : > { %4495 = vmatprep.mubr.f32.mxu1 %v7035_v42  ;;  %9482 = vst [vmem:[#allocation173_spill] sm:$0xff] %v7242_v53  ;;  %v7244_v54 = vpop.f32.mrb[85].mxu1  ;;  %v3299_v53 = vld [vmem:[#allocation9 + $0x38] sm:$0xff] }
 0x281   : > { %v7177_v63 = vpop.f32.mrb[88].mxu0  ;;  %9483 = vst [vmem:[#allocation174_spill] sm:$0xff] %v7244_v54 }
 0x282   : > { %v7180_v50 = vpop.f32.mrb[89].mxu0 }
 0x283   : > { %4496 = vmatmul.mubr.f32.gmra.mrb[138].mxu1 %v7048_v21 }
 0x284   : > { %4498 = vmatprep.mubr.f32.mxu1 %v7051_v17 }
 0x285   : > { %v7183_v44 = vpop.f32.mrb[90].mxu0 }
 0x286   : > { %v7186_v8 = vpop.f32.mrb[91].mxu0 }
 0x287   : > { %4499 = vmatmul.mubr.f32.gmra.mrb[140].mxu1 %v7064_v26  ;;  %v3297_v26 = vld [vmem:[#allocation9 + $0x28] sm:$0xff] }
 0x288   : > { %4501 = vmatprep.mubr.f32.mxu1 %v7067_v41  ;;  %v4784_v16 = vpack.c.bf16 %v3297_v26, %v3296_v31 }
 0x289   : > { %v7189_v48 = vpop.f32.mrb[92].mxu0 }
 0x28a   : > { %v7192_v36 = vpop.f32.mrb[93].mxu0  ;;  %4785 = vmatprep.subr.bf16.mxu1 %v4784_v16 }
 0x28b   : > { %4502 = vmatmul.mubr.f32.gmra.mrb[142].mxu1 %v7080_v28 }
 0x28c   : > { %4787 = vmatpush3.bf16.msra.mxu1 %v4784_v16 }
 0x28d   : > { %v7195_v40 = vpop.f32.mrb[94].mxu0 }
 0x28e   : > { %v7200_v56 = vpop.f32.mrb[95].mxu0 }
 0x291   : > { %v7205_v45 = vpop.f32.mrb[96].mxu0 }
 0x292   : > { %v7208_v27 = vpop.f32.mrb[97].mxu0 }
 0x295   : > { %v7211_v62 = vpop.f32.mrb[98].mxu0 }
 0x296   : > { %v7216_v13 = vpop.f32.mrb[99].mxu0 }
 0x299   : > { %v7221_v42 = vpop.f32.mrb[100].mxu0 }
 0x29a   : > { %v7224_v21 = vpop.f32.mrb[101].mxu0 }
 0x29d   : > { %v7226_v46 = vpop.f32.mrb[102].mxu0 }
 0x29e   : > { %v7228_v17 = vpop.f32.mrb[103].mxu0 }
 0x2a1   : > { %v7230_v43 = vpop.f32.mrb[104].mxu0 }
 0x2a2   : > { %9476 = vst [vmem:[#allocation167_spill] sm:$0xff] %v7230_v43  ;;  %v7232_v47 = vpop.f32.mrb[105].mxu0 }
 0x2a3   : > { %9477 = vst [vmem:[#allocation168_spill] sm:$0xff] %v7232_v47 }
 0x2a5   : > { %v7234_v7 = vpop.f32.mrb[106].mxu0 }
 0x2a6   : > { %9478 = vst [vmem:[#allocation169_spill] sm:$0xff] %v7234_v7  ;;  %v7236_v41 = vpop.f32.mrb[107].mxu0 }
 0x2a7   : > { %9479 = vst [vmem:[#allocation170_spill] sm:$0xff] %v7236_v41 }
 0x2a9   : > { %v7238_v28 = vpop.f32.mrb[108].mxu0 }
 0x2aa   : > { %9480 = vst [vmem:[#allocation171_spill] sm:$0xff] %v7238_v28  ;;  %v7240_v20 = vpop.f32.mrb[109].mxu0 }
 0x2ab   : > { %9481 = vst [vmem:[#allocation172_spill] sm:$0xff] %v7240_v20  ;;  %v3298_v20 = vld [vmem:[#allocation9 + $0x30] sm:$0xff] }
 0x2ac   : > { %v4788_v54 = vpack.c.bf16 %v3299_v53, %v3298_v20 }
 0x2ad   : > { %v7246_v29 = vpop.f32.mrb[110].mxu0 }
 0x2ae   : > { %9484 = vst [vmem:[#allocation175_spill] sm:$0xff] %v7246_v29  ;;  %v7248_v51 = vpop.f32.mrb[111].mxu0  ;;  %4789 = vmatprep.subr.bf16.mxu1 %v4788_v54 }
 0x2af   : > { %9485 = vst [vmem:[#allocation176_spill] sm:$0xff] %v7248_v51  ;;  %v7266_v51 = vpop.f32.mrb[86].mxu1  ;;  %4791 = vmatpush3.bf16.msra.mxu1 %v4788_v54 }
 0x2b0   : > { %9494 = vst [vmem:[#allocation185_spill] sm:$0xff] %v7266_v51 }
 0x2b1   : > { %v7250_v1 = vpop.f32.mrb[112].mxu0 }
 0x2b2   : > { %9486 = vst [vmem:[#allocation177_spill] sm:$0xff] %v7250_v1  ;;  %v7252_v31 = vpop.f32.mrb[113].mxu0 }
 0x2b3   : > { %9487 = vst [vmem:[#allocation178_spill] sm:$0xff] %v7252_v31  ;;  %v7268_v31 = vpop.f32.mrb[87].mxu1 }
 0x2b4   : > { %9495 = vst [vmem:[#allocation186_spill] sm:$0xff] %v7268_v31 }
 0x2b5   : > { %v7254_v26 = vpop.f32.mrb[114].mxu0 }
 0x2b6   : > { %9488 = vst [vmem:[#allocation179_spill] sm:$0xff] %v7254_v26  ;;  %v7256_v16 = vpop.f32.mrb[115].mxu0  ;;  %v7278_v26 = vpop.f32.mrb[88].mxu1 }
 0x2b7   : > { %9489 = vst [vmem:[#allocation180_spill] sm:$0xff] %v7256_v16  ;;  %9500 = vst [vmem:[#allocation191_spill] sm:$0xff] %v7278_v26 }
 0x2b9   : > { %v7258_v47 = vpop.f32.mrb[116].mxu0 }
 0x2ba   : > { %9490 = vst [vmem:[#allocation181_spill] sm:$0xff] %v7258_v47  ;;  %v7260_v28 = vpop.f32.mrb[117].mxu0 }
 0x2bb   : > { %9491 = vst [vmem:[#allocation182_spill] sm:$0xff] %v7260_v28 }
 0x2bd   : > { %v7262_v43 = vpop.f32.mrb[118].mxu0 }
 0x2be   : > { %9492 = vst [vmem:[#allocation183_spill] sm:$0xff] %v7262_v43  ;;  %v7264_v29 = vpop.f32.mrb[119].mxu0  ;;  %v7280_v43 = vpop.f32.mrb[89].mxu1 }
 0x2bf   : > { %9493 = vst [vmem:[#allocation184_spill] sm:$0xff] %v7264_v29  ;;  %9501 = vst [vmem:[#allocation192_spill] sm:$0xff] %v7280_v43 }
 0x2c1   : > { %v7270_v1 = vpop.f32.mrb[120].mxu0 }
 0x2c2   : > { %9496 = vst [vmem:[#allocation187_spill] sm:$0xff] %v7270_v1  ;;  %v7272_v16 = vpop.f32.mrb[121].mxu0 }
 0x2c3   : > { %9497 = vst [vmem:[#allocation188_spill] sm:$0xff] %v7272_v16 }
 0x2c5   : > { %v7274_v47 = vpop.f32.mrb[122].mxu0 }
 0x2c6   : > { %9498 = vst [vmem:[#allocation189_spill] sm:$0xff] %v7274_v47  ;;  %v7276_v28 = vpop.f32.mrb[123].mxu0  ;;  %v3300_v47 = vld [vmem:[#allocation9 + $0x40] sm:$0xff] }
 0x2c7   : > { %9499 = vst [vmem:[#allocation190_spill] sm:$0xff] %v7276_v28  ;;  %v3301_v28 = vld [vmem:[#allocation9 + $0x48] sm:$0xff] }
 0x2c8   : > { %v4792_v26 = vpack.c.bf16 %v3301_v28, %v3300_v47 }
 0x2c9   : > { %v7282_v53 = vpop.f32.mrb[124].mxu0 }
 0x2ca   : > { %9502 = vst [vmem:[#allocation193_spill] sm:$0xff] %v7282_v53  ;;  %v7284_v20 = vpop.f32.mrb[125].mxu0  ;;  %4793 = vmatprep.subr.bf16.mxu1 %v4792_v26  ;;  %v7302_v53 = vpop.f32.mrb[90].mxu1 }
 0x2cb   : > { %9503 = vst [vmem:[#allocation194_spill] sm:$0xff] %v7284_v20  ;;  %4795 = vmatpush3.bf16.msra.mxu1 %v4792_v26  ;;  %9512 = vst [vmem:[#allocation203_spill] sm:$0xff] %v7302_v53 }
 0x2cd   : > { %v7286_v51 = vpop.f32.mrb[126].mxu0 }
 0x2ce   : > { %9504 = vst [vmem:[#allocation195_spill] sm:$0xff] %v7286_v51  ;;  %v7288_v54 = vpop.f32.mrb[127].mxu0 }
 0x2cf   : > { %9505 = vst [vmem:[#allocation196_spill] sm:$0xff] %v7288_v54 }
 0x2d1   : > { %v7290_v31 = vpop.f32.mrb[128].mxu0 }
 0x2d2   : > { %9506 = vst [vmem:[#allocation197_spill] sm:$0xff] %v7290_v31  ;;  %v7292_v1 = vpop.f32.mrb[129].mxu0  ;;  %v7306_v31 = vpop.f32.mrb[91].mxu1 }
 0x2d3   : > { %9507 = vst [vmem:[#allocation198_spill] sm:$0xff] %v7292_v1  ;;  %9514 = vst [vmem:[#allocation205_spill] sm:$0xff] %v7306_v31 }
 0x2d5   : > { %v7294_v16 = vpop.f32.mrb[130].mxu0 }
 0x2d6   : > { %9508 = vst [vmem:[#allocation199_spill] sm:$0xff] %v7294_v16  ;;  %v7296_v29 = vpop.f32.mrb[131].mxu0 }
 0x2d7   : > { %9509 = vst [vmem:[#allocation200_spill] sm:$0xff] %v7296_v29  ;;  %v7314_v29 = vpop.f32.mrb[92].mxu1 }
 0x2d8   : > { %9518 = vst [vmem:[#allocation209_spill] sm:$0xff] %v7314_v29  ;;  %v7318_v28 = vpop.f32.mrb[93].mxu1 }
 0x2d9   : > { %v7298_v43 = vpop.f32.mrb[132].mxu0  ;;  %9520 = vst [vmem:[#allocation211_spill] sm:$0xff] %v7318_v28 }
 0x2da   : > { %9510 = vst [vmem:[#allocation201_spill] sm:$0xff] %v7298_v43  ;;  %v7300_v20 = vpop.f32.mrb[133].mxu0 }
 0x2db   : > { %9511 = vst [vmem:[#allocation202_spill] sm:$0xff] %v7300_v20 }
 0x2dd   : > { %v7304_v54 = vpop.f32.mrb[134].mxu0 }
 0x2de   : > { %9513 = vst [vmem:[#allocation204_spill] sm:$0xff] %v7304_v54  ;;  %v7308_v1 = vpop.f32.mrb[135].mxu0 }
 0x2df   : > { %9515 = vst [vmem:[#allocation206_spill] sm:$0xff] %v7308_v1  ;;  %v3302_v1 = vld [vmem:[#allocation9 + $0x50] sm:$0xff] }
 0x2e1   : > { %v7310_v16 = vpop.f32.mrb[136].mxu0 }
 0x2e2   : > { %9516 = vst [vmem:[#allocation207_spill] sm:$0xff] %v7310_v16  ;;  %v7312_v51 = vpop.f32.mrb[137].mxu0  ;;  %v3303_v16 = vld [vmem:[#allocation9 + $0x58] sm:$0xff] }
 0x2e3   : > { %9517 = vst [vmem:[#allocation208_spill] sm:$0xff] %v7312_v51  ;;  %v7333_v51 = vld [vmem:[%s9134_s4] ss:$0 sm:$0xff] }
 0x2e5   : > { %v7316_v47 = vpop.f32.mrb[138].mxu0 }
 0x2e6   : > { %9519 = vst [vmem:[#allocation210_spill] sm:$0xff] %v7316_v47  ;;  %v7320_v26 = vpop.f32.mrb[139].mxu0  ;;  %v4796_v47 = vpack.c.bf16 %v3303_v16, %v3302_v1 }
 0x2e7   : > { %9521 = vst [vmem:[#allocation212_spill] sm:$0xff] %v7320_v26 }
 0x2e8   : > { %4797 = vmatprep.subr.bf16.mxu1 %v4796_v47 }
 0x2e9   : > { %v7322_v20 = vpop.f32.mrb[140].mxu0  ;;  %4799 = vmatpush3.bf16.msra.mxu1 %v4796_v47 }
 0x2ea   : > { %9522 = vst [vmem:[#allocation213_spill] sm:$0xff] %v7322_v20  ;;  %v7324_v43 = vpop.f32.mrb[141].mxu0 }
 0x2eb   : > { %9523 = vst [vmem:[#allocation214_spill] sm:$0xff] %v7324_v43 }
 0x2ed   : > { %v7326_v54 = vpop.f32.mrb[142].mxu0 }
 0x2ee   : > { %9524 = vst [vmem:[#allocation215_spill] sm:$0xff] %v7326_v54  ;;  %v7328_v31 = vpop.f32.mrb[143].mxu0 }
 0x2ef   : > { %9525 = vst [vmem:[#allocation216_spill] sm:$0xff] %v7328_v31 }
 0x2f1   : > { %v4378_v29 = vpop.f32.mrb[144].mxu0 }
 0x2f2   : > { %v1763_v26 = vadd.f32 %v4378_v29, %v7333_v51  ;;  %v1757_v28 = vpop.f32.mrb[145].mxu0 }
 0x2f3   : > { %v1758_v43 = vadd.f32 %v7333_v51, %v1757_v28 }
 0x2f4   : > { %v1917_v20 = vsub.f32 %v1763_v26, %v7153_v12  ;;  %v2237_v31 = vsub.f32 %v1763_v26, %v7158_v23  ;;  %v2557_v54 = vsub.f32 %v1763_v26, %v6989_v22  ;;  %v2877_v53 = vsub.f32 %v1763_v26, %v6993_v37 }
 0x2f5   : > { %v1916_v49 = vsub.f32 %v1758_v43, %v7143_v38  ;;  %v2236_v1 = vsub.f32 %v1758_v43, %v7148_v0  ;;  %v2556_v16 = vsub.f32 %v1758_v43, %v6973_v52  ;;  %v2876_v29 = vsub.f32 %v1758_v43, %v6977_v19  ;;  %v4381_v59 = vpop.f32.mrb[146].mxu0  ;;  %v7350_v38 = vpop.f32.mrb[94].mxu1 }
 0x2f6   : > { %v4064_v47 = vmul.f32 -1.442695, %v1917_v20  ;;  %v4096_v41 = vmul.f32 -1.442695, %v2237_v31  ;;  %v4128_v28 = vmul.f32 -1.442695, %v2557_v54  ;;  %v1773_v12 = vadd.f32 %v4381_v59, %v7333_v51 }
 0x2f7   : > { %v4160_v7 = vmul.f32 -1.442695, %v2877_v53  ;;  %v4063_v23 = vmul.f32 -1.442695, %v1916_v49  ;;  %v4095_v22 = vmul.f32 -1.442695, %v2236_v1 }
 0x2f8   : > { %4971 = vpow2.f32 %v4064_v47  ;;  %v1919_v37 = vsub.f32 %v1773_v12, %v7171_v35  ;;  %v1767_v26 = vpop.f32.mrb[147].mxu0  ;;  %v2239_v0 = vsub.f32 %v1773_v12, %v7174_v24  ;;  %v2559_v52 = vsub.f32 %v1773_v12, %v7021_v61  ;;  %9526 = vst [vmem:[#allocation217_spill] sm:$0xff] %v7350_v38  ;;  %v7358_v53 = vpop.f32.mrb[95].mxu1  ;;  %v9652_v38 = vld [vmem:[#allocation193_spill] sm:$0xff] }
 0x2f9   : > { %4973 = vpow2.f32 %v4096_v41  ;;  %v2879_v43 = vsub.f32 %v1773_v12, %v7025_v34  ;;  %v4384_v19 = vpop.f32.mrb[148].mxu0  ;;  %v4127_v31 = vmul.f32 -1.442695, %v2556_v16  ;;  %v7353_v59 = vadd.f32 %v7333_v51, %v1767_v26  ;;  %9527 = vst [vmem:[#allocation218_spill] sm:$0xff] %v7358_v53  ;;  %v9568_v53 = vld [vmem:[#allocation161_spill] sm:$0xff] }
 0x2fa   : > { %4975 = vpow2.f32 %v4128_v28  ;;  %v7356_v49 = vadd.f32 %v4384_v19, %v7333_v51  ;;  %v1777_v35 = vpop.f32.mrb[149].mxu0  ;;  %v4159_v24 = vmul.f32 -1.442695, %v2876_v29  ;;  %v4066_v41 = vmul.f32 -1.442695, %v1919_v37 }
 0x2fb   : > { %4977 = vpow2.f32 %v4160_v7  ;;  %v4098_v61 = vmul.f32 -1.442695, %v2239_v0  ;;  %v1918_v34 = vsub.f32 %v7353_v59, %v7163_v33  ;;  %v2238_v20 = vsub.f32 %v7353_v59, %v7168_v58 }
 0x2fc   : > { %4979 = vpow2.f32 %v4063_v23  ;;  %v2558_v54 = vsub.f32 %v7353_v59, %v7005_v30  ;;  %v2878_v1 = vsub.f32 %v7353_v59, %v7009_v5  ;;  %v4130_v47 = vmul.f32 -1.442695, %v2559_v52  ;;  %v7439_v30 = vpop.f32.mrb[96].mxu1 }
 0x2fd   : > { %4981 = vpow2.f32 %v4095_v22  ;;  %v4387_v29 = vpop.f32.mrb[150].mxu0  ;;  %v4162_v33 = vmul.f32 -1.442695, %v2879_v43  ;;  %v4065_v28 = vmul.f32 -1.442695, %v1918_v34  ;;  %v7377_v22 = vadd.f32 %v7333_v51, %v1777_v35  ;;  %9529 = vst [vmem:[#allocation219_spill] sm:$0xff] %v7439_v30 }
 0x2fe   : > { %4983 = vpow2.f32 %v4127_v31  ;;  %v1787_v37 = vpop.f32.mrb[151].mxu0  ;;  %v7384_v43 = vadd.f32 %v4387_v29, %v7333_v51 }
 0x2ff   : > { %4985 = vpow2.f32 %v4159_v24  ;;  %v7397_v35 = vadd.f32 %v7333_v51, %v1787_v37 }
 0x300   : > { %4987 = vpow2.f32 %v4066_v41 }
 0x301   : > { %4989 = vpow2.f32 %v4098_v61  ;;  %v7379_v26 = vpop.f32.mrb[152].mxu0 }
 0x302   : > { %v4972_v0 = vpop.eup %4971  ;;  %4991 = vpow2.f32 %v4130_v47  ;;  %v7386_v19 = vpop.f32.mrb[153].mxu0 }
 0x303   : > { %v4974_v31 = vpop.eup %4973  ;;  %v2045_v24 = vadd.f32 1.0, %v4972_v0  ;;  %4993 = vpow2.f32 %v4162_v33  ;;  %v7445_v59 = vadd.f32 %v7333_v51, %v7386_v19 }
 0x304   : > { %v4976_v61 = vpop.eup %4975  ;;  %v2365_v34 = vadd.f32 1.0, %v4974_v31  ;;  %4995 = vpow2.f32 %v4065_v28 }
 0x305   : > { %v4978_v52 = vpop.eup %4977  ;;  %4997 = vrcp.f32 %v2045_v24  ;;  %v2685_v29 = vadd.f32 1.0, %v4976_v61  ;;  %v4393_v23 = vpop.f32.mrb[154].mxu0 }
 0x306   : > { %v4980_v12 = vpop.eup %4979  ;;  %4999 = vrcp.f32 %v2365_v34  ;;  %v3005_v0 = vadd.f32 1.0, %v4978_v52  ;;  %v7399_v41 = vpop.f32.mrb[155].mxu0 }
 0x307   : > { %v4982_v31 = vpop.eup %4981  ;;  %5001 = vrcp.f32 %v2685_v29  ;;  %v2044_v28 = vadd.f32 1.0, %v4980_v12 }
 0x308   : > { %v4984_v61 = vpop.eup %4983  ;;  %5003 = vrcp.f32 %v3005_v0  ;;  %v2364_v52 = vadd.f32 1.0, %v4982_v31  ;;  %v9536_v31 = vsub.f32 %v7356_v49, %v7053_v10 }
 0x309   : > { %v4986_v33 = vpop.eup %4985  ;;  %5005 = vrcp.f32 %v2044_v28  ;;  %v2684_v37 = vadd.f32 1.0, %v4984_v61  ;;  %v7407_v16 = vpop.f32.mrb[156].mxu0  ;;  %v4161_v28 = vmul.f32 -1.442695, %v2878_v1  ;;  %v7448_v1 = vadd.f32 %v4393_v23, %v7333_v51 }
 0x30a   : > { %v4988_v7 = vpop.eup %4987  ;;  %5007 = vrcp.f32 %v2364_v52  ;;  %v3004_v12 = vadd.f32 1.0, %v4986_v33  ;;  %v7411_v47 = vpop.f32.mrb[157].mxu0  ;;  %v4097_v33 = vmul.f32 -1.442695, %v2238_v20  ;;  %v9528_v20 = vsub.f32 %v7356_v49, %v7183_v44 }
 0x30b   : > { %v4990_v24 = vpop.eup %4989  ;;  %5009 = vrcp.f32 %v2684_v37  ;;  %v2047_v0 = vadd.f32 1.0, %v4988_v7  ;;  %v4129_v7 = vmul.f32 -1.442695, %v2558_v54  ;;  %v7450_v44 = vpop.f32.mrb[97].mxu1 }
 0x30c   : > { %v4992_v61 = vpop.eup %4991  ;;  %5011 = vrcp.f32 %v3004_v12  ;;  %v2367_v34 = vadd.f32 1.0, %v4990_v24  ;;  %v4068_v52 = vmul.f32 -1.442695, %v9528_v20  ;;  %9531 = vst [vmem:[#allocation221_spill] sm:$0xff] %v7450_v44 }
 0x30d   : > { %v4994_v29 = vpop.eup %4993  ;;  %5013 = vrcp.f32 %v2047_v0  ;;  %v2687_v37 = vadd.f32 1.0, %v4992_v61  ;;  %v7428_v12 = vpop.f32.mrb[158].mxu0  ;;  %v7435_v0 = vadd.f32 %v7379_v26, %v7333_v51 }
 0x30e   : > { %v4996_v24 = vpop.eup %4995  ;;  %5015 = vrcp.f32 %v2367_v34  ;;  %v3007_v58 = vadd.f32 1.0, %v4994_v29  ;;  %v7437_v61 = vpop.f32.mrb[159].mxu0 }
 0x30f   : > { %v7441_v54 = vpop.eup %4997  ;;  %5017 = vrcp.f32 %v2687_v37  ;;  %v2046_v5 = vadd.f32 1.0, %v4996_v24  ;;  %v9535_v37 = vsub.f32 %v7356_v49, %v7186_v8 }
 0x310   : > { %9530 = vst [vmem:[#allocation220_spill] sm:$0xff] %v7441_v54  ;;  %v7452_v34 = vpop.eup %4999  ;;  %5019 = vrcp.f32 %v3007_v58  ;;  %v9538_v58 = vsub.f32 %v7356_v49, %v7057_v25 }
 0x311   : > { %9532 = vst [vmem:[#allocation222_spill] sm:$0xff] %v7452_v34  ;;  %v7460_v24 = vpop.eup %5001  ;;  %v2525_v23 = vadd.f32 %v7452_v34, %v7441_v54  ;;  %5021 = vrcp.f32 %v2046_v5  ;;  %v7468_v20 = vpop.f32.mrb[160].mxu0  ;;  %v4100_v29 = vmul.f32 -1.442695, %v9535_v37  ;;  %v4132_v34 = vmul.f32 -1.442695, %v9536_v31 }
 0x312   : > { %9533 = vst [vmem:[#allocation223_spill] sm:$0xff] %v7460_v24  ;;  %v7470_v26 = vpop.eup %5003  ;;  %5023 = vpow2.f32 %v4097_v33  ;;  %v4164_v54 = vmul.f32 -1.442695, %v9538_v58  ;;  %v9539_v33 = vsub.f32 %v7377_v22, %v7177_v63  ;;  %v7487_v30 = vpop.f32.mrb[161].mxu0  ;;  %v9544_v58 = vsub.f32 %v7377_v22, %v7180_v50 }
 0x313   : > { %9534 = vst [vmem:[#allocation224_spill] sm:$0xff] %v7470_v26  ;;  %v7478_v5 = vpop.eup %5005  ;;  %v2845_v19 = vadd.f32 %v7460_v24, %v2525_v23  ;;  %5025 = vpow2.f32 %v4129_v7  ;;  %v9547_v63 = vsub.f32 %v7377_v22, %v7041_v57  ;;  %v7537_v57 = vadd.f32 %v7407_v16, %v7333_v51  ;;  %v9557_v16 = vld [vmem:[#allocation170_spill] sm:$0xff] }
 0x314   : > { %9537 = vst [vmem:[#allocation225_spill] sm:$0xff] %v7478_v5  ;;  %v4067_v44 = vmul.f32 -1.442695, %v9539_v33  ;;  %v7489_v8 = vpop.eup %5007  ;;  %5027 = vpow2.f32 %v4161_v28  ;;  %v4099_v33 = vmul.f32 -1.442695, %v9544_v58  ;;  %v9552_v58 = vsub.f32 %v7384_v43, %v7195_v40 }
 0x315   : > { %9540 = vst [vmem:[#allocation226_spill] sm:$0xff] %v7489_v8  ;;  %v7497_v25 = vpop.eup %5009  ;;  %v7500_v49 = vadd.f32 %v7470_v26, %v2845_v19  ;;  %5029 = vpow2.f32 %v4068_v52  ;;  %v7506_v37 = vpop.f32.mrb[162].mxu0  ;;  %v9546_v52 = vsub.f32 %v7377_v22, %v7037_v15  ;;  %v4163_v28 = vmul.f32 -1.442695, %v9547_v63 }
 0x316   : > { %9541 = vst [vmem:[#allocation227_spill] sm:$0xff] %v7497_v25  ;;  %v7508_v23 = vpop.eup %5011  ;;  %5031 = vpow2.f32 %v4100_v29  ;;  %v7523_v10 = vpop.f32.mrb[163].mxu0  ;;  %v7533_v15 = vadd.f32 %v7333_v51, %v7399_v41  ;;  %v9554_v41 = vsub.f32 %v7384_v43, %v7200_v56  ;;  %v7577_v56 = vadd.f32 %v7428_v12, %v7333_v51 }
 0x317   : > { %9542 = vst [vmem:[#allocation228_spill] sm:$0xff] %v7500_v49  ;;  %9543 = vst [vmem:[#allocation229_spill] sm:$0xff] %v7508_v23  ;;  %v7513_v7 = vpop.eup %5013  ;;  %5033 = vpow2.f32 %v4132_v34  ;;  %v4131_v19 = vmul.f32 -1.442695, %v9546_v52  ;;  %v7525_v29 = vpop.f32.mrb[98].mxu1  ;;  %v7571_v49 = vadd.f32 %v7333_v51, %v7411_v47  ;;  %v9559_v47 = vld [vmem:[#allocation158_spill] sm:$0xff]  ;;  %v9566_v24 = vsub.f32 %v7384_v43, %v7082_v18 }
 0x318   : > { %9545 = vst [vmem:[#allocation230_spill] sm:$0xff] %v7513_v7  ;;  %9548 = vst [vmem:[#allocation231_spill] sm:$0xff] %v7525_v29  ;;  %v7527_v50 = vpop.eup %5015  ;;  %5035 = vpow2.f32 %v4164_v54  ;;  %v7539_v22 = vpop.f32.mrb[99].mxu1  ;;  %v4070_v54 = vmul.f32 -1.442695, %v9552_v58  ;;  %v9556_v58 = vld [vmem:[#allocation169_spill] sm:$0xff]  ;;  %v7607_v18 = vadd.f32 %v7333_v51, %v7437_v61 }
 0x319   : > { %9549 = vst [vmem:[#allocation232_spill] sm:$0xff] %v7527_v50  ;;  %9550 = vst [vmem:[#allocation233_spill] sm:$0xff] %v7539_v22  ;;  %v7541_v63 = vpop.eup %5017  ;;  %5037 = vpow2.f32 %v4067_v44  ;;  %v7546_v52 = vpop.f32.mrb[164].mxu0  ;;  %v4102_v31 = vmul.f32 -1.442695, %v9554_v41  ;;  %v9560_v23 = vld [vmem:[#allocation167_spill] sm:$0xff] }
 0x31a   : > { %9551 = vst [vmem:[#allocation234_spill] sm:$0xff] %v7541_v63  ;;  %v7548_v34 = vpop.eup %5019  ;;  %5039 = vpow2.f32 %v4099_v33  ;;  %v7557_v44 = vpop.f32.mrb[165].mxu0  ;;  %v4134_v22 = vmul.f32 -1.442695, %v9566_v24 }
 0x31b   : > { %9553 = vst [vmem:[#allocation235_spill] sm:$0xff] %v7548_v34  ;;  %v7559_v63 = vpop.eup %5021  ;;  %5041 = vpow2.f32 %v4131_v19  ;;  %v9558_v34 = vld [vmem:[#allocation157_spill] sm:$0xff] }
 0x31c   : > { %9555 = vst [vmem:[#allocation236_spill] sm:$0xff] %v7559_v63  ;;  %v5024_v41 = vpop.eup %5023  ;;  %5043 = vpow2.f32 %v4163_v28 }
 0x31d   : > { %v5026_v50 = vpop.eup %5025  ;;  %v2366_v19 = vadd.f32 1.0, %v5024_v41  ;;  %5045 = vpow2.f32 %v4070_v54  ;;  %v7573_v7 = vpop.f32.mrb[166].mxu0 }
 0x31e   : > { %v5028_v40 = vpop.eup %5027  ;;  %v2686_v63 = vadd.f32 1.0, %v5026_v50  ;;  %5047 = vpow2.f32 %v4102_v31  ;;  %v9561_v31 = vld [vmem:[#allocation168_spill] sm:$0xff] }
 0x31f   : > { %v5030_v28 = vpop.eup %5029  ;;  %5049 = vrcp.f32 %v2366_v19  ;;  %v3006_v33 = vadd.f32 1.0, %v5028_v40 }
 0x320   : > { %v5032_v41 = vpop.eup %5031  ;;  %5051 = vrcp.f32 %v2686_v63  ;;  %v2049_v54 = vadd.f32 1.0, %v5030_v28  ;;  %v9563_v63 = vld [vmem:[#allocation155_spill] sm:$0xff] }
 0x321   : > { %v5034_v12 = vpop.eup %5033  ;;  %5053 = vrcp.f32 %v3006_v33  ;;  %v2369_v8 = vadd.f32 1.0, %v5032_v41  ;;  %v7639_v33 = vpop.f32.mrb[100].mxu1 }
 0x322   : > { %v5036_v19 = vpop.eup %5035  ;;  %5055 = vrcp.f32 %v2049_v54  ;;  %v2689_v40 = vadd.f32 1.0, %v5034_v12  ;;  %9581 = vst [vmem:[#allocation158_spill] sm:$0xff] %v7639_v33 }
 0x323   : > { %v5038_v5 = vpop.eup %5037  ;;  %5057 = vrcp.f32 %v2369_v8  ;;  %v3009_v26 = vadd.f32 1.0, %v5036_v19 }
 0x324   : > { %v5040_v29 = vpop.eup %5039  ;;  %5059 = vrcp.f32 %v2689_v40  ;;  %v2048_v50 = vadd.f32 1.0, %v5038_v5  ;;  %v9567_v40 = vsub.f32 %v7384_v43, %v7086_v11  ;;  %v7611_v11 = vadd.f32 %v7468_v20, %v7333_v51  ;;  %v7613_v43 = vpop.f32.mrb[167].mxu0 }
 0x325   : > { %v5042_v54 = vpop.eup %5041  ;;  %5061 = vrcp.f32 %v3009_v26  ;;  %v2368_v12 = vadd.f32 1.0, %v5040_v29  ;;  %v9575_v26 = vld [vmem:[#allocation172_spill] sm:$0xff] }
 0x326   : > { %v5044_v8 = vpop.eup %5043  ;;  %5063 = vrcp.f32 %v2048_v50  ;;  %v2688_v19 = vadd.f32 1.0, %v5042_v54  ;;  %v4166_v5 = vmul.f32 -1.442695, %v9567_v40  ;;  %v9574_v40 = vld [vmem:[#allocation171_spill] sm:$0xff] }
 0x327   : > { %v5046_v28 = vpop.eup %5045  ;;  %5065 = vrcp.f32 %v2368_v12  ;;  %v3008_v25 = vadd.f32 1.0, %v5044_v8  ;;  %v9571_v12 = vsub.f32 %v7397_v35, %v7189_v48  ;;  %v9578_v48 = vld [vmem:[#allocation160_spill] sm:$0xff] }
 0x328   : > { %v5048_v29 = vpop.eup %5047  ;;  %5067 = vrcp.f32 %v2688_v19  ;;  %v2051_v50 = vadd.f32 1.0, %v5046_v28  ;;  %v9572_v28 = vsub.f32 %v7397_v35, %v7192_v36  ;;  %v9579_v36 = vld [vmem:[#allocation179_spill] sm:$0xff] }
 0x329   : > { %v7615_v24 = vpop.eup %5049  ;;  %5069 = vrcp.f32 %v3008_v25  ;;  %v2371_v54 = vadd.f32 1.0, %v5048_v29  ;;  %v4069_v8 = vmul.f32 -1.442695, %v9571_v12  ;;  %v9583_v25 = vsub.f32 %v7397_v35, %v7069_v2  ;;  %v9589_v2 = vld [vmem:[#allocation165_spill] sm:$0xff] }
 0x32a   : > { %9570 = vst [vmem:[#allocation169_spill] sm:$0xff] %v7615_v24  ;;  %v4101_v19 = vmul.f32 -1.442695, %v9572_v28  ;;  %v7623_v61 = vpop.eup %5051  ;;  %5071 = vrcp.f32 %v2051_v50  ;;  %v9585_v28 = vsub.f32 %v7397_v35, %v7073_v39  ;;  %v9586_v50 = vsub.f32 %v7435_v0, %v7211_v62  ;;  %v7667_v35 = vpop.f32.mrb[101].mxu1 }
 0x32b   : > { %9573 = vst [vmem:[#allocation170_spill] sm:$0xff] %v7623_v61  ;;  %v7631_v29 = vpop.eup %5053  ;;  %5073 = vrcp.f32 %v2371_v54  ;;  %v4133_v41 = vmul.f32 -1.442695, %v9583_v25  ;;  %v3305_v54 = vld [vmem:[#allocation9 + $0x68] sm:$0xff]  ;;  %v7665_v39 = vadd.f32 %v7333_v51, %v7487_v30  ;;  %9591 = vst [vmem:[#allocation161_spill] sm:$0xff] %v7667_v35  ;;  %v7669_v62 = vpop.f32.mrb[168].mxu0  ;;  %v9595_v30 = vsub.f32 %v7435_v0, %v7105_v9 }
 0x32c   : > { %9577 = vst [vmem:[#allocation157_spill] sm:$0xff] %v7631_v29  ;;  %v7641_v20 = vpop.eup %5055  ;;  %5075 = vpow2.f32 %v4134_v22  ;;  %v3304_v29 = vld [vmem:[#allocation9 + $0x60] sm:$0xff]  ;;  %v4165_v12 = vmul.f32 -1.442695, %v9585_v28  ;;  %v4072_v33 = vmul.f32 -1.442695, %v9586_v50  ;;  %v9587_v22 = vsub.f32 %v7435_v0, %v7216_v13 }
 0x32d   : > { %9582 = vst [vmem:[#allocation167_spill] sm:$0xff] %v7641_v20  ;;  %v7646_v24 = vpop.eup %5057  ;;  %5077 = vpow2.f32 %v4166_v5  ;;  %v9593_v13 = vsub.f32 %v7435_v0, %v7101_v32  ;;  %v7678_v50 = vadd.f32 %v7506_v37, %v7333_v51  ;;  %v4168_v25 = vmul.f32 -1.442695, %v9595_v30  ;;  %v7691_v32 = vpop.f32.mrb[169].mxu0  ;;  %v9599_v37 = vld [vmem:[#allocation178_spill] sm:$0xff]  ;;  %v9601_v9 = vld [vmem:[#allocation164_spill] sm:$0xff] }
 0x32e   : > { %9584 = vst [vmem:[#allocation168_spill] sm:$0xff] %v7646_v24  ;;  %v4104_v20 = vmul.f32 -1.442695, %v9587_v22  ;;  %v7657_v61 = vpop.eup %5059  ;;  %5079 = vpow2.f32 %v4069_v8  ;;  %v9590_v24 = vld [vmem:[#allocation166_spill] sm:$0xff]  ;;  %v4800_v22 = vpack.c.bf16 %v3305_v54, %v3304_v29  ;;  %v9607_v0 = vsub.f32 %v7445_v59, %v7208_v27  ;;  %v7748_v27 = vpop.f32.mrb[170].mxu0 }
 0x32f   : > { %9588 = vst [vmem:[#allocation155_spill] sm:$0xff] %v7657_v61  ;;  %v7671_v28 = vpop.eup %5061  ;;  %5081 = vpow2.f32 %v4101_v19  ;;  %v4136_v8 = vmul.f32 -1.442695, %v9593_v13  ;;  %v9596_v61 = vld [vmem:[#allocation177_spill] sm:$0xff]  ;;  %v7689_v19 = vadd.f32 %v7333_v51, %v7523_v10  ;;  %v9603_v10 = vsub.f32 %v7445_v59, %v7205_v45 }
 0x330   : > { %9592 = vst [vmem:[#allocation171_spill] sm:$0xff] %v7671_v28  ;;  %v7680_v5 = vpop.eup %5063  ;;  %5083 = vpow2.f32 %v4133_v41  ;;  %v9600_v41 = vld [vmem:[#allocation163_spill] sm:$0xff]  ;;  %4801 = vmatprep.subr.bf16.mxu1 %v4800_v22  ;;  %v4103_v54 = vmul.f32 -1.442695, %v9607_v0  ;;  %v9609_v45 = vsub.f32 %v7445_v59, %v7091_v6 }
 0x331   : > { %9594 = vst [vmem:[#allocation172_spill] sm:$0xff] %v7680_v5  ;;  %9597 = vst [vmem:[#allocation160_spill] sm:$0xff] %v7689_v19  ;;  %v7693_v13 = vpop.eup %5065  ;;  %5085 = vpow2.f32 %v4165_v12  ;;  %v4071_v28 = vmul.f32 -1.442695, %v9603_v10  ;;  %v9604_v5 = vld [vmem:[#allocation183_spill] sm:$0xff]  ;;  %4803 = vmatpush3.bf16.msra.mxu1 %v4800_v22  ;;  %v9610_v10 = vsub.f32 %v7445_v59, %v7095_v55 }
 0x332   : > { %9598 = vst [vmem:[#allocation179_spill] sm:$0xff] %v7693_v13  ;;  %v7701_v30 = vpop.eup %5067  ;;  %5087 = vpow2.f32 %v4072_v33  ;;  %v4135_v33 = vmul.f32 -1.442695, %v9609_v45 }
 0x333   : > { %9602 = vst [vmem:[#allocation165_spill] sm:$0xff] %v7701_v30  ;;  %v7710_v35 = vpop.eup %5069  ;;  %5089 = vpow2.f32 %v4104_v20  ;;  %v7723_v12 = vmul.f32 -1.442695, %v9610_v10  ;;  %v7727_v20 = vpop.f32.mrb[102].mxu1  ;;  %v9618_v10 = vsub.f32 %v7448_v1, %v7226_v46  ;;  %v9622_v46 = vsub.f32 %v7448_v1, %v7121_v4 }
 0x334   : > { %9606 = vst [vmem:[#allocation166_spill] sm:$0xff] %v7710_v35  ;;  %v7715_v30 = vpop.eup %5071  ;;  %5091 = vpow2.f32 %v4136_v8  ;;  %9612 = vst [vmem:[#allocation178_spill] sm:$0xff] %v7727_v20  ;;  %v7737_v55 = vpop.f32.mrb[103].mxu1  ;;  %v9623_v8 = vsub.f32 %v7448_v1, %v7125_v14  ;;  %v9625_v4 = vsub.f32 %v7533_v15, %v7224_v21 }
 0x335   : > { %9608 = vst [vmem:[#allocation177_spill] sm:$0xff] %v7715_v30  ;;  %v7729_v35 = vpop.eup %5073  ;;  %5093 = vpow2.f32 %v4168_v25  ;;  %9617 = vst [vmem:[#allocation164_spill] sm:$0xff] %v7737_v55  ;;  %v7742_v29 = vmul.f32 -1.442695, %v9618_v10  ;;  %v9621_v30 = vsub.f32 %v7448_v1, %v7228_v17  ;;  %v7758_v10 = vmul.f32 -1.442695, %v9622_v46 }
 0x336   : > { %9613 = vst [vmem:[#allocation163_spill] sm:$0xff] %v7729_v35  ;;  %v5076_v59 = vpop.eup %5075  ;;  %5095 = vpow2.f32 %v4071_v28  ;;  %v7763_v22 = vmul.f32 -1.442695, %v9623_v8  ;;  %v7773_v46 = vmul.f32 -1.442695, %v9625_v4  ;;  %v9632_v4 = vsub.f32 %v7537_v57, %v9556_v58 }
 0x337   : > { %v5078_v6 = vpop.eup %5077  ;;  %v2691_v0 = vadd.f32 1.0, %v5076_v59  ;;  %5097 = vpow2.f32 %v4103_v54  ;;  %v7753_v28 = vmul.f32 -1.442695, %v9621_v30  ;;  %v9624_v54 = vsub.f32 %v7533_v15, %v7221_v42 }
 0x338   : > { %v5080_v45 = vpop.eup %5079  ;;  %v3011_v25 = vadd.f32 1.0, %v5078_v6  ;;  %5099 = vpow2.f32 %v4135_v33  ;;  %v7777_v33 = vadd.f32 %v7546_v52, %v7333_v51  ;;  %v9626_v42 = vsub.f32 %v7533_v15, %v7111_v60 }
 0x339   : > { %v7768_v59 = vmul.f32 -1.442695, %v9624_v54  ;;  %v5082_v17 = vpop.eup %5081  ;;  %5101 = vrcp.f32 %v2691_v0  ;;  %v2050_v30 = vadd.f32 1.0, %v5080_v45  ;;  %v7786_v0 = vadd.f32 %v7333_v51, %v7557_v44  ;;  %v9627_v45 = vld [vmem:[#allocation189_spill] sm:$0xff] }
 0x33a   : > { %v5084_v14 = vpop.eup %5083  ;;  %5103 = vrcp.f32 %v3011_v25  ;;  %v2370_v1 = vadd.f32 1.0, %v5082_v17  ;;  %v7782_v8 = vmul.f32 -1.442695, %v9626_v42  ;;  %v7804_v54 = vmul.f32 -1.442695, %v9632_v4  ;;  %v9635_v4 = vld [vmem:[#allocation188_spill] sm:$0xff] }
 0x33b   : > { %v5086_v6 = vpop.eup %5085  ;;  %5105 = vrcp.f32 %v2050_v30  ;;  %v2690_v21 = vadd.f32 1.0, %v5084_v14  ;;  %v9631_v30 = vsub.f32 %v7533_v15, %v7115_v3  ;;  %v9633_v60 = vsub.f32 %v7537_v57, %v9557_v16 }
 0x33c   : > { %v5088_v25 = vpop.eup %5087  ;;  %5107 = vrcp.f32 %v2370_v1  ;;  %v3010_v17 = vadd.f32 1.0, %v5086_v6  ;;  %v9640_v16 = vsub.f32 %v7571_v49, %v9560_v23 }
 0x33d   : > { %v5090_v44 = vpop.eup %5089  ;;  %5109 = vrcp.f32 %v2690_v21  ;;  %v2053_v13 = vadd.f32 1.0, %v5088_v25  ;;  %v7799_v14 = vmul.f32 -1.442695, %v9631_v30  ;;  %v7809_v19 = vmul.f32 -1.442695, %v9633_v60  ;;  %v9634_v25 = vld [vmem:[#allocation187_spill] sm:$0xff] }
 0x33e   : > { %v5092_v1 = vpop.eup %5091  ;;  %5111 = vrcp.f32 %v3010_v17  ;;  %v2373_v6 = vadd.f32 1.0, %v5090_v44  ;;  %v7813_v21 = vadd.f32 %v7573_v7, %v7333_v51  ;;  %v9639_v30 = vsub.f32 %v7537_v57, %v9559_v47 }
 0x33f   : > { %v5094_v3 = vpop.eup %5093  ;;  %5113 = vrcp.f32 %v2053_v13  ;;  %v2693_v15 = vadd.f32 1.0, %v5092_v1  ;;  %v9638_v13 = vsub.f32 %v7537_v57, %v9558_v34  ;;  %v7836_v35 = vmul.f32 -1.442695, %v9640_v16  ;;  %v9643_v57 = vld [vmem:[#allocation196_spill] sm:$0xff] }
 0x340   : > { %v5096_v17 = vpop.eup %5095  ;;  %5115 = vrcp.f32 %v2373_v6  ;;  %v3013_v44 = vadd.f32 1.0, %v5094_v3  ;;  %v7831_v58 = vmul.f32 -1.442695, %v9639_v30 }
 0x341   : > { %v5098_v7 = vpop.eup %5097  ;;  %5117 = vrcp.f32 %v2693_v15  ;;  %v2052_v52 = vadd.f32 1.0, %v5096_v17  ;;  %v7826_v1 = vmul.f32 -1.442695, %v9638_v13  ;;  %v3306_v15 = vld [vmem:[#allocation9 + $0x70] sm:$0xff]  ;;  %v3307_v17 = vld [vmem:[#allocation9 + $0x78] sm:$0xff]  ;;  %v9642_v13 = vld [vmem:[#allocation195_spill] sm:$0xff] }
 0x342   : > { %v5100_v6 = vpop.eup %5099  ;;  %5119 = vrcp.f32 %v3013_v44  ;;  %v2372_v3 = vadd.f32 1.0, %v5098_v7  ;;  %v7852_v7 = vadd.f32 %v7333_v51, %v7613_v43  ;;  %v4804_v23 = vpack.c.bf16 %v3307_v17, %v3306_v15  ;;  %v9654_v15 = vld [vmem:[#allocation194_spill] sm:$0xff] }
 0x343   : > { %v7838_v60 = vpop.eup %5101  ;;  %5121 = vrcp.f32 %v2052_v52  ;;  %v2692_v34 = vadd.f32 1.0, %v5100_v6  ;;  %v9646_v6 = vsub.f32 %v7571_v49, %v9561_v31  ;;  %v9649_v43 = vsub.f32 %v7571_v49, %v9563_v63  ;;  %v9650_v31 = vld [vmem:[#allocation175_spill] sm:$0xff] }
 0x344   : > { %9641 = vst [vmem:[#allocation183_spill] sm:$0xff] %v7838_v60  ;;  %v7844_v30 = vpop.eup %5103  ;;  %5123 = vrcp.f32 %v2372_v3  ;;  %v9647_v3 = vld [vmem:[#allocation153_spill] sm:$0xff]  ;;  %v1887_v60 = vpop.f32.mrb[171].mxu0  ;;  %4805 = vmatprep.subr.bf16.mxu1 %v4804_v23 }
 0x345   : > { %9644 = vst [vmem:[#allocation189_spill] sm:$0xff] %v7844_v30  ;;  %v7854_v52 = vpop.eup %5105  ;;  %5125 = vrcp.f32 %v2692_v34  ;;  %v7859_v47 = vmul.f32 -1.442695, %v9646_v6  ;;  %v9648_v42 = vsub.f32 %v7571_v49, %v9647_v3  ;;  %v7872_v34 = vmul.f32 -1.442695, %v9649_v43  ;;  %4807 = vmatpush3.bf16.msra.mxu1 %v4804_v23 }
 0x346   : > { %v7866_v16 = vpop.eup %5107  ;;  %5127 = vpow2.f32 %v7723_v12  ;;  %v9651_v6 = vsub.f32 %v7577_v56, %v9650_v31  ;;  %v7904_v49 = vadd.f32 %v7333_v51, %v7691_v32 }
 0x347   : > { %v7864_v30 = vmul.f32 -1.442695, %v9648_v42  ;;  %v7881_v3 = vpop.eup %5109  ;;  %5129 = vpow2.f32 %v7742_v29  ;;  %v7900_v29 = vadd.f32 %v7669_v62, %v7333_v51  ;;  %v9665_v62 = vsub.f32 %v7607_v18, %v9574_v40  ;;  %v9723_v40 = vld [vmem:[#allocation29_spill] sm:$0xff] }
 0x348   : > { %v7877_v44 = vmul.f32 -1.442695, %v9651_v6  ;;  %9653 = vst [vmem:[#allocation187_spill] sm:$0xff] %v7881_v3  ;;  %v7890_v31 = vpop.eup %5111  ;;  %5131 = vpow2.f32 %v7753_v28  ;;  %v9658_v6 = vld [vmem:[#allocation176_spill] sm:$0xff]  ;;  %9660 = vst [vmem:[#allocation195_spill] sm:$0xff] %v7904_v49  ;;  %v9662_v28 = vsub.f32 %v7577_v56, %v9568_v53 }
 0x349   : > { %9657 = vst [vmem:[#allocation188_spill] sm:$0xff] %v7890_v31  ;;  %v9659_v42 = vsub.f32 %v7577_v56, %v9658_v6  ;;  %v7906_v43 = vpop.eup %5113  ;;  %5133 = vpow2.f32 %v7758_v10  ;;  %v7922_v31 = vmul.f32 -1.442695, %v9665_v62  ;;  %v9667_v10 = vld [vmem:[#allocation199_spill] sm:$0xff]  ;;  %v9668_v53 = vld [vmem:[#allocation200_spill] sm:$0xff] }
 0x34a   : > { %9661 = vst [vmem:[#allocation196_spill] sm:$0xff] %v7906_v43  ;;  %v7912_v12 = vmul.f32 -1.442695, %v9662_v28  ;;  %v7924_v32 = vpop.eup %5115  ;;  %5135 = vpow2.f32 %v7763_v22  ;;  %v9691_v22 = vld [vmem:[#allocation225_spill] sm:$0xff] }
 0x34b   : > { %v7896_v3 = vmul.f32 -1.442695, %v9659_v42  ;;  %v9663_v42 = vld [vmem:[#allocation162_spill] sm:$0xff]  ;;  %9666 = vst [vmem:[#allocation153_spill] sm:$0xff] %v7924_v32  ;;  %5137 = vpow2.f32 %v7768_v59  ;;  %v9676_v59 = vld [vmem:[#allocation159_spill] sm:$0xff]  ;;  %v9678_v32 = vsub.f32 %v7607_v18, %v9578_v48 }
 0x34c   : > { %v9664_v23 = vsub.f32 %v7577_v56, %v9663_v42  ;;  %v7933_v42 = vpop.eup %5117  ;;  %5139 = vpow2.f32 %v7773_v46  ;;  %v9675_v56 = vsub.f32 %v7607_v18, %v9575_v26  ;;  %v9680_v46 = vsub.f32 %v7611_v11, %v9579_v36 }
 0x34d   : > { %9670 = vst [vmem:[#allocation175_spill] sm:$0xff] %v7933_v42  ;;  %v7942_v43 = vpop.eup %5119  ;;  %v9677_v42 = vsub.f32 %v7607_v18, %v9676_v59  ;;  %5141 = vpow2.f32 %v7782_v8  ;;  %v9693_v8 = vld [vmem:[#allocation226_spill] sm:$0xff] }
 0x34e   : > { %v7917_v6 = vmul.f32 -1.442695, %v9664_v23  ;;  %9674 = vst [vmem:[#allocation193_spill] sm:$0xff] %v7942_v43  ;;  %v7948_v28 = vmul.f32 -1.442695, %v9675_v56  ;;  %v7960_v17 = vpop.eup %5121  ;;  %v9681_v56 = vld [vmem:[#allocation180_spill] sm:$0xff]  ;;  %5143 = vpow2.f32 %v7799_v14 }
 0x34f   : > { %v7953_v63 = vmul.f32 -1.442695, %v9677_v42  ;;  %v7958_v23 = vmul.f32 -1.442695, %v9678_v32  ;;  %9679 = vst [vmem:[#allocation194_spill] sm:$0xff] %v7960_v17  ;;  %v9682_v43 = vsub.f32 %v7611_v11, %v9681_v56  ;;  %v9683_v42 = vsub.f32 %v7611_v11, %v9589_v2  ;;  %v7978_v48 = vpop.eup %5123  ;;  %v9690_v14 = vld [vmem:[#allocation27_spill] sm:$0xff] }
 0x350   : > { %v7966_v26 = vmul.f32 -1.442695, %v9680_v46  ;;  %9684 = vst [vmem:[#allocation176_spill] sm:$0xff] %v7978_v48  ;;  %v7987_v56 = vadd.f32 %v7748_v27, %v7333_v51  ;;  %5145 = vpow2.f32 %v7804_v54  ;;  %v9689_v2 = vsub.f32 %v7611_v11, %v9590_v24  ;;  %v9692_v32 = vld [vmem:[#allocation28_spill] sm:$0xff]  ;;  %v9716_v54 = vld [vmem:[#allocation181_spill] sm:$0xff] }
 0x351   : > { %v7971_v59 = vmul.f32 -1.442695, %v9682_v43  ;;  %v7976_v18 = vmul.f32 -1.442695, %v9683_v42  ;;  %v7989_v43 = vpop.eup %5125  ;;  %v2140_v62 = vmul.f32 %v9691_v22, %v9690_v14  ;;  %v2460_v48 = vmul.f32 %v9693_v8, %v9692_v32 }
 0x352   : > { %9687 = vst [vmem:[#allocation162_spill] sm:$0xff] %v7987_v56  ;;  %9688 = vst [vmem:[#allocation199_spill] sm:$0xff] %v7989_v43  ;;  %v7995_v42 = vmul.f32 -1.442695, %v9689_v2  ;;  %v5128_v46 = vpop.eup %5127  ;;  %5147 = vpow2.f32 %v7809_v19  ;;  %v9694_v27 = vsub.f32 %v7665_v39, %v9596_v61  ;;  %v8010_v11 = vadd.f32 %v7333_v51, %v1887_v60 }
 0x353   : > { %v5130_v24 = vpop.eup %5129  ;;  %v3012_v2 = vadd.f32 1.0, %v5128_v46  ;;  %5149 = vpow2.f32 %v7826_v1  ;;  %v9699_v46 = vsub.f32 %v7665_v39, %v9600_v41 }
 0x354   : > { %v8005_v36 = vmul.f32 -1.442695, %v9694_v27  ;;  %9696 = vst [vmem:[#allocation200_spill] sm:$0xff] %v8010_v11  ;;  %v5132_v49 = vpop.eup %5131  ;;  %v2055_v61 = vadd.f32 1.0, %v5130_v24  ;;  %5151 = vpow2.f32 %v7831_v58  ;;  %v9698_v27 = vsub.f32 %v7665_v39, %v9599_v37  ;;  %v9720_v11 = vld [vmem:[#allocation227_spill] sm:$0xff] }
 0x355   : > { %v5134_v60 = vpop.eup %5133  ;;  %5153 = vrcp.f32 %v3012_v2  ;;  %v2375_v1 = vadd.f32 1.0, %v5132_v49  ;;  %v8028_v32 = vmul.f32 -1.442695, %v9699_v46  ;;  %v9700_v24 = vsub.f32 %v7665_v39, %v9601_v9  ;;  %v9712_v9 = vld [vmem:[#allocation186_spill] sm:$0xff] }
 0x356   : > { %v8021_v43 = vmul.f32 -1.442695, %v9698_v27  ;;  %v5136_v19 = vpop.eup %5135  ;;  %5155 = vrcp.f32 %v2055_v61  ;;  %v2695_v37 = vadd.f32 1.0, %v5134_v60  ;;  %v9701_v27 = vsub.f32 %v7678_v50, %v9604_v5  ;;  %v9705_v60 = vld [vmem:[#allocation184_spill] sm:$0xff] }
 0x357   : > { %v8033_v58 = vmul.f32 -1.442695, %v9700_v24  ;;  %v5138_v55 = vpop.eup %5137  ;;  %5157 = vrcp.f32 %v2375_v1  ;;  %v3015_v41 = vadd.f32 1.0, %v5136_v19  ;;  %v9706_v5 = vsub.f32 %v7678_v50, %v9705_v60  ;;  %v9709_v1 = vld [vmem:[#allocation185_spill] sm:$0xff] }
 0x358   : > { %v8038_v51 = vmul.f32 -1.442695, %v9701_v27  ;;  %v5140_v24 = vpop.eup %5139  ;;  %5159 = vrcp.f32 %v2695_v37  ;;  %v2054_v61 = vadd.f32 1.0, %v5138_v55  ;;  %v9710_v20 = vsub.f32 %v7678_v50, %v9709_v1  ;;  %v9719_v1 = vld [vmem:[#allocation139_spill] sm:$0xff] }
 0x359   : > { %v8049_v27 = vmul.f32 -1.442695, %v9706_v5  ;;  %v5142_v2 = vpop.eup %5141  ;;  %5161 = vrcp.f32 %v3015_v41  ;;  %v2374_v19 = vadd.f32 1.0, %v5140_v24  ;;  %v9713_v37 = vsub.f32 %v7678_v50, %v9712_v9  ;;  %v9715_v5 = vld [vmem:[#allocation160_spill] sm:$0xff] }
 0x35a   : > { %v8056_v46 = vmul.f32 -1.442695, %v9710_v20  ;;  %v5144_v39 = vpop.eup %5143  ;;  %5163 = vrcp.f32 %v2054_v61  ;;  %v2694_v60 = vadd.f32 1.0, %v5142_v2  ;;  %v9717_v56 = vsub.f32 %v9715_v5, %v9716_v54  ;;  %v9721_v61 = vld [vmem:[#allocation140_spill] sm:$0xff]  ;;  %v9722_v2 = vld [vmem:[#allocation229_spill] sm:$0xff] }
 0x35b   : > { %9707 = vst [vmem:[#allocation159_spill] sm:$0xff] %v8049_v27  ;;  %v8061_v55 = vmul.f32 -1.442695, %v9713_v37  ;;  %v2492_v41 = vadd.f32 %v2460_v48, %v2140_v62  ;;  %v5146_v24 = vpop.eup %5145  ;;  %5165 = vrcp.f32 %v2374_v19  ;;  %v3014_v14 = vadd.f32 1.0, %v5144_v39  ;;  %v9724_v54 = vld [vmem:[#allocation220_spill] sm:$0xff] }
 0x35c   : > { %9711 = vst [vmem:[#allocation180_spill] sm:$0xff] %v8056_v46  ;;  %v8066_v49 = vmul.f32 -1.442695, %v9717_v56  ;;  %v2524_v20 = vadd.f32 %v9693_v8, %v9691_v22  ;;  %v2780_v50 = vmul.f32 %v9720_v11, %v9719_v1  ;;  %v5148_v9 = vpop.eup %5147  ;;  %5167 = vrcp.f32 %v2694_v60  ;;  %v9725_v8 = vld [vmem:[#allocation30_spill] sm:$0xff]  ;;  %v9727_v60 = vld [vmem:[#allocation141_spill] sm:$0xff] }
 0x35d   : > { %9714 = vst [vmem:[#allocation27_spill] sm:$0xff] %v8061_v55  ;;  %v2057_v37 = vadd.f32 1.0, %v5146_v24  ;;  %v3100_v17 = vmul.f32 %v9722_v2, %v9721_v61  ;;  %v2141_v56 = vmul.f32 %v9724_v54, %v9723_v40  ;;  %5169 = vrcp.f32 %v3014_v14  ;;  %v9726_v1 = vld [vmem:[#allocation222_spill] sm:$0xff]  ;;  %v9728_v24 = vld [vmem:[#allocation223_spill] sm:$0xff]  ;;  %v9735_v54 = vld [vmem:[#allocation224_spill] sm:$0xff] }
 0x35e   : > { %9718 = vst [vmem:[#allocation225_spill] sm:$0xff] %v8066_v49  ;;  %v5150_v49 = vpop.eup %5149  ;;  %v2377_v62 = vadd.f32 1.0, %v5148_v9  ;;  %v2812_v48 = vadd.f32 %v2780_v50, %v2492_v41  ;;  %v2844_v39 = vadd.f32 %v9720_v11, %v2524_v20  ;;  %v2461_v55 = vmul.f32 %v9726_v1, %v9725_v8  ;;  %v8088_v41 = vpop.f32.mrb[104].mxu1  ;;  %v9741_v1 = vld [vmem:[#allocation236_spill] sm:$0xff] }
 0x35f   : > { %v5152_v19 = vpop.eup %5151  ;;  %5171 = vrcp.f32 %v2057_v37  ;;  %v2697_v22 = vadd.f32 1.0, %v5150_v49  ;;  %v2781_v46 = vmul.f32 %v9728_v24, %v9727_v60  ;;  %9731 = vst [vmem:[#allocation184_spill] sm:$0xff] %v8088_v41  ;;  %v9732_v49 = vld [vmem:[#allocation182_spill] sm:$0xff] }
 0x360   : > { %v8081_v27 = vpop.eup %5153  ;;  %5173 = vrcp.f32 %v2377_v62  ;;  %v3017_v61 = vadd.f32 1.0, %v5152_v19  ;;  %v8083_v40 = vadd.f32 %v3100_v17, %v2812_v48  ;;  %v8086_v14 = vadd.f32 %v9722_v2, %v2844_v39  ;;  %v9734_v37 = vld [vmem:[#allocation142_spill] sm:$0xff]  ;;  %v8099_v19 = vpop.f32.mrb[105].mxu1  ;;  %v9737_v2 = vld [vmem:[#allocation173_spill] sm:$0xff] }
 0x361   : > { %v8090_v11 = vpop.eup %5155  ;;  %5175 = vrcp.f32 %v2697_v22  ;;  %v9733_v20 = vsub.f32 %v9715_v5, %v9732_v49  ;;  %v2493_v9 = vadd.f32 %v2461_v55, %v2141_v56  ;;  %v3101_v62 = vmul.f32 %v9735_v54, %v9734_v37  ;;  %9736 = vst [vmem:[#allocation185_spill] sm:$0xff] %v8099_v19  ;;  %v4420_v17 = vpop.f32.mrb[172].mxu0  ;;  %v8111_v22 = vld [vmem:[%s9134_s4] ss:$0 sm:$0xff]  ;;  %v9745_v37 = vld [vmem:[#allocation169_spill] sm:$0xff]  ;;  %v9782_v19 = vld [vmem:[#allocation146_spill] sm:$0xff] }
 0x362   : > { %9729 = vst [vmem:[#allocation28_spill] sm:$0xff] %v8083_v40  ;;  %9730 = vst [vmem:[#allocation226_spill] sm:$0xff] %v8086_v14  ;;  %v8101_v48 = vpop.eup %5157  ;;  %5177 = vrcp.f32 %v3017_v61  ;;  %v9738_v39 = vsub.f32 %v9715_v5, %v9737_v2  ;;  %v8114_v55 = vadd.f32 %v8111_v22, %v4420_v17  ;;  %v9740_v56 = vld [vmem:[#allocation31_spill] sm:$0xff]  ;;  %v8121_v49 = vpop.f32.mrb[106].mxu1  ;;  %v2526_v2 = vadd.f32 %v9745_v37, %v9741_v1 }
 0x363   : > { %v8095_v50 = vmul.f32 -1.442695, %v9733_v20  ;;  %v2142_v60 = vmul.f32 %v9741_v1, %v9740_v56  ;;  %v8118_v24 = vpop.eup %5159  ;;  %5179 = vpow2.f32 %v7836_v35  ;;  %v2813_v61 = vadd.f32 %v2781_v46, %v2493_v9  ;;  %9743 = vst [vmem:[#allocation181_spill] sm:$0xff] %v8121_v49  ;;  %v9744_v20 = vld [vmem:[#allocation32_spill] sm:$0xff]  ;;  %v9749_v35 = vld [vmem:[#allocation143_spill] sm:$0xff]  ;;  %v9750_v46 = vld [vmem:[#allocation170_spill] sm:$0xff] }
 0x364   : > { %v8106_v8 = vmul.f32 -1.442695, %v9738_v39  ;;  %9739 = vst [vmem:[#allocation186_spill] sm:$0xff] %v8114_v55  ;;  %9742 = vst [vmem:[#allocation160_spill] sm:$0xff] %v8118_v24  ;;  %v2462_v54 = vmul.f32 %v9745_v37, %v9744_v20  ;;  %v8127_v39 = vpop.eup %5161  ;;  %5181 = vpow2.f32 %v7859_v47  ;;  %v2782_v9 = vmul.f32 %v9750_v46, %v9749_v35  ;;  %v9752_v47 = vld [vmem:[#allocation174_spill] sm:$0xff] }
 0x365   : > { %9746 = vst [vmem:[#allocation139_spill] sm:$0xff] %v8127_v39  ;;  %v8136_v24 = vpop.eup %5163  ;;  %5183 = vpow2.f32 %v7864_v30  ;;  %v8139_v20 = vadd.f32 %v3101_v62, %v2813_v61  ;;  %v2846_v37 = vadd.f32 %v9750_v46, %v2526_v2  ;;  %v9753_v56 = vsub.f32 %v9715_v5, %v9752_v47  ;;  %v1897_v30 = vpop.f32.mrb[173].mxu0  ;;  %v9755_v62 = vld [vmem:[#allocation144_spill] sm:$0xff]  ;;  %v9756_v61 = vld [vmem:[#allocation157_spill] sm:$0xff]  ;;  %v9759_v46 = vld [vmem:[#allocation34_spill] sm:$0xff] }
 0x366   : > { %v2494_v1 = vadd.f32 %v2462_v54, %v2142_v60  ;;  %v8142_v39 = vpop.eup %5165  ;;  %5185 = vpow2.f32 %v7872_v34  ;;  %v9754_v35 = vsub.f32 %v7777_v33, %v9627_v45  ;;  %v3102_v60 = vmul.f32 %v9756_v61, %v9755_v62  ;;  %v9760_v47 = vld [vmem:[#allocation230_spill] sm:$0xff]  ;;  %v9761_v62 = vld [vmem:[#allocation36_spill] sm:$0xff] }
 0x367   : > { %9751 = vst [vmem:[#allocation227_spill] sm:$0xff] %v8139_v20  ;;  %v8148_v14 = vmul.f32 -1.442695, %v9753_v56  ;;  %v8157_v54 = vpop.eup %5167  ;;  %5187 = vpow2.f32 %v7877_v44  ;;  %v8161_v34 = vadd.f32 %v8111_v22, %v1897_v30  ;;  %v8164_v5 = vadd.f32 %v9756_v61, %v2846_v37  ;;  %v9762_v20 = vld [vmem:[#allocation232_spill] sm:$0xff] }
 0x368   : > { %v8153_v40 = vmul.f32 -1.442695, %v9754_v35  ;;  %v2814_v2 = vadd.f32 %v2782_v9, %v2494_v1  ;;  %v8166_v56 = vpop.eup %5169  ;;  %5189 = vpow2.f32 %v7896_v3  ;;  %v2143_v35 = vmul.f32 %v9760_v47, %v9759_v46  ;;  %v9766_v46 = vld [vmem:[#allocation190_spill] sm:$0xff]  ;;  %v9770_v3 = vld [vmem:[#allocation203_spill] sm:$0xff] }
 0x369   : > { %9757 = vst [vmem:[#allocation140_spill] sm:$0xff] %v8161_v34  ;;  %9758 = vst [vmem:[#allocation229_spill] sm:$0xff] %v8164_v5  ;;  %v2463_v44 = vmul.f32 %v9762_v20, %v9761_v62  ;;  %v8175_v17 = vpop.eup %5171  ;;  %5191 = vpow2.f32 %v7912_v12  ;;  %v9767_v62 = vsub.f32 %v7777_v33, %v9766_v46  ;;  %v9771_v30 = vsub.f32 %v7777_v33, %v9770_v3  ;;  %v9783_v9 = vld [vmem:[#allocation235_spill] sm:$0xff] }
 0x36a   : > { %v8184_v61 = vpop.eup %5173  ;;  %5193 = vpow2.f32 %v7917_v6  ;;  %v8194_v5 = vadd.f32 %v3102_v60, %v2814_v2  ;;  %v9772_v6 = vld [vmem:[#allocation205_spill] sm:$0xff] }
 0x36b   : > { %9765 = vst [vmem:[#allocation29_spill] sm:$0xff] %v8184_v61  ;;  %v8190_v45 = vmul.f32 -1.442695, %v9767_v62  ;;  %v8196_v1 = vpop.eup %5175  ;;  %5195 = vpow2.f32 %v7922_v31  ;;  %v8202_v41 = vmul.f32 -1.442695, %v9771_v30  ;;  %v9773_v37 = vsub.f32 %v7777_v33, %v9772_v6  ;;  %v9777_v30 = vld [vmem:[#allocation191_spill] sm:$0xff] }
 0x36c   : > { %9768 = vst [vmem:[#allocation220_spill] sm:$0xff] %v8194_v5  ;;  %9769 = vst [vmem:[#allocation30_spill] sm:$0xff] %v8196_v1  ;;  %v9774_v62 = vsub.f32 %v7786_v0, %v9634_v25  ;;  %v8214_v60 = vpop.eup %5177  ;;  %5197 = vpow2.f32 %v7948_v28  ;;  %v9776_v31 = vsub.f32 %v7786_v0, %v9635_v4  ;;  %v9778_v3 = vsub.f32 %v7786_v0, %v9777_v30  ;;  %v9781_v5 = vld [vmem:[#allocation234_spill] sm:$0xff] }
 0x36d   : > { %v8207_v46 = vmul.f32 -1.442695, %v9773_v37  ;;  %9775 = vst [vmem:[#allocation222_spill] sm:$0xff] %v8214_v60  ;;  %v2495_v37 = vadd.f32 %v2463_v44, %v2143_v35  ;;  %v5180_v6 = vpop.eup %5179  ;;  %5199 = vpow2.f32 %v7953_v63  ;;  %v2527_v25 = vadd.f32 %v9762_v20, %v9760_v47  ;;  %v9784_v30 = vld [vmem:[#allocation38_spill] sm:$0xff]  ;;  %v9786_v35 = vld [vmem:[#allocation40_spill] sm:$0xff]  ;;  %v9787_v44 = vld [vmem:[#allocation179_spill] sm:$0xff] }
 0x36e   : > { %v8212_v12 = vmul.f32 -1.442695, %v9774_v62  ;;  %v8220_v2 = vmul.f32 -1.442695, %v9776_v31  ;;  %v8225_v33 = vmul.f32 -1.442695, %v9778_v3  ;;  %v3103_v4 = vmul.f32 %v9783_v9, %v9782_v19  ;;  %v5182_v31 = vpop.eup %5181 }
 0x36f   : > { %v9780_v62 = vld [vmem:[#allocation145_spill] sm:$0xff]  ;;  %v2056_v34 = vadd.f32 1.0, %v5180_v6  ;;  %5201 = vpow2.f32 %v7958_v23  ;;  %v9785_v3 = vld [vmem:[#allocation172_spill] sm:$0xff]  ;;  %v2464_v60 = vmul.f32 %v9787_v44, %v9786_v35  ;;  %v5184_v63 = vpop.eup %5183  ;;  %v2376_v1 = vadd.f32 1.0, %v5182_v31 }
 0x370   : > { %9779 = vst [vmem:[#allocation141_spill] sm:$0xff] %v8225_v33  ;;  %v2783_v28 = vmul.f32 %v9781_v5, %v9780_v62  ;;  %v2144_v49 = vmul.f32 %v9785_v3, %v9784_v30  ;;  %5203 = vpow2.f32 %v7966_v26  ;;  %v2847_v47 = vadd.f32 %v9781_v5, %v2527_v25  ;;  %v5186_v62 = vpop.eup %5185  ;;  %v9791_v5 = vld [vmem:[#allocation165_spill] sm:$0xff] }
 0x371   : > { %5205 = vrcp.f32 %v2056_v34  ;;  %v2696_v19 = vadd.f32 1.0, %v5184_v63  ;;  %v2528_v23 = vadd.f32 %v9787_v44, %v9785_v3  ;;  %v5188_v6 = vpop.eup %5187  ;;  %v3016_v30 = vadd.f32 1.0, %v5186_v62  ;;  %v9795_v44 = vld [vmem:[#allocation166_spill] sm:$0xff] }
 0x372   : > { %v2815_v20 = vadd.f32 %v2783_v28, %v2495_v37  ;;  %v2496_v61 = vadd.f32 %v2464_v60, %v2144_v49  ;;  %5207 = vrcp.f32 %v2376_v1  ;;  %v8246_v35 = vadd.f32 %v9783_v9, %v2847_v47  ;;  %v5190_v31 = vpop.eup %5189  ;;  %v9790_v37 = vld [vmem:[#allocation147_spill] sm:$0xff]  ;;  %v9792_v28 = vld [vmem:[#allocation192_spill] sm:$0xff]  ;;  %v8258_v47 = vpop.f32.mrb[107].mxu1 }
 0x373   : > { %5209 = vrcp.f32 %v2696_v19  ;;  %v2059_v26 = vadd.f32 1.0, %v5188_v6  ;;  %v2784_v25 = vmul.f32 %v9791_v5, %v9790_v37  ;;  %v2848_v34 = vadd.f32 %v9791_v5, %v2528_v23  ;;  %v5192_v49 = vpop.eup %5191  ;;  %9796 = vst [vmem:[#allocation142_spill] sm:$0xff] %v8258_v47 }
 0x374   : > { %v8243_v33 = vadd.f32 %v3103_v4, %v2815_v20  ;;  %9789 = vst [vmem:[#allocation182_spill] sm:$0xff] %v8246_v35  ;;  %5211 = vrcp.f32 %v3016_v30  ;;  %v2379_v60 = vadd.f32 1.0, %v5190_v31  ;;  %v9793_v1 = vsub.f32 %v7786_v0, %v9792_v28  ;;  %v9794_v4 = vld [vmem:[#allocation148_spill] sm:$0xff]  ;;  %v5194_v63 = vpop.eup %5193  ;;  %v9798_v30 = vld [vmem:[#allocation42_spill] sm:$0xff]  ;;  %v9799_v31 = vld [vmem:[#allocation167_spill] sm:$0xff] }
 0x375   : > { %v3104_v9 = vmul.f32 %v9795_v44, %v9794_v4  ;;  %5213 = vrcp.f32 %v2059_v26  ;;  %v2699_v20 = vadd.f32 1.0, %v5192_v49  ;;  %v2816_v62 = vadd.f32 %v2784_v25, %v2496_v61  ;;  %v5196_v23 = vpop.eup %5195  ;;  %v9803_v4 = vld [vmem:[#allocation44_spill] sm:$0xff]  ;;  %v9809_v0 = vld [vmem:[#allocation171_spill] sm:$0xff] }
 0x376   : > { %9788 = vst [vmem:[#allocation223_spill] sm:$0xff] %v8243_v33  ;;  %v8254_v3 = vmul.f32 -1.442695, %v9793_v1  ;;  %v8261_v19 = vadd.f32 %v9795_v44, %v2848_v34  ;;  %5215 = vrcp.f32 %v2379_v60  ;;  %v3019_v6 = vadd.f32 1.0, %v5194_v63  ;;  %v5198_v5 = vpop.eup %5197  ;;  %v9804_v44 = vld [vmem:[#allocation168_spill] sm:$0xff] }
 0x377   : > { %v2145_v37 = vmul.f32 %v9799_v31, %v9798_v30  ;;  %5217 = vrcp.f32 %v2699_v20  ;;  %v2058_v28 = vadd.f32 1.0, %v5196_v23  ;;  %v9800_v26 = vsub.f32 %v7813_v21, %v9642_v13  ;;  %v5200_v25 = vpop.eup %5199  ;;  %v9805_v30 = vld [vmem:[#allocation149_spill] sm:$0xff] }
 0x378   : > { %9797 = vst [vmem:[#allocation224_spill] sm:$0xff] %v8261_v19  ;;  %v8272_v61 = vadd.f32 %v3104_v9, %v2816_v62  ;;  %5219 = vrcp.f32 %v3019_v6  ;;  %v2378_v34 = vadd.f32 1.0, %v5198_v5  ;;  %v9802_v60 = vsub.f32 %v7813_v21, %v9643_v57  ;;  %v9806_v9 = vld [vmem:[#allocation155_spill] sm:$0xff]  ;;  %v8285_v5 = vpop.f32.mrb[108].mxu1 }
 0x379   : > { %v8270_v49 = vmul.f32 -1.442695, %v9800_v26  ;;  %v2465_v63 = vmul.f32 %v9804_v44, %v9803_v4  ;;  %v5202_v20 = vpop.eup %5201  ;;  %5221 = vrcp.f32 %v2058_v28  ;;  %v2698_v23 = vadd.f32 1.0, %v5200_v25  ;;  %9807 = vst [vmem:[#allocation31_spill] sm:$0xff] %v8285_v5  ;;  %v8291_v25 = vpop.f32.mrb[109].mxu1 }
 0x37a   : > { %9801 = vst [vmem:[#allocation173_spill] sm:$0xff] %v8272_v61  ;;  %v8277_v1 = vmul.f32 -1.442695, %v9802_v60  ;;  %v2529_v13 = vadd.f32 %v9804_v44, %v9799_v31  ;;  %v2785_v62 = vmul.f32 %v9806_v9, %v9805_v30  ;;  %v5204_v26 = vpop.eup %5203  ;;  %5223 = vrcp.f32 %v2378_v34  ;;  %v9808_v60 = vld [vmem:[#allocation150_spill] sm:$0xff]  ;;  %9810 = vst [vmem:[#allocation236_spill] sm:$0xff] %v8291_v25  ;;  %v4423_v4 = vpop.f32.mrb[174].mxu0 }
 0x37b   : > { %v3018_v6 = vadd.f32 1.0, %v5202_v20  ;;  %v2497_v57 = vadd.f32 %v2465_v63, %v2145_v37  ;;  %v3105_v61 = vmul.f32 %v9809_v0, %v9808_v60  ;;  %v8289_v33 = vpop.eup %5205  ;;  %5225 = vrcp.f32 %v2698_v23  ;;  %v9811_v44 = vld [vmem:[#allocation46_spill] sm:$0xff]  ;;  %v8301_v63 = vpop.f32.mrb[110].mxu1  ;;  %v9814_v23 = vld [vmem:[#allocation48_spill] sm:$0xff] }
 0x37c   : > { %v2061_v28 = vadd.f32 1.0, %v5204_v26  ;;  %v2849_v31 = vadd.f32 %v9806_v9, %v2529_v13  ;;  %v2146_v30 = vmul.f32 %v7854_v52, %v9811_v44  ;;  %v8296_v34 = vpop.eup %5207  ;;  %v8299_v37 = vadd.f32 %v8111_v22, %v4423_v4  ;;  %9813 = vst [vmem:[#allocation169_spill] sm:$0xff] %v8301_v63  ;;  %v1907_v20 = vpop.f32.mrb[175].mxu0  ;;  %v9846_v44 = vld [vmem:[#allocation183_spill] sm:$0xff] }
 0x37d   : > { %5227 = vrcp.f32 %v3018_v6  ;;  %v2817_v60 = vadd.f32 %v2785_v62, %v2497_v57  ;;  %v2466_v26 = vmul.f32 %v7866_v16, %v9814_v23  ;;  %v8305_v19 = vpop.eup %5209  ;;  %v8308_v13 = vadd.f32 %v8111_v22, %v1907_v20  ;;  %v9821_v23 = vld [vmem:[#allocation217_spill] sm:$0xff] }
 0x37e   : > { %9812 = vst [vmem:[#allocation32_spill] sm:$0xff] %v8299_v37  ;;  %5229 = vrcp.f32 %v2061_v28  ;;  %v8311_v9 = vadd.f32 %v9809_v0, %v2849_v31  ;;  %v2530_v6 = vadd.f32 %v7866_v16, %v7854_v52  ;;  %v8315_v4 = vpop.eup %5211  ;;  %v9822_v22 = vsub.f32 %v7813_v21, %v9821_v23  ;;  %v9856_v37 = vld [vmem:[#allocation156_spill] sm:$0xff] }
 0x37f   : > { %9815 = vst [vmem:[#allocation143_spill] sm:$0xff] %v8308_v13  ;;  %5231 = vpow2.f32 %v7971_v59  ;;  %v8324_v28 = vpop.eup %5213  ;;  %v9825_v31 = vsub.f32 %v7852_v7, %v9652_v38  ;;  %v9844_v13 = vld [vmem:[#allocation159_spill] sm:$0xff] }
 0x380   : > { %9816 = vst [vmem:[#allocation170_spill] sm:$0xff] %v8311_v9  ;;  %5233 = vpow2.f32 %v7976_v18  ;;  %v8333_v20 = vpop.eup %5215  ;;  %v8339_v57 = vmul.f32 -1.442695, %v9822_v22  ;;  %v9823_v18 = vld [vmem:[#allocation218_spill] sm:$0xff]  ;;  %v9827_v22 = vld [vmem:[#allocation209_spill] sm:$0xff] }
 0x381   : > { %5235 = vpow2.f32 %v7995_v42  ;;  %v9824_v9 = vsub.f32 %v7813_v21, %v9823_v18  ;;  %v8349_v16 = vmul.f32 -1.442695, %v9825_v31  ;;  %v8351_v59 = vpop.eup %5217  ;;  %v9826_v42 = vsub.f32 %v7852_v7, %v9654_v15 }
 0x382   : > { %5237 = vpow2.f32 %v8005_v36  ;;  %v9828_v5 = vsub.f32 %v7852_v7, %v9827_v22  ;;  %v8369_v31 = vpop.eup %5219  ;;  %v9831_v36 = vsub.f32 %v7900_v29, %v9667_v10  ;;  %v8379_v22 = vadd.f32 %v3105_v61, %v2817_v60  ;;  %v9836_v61 = vld [vmem:[#allocation152_spill] sm:$0xff] }
 0x383   : > { %v8344_v63 = vmul.f32 -1.442695, %v9824_v9  ;;  %v8357_v23 = vmul.f32 -1.442695, %v9826_v42  ;;  %v9829_v9 = vld [vmem:[#allocation211_spill] sm:$0xff]  ;;  %5239 = vpow2.f32 %v8021_v43  ;;  %v9835_v10 = vsub.f32 %v7900_v29, %v9668_v53  ;;  %v9837_v60 = vld [vmem:[#allocation188_spill] sm:$0xff] }
 0x384   : > { %v8362_v21 = vmul.f32 -1.442695, %v9828_v5  ;;  %v9830_v18 = vsub.f32 %v7852_v7, %v9829_v9  ;;  %v8375_v15 = vmul.f32 -1.442695, %v9831_v36  ;;  %9832 = vst [vmem:[#allocation174_spill] sm:$0xff] %v8379_v22  ;;  %v8381_v5 = vpop.eup %5221  ;;  %5241 = vpow2.f32 %v8028_v32  ;;  %v9833_v9 = vld [vmem:[#allocation151_spill] sm:$0xff] }
 0x385   : > { %v2498_v7 = vadd.f32 %v2466_v26, %v2146_v30  ;;  %v8387_v0 = vpop.eup %5223  ;;  %5243 = vpow2.f32 %v8033_v58  ;;  %v8393_v36 = vmul.f32 -1.442695, %v9835_v10  ;;  %v3106_v42 = vmul.f32 %v9837_v60, %v9836_v61  ;;  %v9838_v22 = vld [vmem:[#allocation50_spill] sm:$0xff]  ;;  %v9839_v32 = vld [vmem:[#allocation177_spill] sm:$0xff]  ;;  %v9843_v53 = vld [vmem:[#allocation163_spill] sm:$0xff] }
 0x386   : > { %v8367_v38 = vmul.f32 -1.442695, %v9830_v18  ;;  %v9834_v18 = vld [vmem:[#allocation187_spill] sm:$0xff]  ;;  %v2147_v30 = vmul.f32 %v9839_v32, %v9838_v22  ;;  %v8399_v26 = vpop.eup %5225  ;;  %5245 = vpow2.f32 %v8038_v51  ;;  %v2531_v61 = vadd.f32 %v9843_v53, %v9839_v32  ;;  %v9845_v51 = vld [vmem:[#allocation154_spill] sm:$0xff]  ;;  %v9853_v32 = vld [vmem:[#allocation233_spill] sm:$0xff] }
 0x387   : > { %v2786_v52 = vmul.f32 %v9834_v18, %v9833_v9  ;;  %v2850_v43 = vadd.f32 %v9834_v18, %v2530_v6  ;;  %v8402_v6 = vpop.f32.mrb[111].mxu1  ;;  %v9842_v18 = vld [vmem:[#allocation52_spill] sm:$0xff]  ;;  %v8409_v25 = vpop.eup %5227  ;;  %5247 = vpow2.f32 %v9844_v13  ;;  %v2787_v62 = vmul.f32 %v9846_v44, %v9845_v51  ;;  %v9852_v22 = vld [vmem:[#allocation27_spill] sm:$0xff] }
 0x388   : > { %9840 = vst [vmem:[#allocation144_spill] sm:$0xff] %v8402_v6  ;;  %v2467_v10 = vmul.f32 %v9843_v53, %v9842_v18  ;;  %v9854_v53 = vsub.f32 %v7900_v29, %v9853_v32  ;;  %v2851_v51 = vadd.f32 %v9846_v44, %v2531_v61  ;;  %v9862_v32 = vld [vmem:[#allocation56_spill] sm:$0xff] }
 0x389   : > { %v2818_v9 = vadd.f32 %v2786_v52, %v2498_v7  ;;  %v8405_v58 = vadd.f32 %v9837_v60, %v2850_v43  ;;  %v8418_v52 = vpop.eup %5229  ;;  %v9847_v7 = vld [vmem:[#allocation180_spill] sm:$0xff]  ;;  %v9848_v43 = vld [vmem:[#allocation231_spill] sm:$0xff] }
 0x38a   : > { %5249 = vpow2.f32 %v9847_v7  ;;  %v9849_v60 = vsub.f32 %v7900_v29, %v9848_v43  ;;  %v2499_v13 = vadd.f32 %v2467_v10, %v2147_v30  ;;  %v5232_v35 = vpop.eup %5231  ;;  %v8432_v6 = vmul.f32 -1.442695, %v9854_v53  ;;  %v9857_v7 = vld [vmem:[#allocation189_spill] sm:$0xff]  ;;  %v9860_v30 = vld [vmem:[#allocation194_spill] sm:$0xff]  ;;  %v9863_v44 = vld [vmem:[#allocation176_spill] sm:$0xff] }
 0x38b   : > { %9841 = vst [vmem:[#allocation157_spill] sm:$0xff] %v8405_v58  ;;  %v8426_v58 = vadd.f32 %v3106_v42, %v2818_v9  ;;  %5251 = vpow2.f32 %v9852_v22  ;;  %v3107_v47 = vmul.f32 %v9857_v7, %v9856_v37  ;;  %v5234_v55 = vpop.eup %5233  ;;  %v2381_v43 = vadd.f32 1.0, %v5232_v35  ;;  %v9859_v9 = vld [vmem:[#allocation54_spill] sm:$0xff] }
 0x38c   : > { %v8424_v18 = vmul.f32 -1.442695, %v9849_v60  ;;  %9855 = vst [vmem:[#allocation36_spill] sm:$0xff] %v8432_v6  ;;  %v9858_v60 = vld [vmem:[#allocation225_spill] sm:$0xff]  ;;  %v2819_v42 = vadd.f32 %v2787_v62, %v2499_v13  ;;  %v2148_v10 = vmul.f32 %v9860_v30, %v9859_v9  ;;  %v2701_v22 = vadd.f32 1.0, %v5234_v55  ;;  %v9865_v55 = vld [vmem:[#allocation195_spill] sm:$0xff] }
 0x38d   : > { %9851 = vst [vmem:[#allocation230_spill] sm:$0xff] %v8426_v58  ;;  %5253 = vpow2.f32 %v9858_v60  ;;  %v5236_v58 = vpop.eup %5235  ;;  %v8442_v29 = vadd.f32 %v9857_v7, %v2851_v51  ;;  %v2468_v61 = vmul.f32 %v9863_v44, %v9862_v32  ;;  %v2532_v62 = vadd.f32 %v9863_v44, %v9860_v30  ;;  %v9866_v9 = vld [vmem:[#allocation197_spill] sm:$0xff]  ;;  %v9871_v44 = vld [vmem:[#allocation35_spill] sm:$0xff] }
 0x38e   : > { %9850 = vst [vmem:[#allocation34_spill] sm:$0xff] %v8424_v18  ;;  %5255 = vpow2.f32 %v8095_v50  ;;  %v5238_v53 = vpop.eup %5237  ;;  %v3021_v37 = vadd.f32 1.0, %v5236_v58  ;;  %v8446_v35 = vadd.f32 %v3107_v47, %v2819_v42  ;;  %v9867_v50 = vsub.f32 %v9865_v55, %v9866_v9 }
 0x38f   : > { %9861 = vst [vmem:[#allocation232_spill] sm:$0xff] %v8442_v29  ;;  %5257 = vrcp.f32 %v2381_v43  ;;  %v5240_v13 = vpop.eup %5239  ;;  %v2060_v60 = vadd.f32 1.0, %v5238_v53  ;;  %v2500_v51 = vadd.f32 %v2468_v61, %v2148_v10  ;;  %v9869_v29 = vld [vmem:[#allocation33_spill] sm:$0xff]  ;;  %v9870_v43 = vld [vmem:[#allocation199_spill] sm:$0xff]  ;;  %v9872_v53 = vld [vmem:[#allocation58_spill] sm:$0xff] }
 0x390   : > { %9864 = vst [vmem:[#allocation190_spill] sm:$0xff] %v8446_v35  ;;  %5259 = vrcp.f32 %v2701_v22  ;;  %v8453_v6 = vmul.f32 -1.442695, %v9867_v50  ;;  %v5242_v7 = vpop.eup %5241  ;;  %v2380_v32 = vadd.f32 1.0, %v5240_v13  ;;  %v2788_v58 = vmul.f32 %v9870_v43, %v9869_v29  ;;  %v9873_v35 = vld [vmem:[#allocation196_spill] sm:$0xff] }
 0x391   : > { %5261 = vrcp.f32 %v3021_v37  ;;  %v2852_v47 = vadd.f32 %v9870_v43, %v2532_v62  ;;  %v5244_v42 = vpop.eup %5243  ;;  %v2700_v30 = vadd.f32 1.0, %v5242_v7  ;;  %v3108_v22 = vmul.f32 %v8081_v27, %v9871_v44  ;;  %v9875_v62 = vld [vmem:[#allocation60_spill] sm:$0xff]  ;;  %v9876_v43 = vld [vmem:[#allocation153_spill] sm:$0xff] }
 0x392   : > { %9868 = vst [vmem:[#allocation203_spill] sm:$0xff] %v8453_v6  ;;  %5263 = vrcp.f32 %v2060_v60  ;;  %v2149_v9 = vmul.f32 %v9873_v35, %v9872_v53  ;;  %v5246_v50 = vpop.eup %5245  ;;  %v3020_v10 = vadd.f32 1.0, %v5244_v42  ;;  %v2820_v61 = vadd.f32 %v2788_v58, %v2500_v51  ;;  %v9877_v53 = vld [vmem:[#allocation198_spill] sm:$0xff] }
 0x393   : > { %5265 = vrcp.f32 %v2380_v32  ;;  %v8463_v37 = vadd.f32 %v8081_v27, %v2852_v47  ;;  %v5248_v13 = vpop.eup %5247  ;;  %v2063_v29 = vadd.f32 1.0, %v5246_v50  ;;  %v2469_v60 = vmul.f32 %v9876_v43, %v9875_v62  ;;  %v9880_v50 = vld [vmem:[#allocation175_spill] sm:$0xff] }
 0x394   : > { %5267 = vrcp.f32 %v2700_v30  ;;  %v2533_v7 = vadd.f32 %v9876_v43, %v9873_v35  ;;  %v5250_v44 = vpop.eup %5249  ;;  %v2383_v6 = vadd.f32 1.0, %v5248_v13  ;;  %v9878_v32 = vsub.f32 %v9865_v55, %v9877_v53  ;;  %v9879_v30 = vld [vmem:[#allocation37_spill] sm:$0xff]  ;;  %v9881_v13 = vld [vmem:[#allocation39_spill] sm:$0xff] }
 0x395   : > { %9874 = vst [vmem:[#allocation205_spill] sm:$0xff] %v8463_v37  ;;  %5269 = vrcp.f32 %v3020_v10  ;;  %v8474_v51 = vadd.f32 %v3108_v22, %v2820_v61  ;;  %v5252_v27 = vpop.eup %5251  ;;  %v2703_v58 = vadd.f32 1.0, %v5250_v44  ;;  %v2501_v47 = vadd.f32 %v2469_v60, %v2149_v9  ;;  %v9882_v43 = vld [vmem:[#allocation193_spill] sm:$0xff]  ;;  %v9883_v61 = vld [vmem:[#allocation62_spill] sm:$0xff] }
 0x396   : > { %v8472_v42 = vmul.f32 -1.442695, %v9878_v32  ;;  %5271 = vrcp.f32 %v2063_v29  ;;  %v2789_v62 = vmul.f32 %v9880_v50, %v9879_v30  ;;  %v3023_v35 = vadd.f32 1.0, %v5252_v27 }
 0x397   : > { %v5254_v37 = vpop.eup %5253  ;;  %5273 = vrcp.f32 %v2383_v6  ;;  %v2853_v10 = vadd.f32 %v9880_v50, %v2533_v7  ;;  %v3109_v18 = vmul.f32 %v9882_v43, %v9881_v13  ;;  %v2150_v29 = vmul.f32 %v8136_v24, %v9883_v61  ;;  %v9884_v6 = vld [vmem:[#allocation64_spill] sm:$0xff] }
 0x398   : > { %v5256_v53 = vpop.eup %5255  ;;  %5275 = vrcp.f32 %v2703_v58  ;;  %v2062_v32 = vadd.f32 1.0, %v5254_v37  ;;  %v2821_v22 = vadd.f32 %v2789_v62, %v2501_v47  ;;  %v2470_v7 = vmul.f32 %v8142_v39, %v9884_v6  ;;  %v9886_v58 = vld [vmem:[#allocation41_spill] sm:$0xff]  ;;  %v9887_v62 = vld [vmem:[#allocation219_spill] sm:$0xff] }
 0x399   : > { %v8483_v44 = vpop.eup %5257  ;;  %5277 = vrcp.f32 %v3023_v35  ;;  %v2382_v9 = vadd.f32 1.0, %v5256_v53  ;;  %v8486_v60 = vadd.f32 %v9882_v43, %v2853_v10  ;;  %v2534_v37 = vadd.f32 %v8142_v39, %v8136_v24  ;;  %v9889_v43 = vld [vmem:[#allocation43_spill] sm:$0xff]  ;;  %v9890_v39 = vld [vmem:[#allocation66_spill] sm:$0xff] }
 0x39a   : > { %v8490_v27 = vpop.eup %5259  ;;  %5279 = vrcp.f32 %v2062_v32  ;;  %v8492_v30 = vadd.f32 %v3109_v18, %v2821_v22  ;;  %v2790_v47 = vmul.f32 %v8157_v54, %v9886_v58  ;;  %v9888_v35 = vsub.f32 %v9865_v55, %v9887_v62  ;;  %v9891_v22 = vld [vmem:[#allocation68_spill] sm:$0xff] }
 0x39b   : > { %v8498_v50 = vpop.eup %5261  ;;  %5281 = vrcp.f32 %v2382_v9  ;;  %v2502_v13 = vadd.f32 %v2470_v7, %v2150_v29  ;;  %v3110_v53 = vmul.f32 %v8166_v56, %v9889_v43  ;;  %v2854_v24 = vadd.f32 %v8157_v54, %v2534_v37  ;;  %v9892_v7 = vld [vmem:[#allocation45_spill] sm:$0xff]  ;;  %v9893_v58 = vld [vmem:[#allocation160_spill] sm:$0xff]  ;;  %v9895_v43 = vld [vmem:[#allocation139_spill] sm:$0xff] }
 0x39c   : > { %9885 = vst [vmem:[#allocation191_spill] sm:$0xff] %v8492_v30  ;;  %v8503_v10 = vmul.f32 -1.442695, %v9888_v35  ;;  %v8507_v18 = vpop.eup %5263  ;;  %5283 = vpow2.f32 %v8106_v8  ;;  %v2151_v32 = vmul.f32 %v8090_v11, %v9890_v39  ;;  %v2471_v61 = vmul.f32 %v8101_v48, %v9891_v22  ;;  %v9894_v35 = vld [vmem:[#allocation47_spill] sm:$0xff] }
 0x39d   : > { %v8515_v9 = vpop.eup %5265  ;;  %5285 = vpow2.f32 %v8148_v14  ;;  %v2822_v29 = vadd.f32 %v2790_v47, %v2502_v13  ;;  %v2535_v6 = vadd.f32 %v8101_v48, %v8090_v11  ;;  %v2791_v62 = vmul.f32 %v9893_v58, %v9892_v7  ;;  %v9897_v48 = vld [vmem:[#allocation70_spill] sm:$0xff] }
 0x39e   : > { %v8522_v8 = vpop.eup %5267  ;;  %5287 = vpow2.f32 %v8153_v40  ;;  %v8526_v54 = vadd.f32 %v8166_v56, %v2854_v24  ;;  %v2503_v37 = vadd.f32 %v2471_v61, %v2151_v32  ;;  %v3111_v39 = vmul.f32 %v9895_v43, %v9894_v35  ;;  %v9898_v40 = vld [vmem:[#allocation221_spill] sm:$0xff]  ;;  %v9900_v61 = vld [vmem:[#allocation72_spill] sm:$0xff] }
 0x39f   : > { %v8530_v22 = vpop.eup %5269  ;;  %5289 = vpow2.f32 %v8190_v45  ;;  %v8533_v14 = vadd.f32 %v3110_v53, %v2822_v29  ;;  %v2855_v11 = vadd.f32 %v9893_v58, %v2535_v6  ;;  %v2152_v47 = vmul.f32 %v8289_v33, %v9897_v48 }
 0x3a0   : > { %v8538_v13 = vpop.eup %5271  ;;  %5291 = vpow2.f32 %v8202_v41  ;;  %v9899_v56 = vsub.f32 %v9865_v55, %v9898_v40  ;;  %v2823_v32 = vadd.f32 %v2791_v62, %v2503_v37  ;;  %v2472_v45 = vmul.f32 %v8296_v34, %v9900_v61  ;;  %v9901_v41 = vld [vmem:[#allocation49_spill] sm:$0xff]  ;;  %v9903_v37 = vld [vmem:[#allocation51_spill] sm:$0xff]  ;;  %v9907_v40 = vld [vmem:[#allocation74_spill] sm:$0xff] }
 0x3a1   : > { %9896 = vst [vmem:[#allocation145_spill] sm:$0xff] %v8533_v14  ;;  %v8548_v53 = vpop.eup %5273  ;;  %5293 = vpow2.f32 %v8207_v46  ;;  %v8552_v29 = vadd.f32 %v9895_v43, %v2855_v11  ;;  %v2536_v6 = vadd.f32 %v8296_v34, %v8289_v33  ;;  %v2792_v7 = vmul.f32 %v8305_v19, %v9901_v41  ;;  %v9904_v43 = vld [vmem:[#allocation162_spill] sm:$0xff]  ;;  %v9905_v11 = vld [vmem:[#allocation204_spill] sm:$0xff]  ;;  %v9910_v61 = vld [vmem:[#allocation29_spill] sm:$0xff] }
 0x3a2   : > { %v8544_v24 = vmul.f32 -1.442695, %v9899_v56  ;;  %v8558_v55 = vpop.eup %5275  ;;  %5295 = vpow2.f32 %v8212_v12  ;;  %v8561_v58 = vadd.f32 %v3111_v39, %v2823_v32  ;;  %v2504_v62 = vadd.f32 %v2472_v45, %v2152_v47  ;;  %v9908_v47 = vld [vmem:[#allocation141_spill] sm:$0xff]  ;;  %v9909_v32 = vld [vmem:[#allocation76_spill] sm:$0xff] }
 0x3a3   : > { %v3112_v35 = vmul.f32 %v8315_v4, %v9903_v37  ;;  %v8565_v46 = vpop.eup %5277  ;;  %5297 = vpow2.f32 %v8220_v2  ;;  %v9906_v33 = vsub.f32 %v9904_v43, %v9905_v11  ;;  %v2856_v48 = vadd.f32 %v8305_v19, %v2536_v6  ;;  %v9911_v6 = vld [vmem:[#allocation53_spill] sm:$0xff]  ;;  %v9912_v37 = vld [vmem:[#allocation30_spill] sm:$0xff] }
 0x3a4   : > { %9902 = vst [vmem:[#allocation234_spill] sm:$0xff] %v8561_v58  ;;  %v2153_v12 = vmul.f32 %v8175_v17, %v9907_v40  ;;  %v8576_v39 = vpop.eup %5279  ;;  %5299 = vpow2.f32 %v9908_v47  ;;  %v2824_v56 = vadd.f32 %v2792_v7, %v2504_v62  ;;  %v2473_v45 = vmul.f32 %v9910_v61, %v9909_v32  ;;  %v9914_v40 = vld [vmem:[#allocation222_spill] sm:$0xff] }
 0x3a5   : > { %v8571_v34 = vmul.f32 -1.442695, %v9906_v33  ;;  %v2537_v2 = vadd.f32 %v9910_v61, %v8175_v17  ;;  %v8583_v41 = vpop.eup %5281  ;;  %5301 = vpow2.f32 %v8254_v3  ;;  %v8587_v19 = vadd.f32 %v8315_v4, %v2856_v48  ;;  %v9913_v33 = vld [vmem:[#allocation55_spill] sm:$0xff]  ;;  %v9915_v3 = vld [vmem:[#allocation206_spill] sm:$0xff] }
 0x3a6   : > { %v2793_v11 = vmul.f32 %v9912_v37, %v9911_v6  ;;  %v3113_v47 = vmul.f32 %v9914_v40, %v9913_v33  ;;  %v5284_v7 = vpop.eup %5283  ;;  %5303 = vpow2.f32 %v8270_v49  ;;  %v8594_v62 = vadd.f32 %v3112_v35, %v2824_v56  ;;  %v9917_v6 = vld [vmem:[#allocation78_spill] sm:$0xff] }
 0x3a7   : > { %v2505_v32 = vadd.f32 %v2473_v45, %v2153_v12  ;;  %v2857_v17 = vadd.f32 %v9912_v37, %v2537_v2  ;;  %v5286_v61 = vpop.eup %5285  ;;  %v2702_v58 = vadd.f32 1.0, %v5284_v7  ;;  %5305 = vpow2.f32 %v8277_v1  ;;  %v9918_v1 = vld [vmem:[#allocation80_spill] sm:$0xff] }
 0x3a8   : > { %v9916_v4 = vsub.f32 %v9904_v43, %v9915_v3  ;;  %v2154_v33 = vmul.f32 %v8381_v5, %v9917_v6  ;;  %v5288_v14 = vpop.eup %5287  ;;  %v3022_v30 = vadd.f32 1.0, %v5286_v61  ;;  %5307 = vpow2.f32 %v8339_v57  ;;  %v9919_v61 = vld [vmem:[#allocation178_spill] sm:$0xff] }
 0x3a9   : > { %v2825_v49 = vadd.f32 %v2793_v11, %v2505_v32  ;;  %v8607_v35 = vadd.f32 %v9914_v40, %v2857_v17  ;;  %v5290_v12 = vpop.eup %5289  ;;  %5309 = vrcp.f32 %v2702_v58  ;;  %v2065_v56 = vadd.f32 1.0, %v5288_v14  ;;  %v9921_v32 = vld [vmem:[#allocation57_spill] sm:$0xff] }
 0x3aa   : > { %v8601_v48 = vmul.f32 -1.442695, %v9916_v4  ;;  %v2474_v45 = vmul.f32 %v8387_v0, %v9918_v1  ;;  %v2538_v2 = vadd.f32 %v8387_v0, %v8381_v5  ;;  %v5292_v37 = vpop.eup %5291  ;;  %5311 = vrcp.f32 %v3022_v30  ;;  %v9922_v30 = vld [vmem:[#allocation59_spill] sm:$0xff] }
 0x3ab   : > { %v2385_v7 = vadd.f32 1.0, %v5290_v12  ;;  %v9920_v3 = vsub.f32 %v9904_v43, %v9919_v61  ;;  %v8618_v11 = vadd.f32 %v3113_v47, %v2825_v49  ;;  %v5294_v40 = vpop.eup %5293  ;;  %5313 = vrcp.f32 %v2065_v56  ;;  %v9923_v49 = vld [vmem:[#allocation82_spill] sm:$0xff] }
 0x3ac   : > { %v2705_v58 = vadd.f32 1.0, %v5292_v37  ;;  %v2506_v14 = vadd.f32 %v2474_v45, %v2154_v33  ;;  %v2794_v17 = vmul.f32 %v8399_v26, %v9921_v32  ;;  %v5296_v4 = vpop.eup %5295  ;;  %v3025_v0 = vadd.f32 1.0, %v5294_v40  ;;  %v9925_v32 = vld [vmem:[#allocation164_spill] sm:$0xff] }
 0x3ad   : > { %v8616_v57 = vmul.f32 -1.442695, %v9920_v3  ;;  %5315 = vrcp.f32 %v2385_v7  ;;  %v2858_v5 = vadd.f32 %v8399_v26, %v2538_v2  ;;  %v3114_v6 = vmul.f32 %v8409_v25, %v9922_v30  ;;  %v5298_v12 = vpop.eup %5297  ;;  %v9924_v7 = vld [vmem:[#allocation84_spill] sm:$0xff]  ;;  %v9927_v30 = vld [vmem:[#allocation61_spill] sm:$0xff] }
 0x3ae   : > { %5317 = vrcp.f32 %v2705_v58  ;;  %v2064_v1 = vadd.f32 1.0, %v5296_v4  ;;  %v2826_v47 = vadd.f32 %v2794_v17, %v2506_v14  ;;  %v2155_v56 = vmul.f32 %v8324_v28, %v9923_v49  ;;  %v5300_v37 = vpop.eup %5299  ;;  %v9929_v49 = vld [vmem:[#allocation86_spill] sm:$0xff] }
 0x3af   : > { %5319 = vrcp.f32 %v3025_v0  ;;  %v2384_v33 = vadd.f32 1.0, %v5298_v12  ;;  %v8628_v45 = vadd.f32 %v8409_v25, %v2858_v5  ;;  %v2475_v61 = vmul.f32 %v8333_v20, %v9924_v7  ;;  %v5302_v26 = vpop.eup %5301 }
 0x3b0   : > { %5321 = vrcp.f32 %v2064_v1  ;;  %v2704_v2 = vadd.f32 1.0, %v5300_v37  ;;  %v8632_v3 = vadd.f32 %v3114_v6, %v2826_v47  ;;  %v2539_v40 = vadd.f32 %v8333_v20, %v8324_v28  ;;  %v5304_v58 = vpop.eup %5303  ;;  %v9928_v20 = vld [vmem:[#allocation63_spill] sm:$0xff] }
 0x3b1   : > { %5323 = vrcp.f32 %v2384_v33  ;;  %v3024_v14 = vadd.f32 1.0, %v5302_v26  ;;  %v9926_v17 = vsub.f32 %v9904_v43, %v9925_v32  ;;  %v2507_v25 = vadd.f32 %v2475_v61, %v2155_v56  ;;  %v5306_v0 = vpop.eup %5305  ;;  %v9930_v26 = vld [vmem:[#allocation88_spill] sm:$0xff] }
 0x3b2   : > { %5325 = vrcp.f32 %v2704_v2  ;;  %v2067_v5 = vadd.f32 1.0, %v5304_v58  ;;  %v2795_v12 = vmul.f32 %v8351_v59, %v9927_v30  ;;  %v2859_v6 = vadd.f32 %v8351_v59, %v2539_v40  ;;  %v5308_v1 = vpop.eup %5307  ;;  %v9931_v40 = vld [vmem:[#allocation65_spill] sm:$0xff]  ;;  %v9932_v32 = vld [vmem:[#allocation200_spill] sm:$0xff] }
 0x3b3   : > { %v8639_v4 = vmul.f32 -1.442695, %v9926_v17  ;;  %5327 = vrcp.f32 %v3024_v14  ;;  %v2387_v28 = vadd.f32 1.0, %v5306_v0  ;;  %v3115_v47 = vmul.f32 %v8369_v31, %v9928_v20  ;;  %v5310_v37 = vpop.eup %5309  ;;  %v9933_v17 = vld [vmem:[#allocation201_spill] sm:$0xff]  ;;  %v9937_v20 = vld [vmem:[#allocation92_spill] sm:$0xff] }
 0x3b4   : > { %v2156_v43 = vmul.f32 %v8507_v18, %v9929_v49  ;;  %5329 = vrcp.f32 %v2067_v5  ;;  %v2707_v56 = vadd.f32 1.0, %v5308_v1  ;;  %v2827_v33 = vadd.f32 %v2795_v12, %v2507_v25  ;;  %v5312_v61 = vpop.eup %5311  ;;  %v9935_v5 = vld [vmem:[#allocation67_spill] sm:$0xff] }
 0x3b5   : > { %v8649_v7 = vadd.f32 %v8369_v31, %v2859_v6  ;;  %5331 = vrcp.f32 %v2387_v28  ;;  %v2476_v59 = vmul.f32 %v8515_v9, %v9930_v26  ;;  %v2540_v2 = vadd.f32 %v8515_v9, %v8507_v18  ;;  %v8657_v14 = vpop.eup %5313  ;;  %v9936_v6 = vld [vmem:[#allocation90_spill] sm:$0xff]  ;;  %v9939_v26 = vld [vmem:[#allocation71_spill] sm:$0xff] }
 0x3b6   : > { %v2796_v58 = vmul.f32 %v8522_v8, %v9931_v40  ;;  %5333 = vrcp.f32 %v2707_v56  ;;  %v9934_v25 = vsub.f32 %v9932_v32, %v9933_v17  ;;  %v8664_v31 = vadd.f32 %v3115_v47, %v2827_v33  ;;  %v9938_v56 = vld [vmem:[#allocation69_spill] sm:$0xff] }
 0x3b7   : > { %v3116_v30 = vmul.f32 %v8530_v22, %v9935_v5  ;;  %v8668_v12 = vpop.eup %5315  ;;  %5335 = vpow2.f32 %v8344_v63  ;;  %v2508_v18 = vadd.f32 %v2476_v59, %v2156_v43  ;;  %v2860_v9 = vadd.f32 %v8522_v8, %v2540_v2  ;;  %v9943_v5 = vld [vmem:[#allocation96_spill] sm:$0xff] }
 0x3b8   : > { %v8662_v0 = vmul.f32 -1.442695, %v9934_v25  ;;  %v2157_v1 = vmul.f32 %v8418_v52, %v9936_v6  ;;  %v8674_v28 = vpop.eup %5317  ;;  %5337 = vpow2.f32 %v8349_v16  ;;  %v2477_v47 = vmul.f32 %v8483_v44, %v9937_v20 }
 0x3b9   : > { %v2541_v49 = vadd.f32 %v8483_v44, %v8418_v52  ;;  %v2797_v33 = vmul.f32 %v8490_v27, %v9938_v56  ;;  %v8683_v63 = vpop.eup %5319  ;;  %5339 = vpow2.f32 %v8357_v23  ;;  %v2828_v8 = vadd.f32 %v2796_v58, %v2508_v18  ;;  %v9940_v44 = vld [vmem:[#allocation94_spill] sm:$0xff] }
 0x3ba   : > { %v8687_v43 = vadd.f32 %v8530_v22, %v2860_v9  ;;  %v3117_v16 = vmul.f32 %v8498_v50, %v9939_v26  ;;  %v5322_v59 = vpop.eup %5321  ;;  %5341 = vpow2.f32 %v8362_v21  ;;  %v2509_v2 = vadd.f32 %v2477_v47, %v2157_v1  ;;  %v9941_v23 = vld [vmem:[#allocation202_spill] sm:$0xff]  ;;  %v9945_v47 = vld [vmem:[#allocation75_spill] sm:$0xff] }
 0x3bb   : > { %v2861_v52 = vadd.f32 %v8490_v27, %v2541_v49  ;;  %v2158_v40 = vmul.f32 %v8576_v39, %v9940_v44  ;;  %v5324_v17 = vpop.eup %5323  ;;  %5343 = vpow2.f32 %v8367_v38  ;;  %v9942_v58 = vsub.f32 %v9932_v32, %v9941_v23 }
 0x3bc   : > { %v8701_v25 = vadd.f32 %v3116_v30, %v2828_v8  ;;  %v2478_v18 = vmul.f32 %v8583_v41, %v9943_v5  ;;  %v5326_v21 = vpop.eup %5325  ;;  %5345 = vpow2.f32 %v8375_v15  ;;  %v2829_v27 = vadd.f32 %v2797_v33, %v2509_v2  ;;  %v9944_v30 = vld [vmem:[#allocation73_spill] sm:$0xff]  ;;  %v9946_v8 = vld [vmem:[#allocation34_spill] sm:$0xff]  ;;  %v9952_v5 = vld [vmem:[#allocation203_spill] sm:$0xff] }
 0x3bd   : > { %v8699_v22 = vmul.f32 -1.442695, %v9942_v58  ;;  %v8707_v9 = vadd.f32 %v8498_v50, %v2861_v52  ;;  %v2542_v38 = vadd.f32 %v8583_v41, %v8576_v39  ;;  %v8711_v6 = vpop.eup %5327  ;;  %5347 = vpow2.f32 %v8393_v36  ;;  %v9947_v15 = vld [vmem:[#allocation158_spill] sm:$0xff]  ;;  %v9949_v36 = vld [vmem:[#allocation36_spill] sm:$0xff] }
 0x3be   : > { %v2510_v1 = vadd.f32 %v2478_v18, %v2158_v40  ;;  %v2798_v20 = vmul.f32 %v5310_v37, %v9944_v30  ;;  %v3118_v49 = vmul.f32 %v5312_v61, %v9945_v47  ;;  %v8716_v56 = vpop.eup %5329  ;;  %5349 = vpow2.f32 %v9946_v8  ;;  %v9950_v52 = vld [vmem:[#allocation98_spill] sm:$0xff]  ;;  %v9951_v40 = vld [vmem:[#allocation100_spill] sm:$0xff] }
 0x3bf   : > { %v9948_v50 = vsub.f32 %v9932_v32, %v9947_v15  ;;  %v8724_v26 = vadd.f32 %v3117_v16, %v2829_v27  ;;  %v2862_v39 = vadd.f32 %v5310_v37, %v2542_v38  ;;  %v8726_v41 = vpop.eup %5331  ;;  %5351 = vpow2.f32 %v9949_v36  ;;  %v9953_v16 = vld [vmem:[#allocation77_spill] sm:$0xff] }
 0x3c0   : > { %v2830_v2 = vadd.f32 %v2798_v20, %v2510_v1  ;;  %v2159_v44 = vmul.f32 %v8538_v13, %v9950_v52  ;;  %v2479_v23 = vmul.f32 %v8548_v53, %v9951_v40  ;;  %v8733_v58 = vpop.eup %5333  ;;  %5353 = vpow2.f32 %v9952_v5  ;;  %v9954_v20 = vld [vmem:[#allocation79_spill] sm:$0xff] }
 0x3c1   : > { %v8722_v33 = vmul.f32 -1.442695, %v9948_v50  ;;  %v8736_v18 = vadd.f32 %v5312_v61, %v2862_v39  ;;  %v2543_v37 = vadd.f32 %v8548_v53, %v8538_v13  ;;  %v2799_v27 = vmul.f32 %v8558_v55, %v9953_v16  ;;  %v5336_v38 = vpop.eup %5335  ;;  %v9955_v61 = vld [vmem:[#allocation161_spill] sm:$0xff] }
 0x3c2   : > { %5355 = vpow2.f32 %v8472_v42  ;;  %v8743_v1 = vadd.f32 %v3118_v49, %v2830_v2  ;;  %v2511_v30 = vadd.f32 %v2479_v23, %v2159_v44  ;;  %v3119_v47 = vmul.f32 %v8565_v46, %v9954_v20  ;;  %v5338_v8 = vpop.eup %5337  ;;  %v9957_v49 = vld [vmem:[#allocation102_spill] sm:$0xff] }
 0x3c3   : > { %v3027_v15 = vadd.f32 1.0, %v5336_v38  ;;  %5357 = vpow2.f32 %v8503_v10  ;;  %v9956_v50 = vsub.f32 %v9932_v32, %v9955_v61  ;;  %v2863_v53 = vadd.f32 %v8558_v55, %v2543_v37  ;;  %v5340_v39 = vpop.eup %5339  ;;  %v9958_v10 = vld [vmem:[#allocation104_spill] sm:$0xff] }
 0x3c4   : > { %v2066_v36 = vadd.f32 1.0, %v5338_v8  ;;  %5359 = vpow2.f32 %v8544_v24  ;;  %v2831_v42 = vadd.f32 %v2799_v27, %v2511_v30  ;;  %v2160_v2 = vmul.f32 %v5322_v59, %v9957_v49  ;;  %v5342_v52 = vpop.eup %5341  ;;  %v9959_v27 = vld [vmem:[#allocation228_spill] sm:$0xff] }
 0x3c5   : > { %v8751_v13 = vmul.f32 -1.442695, %v9956_v50  ;;  %5361 = vrcp.f32 %v3027_v15  ;;  %v2386_v44 = vadd.f32 1.0, %v5340_v39  ;;  %v8757_v40 = vadd.f32 %v8565_v46, %v2863_v53  ;;  %v5344_v32 = vpop.eup %5343  ;;  %v9960_v46 = vld [vmem:[#allocation81_spill] sm:$0xff]  ;;  %v9961_v39 = vld [vmem:[#allocation83_spill] sm:$0xff] }
 0x3c6   : > { %v2480_v23 = vmul.f32 %v5324_v17, %v9958_v10  ;;  %5363 = vrcp.f32 %v2066_v36  ;;  %v2706_v5 = vadd.f32 1.0, %v5342_v52  ;;  %v8760_v16 = vadd.f32 %v3119_v47, %v2831_v42  ;;  %v5346_v37 = vpop.eup %5345 }
 0x3c7   : > { %v2544_v55 = vadd.f32 %v5324_v17, %v5322_v59  ;;  %5365 = vrcp.f32 %v2386_v44  ;;  %v3026_v24 = vadd.f32 1.0, %v5344_v32  ;;  %v8763_v38 = vadd.f32 1e-06, %v9959_v27  ;;  %v5348_v20 = vpop.eup %5347  ;;  %v9962_v59 = vld [vmem:[#allocation106_spill] sm:$0xff] }
 0x3c8   : > { %v2512_v30 = vadd.f32 %v2480_v23, %v2160_v2  ;;  %5367 = vrcp.f32 %v2706_v5  ;;  %v2069_v8 = vadd.f32 1.0, %v5346_v37  ;;  %v2800_v15 = vmul.f32 %v5326_v21, %v9960_v46  ;;  %v5350_v50 = vpop.eup %5349 }
 0x3c9   : > { %v2864_v61 = vadd.f32 %v5326_v21, %v2544_v55  ;;  %5369 = vrcp.f32 %v3026_v24  ;;  %v2389_v53 = vadd.f32 1.0, %v5348_v20  ;;  %v3120_v47 = vmul.f32 %v8711_v6, %v9961_v39  ;;  %v5352_v36 = vpop.eup %5351  ;;  %v9963_v21 = vld [vmem:[#allocation108_spill] sm:$0xff]  ;;  %v9964_v55 = vld [vmem:[#allocation226_spill] sm:$0xff]  ;;  %v9965_v20 = vld [vmem:[#allocation85_spill] sm:$0xff] }
 0x3ca   : > { %v2161_v17 = vmul.f32 %v8657_v14, %v9962_v59  ;;  %5371 = vrcp.f32 %v2069_v8  ;;  %v2709_v42 = vadd.f32 1.0, %v5350_v50  ;;  %v2832_v49 = vadd.f32 %v2800_v15, %v2512_v30  ;;  %v5354_v52 = vpop.eup %5353 }
 0x3cb   : > { %v8771_v2 = vadd.f32 %v8711_v6, %v2864_v61  ;;  %5373 = vrcp.f32 %v2389_v53  ;;  %v3029_v44 = vadd.f32 1.0, %v5352_v36  ;;  %v2481_v10 = vmul.f32 %v8668_v12, %v9963_v21  ;;  %v9969_v21 = vld [vmem:[#allocation110_spill] sm:$0xff] }
 0x3cc   : > { %v2545_v23 = vadd.f32 %v8668_v12, %v8657_v14  ;;  %v5356_v32 = vpop.eup %5355  ;;  %5375 = vrcp.f32 %v2709_v42  ;;  %v2068_v5 = vadd.f32 1.0, %v5354_v52  ;;  %v8778_v37 = vadd.f32 1e-06, %v9964_v55  ;;  %v9966_v12 = vld [vmem:[#allocation87_spill] sm:$0xff]  ;;  %v9968_v42 = vld [vmem:[#allocation116_spill] sm:$0xff]  ;;  %v9972_v55 = vld [vmem:[#allocation210_spill] sm:$0xff] }
 0x3cd   : > { %v8780_v24 = vadd.f32 %v3120_v47, %v2832_v49  ;;  %v5358_v27 = vpop.eup %5357  ;;  %5377 = vrcp.f32 %v3029_v44  ;;  %v2388_v6 = vadd.f32 1.0, %v5356_v32  ;;  %v2513_v30 = vadd.f32 %v2481_v10, %v2161_v17  ;;  %v9967_v47 = vld [vmem:[#allocation114_spill] sm:$0xff] }
 0x3ce   : > { %v2801_v8 = vmul.f32 %v8674_v28, %v9965_v20  ;;  %v5360_v46 = vpop.eup %5359  ;;  %5379 = vrcp.f32 %v2068_v5  ;;  %v2708_v15 = vadd.f32 1.0, %v5358_v27  ;;  %v2865_v14 = vadd.f32 %v8674_v28, %v2545_v23  ;;  %v9970_v23 = vld [vmem:[#allocation93_spill] sm:$0xff] }
 0x3cf   : > { %v3121_v61 = vmul.f32 %v8683_v63, %v9966_v12  ;;  %v5362_v50 = vpop.eup %5361  ;;  %5381 = vrcp.f32 %v2388_v6  ;;  %v3028_v53 = vadd.f32 1.0, %v5360_v46  ;;  %v2163_v59 = vmul.f32 %v8716_v56, %v9967_v47 }
 0x3d0   : > { %v2833_v39 = vadd.f32 %v2801_v8, %v2513_v30  ;;  %v5364_v36 = vpop.eup %5363  ;;  %5383 = vrcp.f32 %v2708_v15  ;;  %v8790_v17 = vadd.f32 %v8683_v63, %v2865_v14  ;;  %v2483_v49 = vmul.f32 %v8726_v41, %v9968_v42  ;;  %v9971_v63 = vld [vmem:[#allocation186_spill] sm:$0xff]  ;;  %v9974_v30 = vld [vmem:[#allocation112_spill] sm:$0xff] }
 0x3d1   : > { %v2547_v28 = vadd.f32 %v8726_v41, %v8716_v56  ;;  %v5366_v52 = vpop.eup %5365  ;;  %5385 = vrcp.f32 %v3028_v53  ;;  %v2162_v10 = vmul.f32 %v5364_v36, %v9969_v21  ;;  %v2803_v32 = vmul.f32 %v8733_v58, %v9970_v23  ;;  %v9975_v41 = vld [vmem:[#allocation89_spill] sm:$0xff]  ;;  %v9976_v53 = vld [vmem:[#allocation91_spill] sm:$0xff] }
 0x3d2   : > { %v8796_v44 = vadd.f32 %v3121_v61, %v2833_v39  ;;  %v5368_v5 = vpop.eup %5367  ;;  %5387 = vpow2.f32 %v8571_v34  ;;  %v9973_v27 = vsub.f32 %v9971_v63, %v9972_v55  ;;  %v2482_v20 = vmul.f32 %v5366_v52, %v9974_v30 }
 0x3d3   : > { %v2546_v8 = vadd.f32 %v5366_v52, %v5364_v36  ;;  %v5370_v56 = vpop.eup %5369  ;;  %5389 = vpow2.f32 %v8601_v48  ;;  %v2802_v46 = vmul.f32 %v5368_v5, %v9975_v41  ;;  %v2515_v15 = vadd.f32 %v2483_v49, %v2163_v59  ;;  %v9977_v36 = vld [vmem:[#allocation95_spill] sm:$0xff]  ;;  %v9978_v49 = vld [vmem:[#allocation122_spill] sm:$0xff] }
 0x3d4   : > { %v4092_v6 = vmul.f32 -1.442695, %v9973_v27  ;;  %v2867_v14 = vadd.f32 %v8733_v58, %v2547_v28  ;;  %v5372_v12 = vpop.eup %5371  ;;  %5391 = vpow2.f32 %v8616_v57  ;;  %v2514_v61 = vadd.f32 %v2482_v20, %v2162_v10  ;;  %v9979_v10 = vld [vmem:[#allocation212_spill] sm:$0xff] }
 0x3d5   : > { %v2866_v34 = vadd.f32 %v5368_v5, %v2546_v8  ;;  %v3122_v39 = vmul.f32 %v5370_v56, %v9976_v53  ;;  %v5374_v47 = vpop.eup %5373  ;;  %5393 = vpow2.f32 %v8639_v4  ;;  %v2835_v42 = vadd.f32 %v2803_v32, %v2515_v15  ;;  %v9981_v5 = vld [vmem:[#allocation124_spill] sm:$0xff]  ;;  %v9985_v15 = vld [vmem:[#allocation101_spill] sm:$0xff] }
 0x3d6   : > { %v3123_v52 = vmul.f32 %v5362_v50, %v9977_v36  ;;  %v8813_v21 = vadd.f32 %v5362_v50, %v2867_v14  ;;  %v5376_v48 = vpop.eup %5375  ;;  %5395 = vpow2.f32 %v8662_v0  ;;  %v2834_v59 = vadd.f32 %v2802_v46, %v2514_v61  ;;  %v9982_v0 = vld [vmem:[#allocation181_spill] sm:$0xff] }
 0x3d7   : > { %v8816_v58 = vadd.f32 %v5370_v56, %v2866_v34  ;;  %v2165_v57 = vmul.f32 %v5372_v12, %v9978_v49  ;;  %v5378_v28 = vpop.eup %5377  ;;  %5397 = vpow2.f32 %v8699_v22  ;;  %v9980_v23 = vsub.f32 %v9971_v63, %v9979_v10  ;;  %v9984_v22 = vld [vmem:[#allocation118_spill] sm:$0xff]  ;;  %v9986_v34 = vld [vmem:[#allocation120_spill] sm:$0xff]  ;;  %v9989_v10 = vld [vmem:[#allocation99_spill] sm:$0xff] }
 0x3d8   : > { %v8823_v32 = vadd.f32 %v3123_v52, %v2835_v42  ;;  %v2485_v50 = vmul.f32 %v5374_v47, %v9981_v5  ;;  %v5380_v55 = vpop.eup %5379  ;;  %5399 = vpow2.f32 %v8722_v33  ;;  %v9983_v27 = vsub.f32 %v9971_v63, %v9982_v0  ;;  %v9988_v52 = vld [vmem:[#allocation103_spill] sm:$0xff] }
 0x3d9   : > { %v4124_v4 = vmul.f32 -1.442695, %v9980_v23  ;;  %v8830_v20 = vadd.f32 %v3122_v39, %v2834_v59  ;;  %v2549_v8 = vadd.f32 %v5374_v47, %v5372_v12  ;;  %v5382_v56 = vpop.eup %5381  ;;  %5401 = vpow2.f32 %v8751_v13  ;;  %v9987_v39 = vld [vmem:[#allocation97_spill] sm:$0xff] }
 0x3da   : > { %v4156_v30 = vmul.f32 -1.442695, %v9983_v27  ;;  %v2164_v41 = vmul.f32 %v5380_v55, %v9984_v22  ;;  %v2517_v46 = vadd.f32 %v2485_v50, %v2165_v57  ;;  %v2805_v14 = vmul.f32 %v5376_v48, %v9985_v15  ;;  %v5384_v61 = vpop.eup %5383 }
 0x3db   : > { %5403 = vrcp.f32 %v8778_v37  ;;  %v2484_v33 = vmul.f32 %v5382_v56, %v9986_v34  ;;  %v2548_v53 = vadd.f32 %v5382_v56, %v5380_v55  ;;  %v2869_v42 = vadd.f32 %v5376_v48, %v2549_v8  ;;  %v5386_v36 = vpop.eup %5385  ;;  %v9991_v34 = vld [vmem:[#allocation207_spill] sm:$0xff] }
 0x3dc   : > { %5405 = vrcp.f32 %v8763_v38  ;;  %v2804_v12 = vmul.f32 %v5384_v61, %v9987_v39  ;;  %v2837_v47 = vadd.f32 %v2805_v14, %v2517_v46  ;;  %v3125_v13 = vmul.f32 %v5378_v28, %v9988_v52  ;;  %v5388_v59 = vpop.eup %5387  ;;  %v9993_v39 = vld [vmem:[#allocation208_spill] sm:$0xff] }
 0x3dd   : > { %5407 = vpow2.f32 %v4092_v6  ;;  %v2516_v49 = vadd.f32 %v2484_v33, %v2164_v41  ;;  %v2868_v57 = vadd.f32 %v5384_v61, %v2548_v53  ;;  %v3124_v23 = vmul.f32 %v5386_v36, %v9989_v10  ;;  %v5390_v5 = vpop.eup %5389  ;;  %v9990_v61 = vld [vmem:[#allocation140_spill] sm:$0xff] }
 0x3de   : > { %v2071_v37 = vadd.f32 1.0, %v5388_v59  ;;  %5409 = vpow2.f32 %v4124_v4  ;;  %v8841_v50 = vadd.f32 %v3125_v13, %v2837_v47  ;;  %v8843_v48 = vadd.f32 %v5378_v28, %v2869_v42  ;;  %v5392_v55 = vpop.eup %5391  ;;  %v9995_v13 = vld [vmem:[#allocation28_spill] sm:$0xff] }
 0x3df   : > { %v2391_v38 = vadd.f32 1.0, %v5390_v5  ;;  %5411 = vpow2.f32 %v4156_v30  ;;  %v2836_v0 = vadd.f32 %v2804_v12, %v2516_v49  ;;  %v8845_v27 = vadd.f32 %v5386_v36, %v2868_v57  ;;  %v5394_v8 = vpop.eup %5393  ;;  %v9996_v57 = vld [vmem:[#allocation227_spill] sm:$0xff] }
 0x3e0   : > { %5413 = vrcp.f32 %v2071_v37  ;;  %v2711_v6 = vadd.f32 1.0, %v5392_v55  ;;  %v5396_v56 = vpop.eup %5395  ;;  %v3031_v22 = vadd.f32 1.0, %v5394_v8  ;;  %v9992_v33 = vsub.f32 %v9990_v61, %v9991_v34 }
 0x3e1   : > { %5415 = vrcp.f32 %v2391_v38  ;;  %v8847_v41 = vadd.f32 %v3124_v23, %v2836_v0  ;;  %v5398_v46 = vpop.eup %5397  ;;  %v2070_v4 = vadd.f32 1.0, %v5396_v56  ;;  %v9994_v12 = vsub.f32 %v9990_v61, %v9993_v39  ;;  %v9997_v38 = vld [vmem:[#allocation184_spill] sm:$0xff]  ;;  %v10005_v39 = vld [vmem:[#allocation130_spill] sm:$0xff] }
 0x3e2   : > { %5417 = vrcp.f32 %v2711_v6  ;;  %v5400_v15 = vpop.eup %5399  ;;  %v2390_v28 = vadd.f32 1.0, %v5398_v46  ;;  %v4091_v53 = vmul.f32 -1.442695, %v9992_v33  ;;  %v9998_v0 = vsub.f32 %v9990_v61, %v9997_v38 }
 0x3e3   : > { %5419 = vrcp.f32 %v3031_v22  ;;  %v5402_v14 = vpop.eup %5401  ;;  %v2710_v30 = vadd.f32 1.0, %v5400_v15  ;;  %v4123_v47 = vmul.f32 -1.442695, %v9994_v12  ;;  %v9999_v22 = vld [vmem:[#allocation185_spill] sm:$0xff] }
 0x3e4   : > { %5421 = vrcp.f32 %v2070_v4  ;;  %v3030_v36 = vadd.f32 1.0, %v5402_v14  ;;  %v4155_v8 = vmul.f32 -1.442695, %v9998_v0  ;;  %v10000_v46 = vsub.f32 %v9990_v61, %v9999_v22  ;;  %v10011_v0 = vld [vmem:[#allocation111_spill] sm:$0xff] }
 0x3e5   : > { %v5404_v42 = vpop.eup %5403  ;;  %5423 = vrcp.f32 %v2390_v28  ;;  %v10001_v28 = vld [vmem:[#allocation229_spill] sm:$0xff] }
 0x3e6   : > { %v5406_v52 = vpop.eup %5405  ;;  %5425 = vrcp.f32 %v2710_v30  ;;  %v3229_v59 = vmul.f32 %v5404_v42, %v9995_v13  ;;  %v4187_v4 = vmul.f32 -1.442695, %v10000_v46  ;;  %v3198_v14 = vadd.f32 1e-06, %v10001_v28  ;;  %v10002_v30 = vld [vmem:[#allocation129_spill] sm:$0xff]  ;;  %v10006_v13 = vld [vmem:[#allocation182_spill] sm:$0xff] }
 0x3e7   : > { %v5408_v49 = vpop.eup %5407  ;;  %5427 = vrcp.f32 %v3030_v36  ;;  %v3231_v10 = vmul.f32 %v5406_v52, %v9996_v57  ;;  %v3199_v61 = vadd.f32 1e-06, %v10006_v13  ;;  %v10014_v46 = vld [vmem:[#allocation169_spill] sm:$0xff] }
 0x3e8   : > { %v5410_v23 = vpop.eup %5409  ;;  %4536 = vmatprep.mubr.f32.mxu1 %v3229_v59  ;;  %v2073_v5 = vadd.f32 1.0, %v5408_v49  ;;  %5429 = vpow2.f32 %v4091_v53  ;;  %v10003_v53 = vld [vmem:[#allocation142_spill] sm:$0xff]  ;;  %v10007_v59 = vld [vmem:[#allocation32_spill] sm:$0xff]  ;;  %v10008_v49 = vld [vmem:[#allocation215_spill] sm:$0xff] }
 0x3e9   : > { %v5412_v37 = vpop.eup %5411  ;;  %4537 = vmatmul.mubr.f32.vlgmr.msra.gmra.mrb[112].mxu1 %v3231_v10  ;;  %v2393_v55 = vadd.f32 1.0, %v5410_v23  ;;  %5431 = vpow2.f32 %v4123_v47  ;;  %v10004_v42 = vsub.f32 %v9971_v63, %v10003_v53  ;;  %v10009_v57 = vsub.f32 %v10007_v59, %v10008_v49  ;;  %v10010_v23 = vld [vmem:[#allocation109_spill] sm:$0xff] }
 0x3ea   : > { %v5414_v6 = vpop.eup %5413  ;;  %5433 = vrcp.f32 %v2073_v5  ;;  %v2713_v56 = vadd.f32 1.0, %v5412_v37 }
 0x3eb   : > { %v5416_v15 = vpop.eup %5415  ;;  %5435 = vrcp.f32 %v2393_v55  ;;  %v2167_v34 = vmul.f32 %v5414_v6, %v10002_v30  ;;  %v4188_v36 = vmul.f32 -1.442695, %v10004_v42  ;;  %v4094_v10 = vmul.f32 -1.442695, %v10009_v57  ;;  %v10016_v30 = vld [vmem:[#allocation126_spill] sm:$0xff]  ;;  %v10021_v57 = vld [vmem:[#allocation105_spill] sm:$0xff] }
 0x3ec   : > { %v5418_v33 = vpop.eup %5417  ;;  %5437 = vrcp.f32 %v2713_v56  ;;  %v2487_v12 = vmul.f32 %v5416_v15, %v10005_v39  ;;  %v2551_v47 = vadd.f32 %v5416_v15, %v5414_v6  ;;  %v10012_v6 = vld [vmem:[#allocation216_spill] sm:$0xff]  ;;  %v10015_v15 = vsub.f32 %v10007_v59, %v10014_v46 }
 0x3ed   : > { %v5420_v52 = vpop.eup %5419  ;;  %5439 = vpow2.f32 %v4155_v8  ;;  %v2807_v5 = vmul.f32 %v5418_v33, %v10010_v23  ;;  %v10013_v22 = vsub.f32 %v10007_v59, %v10012_v6  ;;  %v10017_v39 = vld [vmem:[#allocation128_spill] sm:$0xff] }
 0x3ee   : > { %v5422_v37 = vpop.eup %5421  ;;  %5441 = vpow2.f32 %v4187_v4  ;;  %v2519_v55 = vadd.f32 %v2487_v12, %v2167_v34  ;;  %v2871_v38 = vadd.f32 %v5418_v33, %v2551_v47  ;;  %v3127_v63 = vmul.f32 %v5420_v52, %v10011_v0  ;;  %v10018_v47 = vld [vmem:[#allocation143_spill] sm:$0xff] }
 0x3ef   : > { %v5424_v56 = vpop.eup %5423  ;;  %5443 = vrcp.f32 %v3198_v14  ;;  %v4126_v8 = vmul.f32 -1.442695, %v10013_v22  ;;  %v4158_v28 = vmul.f32 -1.442695, %v10015_v15  ;;  %v2166_v53 = vmul.f32 %v5422_v37, %v10016_v30  ;;  %v10019_v14 = vld [vmem:[#allocation213_spill] sm:$0xff]  ;;  %v10022_v15 = vld [vmem:[#allocation107_spill] sm:$0xff] }
 0x3f0   : > { %v5426_v42 = vpop.eup %5425  ;;  %5445 = vpow2.f32 %v4188_v36  ;;  %v2486_v4 = vmul.f32 %v5424_v56, %v10017_v39  ;;  %v2550_v34 = vadd.f32 %v5424_v56, %v5422_v37  ;;  %v2839_v33 = vadd.f32 %v2807_v5, %v2519_v55  ;;  %v10023_v5 = vld [vmem:[#allocation214_spill] sm:$0xff] }
 0x3f1   : > { %v5428_v12 = vpop.eup %5427  ;;  %5447 = vrcp.f32 %v3199_v61  ;;  %v10020_v13 = vsub.f32 %v10018_v47, %v10019_v14  ;;  %v2806_v23 = vmul.f32 %v5426_v42, %v10021_v57  ;;  %v8887_v0 = vadd.f32 %v5420_v52, %v2871_v38 }
 0x3f2   : > { %v5430_v6 = vpop.eup %5429  ;;  %5449 = vpow2.f32 %v4094_v10  ;;  %v2518_v22 = vadd.f32 %v2486_v4, %v2166_v53  ;;  %v2870_v46 = vadd.f32 %v5426_v42, %v2550_v34  ;;  %v3126_v36 = vmul.f32 %v5428_v12, %v10022_v15  ;;  %v10025_v53 = vld [vmem:[#allocation31_spill] sm:$0xff]  ;;  %v10027_v34 = vld [vmem:[#allocation133_spill] sm:$0xff] }
 0x3f3   : > { %v4093_v49 = vmul.f32 -1.442695, %v10020_v13  ;;  %v5432_v30 = vpop.eup %5431  ;;  %v2072_v39 = vadd.f32 1.0, %v5430_v6  ;;  %5451 = vpow2.f32 %v4126_v8  ;;  %v10024_v61 = vsub.f32 %v10018_v47, %v10023_v5 }
 0x3f4   : > { %v8893_v55 = vadd.f32 %v3127_v63, %v2839_v33  ;;  %v5434_v56 = vpop.eup %5433  ;;  %v2392_v14 = vadd.f32 1.0, %v5432_v30  ;;  %5453 = vpow2.f32 %v4158_v28  ;;  %v2838_v52 = vadd.f32 %v2806_v23, %v2518_v22  ;;  %v10028_v33 = vld [vmem:[#allocation134_spill] sm:$0xff]  ;;  %v10029_v23 = vld [vmem:[#allocation117_spill] sm:$0xff]  ;;  %v10030_v30 = vld [vmem:[#allocation236_spill] sm:$0xff] }
 0x3f5   : > { %v4125_v37 = vmul.f32 -1.442695, %v10024_v61  ;;  %v8895_v38 = vadd.f32 %v5428_v12, %v2870_v46  ;;  %v5436_v10 = vpop.eup %5435  ;;  %5455 = vrcp.f32 %v2072_v39  ;;  %v10026_v42 = vsub.f32 %v10018_v47, %v10025_v53 }
 0x3f6   : > { %v2169_v8 = vmul.f32 %v5434_v56, %v10027_v34  ;;  %v5438_v13 = vpop.eup %5437  ;;  %v2553_v57 = vadd.f32 %v5436_v10, %v5434_v56  ;;  %5457 = vrcp.f32 %v2392_v14  ;;  %v8901_v6 = vadd.f32 %v3126_v36, %v2838_v52 }
 0x3f7   : > { %v4157_v4 = vmul.f32 -1.442695, %v10026_v42  ;;  %v5440_v63 = vpop.eup %5439  ;;  %5459 = vpow2.f32 %v4093_v49  ;;  %v2489_v28 = vmul.f32 %v5436_v10, %v10028_v33  ;;  %v2809_v12 = vmul.f32 %v5438_v13, %v10029_v23  ;;  %v10032_v49 = vld [vmem:[#allocation220_spill] sm:$0xff] }
 0x3f8   : > { %v5442_v22 = vpop.eup %5441  ;;  %v8905_v46 = vadd.f32 %v5438_v13, %v2553_v57  ;;  %v2712_v15 = vadd.f32 1.0, %v5440_v63  ;;  %5461 = vpow2.f32 %v4125_v37  ;;  %v10031_v39 = vsub.f32 %v10018_v47, %v10030_v30  ;;  %v10033_v10 = vld [vmem:[#allocation224_spill] sm:$0xff]  ;;  %v10034_v57 = vld [vmem:[#allocation223_spill] sm:$0xff]  ;;  %v10037_v30 = vld [vmem:[#allocation170_spill] sm:$0xff] }
 0x3f9   : > { %v5444_v61 = vpop.eup %5443  ;;  %v3032_v56 = vadd.f32 1.0, %v5442_v22  ;;  %5463 = vpow2.f32 %v4157_v4  ;;  %v2521_v36 = vadd.f32 %v2489_v28, %v2169_v8  ;;  %v3200_v53 = vadd.f32 1e-06, %v10033_v10  ;;  %v10035_v28 = vld [vmem:[#allocation144_spill] sm:$0xff] }
 0x3fa   : > { %v4189_v5 = vmul.f32 -1.442695, %v10031_v39  ;;  %v5446_v14 = vpop.eup %5445  ;;  %5465 = vrcp.f32 %v2712_v15  ;;  %v3233_v52 = vmul.f32 %v5444_v61, %v10032_v49  ;;  %v10036_v23 = vsub.f32 %v10007_v59, %v10035_v28  ;;  %v10042_v28 = vld [vmem:[#allocation113_spill] sm:$0xff] }
 0x3fb   : > { %v5448_v42 = vpop.eup %5447  ;;  %5467 = vrcp.f32 %v3032_v56  ;;  %v3033_v34 = vadd.f32 1.0, %v5446_v14  ;;  %v8912_v13 = vadd.f32 %v2809_v12, %v2521_v36  ;;  %v3201_v39 = vadd.f32 1e-06, %v10037_v30  ;;  %v10038_v56 = vld [vmem:[#allocation131_spill] sm:$0xff]  ;;  %v10039_v14 = vld [vmem:[#allocation132_spill] sm:$0xff]  ;;  %v10043_v30 = vld [vmem:[#allocation205_spill] sm:$0xff] }
 0x3fc   : > { %v5450_v37 = vpop.eup %5449  ;;  %4539 = vmatprep.mubr.f32.mxu1 %v3233_v52  ;;  %v3235_v47 = vmul.f32 %v5448_v42, %v10034_v57  ;;  %5469 = vpow2.f32 %v4189_v5  ;;  %v4190_v22 = vmul.f32 -1.442695, %v10036_v23 }
 0x3fd   : > { %v5452_v63 = vpop.eup %5451  ;;  %5471 = vrcp.f32 %v3033_v34  ;;  %v2075_v4 = vadd.f32 1.0, %v5450_v37  ;;  %v10040_v34 = vld [vmem:[#allocation157_spill] sm:$0xff] }
 0x3fe   : > { %v5454_v8 = vpop.eup %5453  ;;  %4540 = vmatmul.mubr.f32.gmra.mrb[114].mxu1 %v3235_v47  ;;  %v2395_v33 = vadd.f32 1.0, %v5452_v63  ;;  %5473 = vrcp.f32 %v3200_v53  ;;  %v3202_v37 = vadd.f32 1e-06, %v10040_v34 }
 0x3ff   : > { %v5456_v15 = vpop.eup %5455  ;;  %5475 = vrcp.f32 %v2075_v4  ;;  %v2715_v12 = vadd.f32 1.0, %v5454_v8  ;;  %v10041_v4 = vld [vmem:[#allocation232_spill] sm:$0xff] }
 0x400   : > { %v5458_v61 = vpop.eup %5457  ;;  %5477 = vrcp.f32 %v2395_v33  ;;  %v2168_v5 = vmul.f32 %v5456_v15, %v10038_v56  ;;  %v3203_v8 = vadd.f32 1e-06, %v10041_v4 }
 0x401   : > { %v5460_v36 = vpop.eup %5459  ;;  %5479 = vrcp.f32 %v2715_v12  ;;  %v2488_v49 = vmul.f32 %v5458_v61, %v10039_v14  ;;  %v2552_v52 = vadd.f32 %v5458_v61, %v5456_v15  ;;  %v3205_v61 = vadd.f32 1e-06, %v8486_v60  ;;  %v10046_v60 = vld [vmem:[#allocation173_spill] sm:$0xff] }
 0x402   : > { %v5462_v10 = vpop.eup %5461  ;;  %v2074_v53 = vadd.f32 1.0, %v5460_v36  ;;  %5481 = vpow2.f32 %v4190_v22  ;;  %v3204_v22 = vadd.f32 1e-06, %v10043_v30  ;;  %v3210_v30 = vadd.f32 1e-06, %v8628_v45 }
 0x403   : > { %v5464_v42 = vpop.eup %5463  ;;  %v2394_v59 = vadd.f32 1.0, %v5462_v10  ;;  %5483 = vrcp.f32 %v3201_v39  ;;  %v2520_v57 = vadd.f32 %v2488_v49, %v2168_v5  ;;  %v10044_v39 = vld [vmem:[#allocation115_spill] sm:$0xff] }
 0x404   : > { %v5466_v47 = vpop.eup %5465  ;;  %5485 = vrcp.f32 %v2074_v53  ;;  %v2714_v63 = vadd.f32 1.0, %v5464_v42  ;;  %v10045_v42 = vld [vmem:[#allocation119_spill] sm:$0xff] }
 0x405   : > { %v5468_v33 = vpop.eup %5467  ;;  %5487 = vrcp.f32 %v2394_v59  ;;  %v2808_v23 = vmul.f32 %v5466_v47, %v10042_v28  ;;  %v2872_v12 = vadd.f32 %v5466_v47, %v2552_v52  ;;  %v3206_v52 = vadd.f32 1e-06, %v8526_v54 }
 0x406   : > { %v5470_v15 = vpop.eup %5469  ;;  %5489 = vrcp.f32 %v2714_v63  ;;  %v3128_v56 = vmul.f32 %v5468_v33, %v10044_v39  ;;  %v3207_v63 = vadd.f32 1e-06, %v8552_v29  ;;  %v3209_v29 = vadd.f32 1e-06, %v8607_v35 }
 0x407   : > { %v5472_v36 = vpop.eup %5471  ;;  %v3034_v5 = vadd.f32 1.0, %v5470_v15  ;;  %5491 = vrcp.f32 %v3202_v37  ;;  %v2840_v14 = vadd.f32 %v2808_v23, %v2520_v57  ;;  %v8927_v49 = vadd.f32 %v5468_v33, %v2872_v12  ;;  %v10048_v23 = vld [vmem:[#allocation138_spill] sm:$0xff] }
 0x408   : > { %v5474_v10 = vpop.eup %5473  ;;  %v8930_v53 = vadd.f32 %v5472_v36, %v8905_v46  ;;  %5493 = vrcp.f32 %v3203_v8  ;;  %v3129_v59 = vmul.f32 %v5472_v36, %v10045_v42  ;;  %v3208_v57 = vadd.f32 1e-06, %v8587_v19  ;;  %v10047_v8 = vld [vmem:[#allocation137_spill] sm:$0xff] }
 0x409   : > { %v5476_v34 = vpop.eup %5475  ;;  %5495 = vrcp.f32 %v3034_v5  ;;  %v3237_v47 = vmul.f32 %v5474_v10, %v10046_v60  ;;  %v8936_v4 = vadd.f32 %v3128_v56, %v2840_v14  ;;  %v10050_v14 = vld [vmem:[#allocation174_spill] sm:$0xff]  ;;  %v3212_v35 = vadd.f32 1e-06, %v8687_v43 }
 0x40a   : > { %v5478_v37 = vpop.eup %5477  ;;  %5497 = vrcp.f32 %v3204_v22  ;;  %v8940_v46 = vadd.f32 %v3129_v59, %v8912_v13  ;;  %v2171_v33 = vmul.f32 %v5476_v34, %v10047_v8  ;;  %v10049_v22 = vld [vmem:[#allocation125_spill] sm:$0xff]  ;;  %v3213_v60 = vadd.f32 1e-06, %v8707_v9 }
 0x40b   : > { %v5480_v54 = vpop.eup %5479  ;;  %v2555_v28 = vadd.f32 %v5478_v37, %v5476_v34  ;;  %4542 = vmatprep.mubr.f32.mxu1 %v3237_v47  ;;  %5499 = vrcp.f32 %v3205_v61  ;;  %v2491_v12 = vmul.f32 %v5478_v37, %v10048_v23  ;;  %v3211_v61 = vadd.f32 1e-06, %v8649_v7  ;;  %v10052_v47 = vld [vmem:[#allocation136_spill] sm:$0xff] }
 0x40c   : > { %v5482_v15 = vpop.eup %5481  ;;  %5501 = vrcp.f32 %v3206_v52  ;;  %v2811_v39 = vmul.f32 %v5480_v54, %v10049_v22  ;;  %v10051_v52 = vld [vmem:[#allocation135_spill] sm:$0xff]  ;;  %v3214_v7 = vadd.f32 1e-06, %v8736_v18  ;;  %v10055_v22 = vld [vmem:[#allocation190_spill] sm:$0xff] }
 0x40d   : > { %v5484_v19 = vpop.eup %5483  ;;  %v8947_v56 = vadd.f32 %v5480_v54, %v2555_v28  ;;  %v3035_v13 = vadd.f32 1.0, %v5482_v15  ;;  %5503 = vrcp.f32 %v3207_v63  ;;  %v2523_v36 = vadd.f32 %v2491_v12, %v2171_v33  ;;  %v10053_v33 = vld [vmem:[#allocation121_spill] sm:$0xff]  ;;  %v10054_v28 = vld [vmem:[#allocation230_spill] sm:$0xff] }
 0x40e   : > { %v5486_v5 = vpop.eup %5485  ;;  %v3239_v10 = vmul.f32 %v5484_v19, %v10050_v14  ;;  %5505 = vrcp.f32 %v3208_v57  ;;  %v3215_v57 = vadd.f32 1e-06, %v8757_v40  ;;  %v10056_v40 = vld [vmem:[#allocation123_spill] sm:$0xff] }
 0x40f   : > { %v5488_v42 = vpop.eup %5487  ;;  %5507 = vrcp.f32 %v3035_v13  ;;  %v2170_v45 = vmul.f32 %v5486_v5, %v10051_v52  ;;  %v8953_v59 = vadd.f32 %v2811_v39, %v2523_v36  ;;  %v3216_v39 = vadd.f32 1e-06, %v8771_v2 }
 0x410   : > { %v5490_v34 = vpop.eup %5489  ;;  %4543 = vmatmul.mubr.f32.gmra.mrb[116].mxu1 %v3239_v10  ;;  %5509 = vrcp.f32 %v3209_v29  ;;  %v2490_v63 = vmul.f32 %v5488_v42, %v10052_v47  ;;  %v2554_v37 = vadd.f32 %v5488_v42, %v5486_v5  ;;  %v3218_v10 = vadd.f32 1e-06, %v8816_v58  ;;  %v10057_v42 = vld [vmem:[#allocation191_spill] sm:$0xff] }
 0x411   : > { %v5492_v8 = vpop.eup %5491  ;;  %5511 = vrcp.f32 %v3210_v30  ;;  %v2810_v43 = vmul.f32 %v5490_v34, %v10053_v33  ;;  %v3217_v30 = vadd.f32 1e-06, %v8790_v17  ;;  %v3219_v2 = vadd.f32 1e-06, %v8813_v21  ;;  %v10060_v33 = vld [vmem:[#allocation127_spill] sm:$0xff] }
 0x412   : > { %v5494_v54 = vpop.eup %5493  ;;  %v3241_v23 = vmul.f32 %v5492_v8, %v10054_v28  ;;  %5513 = vrcp.f32 %v3211_v61  ;;  %v2522_v12 = vadd.f32 %v2490_v63, %v2170_v45  ;;  %v2874_v15 = vadd.f32 %v5490_v34, %v2554_v37  ;;  %v10058_v45 = vld [vmem:[#allocation145_spill] sm:$0xff] }
 0x413   : > { %v5496_v29 = vpop.eup %5495  ;;  %v3243_v9 = vmul.f32 %v5494_v54, %v10055_v22  ;;  %5515 = vrcp.f32 %v3212_v35  ;;  %v3221_v58 = vadd.f32 1e-06, %v8843_v48  ;;  %v3222_v21 = vadd.f32 1e-06, %v8895_v38 }
 0x414   : > { %v5498_v19 = vpop.eup %5497  ;;  %4545 = vmatprep.mubr.f32.mxu1 %v3241_v23  ;;  %5517 = vrcp.f32 %v3213_v60  ;;  %v2842_v18 = vadd.f32 %v2810_v43, %v2522_v12  ;;  %v3130_v13 = vmul.f32 %v5496_v29, %v10056_v40  ;;  %v3194_v36 = vadd.f32 %v5496_v29, %v2874_v15 }
 0x415   : > { %v5500_v5 = vpop.eup %5499  ;;  %4546 = vmatmul.mubr.f32.gmra.mrb[118].mxu1 %v3243_v9  ;;  %v3245_v14 = vmul.f32 %v5498_v19, %v8474_v51  ;;  %5519 = vrcp.f32 %v3214_v7  ;;  %v3220_v60 = vadd.f32 1e-06, %v8845_v27  ;;  %v10059_v51 = vld [vmem:[#allocation234_spill] sm:$0xff]  ;;  %v3223_v27 = vadd.f32 1e-06, %v8887_v0 }
 0x416   : > { %v5502_v61 = vpop.eup %5501  ;;  %v3247_v35 = vmul.f32 %v5500_v5, %v10057_v42  ;;  %5521 = vrcp.f32 %v3215_v57  ;;  %v8969_v17 = vadd.f32 %v3130_v13, %v2842_v18  ;;  %v3224_v48 = vadd.f32 1e-06, %v8927_v49 }
 0x417   : > { %v5504_v52 = vpop.eup %5503  ;;  %4548 = vmatprep.mubr.f32.mxu1 %v3245_v14  ;;  %v3249_v34 = vmul.f32 %v5502_v61, %v10058_v45  ;;  %5523 = vrcp.f32 %v3216_v39  ;;  %v3225_v38 = vadd.f32 1e-06, %v8930_v53  ;;  %v3226_v15 = vadd.f32 1e-06, %v3194_v36 }
 0x418   : > { %v5506_v47 = vpop.eup %5505  ;;  %v3251_v63 = vmul.f32 %v5504_v52, %v10059_v51  ;;  %5525 = vrcp.f32 %v3217_v30 }
 0x419   : > { %v5508_v37 = vpop.eup %5507  ;;  %4549 = vmatmul.mubr.f32.gmra.mrb[120].mxu1 %v3247_v35  ;;  %v3253_v8 = vmul.f32 %v5506_v47, %v8594_v62  ;;  %5527 = vrcp.f32 %v3218_v10 }
 0x41a   : > { %v5510_v7 = vpop.eup %5509  ;;  %v3195_v57 = vadd.f32 %v5508_v37, %v8947_v56  ;;  %4551 = vmatprep.mubr.f32.mxu1 %v3249_v34  ;;  %5529 = vrcp.f32 %v3219_v2  ;;  %v3131_v43 = vmul.f32 %v5508_v37, %v10060_v33 }
 0x41b   : > { %v5512_v54 = vpop.eup %5511  ;;  %v3255_v28 = vmul.f32 %v5510_v7, %v8618_v11  ;;  %5531 = vrcp.f32 %v3220_v60 }
 0x41c   : > { %v5514_v23 = vpop.eup %5513  ;;  %v3257_v62 = vmul.f32 %v5512_v54, %v8632_v3  ;;  %5533 = vrcp.f32 %v3221_v58  ;;  %v3163_v56 = vadd.f32 %v3131_v43, %v8953_v59  ;;  %v3227_v49 = vadd.f32 1e-06, %v3195_v57 }
 0x41d   : > { %v5516_v12 = vpop.eup %5515  ;;  %4552 = vmatmul.mubr.f32.gmra.mrb[122].mxu1 %v3251_v63  ;;  %v3259_v0 = vmul.f32 %v5514_v23, %v8664_v31  ;;  %5535 = vrcp.f32 %v3222_v21 }
 0x41e   : > { %v5518_v29 = vpop.eup %5517  ;;  %4554 = vmatprep.mubr.f32.mxu1 %v3253_v8  ;;  %v3261_v11 = vmul.f32 %v5516_v12, %v8701_v25  ;;  %5537 = vrcp.f32 %v3223_v27 }
 0x41f   : > { %v5520_v22 = vpop.eup %5519  ;;  %v3263_v3 = vmul.f32 %v5518_v29, %v8724_v26  ;;  %5539 = vrcp.f32 %v3224_v48 }
 0x420   : > { %v5522_v9 = vpop.eup %5521  ;;  %v3265_v53 = vmul.f32 %v5520_v22, %v8743_v1  ;;  %5541 = vrcp.f32 %v3225_v38 }
 0x421   : > { %v5524_v59 = vpop.eup %5523  ;;  %4555 = vmatmul.mubr.f32.gmra.mrb[124].mxu1 %v3255_v28  ;;  %v3267_v31 = vmul.f32 %v5522_v9, %v8760_v16  ;;  %5543 = vrcp.f32 %v3226_v15 }
 0x422   : > { %v5526_v39 = vpop.eup %5525  ;;  %4557 = vmatprep.mubr.f32.mxu1 %v3257_v62  ;;  %v3269_v30 = vmul.f32 %v5524_v59, %v8780_v24  ;;  %5545 = vrcp.f32 %v3227_v49 }
 0x423   : > { %v5528_v25 = vpop.eup %5527  ;;  %v3271_v19 = vmul.f32 %v5526_v39, %v8796_v44 }
 0x424   : > { %v5530_v18 = vpop.eup %5529  ;;  %v3273_v26 = vmul.f32 %v5528_v25, %v8830_v20 }
 0x425   : > { %v5532_v40 = vpop.eup %5531  ;;  %4558 = vmatmul.mubr.f32.gmra.mrb[126].mxu1 %v3259_v0  ;;  %v3275_v1 = vmul.f32 %v5530_v18, %v8823_v32 }
 0x426   : > { %v5534_v13 = vpop.eup %5533  ;;  %4560 = vmatprep.mubr.f32.mxu1 %v3261_v11  ;;  %v3277_v16 = vmul.f32 %v5532_v40, %v8847_v41 }
 0x427   : > { %v5536_v36 = vpop.eup %5535  ;;  %v3279_v5 = vmul.f32 %v5534_v13, %v8841_v50  ;;  %v9004_v50 = vld [vmem:[%s9137_s7] ss:$0 sm:$0xff] }
 0x428   : > { %v5538_v14 = vpop.eup %5537  ;;  %v3281_v24 = vmul.f32 %v5536_v36, %v8901_v6 }
 0x429   : > { %v5540_v10 = vpop.eup %5539  ;;  %4561 = vmatmul.mubr.f32.gmra.mrb[128].mxu1 %v3263_v3  ;;  %v3283_v44 = vmul.f32 %v5538_v14, %v8893_v55 }
 0x42a   : > { %v5542_v61 = vpop.eup %5541  ;;  %4563 = vmatprep.mubr.f32.mxu1 %v3265_v53  ;;  %v3285_v20 = vmul.f32 %v5540_v10, %v8936_v4 }
 0x42b   : > { %v5544_v42 = vpop.eup %5543  ;;  %v3287_v32 = vmul.f32 %v5542_v61, %v8940_v46 }
 0x42c   : > { %v5546_v35 = vpop.eup %5545  ;;  %v3289_v41 = vmul.f32 %v5544_v42, %v8969_v17 }
 0x42d   : > { %4564 = vmatmul.mubr.f32.gmra.mrb[130].mxu1 %v3267_v31  ;;  %v3291_v2 = vmul.f32 %v5546_v35, %v3163_v56 }
 0x42e   : > { %4566 = vmatprep.mubr.f32.mxu1 %v3269_v30 }
 0x431   : > { %4567 = vmatmul.mubr.f32.gmra.mrb[132].mxu1 %v3271_v19 }
 0x432   : > { %4569 = vmatprep.mubr.f32.mxu1 %v3273_v26 }
 0x435   : > { %4570 = vmatmul.mubr.f32.gmra.mrb[134].mxu1 %v3275_v1 }
 0x436   : > { %4572 = vmatprep.mubr.f32.mxu1 %v3277_v16 }
 0x439   : > { %4573 = vmatmul.mubr.f32.gmra.mrb[136].mxu1 %v3279_v5 }
 0x43a   : > { %4575 = vmatprep.mubr.f32.mxu1 %v3281_v24 }
 0x43d   : > { %4576 = vmatmul.mubr.f32.gmra.mrb[138].mxu1 %v3283_v44 }
 0x43e   : > { %4578 = vmatprep.mubr.f32.mxu1 %v3285_v20 }
 0x441   : > { %4579 = vmatmul.mubr.f32.gmra.mrb[140].mxu1 %v3287_v32 }
 0x442   : > { %4581 = vmatprep.mubr.f32.mxu1 %v3289_v41 }
 0x445   : > { %4582 = vmatmul.mubr.f32.gmra.mrb[142].mxu1 %v3291_v2 }
 0x4bc   : > { %v4538_v55 = vpop.f32.mrb[112].mxu1 }
 0x4bd   : > { %v3782_v6 = vadd.f32 %v4538_v55, %v9004_v50  ;;  %v3615_v4 = vpop.f32.mrb[113].mxu1 }
 0x4be   : > { %v3781_v46 = vadd.f32 %v9004_v50, %v3615_v4 }
 0x4bf   : > { %v3814_v17 = vmax.f32 %v3782_v6, 0.0 }
 0x4c0   : > { %v3813_v52 = vmax.f32 %v3781_v46, 0.0 }
 0x4c1   : > { %3846 = vst [vmem:[%s9010_s18 + $0x8] sm:$0xff] %v3814_v17 }
 0x4c2   : > { %3845 = vst [vmem:[%s9010_s18] sm:$0xff] %v3813_v52 }
 0x4d1   : > { %v4541_v45 = vpop.f32.mrb[114].mxu1 }
 0x4d2   : > { %v3784_v34 = vadd.f32 %v4541_v45, %v9004_v50  ;;  %v3625_v60 = vpop.f32.mrb[115].mxu1 }
 0x4d3   : > { %v3783_v47 = vadd.f32 %v9004_v50, %v3625_v60 }
 0x4d4   : > { %v3816_v51 = vmax.f32 %v3784_v34, 0.0 }
 0x4d5   : > { %v3815_v63 = vmax.f32 %v3783_v47, 0.0 }
 0x4d6   : > { %3848 = vst [vmem:[%s9010_s18 + $0x18] sm:$0xff] %v3816_v51 }
 0x4d7   : > { %3847 = vst [vmem:[%s9010_s18 + $0x10] sm:$0xff] %v3815_v63 }
 0x4e3   : > { %v4544_v58 = vpop.f32.mrb[116].mxu1 }
 0x4e4   : > { %v3786_v37 = vadd.f32 %v4544_v58, %v9004_v50  ;;  %v3635_v8 = vpop.f32.mrb[117].mxu1 }
 0x4e5   : > { %v3785_v21 = vadd.f32 %v9004_v50, %v3635_v8 }
 0x4e6   : > { %v3818_v7 = vmax.f32 %v3786_v37, 0.0 }
 0x4e7   : > { %v3817_v57 = vmax.f32 %v3785_v21, 0.0 }
 0x4e8   : > { %3850 = vst [vmem:[%s9010_s18 + $0x28] sm:$0xff] %v3818_v7  ;;  %v4547_v27 = vpop.f32.mrb[118].mxu1 }
 0x4e9   : > { %3849 = vst [vmem:[%s9010_s18 + $0x20] sm:$0xff] %v3817_v57  ;;  %v3788_v33 = vadd.f32 %v4547_v27, %v9004_v50  ;;  %v3645_v43 = vpop.f32.mrb[119].mxu1 }
 0x4ea   : > { %v3787_v54 = vadd.f32 %v9004_v50, %v3645_v43 }
 0x4eb   : > { %v3820_v28 = vmax.f32 %v3788_v33, 0.0 }
 0x4ec   : > { %v3819_v48 = vmax.f32 %v3787_v54, 0.0  ;;  %v4550_v23 = vpop.f32.mrb[120].mxu1 }
 0x4ed   : > { %3852 = vst [vmem:[%s9010_s18 + $0x38] sm:$0xff] %v3820_v28  ;;  %v3790_v62 = vadd.f32 %v4550_v23, %v9004_v50  ;;  %v3655_v38 = vpop.f32.mrb[121].mxu1 }
 0x4ee   : > { %3851 = vst [vmem:[%s9010_s18 + $0x30] sm:$0xff] %v3819_v48  ;;  %v3789_v56 = vadd.f32 %v9004_v50, %v3655_v38 }
 0x4ef   : > { %v3822_v12 = vmax.f32 %v3790_v62, 0.0 }
 0x4f0   : > { %v3821_v0 = vmax.f32 %v3789_v56, 0.0  ;;  %v4553_v15 = vpop.f32.mrb[122].mxu1 }
 0x4f1   : > { %3854 = vst [vmem:[%s9010_s18 + $0x48] sm:$0xff] %v3822_v12  ;;  %v3792_v29 = vadd.f32 %v4553_v15, %v9004_v50  ;;  %v3665_v11 = vpop.f32.mrb[123].mxu1 }
 0x4f2   : > { %3853 = vst [vmem:[%s9010_s18 + $0x40] sm:$0xff] %v3821_v0  ;;  %v3791_v49 = vadd.f32 %v9004_v50, %v3665_v11 }
 0x4f3   : > { %v3824_v22 = vmax.f32 %v3792_v29, 0.0 }
 0x4f4   : > { %v3823_v3 = vmax.f32 %v3791_v49, 0.0  ;;  %v4556_v9 = vpop.f32.mrb[124].mxu1 }
 0x4f5   : > { %3856 = vst [vmem:[%s9010_s18 + $0x58] sm:$0xff] %v3824_v22  ;;  %v3794_v53 = vadd.f32 %v4556_v9, %v9004_v50  ;;  %v3675_v59 = vpop.f32.mrb[125].mxu1 }
 0x4f6   : > { %3855 = vst [vmem:[%s9010_s18 + $0x50] sm:$0xff] %v3823_v3  ;;  %v3793_v31 = vadd.f32 %v9004_v50, %v3675_v59 }
 0x4f7   : > { %v3826_v39 = vmax.f32 %v3794_v53, 0.0 }
 0x4f8   : > { %v3825_v30 = vmax.f32 %v3793_v31, 0.0  ;;  %v4559_v25 = vpop.f32.mrb[126].mxu1 }
 0x4f9   : > { %3858 = vst [vmem:[%s9010_s18 + $0x68] sm:$0xff] %v3826_v39  ;;  %v3796_v19 = vadd.f32 %v4559_v25, %v9004_v50  ;;  %v3685_v18 = vpop.f32.mrb[127].mxu1 }
 0x4fa   : > { %3857 = vst [vmem:[%s9010_s18 + $0x60] sm:$0xff] %v3825_v30  ;;  %v3795_v26 = vadd.f32 %v9004_v50, %v3685_v18 }
 0x4fb   : > { %v3828_v40 = vmax.f32 %v3796_v19, 0.0 }
 0x4fc   : > { %v3827_v1 = vmax.f32 %v3795_v26, 0.0  ;;  %v4562_v13 = vpop.f32.mrb[128].mxu1 }
 0x4fd   : > { %3860 = vst [vmem:[%s9010_s18 + $0x78] sm:$0xff] %v3828_v40  ;;  %v3798_v16 = vadd.f32 %v4562_v13, %v9004_v50  ;;  %v3695_v36 = vpop.f32.mrb[129].mxu1 }
 0x4fe   : > { %3859 = vst [vmem:[%s9010_s18 + $0x70] sm:$0xff] %v3827_v1  ;;  %v3797_v5 = vadd.f32 %v9004_v50, %v3695_v36 }
 0x4ff   : > { %v3830_v14 = vmax.f32 %v3798_v16, 0.0 }
 0x500   : > { %v3829_v24 = vmax.f32 %v3797_v5, 0.0  ;;  %v4565_v10 = vpop.f32.mrb[130].mxu1 }
 0x501   : > { %3862 = vst [vmem:[%s9010_s18 + $0x88] sm:$0xff] %v3830_v14  ;;  %v3800_v44 = vadd.f32 %v4565_v10, %v9004_v50  ;;  %v3705_v61 = vpop.f32.mrb[131].mxu1 }
 0x502   : > { %3861 = vst [vmem:[%s9010_s18 + $0x80] sm:$0xff] %v3829_v24  ;;  %v3799_v20 = vadd.f32 %v9004_v50, %v3705_v61 }
 0x503   : > { %v3832_v42 = vmax.f32 %v3800_v44, 0.0 }
 0x504   : > { %v3831_v32 = vmax.f32 %v3799_v20, 0.0  ;;  %v4568_v35 = vpop.f32.mrb[132].mxu1 }
 0x505   : > { %3864 = vst [vmem:[%s9010_s18 + $0x98] sm:$0xff] %v3832_v42  ;;  %v3802_v41 = vadd.f32 %v4568_v35, %v9004_v50  ;;  %v3715_v2 = vpop.f32.mrb[133].mxu1 }
 0x506   : > { %3863 = vst [vmem:[%s9010_s18 + $0x90] sm:$0xff] %v3831_v32  ;;  %v3801_v55 = vadd.f32 %v9004_v50, %v3715_v2 }
 0x507   : > { %v3834_v6 = vmax.f32 %v3802_v41, 0.0 }
 0x508   : > { %v3833_v4 = vmax.f32 %v3801_v55, 0.0  ;;  %v4571_v46 = vpop.f32.mrb[134].mxu1 }
 0x509   : > { %3866 = vst [vmem:[%s9010_s18 + $0xa8] sm:$0xff] %v3834_v6  ;;  %v3804_v17 = vadd.f32 %v4571_v46, %v9004_v50  ;;  %v3725_v52 = vpop.f32.mrb[135].mxu1 }
 0x50a   : > { %3865 = vst [vmem:[%s9010_s18 + $0xa0] sm:$0xff] %v3833_v4  ;;  %v3803_v45 = vadd.f32 %v9004_v50, %v3725_v52 }
 0x50b   : > { %v3836_v34 = vmax.f32 %v3804_v17, 0.0 }
 0x50c   : > { %v3835_v60 = vmax.f32 %v3803_v45, 0.0  ;;  %v4574_v47 = vpop.f32.mrb[136].mxu1 }
 0x50d   : > { %3868 = vst [vmem:[%s9010_s18 + $0xb8] sm:$0xff] %v3836_v34  ;;  %v3806_v51 = vadd.f32 %v4574_v47, %v9004_v50  ;;  %v3735_v63 = vpop.f32.mrb[137].mxu1 }
 0x50e   : > { %3867 = vst [vmem:[%s9010_s18 + $0xb0] sm:$0xff] %v3835_v60  ;;  %v3805_v58 = vadd.f32 %v9004_v50, %v3735_v63 }
 0x50f   : > { %v3838_v37 = vmax.f32 %v3806_v51, 0.0 }
 0x510   : > { %v3837_v8 = vmax.f32 %v3805_v58, 0.0  ;;  %v4577_v21 = vpop.f32.mrb[138].mxu1 }
 0x511   : > { %3870 = vst [vmem:[%s9010_s18 + $0xc8] sm:$0xff] %v3838_v37  ;;  %v3808_v7 = vadd.f32 %v4577_v21, %v9004_v50  ;;  %v3745_v57 = vpop.f32.mrb[139].mxu1 }
 0x512   : > { %3869 = vst [vmem:[%s9010_s18 + $0xc0] sm:$0xff] %v3837_v8  ;;  %v3807_v27 = vadd.f32 %v9004_v50, %v3745_v57 }
 0x513   : > { %v3840_v33 = vmax.f32 %v3808_v7, 0.0 }
 0x514   : > { %v3839_v43 = vmax.f32 %v3807_v27, 0.0  ;;  %v4580_v54 = vpop.f32.mrb[140].mxu1 }
 0x515   : > { %3872 = vst [vmem:[%s9010_s18 + $0xd8] sm:$0xff] %v3840_v33  ;;  %v3810_v28 = vadd.f32 %v4580_v54, %v9004_v50  ;;  %v3755_v48 = vpop.f32.mrb[141].mxu1 }
 0x516   : > { %3871 = vst [vmem:[%s9010_s18 + $0xd0] sm:$0xff] %v3839_v43  ;;  %v3809_v23 = vadd.f32 %v9004_v50, %v3755_v48 }
 0x517   : > { %v3842_v62 = vmax.f32 %v3810_v28, 0.0 }
 0x518   : > { %v3841_v38 = vmax.f32 %v3809_v23, 0.0  ;;  %v4583_v56 = vpop.f32.mrb[142].mxu1 }
 0x519   : > { %3874 = vst [vmem:[%s9010_s18 + $0xe8] sm:$0xff] %v3842_v62  ;;  %v3812_v12 = vadd.f32 %v4583_v56, %v9004_v50  ;;  %v3765_v0 = vpop.f32.mrb[143].mxu1 }
 0x51a   : > { %3873 = vst [vmem:[%s9010_s18 + $0xe0] sm:$0xff] %v3841_v38  ;;  %v3811_v15 = vadd.f32 %v9004_v50, %v3765_v0 }
 0x51b   : > { %v3844_v29 = vmax.f32 %v3812_v12, 0.0 }
 0x51c   : > { %v3843_v11 = vmax.f32 %v3811_v15, 0.0 }
 0x51d   : > { %3876 = vst [vmem:[%s9010_s18 + $0xf8] sm:$0xff] %v3844_v29 }
 0x51e   : > { %3875 = vst [vmem:[%s9010_s18 + $0xf0] sm:$0xff] %v3843_v11 }
 0x51f   : > { %5733 = shalt.err (!%p5730_p0)
}
 0x520   : > { %s5734_s10 = scalar_lea.hbm %s9077_s12, 4096  ;;  %s5738_s11 = scalar_lea.hbm %s10063_s21, 8192 }
 0x521   : > { %p5735_p1 = scmp.ne.s32.totalorder %s9077_s12, %s5734_s10  ;;  %p5739_p10 = scmp.lt.u32.totalorder %s9077_s12, %s10063_s21 }
 0x522   : > { %p5740_p5 = scmp.lt.u32.totalorder %s5738_s11, %s5734_s10  ;;  %p5742_p9 = scmp.lt.u32.totalorder %s5734_s10, %s9077_s12 }
 0x523   : > { %p5736_p2 = pnand %p5735_p1, %p10064_p13 }
 0x524   : > { %p5741_p7 = por %p5740_p5, %p5739_p10 }
 0x525   : > { %p5737_p4 = pneg %p5736_p2 }
 0x526   : > { %p5743_p6 = por %p5742_p9, %p5741_p7 }
 0x528   : > { %p5744_p8 = pnand %p5743_p6, %p5737_p4 }
 0x52a   : > { %5747 = shalt.err (!%p5744_p8)
}
 0x52b   : > { %s5832_s25 = smov 128   ;;  %s5833_s17 = smov 8  }
 0x52c   : > { %4876 = dma.vmem_to_hbm [thread:$0]  (%p10064_p13), %s9079_s16, 4096, %s9077_s12, %s3878_s27, %s5832_s25, %s5832_s25, %s5833_s17  }
 0x52d PF: > { %s10065_s26 = sld [smem:[#allocation19_spill]]  ;;  %s10066_s18 = sld [smem:[#allocation23_spill]] }
 0x52e   : > { %s10067_s24 = sld [smem:[#allocation22_spill]] }
 0x533   : > { %s3908_s19 = sand.u32 1, %s10065_s26   ;;  %p10068_p12 = scmp.ne.s32.totalorder %s10066_s18, 0 }
 0x534   : > { %p10069_p3 = scmp.ge.s32.totalorder %s10067_s24, 2  ;;  %s3909_s14 = scalar_lea.sflag [#allocation4], %s3908_s19 }
 0x536   : > { %p4899_p11 = pnand %p10069_p3, %p10068_p12 }
 0x538   : > { %5793 = dma.done.wait (!%p4899_p11), %s3909_s14, 4096  }
 0x539   : > { %5795 = vsyncadd (!%p4899_p11), %s3909_s14, 4294963200  ;;  %s26_s10 = sadd.s32 1, %s10067_s24   ;;  %s10070_s20 = sld [smem:[#allocation20_spill]] }
 0x53a   : > { %p23_p0 = scmp.ge.s32.totalorder %s26_s10, 4   ;;  %s10071_s29 = sld [smem:[#allocation26_spill]] }
 0x53b   : > { %s10072_s23 = sld [smem:[#allocation24_spill]]  ;;  %s10073_s27 = smov %s5802_s28 }
 0x53c   : > { %s10075_s30 = smov %s5814_s9  ;;  %25 = sbr.rel (!%p23_p0) target bundleno = 13 (0xd), region = 125 }
 0x53f   : > { %s10074_s28 = smov %s10070_s20 }
 0x541   : > { %s10076_s9 = smov %s10072_s23 }
 0x543   :  { %3914 = vsyncpa [#allocation3], 1 }
 0x544   :  { %3916 = vsyncpa [#allocation3 + $0x1], 1 }
 0x545   :  { %3917 = vsyncpa [#allocation6], 1 }
 0x546   :  { %3918 = vsyncpa [#allocation10], 1 }
 0x547   :  { %3919 = vsyncpa [#allocation4], 1 }
 0x548   :  { %3921 = vsyncpa [#allocation4 + $0x1], 1 }

// kernel: tpu_custom_call.1
= control target key start
LH: loop header
LB: loop body
LE: loop exit
PB: predicated region body
PF: predicated region fallthrough
CT: control target
= control target key end

     0   :  { %s9130_s0 = inlined_call_operand.hbm [shape: f32[2,256,128], index: 0, kind: input, shape index: {}]   ;;  %s9131_s1 = inlined_call_operand.hbm [shape: f32[256,128], index: 1, kind: input, shape index: {}]   ;;  %s9132_s2 = inlined_call_operand.hbm [shape: f32[2,128,1024], index: 2, kind: input, shape index: {}]   ;;  %s9133_s3 = inlined_call_operand.hbm [shape: f32[128,128], index: 3, kind: input, shape index: {}]   ;;  %s9134_s4 = inlined_call_operand.vmem [shape: f32[1,128], index: 4, kind: input, shape index: {}]   ;;  %s9135_s5 = inlined_call_operand.hbm [shape: f32[128,128], index: 5, kind: input, shape index: {}]   ;;  %s9136_s6 = inlined_call_operand.hbm [shape: f32[128,128], index: 6, kind: input, shape index: {}]   ;;  %s9137_s7 = inlined_call_operand.vmem [shape: f32[1,128], index: 7, kind: input, shape index: {}]   ;;  %s9138_s8 = inlined_call_operand.hbm [shape: f32[2,256,128], index: 8, kind: output, shape index: {}]  }
   0x1   :  { %9299 = sst [smem:[#allocation237_spill]] %s9130_s0 }
   0x2   :  { %9300 = sst [smem:[#allocation238_spill]] %s9131_s1 }
   0x3   :  { %9301 = sst [smem:[#allocation239_spill]] %s9135_s5 }
   0x4   :  { %9302 = sst [smem:[#allocation240_spill]] %s9138_s8 }
   0x5   :  { %13 = vsyncpa [#allocation3], 0 }
   0x6   :  { %15 = vsyncpa [#allocation3 + $0x1], 0 }
   0x7   :  { %16 = vsyncpa [#allocation6], 0 }
   0x8   :  { %17 = vsyncpa [#allocation10], 0 }
   0x9   :  { %18 = vsyncpa [#allocation4], 0 }
   0xa   :  { %20 = vsyncpa [#allocation4 + $0x1], 0  ;;  %s5879_s27 = smov 0   ;;  %s5881_s28 = smov 0  }
   0xb   :  { %s5883_s29 = smov 0   ;;  %s5885_s30 = smov 0  }
   0xc   :  { %s5887_s9 = smov 0   ;;  %s5889_s10 = smov 0  }
   0xd LB: > { %9303 = sst [smem:[#allocation19_spill]] %s5798_s27  ;;  %s5910_s11 = sadd.s32 4294967295, %s5818_s10   ;;  %s5818_s10 = sphi %s5889_s10, %s26_s10   ;;  %s5814_s9 = sphi %s5887_s9, %s10076_s9   ;;  %s5810_s30 = sphi %s5885_s30, %s10075_s30   ;;  %s5806_s29 = sphi %s5883_s29, %s10071_s29   ;;  %s5802_s28 = sphi %s5881_s28, %s10074_s28   ;;  %s5798_s27 = sphi %s5879_s27, %s10073_s27  }
   0xe   : > { %9304 = sst [smem:[#allocation20_spill]] %s5806_s29  ;;  %s4041_s12 = sadd.s32 4294967294, %s5818_s10  }
   0xf   : > { %9305 = sst [smem:[#allocation21_spill]] %s5810_s30  ;;  %p60_p0 = scmp.ne.s32.totalorder %s5802_s28, %s5798_s27 }
  0x10   : > { %9306 = sst [smem:[#allocation22_spill]] %s5818_s10  ;;  %p9139_p1 = scmp.eq.s32.totalorder %s5910_s11, 0 }
  0x11   : > { %p249_p3 = scmp.eq.s32.totalorder %s4041_s12, 1  ;;  %p4042_p5 = scmp.ge.s32.totalorder %s5818_s10, 1 }
  0x12   : > { %p5919_p4 = por %p9139_p1, %p60_p0  ;;  %p256_p7 = scmp.lt.s32.totalorder %s5818_s10, 3 }
  0x13   : > { %p5924_p6 = por %p249_p3, %p60_p0  ;;  %s5820_s16 = smov [#allocation5]  }
  0x14   : > { %s9307_s13 = scalar_select %p5919_p4, 1, 0 }
  0x15   : > { %s9308_s14 = scalar_select %p5924_p6, 1, 0 }
  0x16   : > { %p5929_p8 = pnand %p4042_p5, %p256_p7  ;;  %s271_s17 = sshll.u32 %s5820_s16, 4  ;;  %s5933_s17 = int_to_ptr.vmem [resolvable:$true] %s271_s17 }
  0x17   : > { %9309 = sst [smem:[#allocation23_spill]] %s9308_s14  ;;  %s5821_s19 = smov [#allocation9]  }
  0x18   : > { %s9310_s15 = scalar_select %p5929_p8, 1, 0 }
  0x19   : > { %p4878_p9 = pneg %p5929_p8  ;;  %s300_s20 = sshll.u32 %s5821_s19, 4  ;;  %s5944_s20 = int_to_ptr.vmem [resolvable:$true] %s300_s20 }
  0x1a   : > { %s9312_s1 = sld [smem:[#allocation238_spill]] }
  0x1b   : > { %p5940_p11 = pnand %p4878_p9, %p9139_p1 }
  0x1d   : > { %s9311_s18 = scalar_select %p5940_p11, 1, 0 }
  0x1e   : > { %p5954_p13 = pneg %p5940_p11 }
  0x20   : > { %s5548_s23 = scalar_lea.hbm %s9312_s1, 4096 }
  0x21   : > { %p5549_p12 = scmp.ne.s32.totalorder %s9312_s1, %s5548_s23  ;;  %p5555_p5 = scmp.lt.u32.totalorder %s5548_s23, %s9312_s1 }
  0x23   : > { %p5551_p0 = pnand %p5954_p13, %p5549_p12 }
  0x25   : > { %p5552_p3 = pneg %p5551_p0 }
  0x27   : > { %p5557_p7 = pnand %p5555_p5, %p5552_p3 }
  0x29   : > { %5560 = shalt.err (!%p5557_p7)
}
  0x2a   : > { %s5561_s19 = scalar_lea.vmem %s5933_s17, 4096  ;;  %p5569_p2 = scmp.lt.s32.totalorder %s5933_s17, %s5933_s17 }
  0x2b   : > { %p5562_p9 = scmp.ne.s32.totalorder %s5933_s17, %s5561_s19  ;;  %p5570_p6 = scmp.lt.s32.totalorder %s5561_s19, %s5561_s19 }
  0x2d   : > { %p5564_p10 = pnand %p5562_p9, %p5954_p13  ;;  %p5571_p12 = por %p5570_p6, %p5569_p2 }
  0x2f   : > { %p5565_p1 = pneg %p5564_p10 }
  0x31   : > { %p5572_p0 = pnand %p5571_p12, %p5565_p1 }
  0x33   : > { %5575 = shalt.err (!%p5572_p0)
}
  0x34   : > { %s9143_s21 = smov 128   ;;  %s9145_s22 = smov 8  }
  0x35   : > { %4881 = dma.hbm_to_vmem [thread:$0]  (!%p5940_p11), %s9312_s1, 4096, %s5933_s17, [#allocation6], %s9143_s21, %s9143_s21, %s9145_s22  }
  0x36   : > { %s9314_s5 = sld [smem:[#allocation239_spill]] }
  0x3c   : > { %s5576_s16 = scalar_lea.hbm %s9314_s5, 2048 }
  0x3d   : > { %p5577_p1 = scmp.ne.s32.totalorder %s9314_s5, %s5576_s16  ;;  %p5583_p10 = scmp.lt.u32.totalorder %s5576_s16, %s9314_s5 }
  0x3f   : > { %p5579_p2 = pnand %p5577_p1, %p5954_p13 }
  0x41   : > { %p5580_p6 = pneg %p5579_p2 }
  0x43   : > { %p5585_p3 = pnand %p5583_p10, %p5580_p6 }
  0x45   : > { %5588 = shalt.err (!%p5585_p3)
}
  0x46   : > { %s5589_s17 = scalar_lea.vmem %s5944_s20, 2048  ;;  %p5597_p12 = scmp.lt.s32.totalorder %s5944_s20, %s5944_s20 }
  0x47   : > { %p5590_p5 = scmp.ne.s32.totalorder %s5944_s20, %s5589_s17  ;;  %p5598_p0 = scmp.lt.s32.totalorder %s5589_s17, %s5589_s17 }
  0x49   : > { %p5592_p7 = pnand %p5590_p5, %p5954_p13  ;;  %p5599_p1 = por %p5598_p0, %p5597_p12 }
  0x4b   : > { %p5593_p9 = pneg %p5592_p7 }
  0x4d   : > { %p5600_p2 = pnand %p5599_p1, %p5593_p9 }
  0x4f   : > { %5603 = shalt.err (!%p5600_p2)
}
  0x50   : > { %4887 = dma.hbm_to_vmem [thread:$0]  (!%p5940_p11), %s9314_s5, 2048, %s5944_s20, [#allocation10], %s9143_s21, %s9143_s21, %s9145_s22  }
  0x51   : > { %s35_s14 = sadd.s32 1, %s5814_s9  ;;  %s47_s23 = sadd.s32 1, %s5806_s29 }
  0x52   : > { %p36_p6 = scmp.ge.s32.totalorder %s35_s14, 2  ;;  %p54_p10 = scmp.ne.s32.totalorder %s5806_s29, %s5802_s28 }
  0x53   : > { %p55_p3 = scmp.eq.s32.totalorder %s5818_s10, 0  ;;  %p4906_p5 = scmp.lt.s32.totalorder %s5818_s10, 2 }
  0x54   : > { %s10078_s14 = smov (%p36_p6, %s35_s14), 0  ;;  %p9316_p9 = scmp.eq.s32.totalorder %s5910_s11, 1 }
  0x55   : > { %9315 = sst [smem:[#allocation24_spill]] %s10078_s14  ;;  %p56_p7 = por %p55_p3, %p54_p10 }
  0x56   : > { %p6014_p12 = por %p9316_p9, %p54_p10  ;;  %s42_s25 = ssub.s32 %s5814_s9, %s10078_s14 }
  0x57   : > { %s330_s12 = sand.u32 1, %s5818_s10   ;;  %p45_p0 = scmp.eq.s32.totalorder %s42_s25, 0 }
  0x58   : > { %s9317_s24 = scalar_select %p6014_p12, 1, 0 }
  0x59   : > { %s332_s16 = sand.u32 1, %s5806_s29   ;;  %s4197_s20 = sshll.u32 %s5814_s9, 12 }
  0x5a   : > { %9318 = sst [smem:[#allocation25_spill]] %s9317_s24  ;;  %s4048_s17 = sshll.u32 %s332_s16, 8 }
  0x5b   : > { %s6024_s19 = scalar_select %p45_p0, %s5806_s29, %s47_s23  }
  0x5c   : > { %s9320_s0 = sld [smem:[#allocation237_spill]]  ;;  %p6031_p1 = pnand %p4906_p5, %p56_p7 }
  0x5d   : > { %9319 = sst [smem:[#allocation26_spill]] %s6024_s19  ;;  %s334_s25 = scalar_lea.vmem [#allocation2], %s4048_s17 }
  0x5e   : > { %s9321_s22 = scalar_select %p6031_p1, 1, 0 }
  0x5f   : > { %s343_s1 = sshll.u32 %s334_s25, 4  ;;  %s6035_s23 = sshll.u32 %s332_s16, 10  ;;  %s6037_s1 = int_to_ptr.vmem [resolvable:$true] %s343_s1 }
  0x60   : > { %s6039_s5 = scalar_lea.sflag [#allocation3], %s330_s12  ;;  %p9158_p6 = pneg %p6031_p1 }
  0x62   : > { %s6029_s21 = scalar_lea.hbm %s9320_s0, %s4197_s20  ;;  %s5609_s14 = scalar_lea.hbm %s9320_s0, 8192 }
  0x63   : > { %s5604_s20 = scalar_lea.hbm %s6029_s21, 4096  ;;  %p5610_p5 = scmp.lt.u32.totalorder %s6029_s21, %s9320_s0 }
  0x64   : > { %p5605_p2 = scmp.ne.s32.totalorder %s6029_s21, %s5604_s20  ;;  %p5611_p7 = scmp.lt.u32.totalorder %s5609_s14, %s5604_s20 }
  0x65   : > { %p5613_p0 = scmp.lt.u32.totalorder %s5604_s20, %s6029_s21 }
  0x66   : > { %p5607_p10 = pnand %p9158_p6, %p5605_p2  ;;  %p5612_p9 = por %p5611_p7, %p5610_p5 }
  0x68   : > { %p5608_p3 = pneg %p5607_p10  ;;  %p5614_p12 = por %p5613_p0, %p5612_p9 }
  0x6a   : > { %p5615_p4 = pnand %p5614_p12, %p5608_p3 }
  0x6c   : > { %5618 = shalt.err (!%p5615_p4)
}
  0x6d   : > { %s5619_s12 = scalar_lea.vmem %s6037_s1, 4096  ;;  %s5824_s16 = smov [#allocation2]  }
  0x6e   : > { %p5620_p2 = scmp.ne.s32.totalorder %s6037_s1, %s5619_s12  ;;  %s5624_s8 = sshll.u32 %s5824_s16, 4  ;;  %s5625_s8 = int_to_ptr.vmem [resolvable:$false] %s5624_s8 }
  0x6f   : > { %s5626_s27 = scalar_lea.vmem %s5625_s8, 8192  ;;  %p5627_p11 = scmp.lt.s32.totalorder %s6037_s1, %s5625_s8 }
  0x70   : > { %p5622_p10 = pnand %p5620_p2, %p9158_p6  ;;  %p5628_p5 = scmp.lt.s32.totalorder %s5626_s27, %s5619_s12 }
  0x72   : > { %p5623_p8 = pneg %p5622_p10  ;;  %p5629_p7 = por %p5628_p5, %p5627_p11 }
  0x74   : > { %p5630_p9 = pnand %p5629_p7, %p5623_p8 }
  0x76   : > { %5633 = shalt.err (!%p5630_p9)
}
  0x77   : > { %s9322_s14 = smov 8   ;;  %s9323_s20 = smov 128  }
  0x78   : > { %4894 = dma.hbm_to_vmem [thread:$0]  (!%p6031_p1), %s6029_s21, 4096, %s6037_s1, %s6039_s5, %s9323_s20, %s9323_s20, %s9322_s14  }
  0x79   : > { %s357_s17 = scalar_lea.vmem [#allocation7], %s6035_s23  ;;  %s5825_s16 = smov [#allocation8]  }
  0x7a   : > { %s6071_s25 = sshll.u32 %s357_s17, 4  ;;  %s284_s8 = sshll.u32 %s5825_s16, 4  ;;  %s285_s8 = int_to_ptr.vmem [resolvable:$true] %s284_s8  ;;  %s6122_s25 = int_to_ptr.vmem [resolvable:$true] %s6071_s25 }
  0x7b   : > { %s5634_s0 = scalar_lea.hbm %s9133_s3, 2048 }
  0x7c   : > { %p5635_p4 = scmp.ne.s32.totalorder %s9133_s3, %s5634_s0  ;;  %p5641_p12 = scmp.lt.u32.totalorder %s5634_s0, %s9133_s3 }
  0x7e   : > { %p5637_p8 = pnand %p5635_p4, %p5954_p13 }
  0x80   : > { %p5638_p11 = pneg %p5637_p8 }
  0x82   : > { %p5643_p3 = pnand %p5641_p12, %p5638_p11 }
  0x84   : > { %5646 = shalt.err (!%p5643_p3)
}
  0x85   : > { %s5647_s1 = scalar_lea.vmem %s285_s8, 2048  ;;  %p5655_p5 = scmp.lt.s32.totalorder %s285_s8, %s285_s8 }
  0x86   : > { %p5648_p0 = scmp.ne.s32.totalorder %s285_s8, %s5647_s1  ;;  %p5656_p7 = scmp.lt.s32.totalorder %s5647_s1, %s5647_s1 }
  0x88   : > { %p5650_p2 = pnand %p5648_p0, %p5954_p13  ;;  %p5657_p9 = por %p5656_p7, %p5655_p5 }
  0x8a   : > { %p5651_p10 = pneg %p5650_p2 }
  0x8c   : > { %p5658_p6 = pnand %p5657_p9, %p5651_p10 }
  0x8e   : > { %5661 = shalt.err (!%p5658_p6)
}
  0x8f   : > { %p9324_p4 = scmp.ne.s32.totalorder %s9311_s18, 0  ;;  %s5826_s10 = smov [#allocation11]  }
  0x90   : > { %s313_s21 = sshll.u32 %s5826_s10, 4  ;;  %s4198_s24 = sshll.u32 %s5814_s9, 14  ;;  %s314_s21 = int_to_ptr.vmem [resolvable:$true] %s313_s21 }
  0x91   : > { %4884 = dma.hbm_to_vmem [thread:$0]  (!%p9324_p4), %s9133_s3, 2048, %s285_s8, [#allocation6], %s9323_s20, %s9323_s20, %s9322_s14  }
  0x92   : > { %s6098_s17 = scalar_lea.hbm %s9132_s2, %s4198_s24  ;;  %s5662_s27 = scalar_lea.hbm %s9136_s6, 2048 }
  0x93   : > { %p5663_p6 = scmp.ne.s32.totalorder %s9136_s6, %s5662_s27  ;;  %p5669_p12 = scmp.lt.u32.totalorder %s5662_s27, %s9136_s6 }
  0x95   : > { %p5665_p8 = pnand %p5663_p6, %p5954_p13 }
  0x97   : > { %p5666_p11 = pneg %p5665_p8 }
  0x99   : > { %p5671_p3 = pnand %p5669_p12, %p5666_p11 }
  0x9b   : > { %5674 = shalt.err (!%p5671_p3)
}
  0x9c   : > { %s5675_s0 = scalar_lea.vmem %s314_s21, 2048  ;;  %p5683_p5 = scmp.lt.s32.totalorder %s314_s21, %s314_s21 }
  0x9d   : > { %p5676_p0 = scmp.ne.s32.totalorder %s314_s21, %s5675_s0  ;;  %p5684_p7 = scmp.lt.s32.totalorder %s5675_s0, %s5675_s0 }
  0x9f   : > { %p5678_p2 = pnand %p5676_p0, %p5954_p13  ;;  %p5685_p9 = por %p5684_p7, %p5683_p5 }
  0xa1   : > { %p5679_p10 = pneg %p5678_p2 }
  0xa3   : > { %p5686_p1 = pnand %p5685_p9, %p5679_p10 }
  0xa5   : > { %5689 = shalt.err (!%p5686_p1)
}
  0xa6   : > { %4890 = dma.hbm_to_vmem [thread:$0]  (!%p9324_p4), %s9136_s6, 2048, %s314_s21, [#allocation10], %s9323_s20, %s9323_s20, %s9322_s14  }
  0xa7   : > { %s5690_s26 = scalar_lea.hbm %s6098_s17, 16384  ;;  %p9325_p1 = scmp.ne.s32.totalorder %s9321_s22, 0 }
  0xa8   : > { %p5691_p13 = scmp.ne.s32.totalorder %s6098_s17, %s5690_s26  ;;  %s5695_s19 = scalar_lea.hbm %s9132_s2, 32768 }
  0xa9   : > { %p9326_p6 = pneg %p9325_p1  ;;  %p5696_p12 = scmp.lt.u32.totalorder %s6098_s17, %s9132_s2 }
  0xaa   : > { %p5697_p3 = scmp.lt.u32.totalorder %s5695_s19, %s5690_s26  ;;  %p5699_p2 = scmp.lt.u32.totalorder %s5690_s26, %s6098_s17 }
  0xab   : > { %p5693_p8 = pnand %p5691_p13, %p9326_p6 }
  0xac   : > { %p5698_p0 = por %p5697_p3, %p5696_p12 }
  0xad   : > { %p5694_p11 = pneg %p5693_p8 }
  0xae   : > { %p5700_p4 = por %p5699_p2, %p5698_p0 }
  0xb0   : > { %p5701_p10 = pnand %p5700_p4, %p5694_p11 }
  0xb2   : > { %5704 = shalt.err (!%p5701_p10)
}
  0xb3   : > { %s5705_s14 = scalar_lea.vmem %s6122_s25, 16384  ;;  %p9327_p7 = pmov %p9326_p6 }
  0xb4   : > { %p5706_p5 = scmp.ne.s32.totalorder %s6122_s25, %s5705_s14  ;;  %s5827_s20 = smov [#allocation7]  }
  0xb5   : > { %s5710_s21 = sshll.u32 %s5827_s20, 4  ;;  %s5711_s21 = int_to_ptr.vmem [resolvable:$false] %s5710_s21 }
  0xb6   : > { %p5708_p9 = pnand %p5706_p5, %p9327_p7  ;;  %s5712_s12 = scalar_lea.vmem %s5711_s21, 32768 }
  0xb7   : > { %p5713_p6 = scmp.lt.s32.totalorder %s6122_s25, %s5711_s21  ;;  %p5714_p8 = scmp.lt.s32.totalorder %s5712_s12, %s5705_s14 }
  0xb8   : > { %p5709_p13 = pneg %p5708_p9 }
  0xb9   : > { %p5715_p12 = por %p5714_p8, %p5713_p6 }
  0xbb   : > { %p5716_p3 = pnand %p5715_p12, %p5709_p13 }
  0xbd   : > { %5719 = shalt.err (!%p5716_p3)
}
  0xbe   : > { %s5828_s27 = smov 1024   ;;  %s5829_s1 = smov 64  }
  0xbf   : > { %4897 = dma.hbm_to_vmem [thread:$0]  (!%p9325_p1), %s6098_s17, 16384, %s6122_s25, %s6039_s5, %s5828_s27, %s5828_s27, %s5829_s1  }
  0xc0   : > { %p9328_p11 = scmp.ne.s32.totalorder %s9310_s15, 0 }
  0xc2   : > { %376 = sbr.rel (%p9328_p11) target bundleno = 1325 (0x52d), region = 52 }
  0xc9   : > { %s378_s8 = sand.u32 1, %s5910_s11   ;;  %s6152_s29 = sand.u32 1, %s5802_s28  }
  0xca   : > { %s4055_s0 = sshll.u32 %s6152_s29, 8  ;;  %s379_s30 = scalar_lea.sflag [#allocation3], %s378_s8 }
  0xcb   : > { %s6157_s10 = scalar_lea.vmem [#allocation2], %s4055_s0  ;;  %p9329_p0 = scmp.ne.s32.totalorder %s9307_s13, 0 }
  0xcd   : > { %5773 = dma.done.wait (%p9329_p0), %s379_s30, 4096  }
  0xce   : > { %5775 = vsyncadd (%p9329_p0), %s379_s30, 4294963200  ;;  %p9330_p1 = scmp.eq.s32.totalorder %s5910_s11, 0 }
  0xd0   : > { %5777 = dma.done.wait (%p9330_p1), [#allocation6], 4096   ;;  %p9331_p2 = pmov %p9330_p1 }
  0xd1   : > { %s4057_s5 = sshll.u32 %s6152_s29, 10 }
  0xd2   : > { %5779 = vsyncadd (%p9331_p2), [#allocation6], 4294963200  ;;  %s6168_s15 = scalar_lea.vmem [#allocation7], %s4057_s5 }
  0xd3   : > { %5781 = dma.done.wait (%p9329_p0), %s379_s30, 16384  }
  0xd4   : > { %5783 = vsyncadd (%p9329_p0), %s379_s30, 4294950912  ;;  %p9332_p4 = pmov %p9330_p1 }
  0xd5   : > { %p9333_p10 = pmov %p9330_p1 }
  0xd6   : > { %5785 = dma.done.wait (%p9332_p4), [#allocation6], 2048  }
  0xd7   : > { %5787 = vsyncadd (%p9333_p10), [#allocation6], 4294965248  ;;  %p9334_p5 = pmov %p9330_p1 }
  0xd8   : > { %p9335_p7 = pmov %p9330_p1 }
  0xd9   : > { %5789 = dma.done.wait (%p9334_p5), [#allocation10], 4096  }
  0xda   : > { %5791 = vsyncadd (%p9335_p7), [#allocation10], 4294963200  ;;  %v5830_v0 = vmov 0.0   ;;  %v513_v1 = vld [vmem:[%s6168_s15 + $0x8] sm:$0xff]  ;;  %v512_v3 = vld [vmem:[%s6168_s15] sm:$0xff]  ;;  %s9010_s18 = scalar_lea.vmem [#allocation12], %s4055_s0 }
  0xdb   : > { %704 = vmatprep.mubr.f32.mxu0 %v5830_v0  ;;  %1009 = vmatprep.mubr.f32.mxu1 %v5830_v0  ;;  %v521_v2 = vld [vmem:[%s6168_s15 + $0x48] sm:$0xff]  ;;  %v520_v5 = vld [vmem:[%s6168_s15 + $0x40] sm:$0xff]  ;;  %v515_v26 = vld [vmem:[%s6168_s15 + $0x18] sm:$0xff]  ;;  %s10061_s24 = sld [smem:[#allocation21_spill]]  ;;  %s10062_s23 = sld [smem:[#allocation25_spill]] }
  0xdc   : > { %v4584_v4 = vpack.c.bf16 %v521_v2, %v513_v1  ;;  %v529_v6 = vld [vmem:[%s6168_s15 + $0x88] sm:$0xff]  ;;  %v4586_v8 = vpack.c.bf16 %v520_v5, %v512_v3  ;;  %v528_v10 = vld [vmem:[%s6168_s15 + $0x80] sm:$0xff]  ;;  %v523_v27 = vld [vmem:[%s6168_s15 + $0x58] sm:$0xff]  ;;  %s3893_s16 = sshll.u32 %s9010_s18, 4  ;;  %s10063_s21 = sld [smem:[#allocation240_spill]]  ;;  %s9079_s16 = int_to_ptr.vmem [resolvable:$true] %s3893_s16 }
  0xdd   : > { %v537_v7 = vld [vmem:[%s6168_s15 + $0xc8] sm:$0xff]  ;;  %v536_v11 = vld [vmem:[%s6168_s15 + $0xc0] sm:$0xff]  ;;  %v514_v28 = vld [vmem:[%s6168_s15 + $0x10] sm:$0xff]  ;;  %v6207_v32 = vpack.c.bf16 %v523_v27, %v515_v26  ;;  %s3878_s27 = scalar_lea.sflag [#allocation4], %s6152_s29  ;;  %s5720_s1 = scalar_lea.vmem %s9079_s16, 4096 }
  0xde   : > { %v4588_v9 = vpack.c.bf16 %v537_v7, %v529_v6  ;;  %v545_v12 = vld [vmem:[%s6168_s15 + $0x108] sm:$0xff]  ;;  %4585 = vmatprep.subr.bf16.mxu0 %v4584_v4  ;;  %v4590_v14 = vpack.c.bf16 %v536_v11, %v528_v10  ;;  %v544_v16 = vld [vmem:[%s6168_s15 + $0x100] sm:$0xff]  ;;  %v522_v33 = vld [vmem:[%s6168_s15 + $0x50] sm:$0xff]  ;;  %p5721_p9 = scmp.ne.s32.totalorder %s9079_s16, %s5720_s1  ;;  %s5831_s8 = smov [#allocation12]  }
  0xdf   : > { %v553_v13 = vld [vmem:[%s6168_s15 + $0x148] sm:$0xff]  ;;  %4587 = vmatpush1.bf16.msra.mxu0 %v4586_v8  ;;  %v552_v17 = vld [vmem:[%s6168_s15 + $0x140] sm:$0xff]  ;;  %v6212_v37 = vpack.c.bf16 %v522_v33, %v514_v28  ;;  %v531_v38 = vld [vmem:[%s6168_s15 + $0x98] sm:$0xff]  ;;  %4808 = vmatprep.subr.bf16.mxu1 %v6207_v32  ;;  %s5724_s0 = sshll.u32 %s5831_s8, 4  ;;  %s5725_s0 = int_to_ptr.vmem [resolvable:$false] %s5724_s0 }
  0xe0   : > { %4589 = vmatprep.subr.bf16.mxu0 %v4588_v9  ;;  %v4592_v15 = vpack.c.bf16 %v553_v13, %v545_v12  ;;  %v561_v18 = vld [vmem:[%s6168_s15 + $0x188] sm:$0xff]  ;;  %v4594_v20 = vpack.c.bf16 %v552_v17, %v544_v16  ;;  %v560_v22 = vld [vmem:[%s6168_s15 + $0x180] sm:$0xff]  ;;  %v539_v39 = vld [vmem:[%s6168_s15 + $0xd8] sm:$0xff]  ;;  %s5726_s30 = scalar_lea.vmem %s5725_s0, 8192  ;;  %p5727_p12 = scmp.lt.s32.totalorder %s9079_s16, %s5725_s0 }
  0xe1   : > { %v569_v19 = vld [vmem:[%s6168_s15 + $0x1c8] sm:$0xff]  ;;  %v568_v23 = vld [vmem:[%s6168_s15 + $0x1c0] sm:$0xff]  ;;  %v530_v40 = vld [vmem:[%s6168_s15 + $0x90] sm:$0xff]  ;;  %v6219_v42 = vpack.c.bf16 %v539_v39, %v531_v38  ;;  %4816 = vmatpush1.bf16.msra.mxu1 %v6212_v37  ;;  %s4199_s19 = sshll.u32 %s10061_s24, 12  ;;  %p10064_p13 = scmp.ne.s32.totalorder %s10062_s23, 0 }
  0xe2   : > { %v4596_v21 = vpack.c.bf16 %v569_v19, %v561_v18  ;;  %v577_v24 = vld [vmem:[%s6168_s15 + $0x208] sm:$0xff]  ;;  %v4598_v29 = vpack.c.bf16 %v568_v23, %v560_v22  ;;  %v576_v30 = vld [vmem:[%s6168_s15 + $0x200] sm:$0xff]  ;;  %v538_v41 = vld [vmem:[%s6168_s15 + $0xd0] sm:$0xff]  ;;  %s9077_s12 = scalar_lea.hbm %s10063_s21, %s4199_s19  ;;  %p5728_p3 = scmp.lt.s32.totalorder %s5726_s30, %s5720_s1 }
  0xe3   : > { %4591 = vmatpush1.bf16.msra.mxu0 %v4590_v14  ;;  %v585_v25 = vld [vmem:[%s6168_s15 + $0x248] sm:$0xff]  ;;  %v584_v31 = vld [vmem:[%s6168_s15 + $0x240] sm:$0xff]  ;;  %v6221_v43 = vpack.c.bf16 %v538_v41, %v530_v40  ;;  %v547_v46 = vld [vmem:[%s6168_s15 + $0x118] sm:$0xff]  ;;  %4809 = vmatprep.subr.bf16.mxu1 %v6219_v42  ;;  %p5722_p6 = pnand %p5721_p9, %p10064_p13 }
  0xe4   : > { %4593 = vmatprep.subr.bf16.mxu0 %v4592_v15  ;;  %v4600_v34 = vpack.c.bf16 %v585_v25, %v577_v24  ;;  %v593_v35 = vld [vmem:[%s6168_s15 + $0x288] sm:$0xff]  ;;  %v4602_v44 = vpack.c.bf16 %v584_v31, %v576_v30  ;;  %v592_v45 = vld [vmem:[%s6168_s15 + $0x280] sm:$0xff]  ;;  %v555_v47 = vld [vmem:[%s6168_s15 + $0x158] sm:$0xff]  ;;  %p5729_p11 = por %p5728_p3, %p5727_p12 }
  0xe5   : > { %v601_v36 = vld [vmem:[%s6168_s15 + $0x2c8] sm:$0xff]  ;;  %v600_v49 = vld [vmem:[%s6168_s15 + $0x2c0] sm:$0xff]  ;;  %v6228_v50 = vpack.c.bf16 %v555_v47, %v547_v46  ;;  %v546_v51 = vld [vmem:[%s6168_s15 + $0x110] sm:$0xff]  ;;  %4817 = vmatpush1.bf16.msra.mxu1 %v6221_v43  ;;  %p5723_p8 = pneg %p5722_p6 }
  0xe6   : > { %v4604_v48 = vpack.c.bf16 %v601_v36, %v593_v35  ;;  %v554_v52 = vld [vmem:[%s6168_s15 + $0x150] sm:$0xff]  ;;  %v609_v53 = vld [vmem:[%s6168_s15 + $0x308] sm:$0xff]  ;;  %v563_v56 = vld [vmem:[%s6168_s15 + $0x198] sm:$0xff]  ;;  %v4606_v58 = vpack.c.bf16 %v600_v49, %v592_v45 }
  0xe7   : > { %4595 = vmatpush1.bf16.msra.mxu0 %v4594_v20  ;;  %v617_v54 = vld [vmem:[%s6168_s15 + $0x348] sm:$0xff]  ;;  %v6235_v55 = vpack.c.bf16 %v554_v52, %v546_v51  ;;  %v571_v57 = vld [vmem:[%s6168_s15 + $0x1d8] sm:$0xff]  ;;  %v562_v60 = vld [vmem:[%s6168_s15 + $0x190] sm:$0xff]  ;;  %4810 = vmatprep.subr.bf16.mxu1 %v6228_v50  ;;  %p5730_p0 = pnand %p5729_p11, %p5723_p8 }
  0xe8   : > { %4597 = vmatprep.subr.bf16.mxu0 %v4596_v21  ;;  %v6240_v59 = vpack.c.bf16 %v571_v57, %v563_v56  ;;  %v570_v61 = vld [vmem:[%s6168_s15 + $0x1d0] sm:$0xff]  ;;  %v4608_v62 = vpack.c.bf16 %v617_v54, %v609_v53  ;;  %v608_v63 = vld [vmem:[%s6168_s15 + $0x300] sm:$0xff]  ;;  %v579_v2 = vld [vmem:[%s6168_s15 + $0x218] sm:$0xff] }
  0xe9   : > { %v616_v1 = vld [vmem:[%s6168_s15 + $0x340] sm:$0xff]  ;;  %v625_v3 = vld [vmem:[%s6168_s15 + $0x388] sm:$0xff]  ;;  %v587_v5 = vld [vmem:[%s6168_s15 + $0x258] sm:$0xff]  ;;  %v6251_v6 = vpack.c.bf16 %v570_v61, %v562_v60  ;;  %4818 = vmatpush1.bf16.msra.mxu1 %v6235_v55 }
  0xea   : > { %v633_v4 = vld [vmem:[%s6168_s15 + $0x3c8] sm:$0xff]  ;;  %v4610_v7 = vpack.c.bf16 %v616_v1, %v608_v63  ;;  %v624_v8 = vld [vmem:[%s6168_s15 + $0x380] sm:$0xff]  ;;  %v6255_v9 = vpack.c.bf16 %v587_v5, %v579_v2  ;;  %v578_v10 = vld [vmem:[%s6168_s15 + $0x210] sm:$0xff]  ;;  %4811 = vmatprep.subr.bf16.mxu1 %v6240_v59 }
  0xeb   : > { %4599 = vmatpush1.bf16.msra.mxu0 %v4598_v29  ;;  %v586_v11 = vld [vmem:[%s6168_s15 + $0x250] sm:$0xff]  ;;  %v4612_v12 = vpack.c.bf16 %v633_v4, %v625_v3  ;;  %v632_v13 = vld [vmem:[%s6168_s15 + $0x3c0] sm:$0xff]  ;;  %v595_v14 = vld [vmem:[%s6168_s15 + $0x298] sm:$0xff] }
  0xec   : > { %4601 = vmatprep.subr.bf16.mxu0 %v4600_v34  ;;  %v603_v15 = vld [vmem:[%s6168_s15 + $0x2d8] sm:$0xff]  ;;  %v6263_v16 = vpack.c.bf16 %v586_v11, %v578_v10  ;;  %v4614_v17 = vpack.c.bf16 %v632_v13, %v624_v8  ;;  %v594_v19 = vld [vmem:[%s6168_s15 + $0x290] sm:$0xff]  ;;  %v6276_v24 = vld [vmem:[#allocation5] sm:$0xff] }
  0xed   : > { %4819 = vmatpush1.bf16.msra.mxu1 %v6251_v6  ;;  %v6266_v18 = vpack.c.bf16 %v603_v15, %v595_v14  ;;  %v602_v20 = vld [vmem:[%s6168_s15 + $0x2d0] sm:$0xff]  ;;  %v611_v21 = vld [vmem:[%s6168_s15 + $0x318] sm:$0xff]  ;;  %v6292_v31 = vld [vmem:[#allocation5 + $0x8] sm:$0xff] }
  0xee   : > { %4812 = vmatprep.subr.bf16.mxu1 %v6255_v9  ;;  %v619_v22 = vld [vmem:[%s6168_s15 + $0x358] sm:$0xff]  ;;  %v6273_v23 = vpack.c.bf16 %v602_v20, %v594_v19  ;;  %v610_v25 = vld [vmem:[%s6168_s15 + $0x310] sm:$0xff]  ;;  %v6327_v45 = vld [vmem:[#allocation5 + $0x20] sm:$0xff] }
  0xef   : > { %4603 = vmatpush1.bf16.msra.mxu0 %v4602_v44  ;;  %v618_v26 = vld [vmem:[%s6168_s15 + $0x350] sm:$0xff]  ;;  %v6282_v27 = vpack.c.bf16 %v619_v22, %v611_v21  ;;  %v627_v28 = vld [vmem:[%s6168_s15 + $0x398] sm:$0xff]  ;;  %v6330_v46 = vld [vmem:[#allocation5 + $0x48] sm:$0xff] }
  0xf0   : > { %4605 = vmatprep.subr.bf16.mxu0 %v4604_v48  ;;  %v635_v29 = vld [vmem:[%s6168_s15 + $0x3d8] sm:$0xff]  ;;  %v6287_v30 = vpack.c.bf16 %v618_v26, %v610_v25  ;;  %v626_v33 = vld [vmem:[%s6168_s15 + $0x390] sm:$0xff]  ;;  %v6337_v47 = vld [vmem:[#allocation5 + $0x28] sm:$0xff] }
  0xf1   : > { %4820 = vmatpush1.bf16.msra.mxu1 %v6263_v16  ;;  %v6297_v34 = vpack.c.bf16 %v635_v29, %v627_v28  ;;  %v6305_v36 = vld [vmem:[#allocation5 + $0x10] sm:$0xff]  ;;  %v527_v38 = vld [vmem:[%s6168_s15 + $0x78] sm:$0xff]  ;;  %v517_v57 = vld [vmem:[%s6168_s15 + $0x28] sm:$0xff] }
  0xf2   : > { %4813 = vmatprep.subr.bf16.mxu1 %v6266_v18  ;;  %v518_v40 = vld [vmem:[%s6168_s15 + $0x30] sm:$0xff]  ;;  %v535_v48 = vld [vmem:[%s6168_s15 + $0xb8] sm:$0xff]  ;;  %v6366_v60 = vld [vmem:[#allocation5 + $0x60] sm:$0xff] }
  0xf3   : > { %4607 = vmatpush1.bf16.msra.mxu0 %v4606_v58  ;;  %v526_v41 = vld [vmem:[%s6168_s15 + $0x70] sm:$0xff]  ;;  %v543_v49 = vld [vmem:[%s6168_s15 + $0xf8] sm:$0xff]  ;;  %v525_v58 = vld [vmem:[%s6168_s15 + $0x68] sm:$0xff] }
  0xf4   : > { %4609 = vmatprep.subr.bf16.mxu0 %v4608_v62  ;;  %v4682_v44 = vpack.c.bf16 %v526_v41, %v518_v40  ;;  %v4684_v51 = vpack.c.bf16 %v543_v49, %v535_v48  ;;  %v534_v52 = vld [vmem:[%s6168_s15 + $0xb0] sm:$0xff]  ;;  %v4648_v61 = vpack.c.bf16 %v525_v58, %v517_v57  ;;  %v551_v62 = vld [vmem:[%s6168_s15 + $0x138] sm:$0xff]  ;;  %v6377_v2 = vld [vmem:[#allocation5 + $0x68] sm:$0xff] }
  0xf5   : > { %4821 = vmatpush1.bf16.msra.mxu1 %v6273_v23  ;;  %v542_v53 = vld [vmem:[%s6168_s15 + $0xf0] sm:$0xff]  ;;  %v559_v63 = vld [vmem:[%s6168_s15 + $0x178] sm:$0xff]  ;;  %v6400_v13 = vld [vmem:[#allocation5 + $0x80] sm:$0xff] }
  0xf6   : > { %4814 = vmatprep.subr.bf16.mxu1 %v6282_v27  ;;  %v6351_v54 = vld [vmem:[#allocation5 + $0x30] sm:$0xff]  ;;  %v4686_v56 = vpack.c.bf16 %v542_v53, %v534_v52  ;;  %v4688_v3 = vpack.c.bf16 %v559_v63, %v551_v62  ;;  %v567_v8 = vld [vmem:[%s6168_s15 + $0x1b8] sm:$0xff]  ;;  %v6406_v15 = vld [vmem:[#allocation5 + $0x88] sm:$0xff] }
  0xf7   : > { %4611 = vmatpush1.bf16.msra.mxu0 %v4610_v7  ;;  %v550_v1 = vld [vmem:[%s6168_s15 + $0x130] sm:$0xff]  ;;  %v6390_v7 = vld [vmem:[#allocation5 + $0x78] sm:$0xff]  ;;  %v6428_v25 = vld [vmem:[#allocation5 + $0xa0] sm:$0xff] }
  0xf8   : > { %4613 = vmatprep.subr.bf16.mxu0 %v4612_v12  ;;  %v558_v4 = vld [vmem:[%s6168_s15 + $0x170] sm:$0xff]  ;;  %v6422_v22 = vld [vmem:[#allocation5 + $0x98] sm:$0xff]  ;;  %v6434_v26 = vld [vmem:[#allocation5 + $0xa8] sm:$0xff] }
  0xf9   : > { %4822 = vmatpush1.bf16.msra.mxu1 %v6287_v30  ;;  %v4690_v5 = vpack.c.bf16 %v558_v4, %v550_v1  ;;  %v566_v11 = vld [vmem:[%s6168_s15 + $0x1b0] sm:$0xff]  ;;  %v607_v28 = vld [vmem:[%s6168_s15 + $0x2f8] sm:$0xff]  ;;  %v6466_v48 = vld [vmem:[#allocation5 + $0xc8] sm:$0xff] }
  0xfa   : > { %4815 = vmatprep.subr.bf16.mxu1 %v6297_v34  ;;  %v574_v12 = vld [vmem:[%s6168_s15 + $0x1f0] sm:$0xff]  ;;  %v6478_v52 = vld [vmem:[#allocation5 + $0xd8] sm:$0xff]  ;;  %v6486_v58 = vld [vmem:[#allocation5 + $0xe0] sm:$0xff] }
  0xfb   : > { %4615 = vmatpush1.bf16.msra.mxu0 %v4614_v17  ;;  %v4694_v14 = vpack.c.bf16 %v574_v12, %v566_v11  ;;  %v583_v17 = vld [vmem:[%s6168_s15 + $0x238] sm:$0xff]  ;;  %v582_v20 = vld [vmem:[%s6168_s15 + $0x230] sm:$0xff]  ;;  %v6494_v1 = vld [vmem:[#allocation5 + $0xe8] sm:$0xff] }
  0xfc   : > { %4617 = vmatprep.subr.bf16.mxu0 %v6207_v32  ;;  %v634_v32 = vld [vmem:[%s6168_s15 + $0x3d0] sm:$0xff]  ;;  %v631_v53 = vld [vmem:[%s6168_s15 + $0x3b8] sm:$0xff] }
  0xfd   : > { %v6301_v35 = vpack.c.bf16 %v634_v32, %v626_v33  ;;  %v590_v21 = vld [vmem:[%s6168_s15 + $0x270] sm:$0xff]  ;;  %v6506_v4 = vld [vmem:[#allocation5 + $0xf8] sm:$0xff] }
  0xfe   : > { %705 = vmatmul.mubr.f32.vlgmr.msra.gmra.mrb[0].mxu0 %v6276_v24  ;;  %v598_v29 = vld [vmem:[%s6168_s15 + $0x2b0] sm:$0xff] }
  0xff   : > { %4619 = vmatpush1.bf16.msra.mxu0 %v6212_v37  ;;  %710 = vmatprep.mubr.f32.mxu0 %v5830_v0  ;;  %v519_v37 = vld [vmem:[%s6168_s15 + $0x38] sm:$0xff]  ;;  %v6444_v33 = vld [vmem:[#allocation5 + $0xb0] sm:$0xff] }
 0x100   : > { %4621 = vmatprep.subr.bf16.mxu0 %v6219_v42  ;;  %v4680_v39 = vpack.c.bf16 %v527_v38, %v519_v37  ;;  %4823 = vmatpush1.bf16.msra.mxu1 %v6301_v35  ;;  %v6317_v42 = vld [vmem:[#allocation5 + $0x18] sm:$0xff]  ;;  %v6456_v37 = vld [vmem:[#allocation5 + $0xc0] sm:$0xff]  ;;  %v614_v41 = vld [vmem:[%s6168_s15 + $0x330] sm:$0xff] }
 0x101   : > { %v615_v38 = vld [vmem:[%s6168_s15 + $0x338] sm:$0xff]  ;;  %v638_v62 = vld [vmem:[%s6168_s15 + $0x3f0] sm:$0xff] }
 0x102   : > { %711 = vmatmul.mubr.f32.gmra.mrb[2].mxu0 %v6292_v31  ;;  %4681 = vmatprep.subr.bf16.mxu1 %v4680_v39  ;;  %v623_v39 = vld [vmem:[%s6168_s15 + $0x378] sm:$0xff] }
 0x103   : > { %716 = vmatprep.mubr.f32.mxu0 %v5830_v0  ;;  %4623 = vmatpush1.bf16.msra.mxu0 %v6221_v43  ;;  %v6320_v43 = vld [vmem:[#allocation5 + $0x40] sm:$0xff]  ;;  %v4704_v40 = vpack.c.bf16 %v623_v39, %v615_v38  ;;  %v581_v39 = vld [vmem:[%s6168_s15 + $0x228] sm:$0xff] }
 0x104   : > { %4625 = vmatprep.subr.bf16.mxu0 %v6228_v50  ;;  %1010 = vmatmul.mubr.f32.vlgmr.msra.gmra.mrb[0].mxu1 %v6320_v43  ;;  %v6342_v50 = vld [vmem:[#allocation5 + $0x50] sm:$0xff]  ;;  %v572_v38 = vld [vmem:[%s6168_s15 + $0x1e0] sm:$0xff] }
 0x105   : > { %1015 = vmatprep.mubr.f32.mxu1 %v5830_v0  ;;  %4683 = vmatpush1.bf16.msra.mxu1 %v4682_v44  ;;  %v622_v44 = vld [vmem:[%s6168_s15 + $0x370] sm:$0xff] }
 0x106   : > { %717 = vmatmul.mubr.f32.gmra.mrb[4].mxu0 %v6305_v36  ;;  %4685 = vmatprep.subr.bf16.mxu1 %v4684_v51  ;;  %v4706_v49 = vpack.c.bf16 %v622_v44, %v614_v41  ;;  %v6472_v51 = vld [vmem:[#allocation5 + $0xd0] sm:$0xff] }
 0x107   : > { %722 = vmatprep.mubr.f32.mxu0 %v5830_v0  ;;  %4627 = vmatpush1.bf16.msra.mxu0 %v6235_v55  ;;  %v6354_v55 = vld [vmem:[#allocation5 + $0x58] sm:$0xff] }
 0x108   : > { %4629 = vmatprep.subr.bf16.mxu0 %v6240_v59  ;;  %1016 = vmatmul.mubr.f32.gmra.mrb[2].mxu1 %v6330_v46  ;;  %v6363_v59 = vld [vmem:[#allocation5 + $0x38] sm:$0xff] }
 0x109   : > { %1021 = vmatprep.mubr.f32.mxu1 %v5830_v0  ;;  %4687 = vmatpush1.bf16.msra.mxu1 %v4686_v56  ;;  %v639_v56 = vld [vmem:[%s6168_s15 + $0x3f8] sm:$0xff] }
 0x10a   : > { %723 = vmatmul.mubr.f32.gmra.mrb[6].mxu0 %v6317_v42  ;;  %4689 = vmatprep.subr.bf16.mxu1 %v4688_v3  ;;  %v4708_v57 = vpack.c.bf16 %v639_v56, %v631_v53  ;;  %v6500_v3 = vld [vmem:[#allocation5 + $0xf0] sm:$0xff]  ;;  %v588_v53 = vld [vmem:[%s6168_s15 + $0x260] sm:$0xff]  ;;  %v597_v56 = vld [vmem:[%s6168_s15 + $0x2a8] sm:$0xff] }
 0x10b   : > { %728 = vmatprep.mubr.f32.mxu0 %v5830_v0  ;;  %4631 = vmatpush1.bf16.msra.mxu0 %v6251_v6  ;;  %v6384_v6 = vld [vmem:[#allocation5 + $0x70] sm:$0xff] }
 0x10c   : > { %4633 = vmatprep.subr.bf16.mxu0 %v6255_v9  ;;  %1022 = vmatmul.mubr.f32.gmra.mrb[4].mxu1 %v6342_v50  ;;  %v575_v9 = vld [vmem:[%s6168_s15 + $0x1f8] sm:$0xff] }
 0x10d   : > { %1027 = vmatprep.mubr.f32.mxu1 %v5830_v0  ;;  %4691 = vmatpush1.bf16.msra.mxu1 %v4690_v5  ;;  %v4692_v10 = vpack.c.bf16 %v575_v9, %v567_v8  ;;  %v516_v5 = vld [vmem:[%s6168_s15 + $0x20] sm:$0xff]  ;;  %v533_v9 = vld [vmem:[%s6168_s15 + $0xa8] sm:$0xff] }
 0x10e   : > { %729 = vmatmul.mubr.f32.gmra.mrb[8].mxu0 %v6327_v45  ;;  %v524_v8 = vld [vmem:[%s6168_s15 + $0x60] sm:$0xff] }
 0x10f   : > { %734 = vmatprep.mubr.f32.mxu0 %v5830_v0  ;;  %4635 = vmatpush1.bf16.msra.mxu0 %v6263_v16  ;;  %v6412_v16 = vld [vmem:[#allocation5 + $0x90] sm:$0xff]  ;;  %v4650_v11 = vpack.c.bf16 %v524_v8, %v516_v5  ;;  %v604_v5 = vld [vmem:[%s6168_s15 + $0x2e0] sm:$0xff]  ;;  %v613_v8 = vld [vmem:[%s6168_s15 + $0x328] sm:$0xff] }
 0x110   : > { %4637 = vmatprep.subr.bf16.mxu0 %v6266_v18  ;;  %1028 = vmatmul.mubr.f32.gmra.mrb[6].mxu1 %v6354_v55  ;;  %v591_v18 = vld [vmem:[%s6168_s15 + $0x278] sm:$0xff] }
 0x111   : > { %1033 = vmatprep.mubr.f32.mxu1 %v5830_v0  ;;  %4693 = vmatprep.subr.bf16.mxu1 %v4692_v10  ;;  %v4696_v19 = vpack.c.bf16 %v591_v18, %v583_v17  ;;  %v541_v10 = vld [vmem:[%s6168_s15 + $0xe8] sm:$0xff]  ;;  %v540_v17 = vld [vmem:[%s6168_s15 + $0xe0] sm:$0xff] }
 0x112   : > { %735 = vmatmul.mubr.f32.gmra.mrb[10].mxu0 %v6337_v47  ;;  %4695 = vmatpush1.bf16.msra.mxu1 %v4694_v14  ;;  %v4652_v12 = vpack.c.bf16 %v541_v10, %v533_v9  ;;  %v532_v14 = vld [vmem:[%s6168_s15 + $0xa0] sm:$0xff]  ;;  %v549_v18 = vld [vmem:[%s6168_s15 + $0x128] sm:$0xff] }
 0x113   : > { %740 = vmatprep.mubr.f32.mxu0 %v5830_v0  ;;  %4639 = vmatpush1.bf16.msra.mxu0 %v6273_v23  ;;  %v4698_v23 = vpack.c.bf16 %v590_v21, %v582_v20  ;;  %v4654_v20 = vpack.c.bf16 %v540_v17, %v532_v14  ;;  %v621_v9 = vld [vmem:[%s6168_s15 + $0x368] sm:$0xff]  ;;  %v620_v14 = vld [vmem:[%s6168_s15 + $0x360] sm:$0xff] }
 0x114   : > { %4641 = vmatprep.subr.bf16.mxu0 %v6282_v27  ;;  %1034 = vmatmul.mubr.f32.gmra.mrb[8].mxu1 %v6366_v60  ;;  %v599_v27 = vld [vmem:[%s6168_s15 + $0x2b8] sm:$0xff]  ;;  %v629_v17 = vld [vmem:[%s6168_s15 + $0x3a8] sm:$0xff] }
 0x115   : > { %1039 = vmatprep.mubr.f32.mxu1 %v5830_v0  ;;  %4697 = vmatprep.subr.bf16.mxu1 %v4696_v19  ;;  %v4700_v32 = vpack.c.bf16 %v607_v28, %v599_v27  ;;  %v557_v19 = vld [vmem:[%s6168_s15 + $0x168] sm:$0xff]  ;;  %v556_v27 = vld [vmem:[%s6168_s15 + $0x160] sm:$0xff] }
 0x116   : > { %741 = vmatmul.mubr.f32.gmra.mrb[12].mxu0 %v6351_v54  ;;  %4699 = vmatpush1.bf16.msra.mxu1 %v4698_v23  ;;  %v4656_v21 = vpack.c.bf16 %v557_v19, %v549_v18  ;;  %v548_v23 = vld [vmem:[%s6168_s15 + $0x120] sm:$0xff]  ;;  %v565_v28 = vld [vmem:[%s6168_s15 + $0x1a8] sm:$0xff] }
 0x117   : > { %746 = vmatprep.mubr.f32.mxu0 %v5830_v0  ;;  %4643 = vmatpush1.bf16.msra.mxu0 %v6287_v30  ;;  %v606_v30 = vld [vmem:[%s6168_s15 + $0x2f0] sm:$0xff]  ;;  %v637_v18 = vld [vmem:[%s6168_s15 + $0x3e8] sm:$0xff] }
 0x118   : > { %4645 = vmatprep.subr.bf16.mxu0 %v6297_v34  ;;  %1040 = vmatmul.mubr.f32.gmra.mrb[10].mxu1 %v6377_v2  ;;  %v4702_v34 = vpack.c.bf16 %v606_v30, %v598_v29  ;;  %v573_v29 = vld [vmem:[%s6168_s15 + $0x1e8] sm:$0xff]  ;;  %v4658_v30 = vpack.c.bf16 %v556_v27, %v548_v23  ;;  %v636_v23 = vld [vmem:[%s6168_s15 + $0x3e0] sm:$0xff] }
 0x119   : > { %1045 = vmatprep.mubr.f32.mxu1 %v5830_v0  ;;  %4701 = vmatprep.subr.bf16.mxu1 %v4700_v32  ;;  %v4660_v32 = vpack.c.bf16 %v573_v29, %v565_v28  ;;  %v1668_v27 = vld [vmem:[#allocation8] sm:$0xff]  ;;  %v1669_v28 = vld [vmem:[#allocation8 + $0x8] sm:$0xff] }
 0x11a   : > { %747 = vmatmul.mubr.f32.gmra.mrb[14].mxu0 %v6363_v59  ;;  %4703 = vmatpush1.bf16.msra.mxu1 %v4702_v34  ;;  %v564_v34 = vld [vmem:[%s6168_s15 + $0x1a0] sm:$0xff] }
 0x11b   : > { %752 = vmatprep.mubr.f32.mxu0 %v5830_v0  ;;  %4647 = vmatpush1.bf16.msra.mxu0 %v6301_v35  ;;  %v6450_v35 = vld [vmem:[#allocation5 + $0xb8] sm:$0xff]  ;;  %v4662_v41 = vpack.c.bf16 %v572_v38, %v564_v34 }
 0x11c   : > { %4649 = vmatprep.subr.bf16.mxu0 %v4648_v61  ;;  %1046 = vmatmul.mubr.f32.gmra.mrb[12].mxu1 %v6384_v6  ;;  %v630_v61 = vld [vmem:[%s6168_s15 + $0x3b0] sm:$0xff]  ;;  %v1671_v34 = vld [vmem:[#allocation8 + $0x18] sm:$0xff] }
 0x11d   : > { %1051 = vmatprep.mubr.f32.mxu1 %v5830_v0  ;;  %4705 = vmatprep.subr.bf16.mxu1 %v4704_v40  ;;  %v4710_v63 = vpack.c.bf16 %v638_v62, %v630_v61  ;;  %v589_v40 = vld [vmem:[%s6168_s15 + $0x268] sm:$0xff] }
 0x11e   : > { %753 = vmatmul.mubr.f32.gmra.mrb[16].mxu0 %v6320_v43  ;;  %4707 = vmatpush1.bf16.msra.mxu1 %v4706_v49  ;;  %v4664_v44 = vpack.c.bf16 %v589_v40, %v581_v39  ;;  %v580_v49 = vld [vmem:[%s6168_s15 + $0x220] sm:$0xff]  ;;  %v1673_v40 = vld [vmem:[#allocation8 + $0x28] sm:$0xff] }
 0x11f   : > { %758 = vmatprep.mubr.f32.mxu0 %v5830_v0  ;;  %4709 = vmatprep.subr.bf16.mxu1 %v4708_v57  ;;  %v605_v57 = vld [vmem:[%s6168_s15 + $0x2e8] sm:$0xff]  ;;  %v4666_v61 = vpack.c.bf16 %v588_v53, %v580_v49  ;;  %v1672_v39 = vld [vmem:[#allocation8 + $0x20] sm:$0xff]  ;;  %v1675_v49 = vld [vmem:[#allocation8 + $0x38] sm:$0xff] }
 0x120   : > { %1052 = vmatmul.mubr.f32.gmra.mrb[14].mxu1 %v6390_v7  ;;  %v4668_v62 = vpack.c.bf16 %v605_v57, %v597_v56  ;;  %v1676_v53 = vld [vmem:[#allocation8 + $0x40] sm:$0xff]  ;;  %v1677_v56 = vld [vmem:[#allocation8 + $0x48] sm:$0xff]  ;;  %v1678_v57 = vld [vmem:[#allocation8 + $0x50] sm:$0xff] }
 0x121   : > { %1057 = vmatprep.mubr.f32.mxu1 %v5830_v0 }
 0x122   : > { %759 = vmatmul.mubr.f32.gmra.mrb[18].mxu0 %v6330_v46  ;;  %4711 = vmatpush1.bf16.msra.mxu1 %v4710_v63  ;;  %v596_v63 = vld [vmem:[%s6168_s15 + $0x2a0] sm:$0xff] }
 0x123   : > { %764 = vmatprep.mubr.f32.mxu0 %v5830_v0  ;;  %v4670_v10 = vpack.c.bf16 %v604_v5, %v596_v63  ;;  %v1681_v63 = vld [vmem:[#allocation8 + $0x68] sm:$0xff]  ;;  %v1682_v5 = vld [vmem:[#allocation8 + $0x70] sm:$0xff] }
 0x124   : > { %1058 = vmatmul.mubr.f32.gmra.mrb[16].mxu1 %v6400_v13 }
 0x125   : > { %1063 = vmatprep.mubr.f32.mxu1 %v5830_v0 }
 0x126   : > { %765 = vmatmul.mubr.f32.gmra.mrb[20].mxu0 %v6342_v50 }
 0x127   : > { %770 = vmatprep.mubr.f32.mxu0 %v5830_v0 }
 0x128   : > { %1064 = vmatmul.mubr.f32.gmra.mrb[18].mxu1 %v6406_v15 }
 0x129   : > { %1069 = vmatprep.mubr.f32.mxu1 %v5830_v0 }
 0x12a   : > { %771 = vmatmul.mubr.f32.gmra.mrb[22].mxu0 %v6354_v55 }
 0x12b   : > { %776 = vmatprep.mubr.f32.mxu0 %v5830_v0 }
 0x12c   : > { %1070 = vmatmul.mubr.f32.gmra.mrb[20].mxu1 %v6412_v16 }
 0x12d   : > { %1075 = vmatprep.mubr.f32.mxu1 %v5830_v0 }
 0x12e   : > { %777 = vmatmul.mubr.f32.gmra.mrb[24].mxu0 %v6366_v60 }
 0x12f   : > { %782 = vmatprep.mubr.f32.mxu0 %v5830_v0 }
 0x130   : > { %1076 = vmatmul.mubr.f32.gmra.mrb[22].mxu1 %v6422_v22 }
 0x131   : > { %1081 = vmatprep.mubr.f32.mxu1 %v5830_v0 }
 0x132   : > { %783 = vmatmul.mubr.f32.gmra.mrb[26].mxu0 %v6377_v2 }
 0x133   : > { %788 = vmatprep.mubr.f32.mxu0 %v5830_v0 }
 0x134   : > { %1082 = vmatmul.mubr.f32.gmra.mrb[24].mxu1 %v6428_v25 }
 0x135   : > { %1087 = vmatprep.mubr.f32.mxu1 %v5830_v0 }
 0x136   : > { %789 = vmatmul.mubr.f32.gmra.mrb[28].mxu0 %v6384_v6 }
 0x137   : > { %794 = vmatprep.mubr.f32.mxu0 %v5830_v0 }
 0x138   : > { %1088 = vmatmul.mubr.f32.gmra.mrb[26].mxu1 %v6434_v26 }
 0x139   : > { %1093 = vmatprep.mubr.f32.mxu1 %v5830_v0 }
 0x13a   : > { %795 = vmatmul.mubr.f32.gmra.mrb[30].mxu0 %v6390_v7 }
 0x13b   : > { %800 = vmatprep.mubr.f32.mxu0 %v5830_v0 }
 0x13c   : > { %1094 = vmatmul.mubr.f32.gmra.mrb[28].mxu1 %v6444_v33 }
 0x13d   : > { %1099 = vmatprep.mubr.f32.mxu1 %v5830_v0 }
 0x13e   : > { %801 = vmatmul.mubr.f32.gmra.mrb[32].mxu0 %v6400_v13 }
 0x13f   : > { %806 = vmatprep.mubr.f32.mxu0 %v5830_v0 }
 0x140   : > { %1100 = vmatmul.mubr.f32.gmra.mrb[30].mxu1 %v6450_v35 }
 0x141   : > { %1105 = vmatprep.mubr.f32.mxu1 %v5830_v0 }
 0x142   : > { %807 = vmatmul.mubr.f32.gmra.mrb[34].mxu0 %v6406_v15 }
 0x143   : > { %812 = vmatprep.mubr.f32.mxu0 %v5830_v0 }
 0x144   : > { %1106 = vmatmul.mubr.f32.gmra.mrb[32].mxu1 %v6456_v37 }
 0x145   : > { %1111 = vmatprep.mubr.f32.mxu1 %v5830_v0 }
 0x146   : > { %813 = vmatmul.mubr.f32.gmra.mrb[36].mxu0 %v6412_v16 }
 0x147   : > { %818 = vmatprep.mubr.f32.mxu0 %v5830_v0 }
 0x148   : > { %1112 = vmatmul.mubr.f32.gmra.mrb[34].mxu1 %v6466_v48 }
 0x149   : > { %1117 = vmatprep.mubr.f32.mxu1 %v5830_v0 }
 0x14a   : > { %819 = vmatmul.mubr.f32.gmra.mrb[38].mxu0 %v6422_v22 }
 0x14b   : > { %824 = vmatprep.mubr.f32.mxu0 %v5830_v0 }
 0x14c   : > { %1118 = vmatmul.mubr.f32.gmra.mrb[36].mxu1 %v6472_v51 }
 0x14d   : > { %1123 = vmatprep.mubr.f32.mxu1 %v5830_v0 }
 0x14e   : > { %825 = vmatmul.mubr.f32.gmra.mrb[40].mxu0 %v6428_v25 }
 0x14f   : > { %830 = vmatprep.mubr.f32.mxu0 %v5830_v0 }
 0x150   : > { %1124 = vmatmul.mubr.f32.gmra.mrb[38].mxu1 %v6478_v52 }
 0x151   : > { %1129 = vmatprep.mubr.f32.mxu1 %v5830_v0 }
 0x152   : > { %831 = vmatmul.mubr.f32.gmra.mrb[42].mxu0 %v6434_v26 }
 0x153   : > { %836 = vmatprep.mubr.f32.mxu0 %v5830_v0 }
 0x154   : > { %1130 = vmatmul.mubr.f32.gmra.mrb[40].mxu1 %v6486_v58 }
 0x155   : > { %1135 = vmatprep.mubr.f32.mxu1 %v5830_v0 }
 0x156   : > { %837 = vmatmul.mubr.f32.gmra.mrb[44].mxu0 %v6444_v33 }
 0x157   : > { %842 = vmatprep.mubr.f32.mxu0 %v5830_v0 }
 0x158   : > { %1136 = vmatmul.mubr.f32.gmra.mrb[42].mxu1 %v6494_v1 }
 0x159   : > { %1141 = vmatprep.mubr.f32.mxu1 %v5830_v0 }
 0x15a   : > { %843 = vmatmul.mubr.f32.gmra.mrb[46].mxu0 %v6450_v35 }
 0x15b   : > { %848 = vmatprep.mubr.f32.mxu0 %v5830_v0 }
 0x15c   : > { %1142 = vmatmul.mubr.f32.gmra.mrb[44].mxu1 %v6500_v3 }
 0x15d   : > { %1147 = vmatprep.mubr.f32.mxu1 %v5830_v0 }
 0x15e   : > { %849 = vmatmul.mubr.f32.gmra.mrb[48].mxu0 %v6456_v37 }
 0x15f   : > { %854 = vmatprep.mubr.f32.mxu0 %v5830_v0 }
 0x160   : > { %1148 = vmatmul.mubr.f32.gmra.mrb[46].mxu1 %v6506_v4 }
 0x161   : > { %1475 = vmatprep.mubr.f32.mxu1 %v5830_v0 }
 0x162   : > { %855 = vmatmul.mubr.f32.gmra.mrb[50].mxu0 %v6466_v48 }
 0x163   : > { %860 = vmatprep.mubr.f32.mxu0 %v5830_v0 }
 0x164   : > { %1476 = vmatmul.mubr.f32.vlgmr.msra.gmra.mrb[48].mxu1 %v6276_v24 }
 0x165   : > { %1481 = vmatprep.mubr.f32.mxu1 %v5830_v0 }
 0x166   : > { %861 = vmatmul.mubr.f32.gmra.mrb[52].mxu0 %v6472_v51 }
 0x167   : > { %866 = vmatprep.mubr.f32.mxu0 %v5830_v0 }
 0x168   : > { %1482 = vmatmul.mubr.f32.gmra.mrb[50].mxu1 %v6292_v31 }
 0x169   : > { %1487 = vmatprep.mubr.f32.mxu1 %v5830_v0 }
 0x16a   : > { %867 = vmatmul.mubr.f32.gmra.mrb[54].mxu0 %v6478_v52 }
 0x16b   : > { %872 = vmatprep.mubr.f32.mxu0 %v5830_v0 }
 0x16c   : > { %1488 = vmatmul.mubr.f32.gmra.mrb[52].mxu1 %v6305_v36 }
 0x16d   : > { %1493 = vmatprep.mubr.f32.mxu1 %v5830_v0 }
 0x16e   : > { %873 = vmatmul.mubr.f32.gmra.mrb[56].mxu0 %v6486_v58 }
 0x16f   : > { %878 = vmatprep.mubr.f32.mxu0 %v5830_v0 }
 0x170   : > { %1494 = vmatmul.mubr.f32.gmra.mrb[54].mxu1 %v6317_v42 }
 0x171   : > { %1499 = vmatprep.mubr.f32.mxu1 %v5830_v0 }
 0x172   : > { %879 = vmatmul.mubr.f32.gmra.mrb[58].mxu0 %v6494_v1 }
 0x173   : > { %884 = vmatprep.mubr.f32.mxu0 %v5830_v0 }
 0x174   : > { %1500 = vmatmul.mubr.f32.gmra.mrb[56].mxu1 %v6327_v45 }
 0x175   : > { %1505 = vmatprep.mubr.f32.mxu1 %v5830_v0 }
 0x176   : > { %885 = vmatmul.mubr.f32.gmra.mrb[60].mxu0 %v6500_v3 }
 0x177   : > { %890 = vmatprep.mubr.f32.mxu0 %v5830_v0 }
 0x178   : > { %1506 = vmatmul.mubr.f32.gmra.mrb[58].mxu1 %v6337_v47 }
 0x179   : > { %1511 = vmatprep.mubr.f32.mxu1 %v5830_v0 }
 0x17a   : > { %891 = vmatmul.mubr.f32.gmra.mrb[62].mxu0 %v6506_v4 }
 0x17b   : > { %961 = vmatprep.mubr.f32.mxu0 %v5830_v0 }
 0x17c   : > { %1512 = vmatmul.mubr.f32.gmra.mrb[60].mxu1 %v6351_v54 }
 0x17d   : > { %1517 = vmatprep.mubr.f32.mxu1 %v5830_v0 }
 0x17e   : > { %962 = vmatmul.mubr.f32.vlgmr.msra.gmra.mrb[64].mxu0 %v6276_v24 }
 0x17f   : > { %4651 = vmatpush1.bf16.msra.mxu0 %v4650_v11  ;;  %967 = vmatprep.mubr.f32.mxu0 %v5830_v0  ;;  %v4672_v11 = vpack.c.bf16 %v621_v9, %v613_v8  ;;  %v1683_v8 = vld [vmem:[#allocation8 + $0x78] sm:$0xff] }
 0x180   : > { %4653 = vmatprep.subr.bf16.mxu0 %v4652_v12  ;;  %1518 = vmatmul.mubr.f32.gmra.mrb[62].mxu1 %v6363_v59  ;;  %v612_v12 = vld [vmem:[%s6168_s15 + $0x320] sm:$0xff] }
 0x181   : > { %1523 = vmatprep.mubr.f32.mxu1 %v5830_v0  ;;  %v4674_v19 = vpack.c.bf16 %v620_v14, %v612_v12  ;;  %v6699_v14 = vld [vmem:[%s6157_s10] sm:$0xff] }
 0x182   : > { %968 = vmatmul.mubr.f32.gmra.mrb[66].mxu0 %v6292_v31 }
 0x183   : > { %4655 = vmatpush1.bf16.msra.mxu0 %v4654_v20  ;;  %973 = vmatprep.mubr.f32.mxu0 %v5830_v0  ;;  %v4676_v20 = vpack.c.bf16 %v637_v18, %v629_v17 }
 0x184   : > { %4657 = vmatprep.subr.bf16.mxu0 %v4656_v21  ;;  %1524 = vmatmul.mubr.f32.gmra.mrb[64].mxu1 %v6320_v43  ;;  %v628_v21 = vld [vmem:[%s6168_s15 + $0x3a0] sm:$0xff] }
 0x185   : > { %1529 = vmatprep.mubr.f32.mxu1 %v5830_v0  ;;  %v4678_v29 = vpack.c.bf16 %v636_v23, %v628_v21 }
 0x186   : > { %974 = vmatmul.mubr.f32.gmra.mrb[68].mxu0 %v6305_v36 }
 0x187   : > { %4659 = vmatpush1.bf16.msra.mxu0 %v4658_v30  ;;  %979 = vmatprep.mubr.f32.mxu0 %v5830_v0  ;;  %v4712_v30 = vpack.c.bf16 %v1669_v28, %v1668_v27 }
 0x188   : > { %4661 = vmatprep.subr.bf16.mxu0 %v4660_v32  ;;  %1530 = vmatmul.mubr.f32.gmra.mrb[66].mxu1 %v6330_v46  ;;  %v1670_v32 = vld [vmem:[#allocation8 + $0x10] sm:$0xff] }
 0x189   : > { %1535 = vmatprep.mubr.f32.mxu1 %v5830_v0  ;;  %v4716_v38 = vpack.c.bf16 %v1671_v34, %v1670_v32 }
 0x18a   : > { %980 = vmatmul.mubr.f32.gmra.mrb[70].mxu0 %v6317_v42 }
 0x18b   : > { %4663 = vmatpush1.bf16.msra.mxu0 %v4662_v41  ;;  %985 = vmatprep.mubr.f32.mxu0 %v5830_v0  ;;  %v4720_v41 = vpack.c.bf16 %v1673_v40, %v1672_v39 }
 0x18c   : > { %4665 = vmatprep.subr.bf16.mxu0 %v4664_v44  ;;  %1536 = vmatmul.mubr.f32.gmra.mrb[68].mxu1 %v6342_v50  ;;  %v1674_v44 = vld [vmem:[#allocation8 + $0x30] sm:$0xff] }
 0x18d   : > { %1541 = vmatprep.mubr.f32.mxu1 %v5830_v0 }
 0x18e   : > { %986 = vmatmul.mubr.f32.gmra.mrb[72].mxu0 %v6327_v45 }
 0x18f   : > { %4667 = vmatpush1.bf16.msra.mxu0 %v4666_v61  ;;  %991 = vmatprep.mubr.f32.mxu0 %v5830_v0  ;;  %v1679_v61 = vld [vmem:[#allocation8 + $0x58] sm:$0xff] }
 0x190   : > { %4669 = vmatprep.subr.bf16.mxu0 %v4668_v62  ;;  %1542 = vmatmul.mubr.f32.gmra.mrb[70].mxu1 %v6354_v55  ;;  %v1680_v62 = vld [vmem:[#allocation8 + $0x60] sm:$0xff] }
 0x191   : > { %1547 = vmatprep.mubr.f32.mxu1 %v5830_v0 }
 0x192   : > { %992 = vmatmul.mubr.f32.gmra.mrb[74].mxu0 %v6337_v47 }
 0x193   : > { %4671 = vmatpush1.bf16.msra.mxu0 %v4670_v10  ;;  %997 = vmatprep.mubr.f32.mxu0 %v5830_v0 }
 0x194   : > { %4673 = vmatprep.subr.bf16.mxu0 %v4672_v11  ;;  %1548 = vmatmul.mubr.f32.gmra.mrb[72].mxu1 %v6366_v60 }
 0x195   : > { %1553 = vmatprep.mubr.f32.mxu1 %v5830_v0 }
 0x196   : > { %998 = vmatmul.mubr.f32.gmra.mrb[76].mxu0 %v6351_v54 }
 0x197   : > { %4675 = vmatpush1.bf16.msra.mxu0 %v4674_v19  ;;  %1003 = vmatprep.mubr.f32.mxu0 %v5830_v0  ;;  %v3308_v19 = vld [vmem:[#allocation11] sm:$0xff] }
 0x198   : > { %4677 = vmatprep.subr.bf16.mxu0 %v4676_v20  ;;  %1554 = vmatmul.mubr.f32.gmra.mrb[74].mxu1 %v6377_v2 }
 0x199   : > { %1559 = vmatprep.mubr.f32.mxu1 %v5830_v0 }
 0x19a   : > { %1004 = vmatmul.mubr.f32.gmra.mrb[78].mxu0 %v6363_v59 }
 0x19b   : > { %4679 = vmatpush1.bf16.msra.mxu0 %v4678_v29  ;;  %1218 = vmatprep.mubr.f32.mxu0 %v5830_v0 }
 0x19c   : > { %4713 = vmatprep.subr.bf16.mxu0 %v4712_v30  ;;  %1560 = vmatmul.mubr.f32.gmra.mrb[76].mxu1 %v6384_v6 }
 0x19d   : > { %1565 = vmatprep.mubr.f32.mxu1 %v5830_v0 }
 0x19e   : > { %1219 = vmatmul.mubr.f32.vlgmr.msra.gmra.mrb[80].mxu0 %v6276_v24  ;;  %v4724_v24 = vpack.c.bf16 %v1675_v49, %v1674_v44  ;;  %v3310_v49 = vld [vmem:[#allocation11 + $0x10] sm:$0xff] }
 0x19f   : > { %4715 = vmatpush3.bf16.msra.mxu0 %v4712_v30  ;;  %1224 = vmatprep.mubr.f32.mxu0 %v5830_v0 }
 0x1a0   : > { %4717 = vmatprep.subr.bf16.mxu0 %v4716_v38  ;;  %1566 = vmatmul.mubr.f32.gmra.mrb[78].mxu1 %v6390_v7 }
 0x1a1   : > { %1571 = vmatprep.mubr.f32.mxu1 %v5830_v0 }
 0x1a2   : > { %1225 = vmatmul.mubr.f32.gmra.mrb[82].mxu0 %v6292_v31  ;;  %v4728_v31 = vpack.c.bf16 %v1677_v56, %v1676_v53 }
 0x1a3   : > { %1230 = vmatprep.mubr.f32.mxu0 %v5830_v0  ;;  %4719 = vmatpush3.bf16.msra.mxu0 %v4716_v38 }
 0x1a4   : > { %4721 = vmatprep.subr.bf16.mxu0 %v4720_v41  ;;  %1572 = vmatmul.mubr.f32.gmra.mrb[80].mxu1 %v6400_v13 }
 0x1a5   : > { %1577 = vmatprep.mubr.f32.mxu1 %v5830_v0 }
 0x1a6   : > { %1231 = vmatmul.mubr.f32.gmra.mrb[84].mxu0 %v6305_v36  ;;  %v4732_v36 = vpack.c.bf16 %v1679_v61, %v1678_v57 }
 0x1a7   : > { %1236 = vmatprep.mubr.f32.mxu0 %v5830_v0  ;;  %4723 = vmatpush3.bf16.msra.mxu0 %v4720_v41 }
 0x1a8   : > { %4725 = vmatprep.subr.bf16.mxu0 %v4724_v24  ;;  %1578 = vmatmul.mubr.f32.gmra.mrb[82].mxu1 %v6406_v15 }
 0x1a9   : > { %1583 = vmatprep.mubr.f32.mxu1 %v5830_v0 }
 0x1aa   : > { %1237 = vmatmul.mubr.f32.gmra.mrb[86].mxu0 %v6317_v42  ;;  %v4736_v42 = vpack.c.bf16 %v1681_v63, %v1680_v62 }
 0x1ab   : > { %1242 = vmatprep.mubr.f32.mxu0 %v5830_v0  ;;  %4727 = vmatpush3.bf16.msra.mxu0 %v4724_v24  ;;  %v3311_v24 = vld [vmem:[#allocation11 + $0x18] sm:$0xff] }
 0x1ac   : > { %4729 = vmatprep.subr.bf16.mxu0 %v4728_v31  ;;  %1584 = vmatmul.mubr.f32.gmra.mrb[84].mxu1 %v6412_v16  ;;  %v4748_v53 = vpack.c.bf16 %v3311_v24, %v3310_v49 }
 0x1ad   : > { %1589 = vmatprep.mubr.f32.mxu1 %v5830_v0 }
 0x1ae   : > { %1243 = vmatmul.mubr.f32.gmra.mrb[88].mxu0 %v6327_v45  ;;  %v4740_v45 = vpack.c.bf16 %v1683_v8, %v1682_v5 }
 0x1af   : > { %1248 = vmatprep.mubr.f32.mxu0 %v5830_v0  ;;  %4731 = vmatpush3.bf16.msra.mxu0 %v4728_v31 }
 0x1b0   : > { %4733 = vmatprep.subr.bf16.mxu0 %v4732_v36  ;;  %1590 = vmatmul.mubr.f32.gmra.mrb[86].mxu1 %v6422_v22 }
 0x1b1   : > { %1595 = vmatprep.mubr.f32.mxu1 %v5830_v0 }
 0x1b2   : > { %1249 = vmatmul.mubr.f32.gmra.mrb[90].mxu0 %v6337_v47 }
 0x1b3   : > { %1254 = vmatprep.mubr.f32.mxu0 %v5830_v0  ;;  %4735 = vmatpush3.bf16.msra.mxu0 %v4732_v36 }
 0x1b4   : > { %4737 = vmatprep.subr.bf16.mxu0 %v4736_v42  ;;  %1596 = vmatmul.mubr.f32.gmra.mrb[88].mxu1 %v6428_v25 }
 0x1b5   : > { %1601 = vmatprep.mubr.f32.mxu1 %v5830_v0 }
 0x1b6   : > { %1255 = vmatmul.mubr.f32.gmra.mrb[92].mxu0 %v6351_v54 }
 0x1b7   : > { %1260 = vmatprep.mubr.f32.mxu0 %v5830_v0  ;;  %4739 = vmatpush3.bf16.msra.mxu0 %v4736_v42 }
 0x1b8   : > { %4741 = vmatprep.subr.bf16.mxu0 %v4740_v45  ;;  %1602 = vmatmul.mubr.f32.gmra.mrb[90].mxu1 %v6434_v26 }
 0x1b9   : > { %1607 = vmatprep.mubr.f32.mxu1 %v5830_v0 }
 0x1ba   : > { %1261 = vmatmul.mubr.f32.gmra.mrb[94].mxu0 %v6363_v59 }
 0x1bb   : > { %1266 = vmatprep.mubr.f32.mxu0 %v5830_v0  ;;  %4743 = vmatpush3.bf16.msra.mxu0 %v4740_v45 }
 0x1bc   : > { %1608 = vmatmul.mubr.f32.gmra.mrb[92].mxu1 %v6444_v33 }
 0x1bd   : > { %1613 = vmatprep.mubr.f32.mxu1 %v5830_v0 }
 0x1be   : > { %1267 = vmatmul.mubr.f32.gmra.mrb[96].mxu0 %v6320_v43 }
 0x1bf   : > { %1272 = vmatprep.mubr.f32.mxu0 %v5830_v0 }
 0x1c0   : > { %1614 = vmatmul.mubr.f32.gmra.mrb[94].mxu1 %v6450_v35 }
 0x1c1   : > { %1619 = vmatprep.mubr.f32.mxu1 %v5830_v0 }
 0x1c2   : > { %1273 = vmatmul.mubr.f32.gmra.mrb[98].mxu0 %v6330_v46 }
 0x1c3   : > { %1278 = vmatprep.mubr.f32.mxu0 %v5830_v0 }
 0x1c4   : > { %1620 = vmatmul.mubr.f32.gmra.mrb[96].mxu1 %v6456_v37 }
 0x1c5   : > { %1625 = vmatprep.mubr.f32.mxu1 %v5830_v0 }
 0x1c6   : > { %1279 = vmatmul.mubr.f32.gmra.mrb[100].mxu0 %v6342_v50 }
 0x1c7   : > { %1284 = vmatprep.mubr.f32.mxu0 %v5830_v0 }
 0x1c8   : > { %1626 = vmatmul.mubr.f32.gmra.mrb[98].mxu1 %v6466_v48 }
 0x1c9   : > { %1631 = vmatprep.mubr.f32.mxu1 %v5830_v0 }
 0x1ca   : > { %1285 = vmatmul.mubr.f32.gmra.mrb[102].mxu0 %v6354_v55 }
 0x1cb   : > { %1290 = vmatprep.mubr.f32.mxu0 %v5830_v0 }
 0x1cc   : > { %1632 = vmatmul.mubr.f32.gmra.mrb[100].mxu1 %v6472_v51 }
 0x1cd   : > { %1637 = vmatprep.mubr.f32.mxu1 %v5830_v0 }
 0x1ce   : > { %1291 = vmatmul.mubr.f32.gmra.mrb[104].mxu0 %v6366_v60 }
 0x1cf   : > { %1296 = vmatprep.mubr.f32.mxu0 %v5830_v0 }
 0x1d0   : > { %1638 = vmatmul.mubr.f32.gmra.mrb[102].mxu1 %v6478_v52 }
 0x1d1   : > { %v6646_v43 = vpop.f32.mrb[0].mxu0  ;;  %1643 = vmatprep.mubr.f32.mxu1 %v5830_v0 }
 0x1d2   : > { %9336 = vst [vmem:[#allocation27_spill] sm:$0xff] %v6646_v43  ;;  %v6649_v46 = vpop.f32.mrb[1].mxu0  ;;  %1297 = vmatmul.mubr.f32.gmra.mrb[106].mxu0 %v6377_v2 }
 0x1d3   : > { %9337 = vst [vmem:[#allocation28_spill] sm:$0xff] %v6649_v46  ;;  %1302 = vmatprep.mubr.f32.mxu0 %v5830_v0 }
 0x1d4   : > { %1644 = vmatmul.mubr.f32.gmra.mrb[104].mxu1 %v6486_v58 }
 0x1d5   : > { %v6654_v47 = vpop.f32.mrb[2].mxu0  ;;  %1649 = vmatprep.mubr.f32.mxu1 %v5830_v0 }
 0x1d6   : > { %9338 = vst [vmem:[#allocation29_spill] sm:$0xff] %v6654_v47  ;;  %v6657_v50 = vpop.f32.mrb[3].mxu0  ;;  %1303 = vmatmul.mubr.f32.gmra.mrb[108].mxu0 %v6384_v6 }
 0x1d7   : > { %9339 = vst [vmem:[#allocation30_spill] sm:$0xff] %v6657_v50  ;;  %1308 = vmatprep.mubr.f32.mxu0 %v5830_v0  ;;  %v6670_v59 = vpop.f32.mrb[0].mxu1 }
 0x1d8   : > { %9342 = vst [vmem:[#allocation33_spill] sm:$0xff] %v6670_v59  ;;  %1650 = vmatmul.mubr.f32.gmra.mrb[106].mxu1 %v6494_v1  ;;  %v6675_v2 = vpop.f32.mrb[1].mxu1 }
 0x1d9   : > { %v6662_v54 = vpop.f32.mrb[4].mxu0  ;;  %9344 = vst [vmem:[#allocation35_spill] sm:$0xff] %v6675_v2  ;;  %1655 = vmatprep.mubr.f32.mxu1 %v5830_v0 }
 0x1da   : > { %9340 = vst [vmem:[#allocation31_spill] sm:$0xff] %v6662_v54  ;;  %v6665_v55 = vpop.f32.mrb[5].mxu0  ;;  %1309 = vmatmul.mubr.f32.gmra.mrb[110].mxu0 %v6390_v7 }
 0x1db   : > { %9341 = vst [vmem:[#allocation32_spill] sm:$0xff] %v6665_v55  ;;  %1314 = vmatprep.mubr.f32.mxu0 %v5830_v0  ;;  %v6682_v7 = vpop.f32.mrb[2].mxu1 }
 0x1dc   : > { %9346 = vst [vmem:[#allocation37_spill] sm:$0xff] %v6682_v7  ;;  %1656 = vmatmul.mubr.f32.gmra.mrb[108].mxu1 %v6500_v3  ;;  %v6687_v10 = vpop.f32.mrb[3].mxu1 }
 0x1dd   : > { %v6672_v60 = vpop.f32.mrb[6].mxu0  ;;  %9348 = vst [vmem:[#allocation39_spill] sm:$0xff] %v6687_v10  ;;  %1661 = vmatprep.mubr.f32.mxu1 %v5830_v0 }
 0x1de   : > { %9343 = vst [vmem:[#allocation34_spill] sm:$0xff] %v6672_v60  ;;  %v6677_v6 = vpop.f32.mrb[7].mxu0  ;;  %1315 = vmatmul.mubr.f32.gmra.mrb[112].mxu0 %v6400_v13 }
 0x1df   : > { %9345 = vst [vmem:[#allocation36_spill] sm:$0xff] %v6677_v6  ;;  %1320 = vmatprep.mubr.f32.mxu0 %v5830_v0  ;;  %v6694_v13 = vpop.f32.mrb[4].mxu1 }
 0x1e0   : > { %9350 = vst [vmem:[#allocation41_spill] sm:$0xff] %v6694_v13  ;;  %1662 = vmatmul.mubr.f32.gmra.mrb[110].mxu1 %v6506_v4  ;;  %v6702_v17 = vpop.f32.mrb[5].mxu1  ;;  %v7032_v13 = vld [vmem:[%s6157_s10 + $0xc8] sm:$0xff] }
 0x1e1   : > { %v6684_v9 = vpop.f32.mrb[8].mxu0  ;;  %9352 = vst [vmem:[#allocation43_spill] sm:$0xff] %v6702_v17  ;;  %4456 = vmatprep.mubr.f32.mxu1 %v6699_v14 }
 0x1e2   : > { %9347 = vst [vmem:[#allocation38_spill] sm:$0xff] %v6684_v9  ;;  %v6689_v11 = vpop.f32.mrb[9].mxu0  ;;  %1321 = vmatmul.mubr.f32.gmra.mrb[114].mxu0 %v6406_v15  ;;  %v3309_v15 = vld [vmem:[#allocation11 + $0x8] sm:$0xff] }
 0x1e3   : > { %9349 = vst [vmem:[#allocation40_spill] sm:$0xff] %v6689_v11  ;;  %1326 = vmatprep.mubr.f32.mxu0 %v5830_v0  ;;  %v4744_v20 = vpack.c.bf16 %v3309_v15, %v3308_v19  ;;  %v6709_v21 = vpop.f32.mrb[6].mxu1  ;;  %v3312_v15 = vld [vmem:[#allocation11 + $0x20] sm:$0xff] }
 0x1e4   : > { %9354 = vst [vmem:[#allocation45_spill] sm:$0xff] %v6709_v21  ;;  %v6713_v27 = vpop.f32.mrb[7].mxu1 }
 0x1e5   : > { %v6696_v12 = vpop.f32.mrb[10].mxu0  ;;  %9356 = vst [vmem:[#allocation47_spill] sm:$0xff] %v6713_v27  ;;  %4745 = vmatprep.subr.bf16.mxu1 %v4744_v20  ;;  %v7016_v27 = vld [vmem:[%s6157_s10 + $0xb8] sm:$0xff] }
 0x1e6   : > { %9351 = vst [vmem:[#allocation42_spill] sm:$0xff] %v6696_v12  ;;  %v6704_v18 = vpop.f32.mrb[11].mxu0  ;;  %1327 = vmatmul.mubr.f32.gmra.mrb[116].mxu0 %v6412_v16  ;;  %4747 = vmatpush3.bf16.msra.mxu1 %v4744_v20  ;;  %v3313_v20 = vld [vmem:[#allocation11 + $0x28] sm:$0xff] }
 0x1e7   : > { %9353 = vst [vmem:[#allocation44_spill] sm:$0xff] %v6704_v18  ;;  %1332 = vmatprep.mubr.f32.mxu0 %v5830_v0  ;;  %v6719_v16 = vpop.f32.mrb[8].mxu1  ;;  %4749 = vmatprep.subr.bf16.mxu1 %v4748_v53  ;;  %v4752_v49 = vpack.c.bf16 %v3313_v20, %v3312_v15 }
 0x1e8   : > { %9358 = vst [vmem:[#allocation49_spill] sm:$0xff] %v6719_v16  ;;  %v6723_v30 = vpop.f32.mrb[9].mxu1 }
 0x1e9   : > { %v6711_v23 = vpop.f32.mrb[12].mxu0  ;;  %9360 = vst [vmem:[#allocation51_spill] sm:$0xff] %v6723_v30 }
 0x1ea   : > { %9355 = vst [vmem:[#allocation46_spill] sm:$0xff] %v6711_v23  ;;  %v6715_v28 = vpop.f32.mrb[13].mxu0  ;;  %1333 = vmatmul.mubr.f32.gmra.mrb[118].mxu0 %v6422_v22  ;;  %4751 = vmatpush3.bf16.msra.mxu1 %v4748_v53 }
 0x1eb   : > { %9357 = vst [vmem:[#allocation48_spill] sm:$0xff] %v6715_v28  ;;  %1338 = vmatprep.mubr.f32.mxu0 %v5830_v0  ;;  %v6729_v34 = vpop.f32.mrb[10].mxu1  ;;  %4753 = vmatprep.subr.bf16.mxu1 %v4752_v49  ;;  %v7080_v28 = vld [vmem:[%s6157_s10 + $0xf8] sm:$0xff] }
 0x1ec   : > { %9362 = vst [vmem:[#allocation53_spill] sm:$0xff] %v6729_v34  ;;  %v6733_v22 = vpop.f32.mrb[11].mxu1 }
 0x1ed   : > { %v6721_v29 = vpop.f32.mrb[14].mxu0  ;;  %9364 = vst [vmem:[#allocation55_spill] sm:$0xff] %v6733_v22 }
 0x1ee   : > { %9359 = vst [vmem:[#allocation50_spill] sm:$0xff] %v6721_v29  ;;  %v6725_v32 = vpop.f32.mrb[15].mxu0  ;;  %1339 = vmatmul.mubr.f32.gmra.mrb[120].mxu0 %v6428_v25  ;;  %4755 = vmatpush3.bf16.msra.mxu1 %v4752_v49  ;;  %v3323_v29 = vld [vmem:[#allocation11 + $0x78] sm:$0xff] }
 0x1ef   : > { %9361 = vst [vmem:[#allocation52_spill] sm:$0xff] %v6725_v32  ;;  %1344 = vmatprep.mubr.f32.mxu0 %v5830_v0  ;;  %v6739_v40 = vpop.f32.mrb[12].mxu1  ;;  %v3322_v32 = vld [vmem:[#allocation11 + $0x70] sm:$0xff] }
 0x1f0   : > { %9366 = vst [vmem:[#allocation57_spill] sm:$0xff] %v6739_v40  ;;  %v6743_v44 = vpop.f32.mrb[13].mxu1  ;;  %v4772_v23 = vpack.c.bf16 %v3323_v29, %v3322_v32 }
 0x1f1   : > { %v6731_v38 = vpop.f32.mrb[16].mxu0  ;;  %9368 = vst [vmem:[#allocation59_spill] sm:$0xff] %v6743_v44  ;;  %v6952_v44 = vld [vmem:[%s6157_s10 + $0x78] sm:$0xff] }
 0x1f2   : > { %9363 = vst [vmem:[#allocation54_spill] sm:$0xff] %v6731_v38  ;;  %v6735_v39 = vpop.f32.mrb[17].mxu0  ;;  %1345 = vmatmul.mubr.f32.gmra.mrb[122].mxu0 %v6434_v26 }
 0x1f3   : > { %9365 = vst [vmem:[#allocation56_spill] sm:$0xff] %v6735_v39  ;;  %1350 = vmatprep.mubr.f32.mxu0 %v5830_v0  ;;  %v6749_v56 = vpop.f32.mrb[14].mxu1 }
 0x1f4   : > { %9370 = vst [vmem:[#allocation61_spill] sm:$0xff] %v6749_v56  ;;  %v6753_v31 = vpop.f32.mrb[15].mxu1 }
 0x1f5   : > { %v6741_v41 = vpop.f32.mrb[18].mxu0  ;;  %9372 = vst [vmem:[#allocation63_spill] sm:$0xff] %v6753_v31 }
 0x1f6   : > { %9367 = vst [vmem:[#allocation58_spill] sm:$0xff] %v6741_v41  ;;  %v6745_v25 = vpop.f32.mrb[19].mxu0  ;;  %1351 = vmatmul.mubr.f32.gmra.mrb[124].mxu0 %v6444_v33  ;;  %v7067_v41 = vld [vmem:[%s6157_s10 + $0xf0] sm:$0xff] }
 0x1f7   : > { %9369 = vst [vmem:[#allocation60_spill] sm:$0xff] %v6745_v25  ;;  %1356 = vmatprep.mubr.f32.mxu0 %v5830_v0  ;;  %v6759_v33 = vpop.f32.mrb[16].mxu1 }
 0x1f8   : > { %9374 = vst [vmem:[#allocation65_spill] sm:$0xff] %v6759_v33  ;;  %v6763_v36 = vpop.f32.mrb[17].mxu1 }
 0x1f9   : > { %v6751_v26 = vpop.f32.mrb[20].mxu0  ;;  %9376 = vst [vmem:[#allocation67_spill] sm:$0xff] %v6763_v36 }
 0x1fa   : > { %9371 = vst [vmem:[#allocation62_spill] sm:$0xff] %v6751_v26  ;;  %v6755_v57 = vpop.f32.mrb[21].mxu0  ;;  %1357 = vmatmul.mubr.f32.gmra.mrb[126].mxu0 %v6450_v35 }
 0x1fb   : > { %9373 = vst [vmem:[#allocation64_spill] sm:$0xff] %v6755_v57  ;;  %1362 = vmatprep.mubr.f32.mxu0 %v5830_v0  ;;  %v6769_v63 = vpop.f32.mrb[18].mxu1 }
 0x1fc   : > { %9378 = vst [vmem:[#allocation69_spill] sm:$0xff] %v6769_v63  ;;  %v6773_v35 = vpop.f32.mrb[19].mxu1 }
 0x1fd   : > { %v6761_v61 = vpop.f32.mrb[22].mxu0  ;;  %9380 = vst [vmem:[#allocation71_spill] sm:$0xff] %v6773_v35 }
 0x1fe   : > { %9375 = vst [vmem:[#allocation66_spill] sm:$0xff] %v6761_v61  ;;  %v6765_v62 = vpop.f32.mrb[23].mxu0  ;;  %1363 = vmatmul.mubr.f32.gmra.mrb[128].mxu0 %v6456_v37 }
 0x1ff   : > { %9377 = vst [vmem:[#allocation68_spill] sm:$0xff] %v6765_v62  ;;  %1368 = vmatprep.mubr.f32.mxu0 %v5830_v0  ;;  %v6779_v8 = vpop.f32.mrb[20].mxu1  ;;  %v7019_v62 = vld [vmem:[%s6157_s10 + $0xc0] sm:$0xff] }
 0x200   : > { %9382 = vst [vmem:[#allocation73_spill] sm:$0xff] %v6779_v8  ;;  %v6783_v19 = vpop.f32.mrb[21].mxu1 }
 0x201   : > { %v6771_v42 = vpop.f32.mrb[24].mxu0  ;;  %9384 = vst [vmem:[#allocation75_spill] sm:$0xff] %v6783_v19 }
 0x202   : > { %9379 = vst [vmem:[#allocation70_spill] sm:$0xff] %v6771_v42  ;;  %v6775_v5 = vpop.f32.mrb[25].mxu0  ;;  %1369 = vmatmul.mubr.f32.gmra.mrb[130].mxu0 %v6466_v48  ;;  %v3321_v42 = vld [vmem:[#allocation11 + $0x68] sm:$0xff] }
 0x203   : > { %9381 = vst [vmem:[#allocation72_spill] sm:$0xff] %v6775_v5  ;;  %1374 = vmatprep.mubr.f32.mxu0 %v5830_v0  ;;  %v6789_v24 = vpop.f32.mrb[22].mxu1 }
 0x204   : > { %9386 = vst [vmem:[#allocation77_spill] sm:$0xff] %v6789_v24  ;;  %v6793_v53 = vpop.f32.mrb[23].mxu1 }
 0x205   : > { %v6781_v45 = vpop.f32.mrb[26].mxu0  ;;  %9388 = vst [vmem:[#allocation79_spill] sm:$0xff] %v6793_v53 }
 0x206   : > { %9383 = vst [vmem:[#allocation74_spill] sm:$0xff] %v6781_v45  ;;  %v6785_v37 = vpop.f32.mrb[27].mxu0  ;;  %1375 = vmatmul.mubr.f32.gmra.mrb[132].mxu0 %v6472_v51  ;;  %v7003_v45 = vld [vmem:[%s6157_s10 + $0xb0] sm:$0xff] }
 0x207   : > { %9385 = vst [vmem:[#allocation76_spill] sm:$0xff] %v6785_v37  ;;  %1380 = vmatprep.mubr.f32.mxu0 %v5830_v0  ;;  %v6799_v51 = vpop.f32.mrb[24].mxu1 }
 0x208   : > { %9390 = vst [vmem:[#allocation81_spill] sm:$0xff] %v6799_v51  ;;  %v6803_v35 = vpop.f32.mrb[25].mxu1 }
 0x209   : > { %v6791_v48 = vpop.f32.mrb[28].mxu0  ;;  %9392 = vst [vmem:[#allocation83_spill] sm:$0xff] %v6803_v35 }
 0x20a   : > { %9387 = vst [vmem:[#allocation78_spill] sm:$0xff] %v6791_v48  ;;  %v6795_v8 = vpop.f32.mrb[29].mxu0  ;;  %1381 = vmatmul.mubr.f32.gmra.mrb[134].mxu0 %v6478_v52  ;;  %v6968_v48 = vld [vmem:[%s6157_s10 + $0x88] sm:$0xff] }
 0x20b   : > { %9389 = vst [vmem:[#allocation80_spill] sm:$0xff] %v6795_v8  ;;  %1386 = vmatprep.mubr.f32.mxu0 %v5830_v0  ;;  %v6809_v20 = vpop.f32.mrb[26].mxu1  ;;  %v6955_v8 = vld [vmem:[%s6157_s10 + $0x80] sm:$0xff] }
 0x20c   : > { %9394 = vst [vmem:[#allocation85_spill] sm:$0xff] %v6809_v20  ;;  %v6813_v52 = vpop.f32.mrb[27].mxu1  ;;  %v3314_v20 = vld [vmem:[#allocation11 + $0x30] sm:$0xff] }
 0x20d   : > { %v6801_v19 = vpop.f32.mrb[30].mxu0  ;;  %9396 = vst [vmem:[#allocation87_spill] sm:$0xff] %v6813_v52  ;;  %v3315_v52 = vld [vmem:[#allocation11 + $0x38] sm:$0xff] }
 0x20e   : > { %9391 = vst [vmem:[#allocation82_spill] sm:$0xff] %v6801_v19  ;;  %v6805_v15 = vpop.f32.mrb[31].mxu0  ;;  %1387 = vmatmul.mubr.f32.gmra.mrb[136].mxu0 %v6486_v58  ;;  %v4756_v63 = vpack.c.bf16 %v3315_v52, %v3314_v20 }
 0x20f   : > { %9393 = vst [vmem:[#allocation84_spill] sm:$0xff] %v6805_v15  ;;  %1392 = vmatprep.mubr.f32.mxu0 %v5830_v0  ;;  %v6819_v51 = vpop.f32.mrb[28].mxu1 }
 0x210   : > { %9398 = vst [vmem:[#allocation89_spill] sm:$0xff] %v6819_v51  ;;  %v6823_v58 = vpop.f32.mrb[29].mxu1  ;;  %4757 = vmatprep.subr.bf16.mxu1 %v4756_v63 }
 0x211   : > { %v6811_v53 = vpop.f32.mrb[32].mxu0  ;;  %9400 = vst [vmem:[#allocation91_spill] sm:$0xff] %v6823_v58  ;;  %4759 = vmatpush3.bf16.msra.mxu1 %v4756_v63 }
 0x212   : > { %9395 = vst [vmem:[#allocation86_spill] sm:$0xff] %v6811_v53  ;;  %v6815_v49 = vpop.f32.mrb[33].mxu0  ;;  %1393 = vmatmul.mubr.f32.gmra.mrb[138].mxu0 %v6494_v1  ;;  %v6904_v53 = vld [vmem:[%s6157_s10 + $0x48] sm:$0xff] }
 0x213   : > { %9397 = vst [vmem:[#allocation88_spill] sm:$0xff] %v6815_v49  ;;  %1398 = vmatprep.mubr.f32.mxu0 %v5830_v0  ;;  %v6829_v1 = vpop.f32.mrb[30].mxu1  ;;  %v6891_v49 = vld [vmem:[%s6157_s10 + $0x40] sm:$0xff] }
 0x214   : > { %9402 = vst [vmem:[#allocation93_spill] sm:$0xff] %v6829_v1  ;;  %v6833_v51 = vpop.f32.mrb[31].mxu1 }
 0x215   : > { %v6821_v35 = vpop.f32.mrb[34].mxu0  ;;  %9404 = vst [vmem:[#allocation95_spill] sm:$0xff] %v6833_v51 }
 0x216   : > { %9399 = vst [vmem:[#allocation90_spill] sm:$0xff] %v6821_v35  ;;  %v6825_v24 = vpop.f32.mrb[35].mxu0  ;;  %1399 = vmatmul.mubr.f32.gmra.mrb[140].mxu0 %v6500_v3  ;;  %v6840_v3 = vld [vmem:[%s6157_s10 + $0x8] sm:$0xff]  ;;  %v6888_v35 = vld [vmem:[%s6157_s10 + $0x38] sm:$0xff] }
 0x217   : > { %9401 = vst [vmem:[#allocation92_spill] sm:$0xff] %v6825_v24  ;;  %1404 = vmatprep.mubr.f32.mxu0 %v5830_v0  ;;  %v6843_v0 = vld [vmem:[%s6157_s10 + $0x10] sm:$0xff]  ;;  %v6845_v20 = vpop.f32.mrb[32].mxu1 }
 0x218   : > { %9406 = vst [vmem:[#allocation97_spill] sm:$0xff] %v6845_v20  ;;  %v6849_v1 = vpop.f32.mrb[33].mxu1 }
 0x219   : > { %v6831_v36 = vpop.f32.mrb[36].mxu0  ;;  %9408 = vst [vmem:[#allocation99_spill] sm:$0xff] %v6849_v1  ;;  %v6872_v1 = vld [vmem:[%s6157_s10 + $0x28] sm:$0xff] }
 0x21a   : > { %9403 = vst [vmem:[#allocation94_spill] sm:$0xff] %v6831_v36  ;;  %v6835_v58 = vpop.f32.mrb[37].mxu0  ;;  %1405 = vmatmul.mubr.f32.gmra.mrb[142].mxu0 %v6506_v4  ;;  %v6856_v4 = vld [vmem:[%s6157_s10 + $0x18] sm:$0xff] }
 0x21b   : > { %9405 = vst [vmem:[#allocation96_spill] sm:$0xff] %v6835_v58  ;;  %4376 = vmatprep.mubr.f32.mxu0 %v6699_v14  ;;  %v6859_v14 = vld [vmem:[%s6157_s10 + $0x20] sm:$0xff]  ;;  %v6861_v63 = vpop.f32.mrb[34].mxu1 }
 0x21c   : > { %9410 = vst [vmem:[#allocation101_spill] sm:$0xff] %v6861_v63  ;;  %v6865_v20 = vpop.f32.mrb[35].mxu1 }
 0x21d   : > { %v6847_v52 = vpop.f32.mrb[38].mxu0  ;;  %9412 = vst [vmem:[#allocation103_spill] sm:$0xff] %v6865_v20  ;;  %v3316_v20 = vld [vmem:[#allocation11 + $0x40] sm:$0xff] }
 0x21e   : > { %9407 = vst [vmem:[#allocation98_spill] sm:$0xff] %v6847_v52  ;;  %v6851_v51 = vpop.f32.mrb[39].mxu0  ;;  %4377 = vmatmul.mubr.f32.vlgmr.msra.gmra.mrb[144].mxu0 %v6840_v3 }
 0x21f   : > { %9409 = vst [vmem:[#allocation100_spill] sm:$0xff] %v6851_v51  ;;  %4379 = vmatprep.mubr.f32.mxu0 %v6843_v0  ;;  %v6875_v51 = vld [vmem:[%s6157_s10 + $0x30] sm:$0xff]  ;;  %v6877_v36 = vpop.f32.mrb[36].mxu1 }
 0x220   : > { %9414 = vst [vmem:[#allocation105_spill] sm:$0xff] %v6877_v36  ;;  %v6881_v63 = vpop.f32.mrb[37].mxu1 }
 0x221   : > { %v6863_v58 = vpop.f32.mrb[40].mxu0  ;;  %9416 = vst [vmem:[#allocation107_spill] sm:$0xff] %v6881_v63 }
 0x222   : > { %9411 = vst [vmem:[#allocation102_spill] sm:$0xff] %v6863_v58  ;;  %v6867_v52 = vpop.f32.mrb[41].mxu0  ;;  %4380 = vmatmul.mubr.f32.gmra.mrb[146].mxu0 %v6856_v4 }
 0x223   : > { %9413 = vst [vmem:[#allocation104_spill] sm:$0xff] %v6867_v52  ;;  %4382 = vmatprep.mubr.f32.mxu0 %v6859_v14  ;;  %v3317_v52 = vld [vmem:[#allocation11 + $0x48] sm:$0xff]  ;;  %v6893_v36 = vpop.f32.mrb[38].mxu1 }
 0x224   : > { %v4760_v33 = vpack.c.bf16 %v3317_v52, %v3316_v20  ;;  %9418 = vst [vmem:[#allocation109_spill] sm:$0xff] %v6893_v36  ;;  %v6897_v63 = vpop.f32.mrb[39].mxu1  ;;  %v6907_v20 = vld [vmem:[%s6157_s10 + $0x50] sm:$0xff] }
 0x225   : > { %v6879_v24 = vpop.f32.mrb[42].mxu0  ;;  %9420 = vst [vmem:[#allocation111_spill] sm:$0xff] %v6897_v63 }
 0x226   : > { %9415 = vst [vmem:[#allocation106_spill] sm:$0xff] %v6879_v24  ;;  %v6883_v58 = vpop.f32.mrb[43].mxu0  ;;  %4383 = vmatmul.mubr.f32.gmra.mrb[148].mxu0 %v6872_v1  ;;  %4761 = vmatprep.subr.bf16.mxu1 %v4760_v33 }
 0x227   : > { %9417 = vst [vmem:[#allocation108_spill] sm:$0xff] %v6883_v58  ;;  %4385 = vmatprep.mubr.f32.mxu0 %v6875_v51  ;;  %4763 = vmatpush3.bf16.msra.mxu1 %v4760_v33  ;;  %v6909_v52 = vpop.f32.mrb[40].mxu1  ;;  %v6920_v33 = vld [vmem:[%s6157_s10 + $0x58] sm:$0xff] }
 0x228   : > { %9422 = vst [vmem:[#allocation113_spill] sm:$0xff] %v6909_v52 }
 0x229   : > { %v6895_v24 = vpop.f32.mrb[44].mxu0 }
 0x22a   : > { %9419 = vst [vmem:[#allocation110_spill] sm:$0xff] %v6895_v24  ;;  %v6899_v58 = vpop.f32.mrb[45].mxu0  ;;  %4386 = vmatmul.mubr.f32.gmra.mrb[150].mxu0 %v6888_v35  ;;  %v6913_v24 = vpop.f32.mrb[41].mxu1 }
 0x22b   : > { %9421 = vst [vmem:[#allocation112_spill] sm:$0xff] %v6899_v58  ;;  %4388 = vmatprep.mubr.f32.mxu0 %v6891_v49  ;;  %9424 = vst [vmem:[#allocation115_spill] sm:$0xff] %v6913_v24  ;;  %v6923_v58 = vld [vmem:[%s6157_s10 + $0x60] sm:$0xff]  ;;  %v6925_v31 = vpop.f32.mrb[42].mxu1  ;;  %v6936_v24 = vld [vmem:[%s6157_s10 + $0x68] sm:$0xff] }
 0x22c   : > { %9426 = vst [vmem:[#allocation117_spill] sm:$0xff] %v6925_v31  ;;  %v6929_v52 = vpop.f32.mrb[43].mxu1 }
 0x22d   : > { %v6911_v36 = vpop.f32.mrb[46].mxu0  ;;  %9428 = vst [vmem:[#allocation119_spill] sm:$0xff] %v6929_v52  ;;  %v3318_v52 = vld [vmem:[#allocation11 + $0x50] sm:$0xff] }
 0x22e   : > { %9423 = vst [vmem:[#allocation114_spill] sm:$0xff] %v6911_v36  ;;  %v6915_v63 = vpop.f32.mrb[47].mxu0  ;;  %4389 = vmatmul.mubr.f32.gmra.mrb[152].mxu0 %v6904_v53 }
 0x22f   : > { %9425 = vst [vmem:[#allocation116_spill] sm:$0xff] %v6915_v63  ;;  %4391 = vmatprep.mubr.f32.mxu0 %v6907_v20  ;;  %v6939_v63 = vld [vmem:[%s6157_s10 + $0x70] sm:$0xff]  ;;  %v6941_v15 = vpop.f32.mrb[44].mxu1 }
 0x230   : > { %9430 = vst [vmem:[#allocation121_spill] sm:$0xff] %v6941_v15  ;;  %v6945_v31 = vpop.f32.mrb[45].mxu1 }
 0x231   : > { %v6927_v56 = vpop.f32.mrb[48].mxu0  ;;  %9432 = vst [vmem:[#allocation123_spill] sm:$0xff] %v6945_v31 }
 0x232   : > { %9427 = vst [vmem:[#allocation118_spill] sm:$0xff] %v6927_v56  ;;  %v6931_v36 = vpop.f32.mrb[49].mxu0  ;;  %4392 = vmatmul.mubr.f32.gmra.mrb[154].mxu0 %v6920_v33 }
 0x233   : > { %9429 = vst [vmem:[#allocation120_spill] sm:$0xff] %v6931_v36  ;;  %4394 = vmatprep.mubr.f32.mxu0 %v6923_v58  ;;  %v3319_v36 = vld [vmem:[#allocation11 + $0x58] sm:$0xff]  ;;  %v6957_v15 = vpop.f32.mrb[46].mxu1 }
 0x234   : > { %v4764_v40 = vpack.c.bf16 %v3319_v36, %v3318_v52  ;;  %9434 = vst [vmem:[#allocation125_spill] sm:$0xff] %v6957_v15  ;;  %v6961_v31 = vpop.f32.mrb[47].mxu1  ;;  %v6971_v36 = vld [vmem:[%s6157_s10 + $0x90] sm:$0xff] }
 0x235   : > { %v6943_v19 = vpop.f32.mrb[50].mxu0  ;;  %9436 = vst [vmem:[#allocation127_spill] sm:$0xff] %v6961_v31 }
 0x236   : > { %9431 = vst [vmem:[#allocation122_spill] sm:$0xff] %v6943_v19  ;;  %v6947_v56 = vpop.f32.mrb[51].mxu0  ;;  %4395 = vmatmul.mubr.f32.gmra.mrb[156].mxu0 %v6936_v24  ;;  %4765 = vmatprep.subr.bf16.mxu1 %v4764_v40 }
 0x237   : > { %9433 = vst [vmem:[#allocation124_spill] sm:$0xff] %v6947_v56  ;;  %4397 = vmatprep.mubr.f32.mxu0 %v6939_v63  ;;  %4767 = vmatpush3.bf16.msra.mxu1 %v4764_v40  ;;  %v6973_v52 = vpop.f32.mrb[48].mxu1  ;;  %v6984_v40 = vld [vmem:[%s6157_s10 + $0x98] sm:$0xff] }
 0x239   : > { %v6959_v19 = vpop.f32.mrb[52].mxu0 }
 0x23a   : > { %9435 = vst [vmem:[#allocation126_spill] sm:$0xff] %v6959_v19  ;;  %v6963_v56 = vpop.f32.mrb[53].mxu0  ;;  %4398 = vmatmul.mubr.f32.gmra.mrb[158].mxu0 %v6952_v44  ;;  %v6977_v19 = vpop.f32.mrb[49].mxu1 }
 0x23b   : > { %9437 = vst [vmem:[#allocation128_spill] sm:$0xff] %v6963_v56  ;;  %4400 = vmatprep.mubr.f32.mxu0 %v6955_v8  ;;  %v6987_v56 = vld [vmem:[%s6157_s10 + $0xa0] sm:$0xff]  ;;  %v6989_v22 = vpop.f32.mrb[50].mxu1 }
 0x23c   : > { %v6993_v37 = vpop.f32.mrb[51].mxu1 }
 0x23d   : > { %v6975_v15 = vpop.f32.mrb[54].mxu0 }
 0x23e   : > { %9438 = vst [vmem:[#allocation129_spill] sm:$0xff] %v6975_v15  ;;  %v6979_v31 = vpop.f32.mrb[55].mxu0  ;;  %4401 = vmatmul.mubr.f32.gmra.mrb[160].mxu0 %v6968_v48 }
 0x23f   : > { %9439 = vst [vmem:[#allocation130_spill] sm:$0xff] %v6979_v31  ;;  %4403 = vmatprep.mubr.f32.mxu0 %v6971_v36  ;;  %v7000_v31 = vld [vmem:[%s6157_s10 + $0xa8] sm:$0xff]  ;;  %v7005_v30 = vpop.f32.mrb[52].mxu1 }
 0x240   : > { %v7009_v5 = vpop.f32.mrb[53].mxu1 }
 0x241   : > { %v6991_v34 = vpop.f32.mrb[56].mxu0 }
 0x242   : > { %9440 = vst [vmem:[#allocation131_spill] sm:$0xff] %v6991_v34  ;;  %v6995_v15 = vpop.f32.mrb[57].mxu0  ;;  %4404 = vmatmul.mubr.f32.gmra.mrb[162].mxu0 %v6984_v40 }
 0x243   : > { %9441 = vst [vmem:[#allocation132_spill] sm:$0xff] %v6995_v15  ;;  %4406 = vmatprep.mubr.f32.mxu0 %v6987_v56  ;;  %v3320_v15 = vld [vmem:[#allocation11 + $0x60] sm:$0xff]  ;;  %v7021_v61 = vpop.f32.mrb[54].mxu1 }
 0x244   : > { %v4768_v21 = vpack.c.bf16 %v3321_v42, %v3320_v15  ;;  %v7035_v42 = vld [vmem:[%s6157_s10 + $0xd0] sm:$0xff] }
 0x245   : > { %v7007_v16 = vpop.f32.mrb[58].mxu0 }
 0x246   : > { %9442 = vst [vmem:[#allocation133_spill] sm:$0xff] %v7007_v16  ;;  %v7011_v34 = vpop.f32.mrb[59].mxu0  ;;  %4407 = vmatmul.mubr.f32.gmra.mrb[164].mxu0 %v7000_v31  ;;  %4769 = vmatprep.subr.bf16.mxu1 %v4768_v21 }
 0x247   : > { %9443 = vst [vmem:[#allocation134_spill] sm:$0xff] %v7011_v34  ;;  %4409 = vmatprep.mubr.f32.mxu0 %v7003_v45  ;;  %v7025_v34 = vpop.f32.mrb[55].mxu1  ;;  %4771 = vmatpush3.bf16.msra.mxu1 %v4768_v21  ;;  %v7048_v21 = vld [vmem:[%s6157_s10 + $0xd8] sm:$0xff] }
 0x248   : > { %v7037_v15 = vpop.f32.mrb[56].mxu1  ;;  %4773 = vmatprep.subr.bf16.mxu1 %v4772_v23 }
 0x249   : > { %v7023_v16 = vpop.f32.mrb[60].mxu0  ;;  %v7041_v57 = vpop.f32.mrb[57].mxu1 }
 0x24a   : > { %9444 = vst [vmem:[#allocation135_spill] sm:$0xff] %v7023_v16  ;;  %v7027_v17 = vpop.f32.mrb[61].mxu0  ;;  %4410 = vmatmul.mubr.f32.gmra.mrb[166].mxu0 %v7016_v27 }
 0x24b   : > { %9445 = vst [vmem:[#allocation136_spill] sm:$0xff] %v7027_v17  ;;  %4412 = vmatprep.mubr.f32.mxu0 %v7019_v62  ;;  %v7051_v17 = vld [vmem:[%s6157_s10 + $0xe0] sm:$0xff]  ;;  %v7053_v10 = vpop.f32.mrb[58].mxu1  ;;  %4775 = vmatpush3.bf16.msra.mxu1 %v4772_v23 }
 0x24c   : > { %v7057_v25 = vpop.f32.mrb[59].mxu1 }
 0x24d   : > { %v7039_v16 = vpop.f32.mrb[62].mxu0 }
 0x24e   : > { %9446 = vst [vmem:[#allocation137_spill] sm:$0xff] %v7039_v16  ;;  %v7043_v26 = vpop.f32.mrb[63].mxu0  ;;  %4413 = vmatmul.mubr.f32.gmra.mrb[168].mxu0 %v7032_v13  ;;  %4457 = vmatmul.mubr.f32.vlgmr.msra.gmra.mrb[112].mxu1 %v6840_v3 }
 0x24f   : > { %9447 = vst [vmem:[#allocation138_spill] sm:$0xff] %v7043_v26  ;;  %4415 = vmatprep.mubr.f32.mxu0 %v7035_v42  ;;  %v7064_v26 = vld [vmem:[%s6157_s10 + $0xe8] sm:$0xff]  ;;  %v7069_v2 = vpop.f32.mrb[60].mxu1  ;;  %4459 = vmatprep.mubr.f32.mxu1 %v6843_v0 }
 0x250   : > { %v7073_v39 = vpop.f32.mrb[61].mxu1 }
 0x251   : > { %v7055_v7 = vpop.f32.mrb[64].mxu0 }
 0x252   : > { %9448 = vst [vmem:[#allocation139_spill] sm:$0xff] %v7055_v7  ;;  %v7059_v16 = vpop.f32.mrb[65].mxu0  ;;  %4416 = vmatmul.mubr.f32.gmra.mrb[170].mxu0 %v7048_v21  ;;  %4460 = vmatmul.mubr.f32.gmra.mrb[114].mxu1 %v6856_v4 }
 0x253   : > { %9449 = vst [vmem:[#allocation140_spill] sm:$0xff] %v7059_v16  ;;  %4418 = vmatprep.mubr.f32.mxu0 %v7051_v17  ;;  %v7082_v18 = vpop.f32.mrb[62].mxu1  ;;  %4462 = vmatprep.mubr.f32.mxu1 %v6859_v14 }
 0x254   : > { %v7086_v11 = vpop.f32.mrb[63].mxu1 }
 0x255   : > { %v7071_v59 = vpop.f32.mrb[66].mxu0 }
 0x256   : > { %9450 = vst [vmem:[#allocation141_spill] sm:$0xff] %v7071_v59  ;;  %v7075_v38 = vpop.f32.mrb[67].mxu0  ;;  %4419 = vmatmul.mubr.f32.gmra.mrb[172].mxu0 %v7064_v26  ;;  %4463 = vmatmul.mubr.f32.gmra.mrb[116].mxu1 %v6872_v1 }
 0x257   : > { %9451 = vst [vmem:[#allocation142_spill] sm:$0xff] %v7075_v38  ;;  %4421 = vmatprep.mubr.f32.mxu0 %v7067_v41  ;;  %v7091_v6 = vpop.f32.mrb[64].mxu1  ;;  %4465 = vmatprep.mubr.f32.mxu1 %v6875_v51 }
 0x258   : > { %v7095_v55 = vpop.f32.mrb[65].mxu1 }
 0x259   : > { %v7084_v12 = vpop.f32.mrb[68].mxu0 }
 0x25a   : > { %9452 = vst [vmem:[#allocation143_spill] sm:$0xff] %v7084_v12  ;;  %v7088_v9 = vpop.f32.mrb[69].mxu0  ;;  %4422 = vmatmul.mubr.f32.gmra.mrb[174].mxu0 %v7080_v28  ;;  %4466 = vmatmul.mubr.f32.gmra.mrb[118].mxu1 %v6888_v35 }
 0x25b   : > { %9453 = vst [vmem:[#allocation144_spill] sm:$0xff] %v7088_v9  ;;  %v7101_v32 = vpop.f32.mrb[66].mxu1  ;;  %4468 = vmatprep.mubr.f32.mxu1 %v6891_v49 }
 0x25c   : > { %v7105_v9 = vpop.f32.mrb[67].mxu1 }
 0x25d   : > { %v7093_v60 = vpop.f32.mrb[70].mxu0 }
 0x25e   : > { %9454 = vst [vmem:[#allocation145_spill] sm:$0xff] %v7093_v60  ;;  %v7098_v29 = vpop.f32.mrb[71].mxu0  ;;  %4469 = vmatmul.mubr.f32.gmra.mrb[120].mxu1 %v6904_v53 }
 0x25f   : > { %9455 = vst [vmem:[#allocation146_spill] sm:$0xff] %v7098_v29  ;;  %v7111_v60 = vpop.f32.mrb[68].mxu1  ;;  %v3292_v29 = vld [vmem:[#allocation9] sm:$0xff]  ;;  %4471 = vmatprep.mubr.f32.mxu1 %v6907_v20 }
 0x260   : > { %v7115_v3 = vpop.f32.mrb[69].mxu1 }
 0x261   : > { %v7103_v12 = vpop.f32.mrb[72].mxu0 }
 0x262   : > { %9456 = vst [vmem:[#allocation147_spill] sm:$0xff] %v7103_v12  ;;  %v7108_v23 = vpop.f32.mrb[73].mxu0  ;;  %v3293_v12 = vld [vmem:[#allocation9 + $0x8] sm:$0xff]  ;;  %4472 = vmatmul.mubr.f32.gmra.mrb[122].mxu1 %v6920_v33 }
 0x263   : > { %9457 = vst [vmem:[#allocation148_spill] sm:$0xff] %v7108_v23  ;;  %v4776_v38 = vpack.c.bf16 %v3293_v12, %v3292_v29  ;;  %v7121_v4 = vpop.f32.mrb[70].mxu1  ;;  %v3294_v29 = vld [vmem:[#allocation9 + $0x10] sm:$0xff]  ;;  %4474 = vmatprep.mubr.f32.mxu1 %v6923_v58 }
 0x264   : > { %v7125_v14 = vpop.f32.mrb[71].mxu1 }
 0x265   : > { %v7113_v54 = vpop.f32.mrb[74].mxu0  ;;  %4777 = vmatprep.subr.bf16.mxu1 %v4776_v38 }
 0x266   : > { %9458 = vst [vmem:[#allocation149_spill] sm:$0xff] %v7113_v54  ;;  %v7118_v0 = vpop.f32.mrb[75].mxu0  ;;  %4779 = vmatpush3.bf16.msra.mxu1 %v4776_v38 }
 0x267   : > { %9459 = vst [vmem:[#allocation150_spill] sm:$0xff] %v7118_v0  ;;  %v7131_v1 = vpop.f32.mrb[72].mxu1  ;;  %4475 = vmatmul.mubr.f32.gmra.mrb[124].mxu1 %v6936_v24 }
 0x268   : > { %9462 = vst [vmem:[#allocation153_spill] sm:$0xff] %v7131_v1  ;;  %v7135_v51 = vpop.f32.mrb[73].mxu1  ;;  %4477 = vmatprep.mubr.f32.mxu1 %v6939_v63 }
 0x269   : > { %v7123_v23 = vpop.f32.mrb[76].mxu0  ;;  %9464 = vst [vmem:[#allocation155_spill] sm:$0xff] %v7135_v51 }
 0x26a   : > { %9460 = vst [vmem:[#allocation151_spill] sm:$0xff] %v7123_v23  ;;  %v7128_v54 = vpop.f32.mrb[77].mxu0  ;;  %v3295_v23 = vld [vmem:[#allocation9 + $0x18] sm:$0xff] }
 0x26b   : > { %9461 = vst [vmem:[#allocation152_spill] sm:$0xff] %v7128_v54  ;;  %v4780_v35 = vpack.c.bf16 %v3295_v23, %v3294_v29  ;;  %v7141_v59 = vpop.f32.mrb[74].mxu1  ;;  %4478 = vmatmul.mubr.f32.gmra.mrb[126].mxu1 %v6952_v44 }
 0x26c   : > { %9466 = vst [vmem:[#allocation157_spill] sm:$0xff] %v7141_v59  ;;  %v7145_v49 = vpop.f32.mrb[75].mxu1  ;;  %4480 = vmatprep.mubr.f32.mxu1 %v6955_v8 }
 0x26d   : > { %v7133_v0 = vpop.f32.mrb[78].mxu0  ;;  %9467 = vst [vmem:[#allocation158_spill] sm:$0xff] %v7145_v49  ;;  %4781 = vmatprep.subr.bf16.mxu1 %v4780_v35 }
 0x26e   : > { %9463 = vst [vmem:[#allocation154_spill] sm:$0xff] %v7133_v0  ;;  %v7138_v12 = vpop.f32.mrb[79].mxu0  ;;  %4783 = vmatpush3.bf16.msra.mxu1 %v4780_v35 }
 0x26f   : > { %9465 = vst [vmem:[#allocation156_spill] sm:$0xff] %v7138_v12  ;;  %v7151_v53 = vpop.f32.mrb[76].mxu1  ;;  %4481 = vmatmul.mubr.f32.gmra.mrb[128].mxu1 %v6968_v48 }
 0x270   : > { %9468 = vst [vmem:[#allocation159_spill] sm:$0xff] %v7151_v53  ;;  %v7155_v20 = vpop.f32.mrb[77].mxu1  ;;  %4483 = vmatprep.mubr.f32.mxu1 %v6971_v36 }
 0x271   : > { %v7143_v38 = vpop.f32.mrb[80].mxu0  ;;  %9469 = vst [vmem:[#allocation160_spill] sm:$0xff] %v7155_v20 }
 0x272   : > { %v7148_v0 = vpop.f32.mrb[81].mxu0 }
 0x273   : > { %v7161_v29 = vpop.f32.mrb[78].mxu1  ;;  %4484 = vmatmul.mubr.f32.gmra.mrb[130].mxu1 %v6984_v40 }
 0x274   : > { %9470 = vst [vmem:[#allocation161_spill] sm:$0xff] %v7161_v29  ;;  %v7165_v54 = vpop.f32.mrb[79].mxu1  ;;  %4486 = vmatprep.mubr.f32.mxu1 %v6987_v56 }
 0x275   : > { %v7153_v12 = vpop.f32.mrb[82].mxu0  ;;  %9471 = vst [vmem:[#allocation162_spill] sm:$0xff] %v7165_v54 }
 0x276   : > { %v7158_v23 = vpop.f32.mrb[83].mxu0 }
 0x277   : > { %4487 = vmatmul.mubr.f32.gmra.mrb[132].mxu1 %v7000_v31  ;;  %v7197_v47 = vpop.f32.mrb[80].mxu1 }
 0x278   : > { %4489 = vmatprep.mubr.f32.mxu1 %v7003_v45  ;;  %9472 = vst [vmem:[#allocation163_spill] sm:$0xff] %v7197_v47  ;;  %v7202_v31 = vpop.f32.mrb[81].mxu1 }
 0x279   : > { %v7163_v33 = vpop.f32.mrb[84].mxu0  ;;  %9473 = vst [vmem:[#allocation164_spill] sm:$0xff] %v7202_v31  ;;  %v3296_v31 = vld [vmem:[#allocation9 + $0x20] sm:$0xff] }
 0x27a   : > { %v7168_v58 = vpop.f32.mrb[85].mxu0 }
 0x27b   : > { %4490 = vmatmul.mubr.f32.gmra.mrb[134].mxu1 %v7016_v27  ;;  %v7213_v16 = vpop.f32.mrb[82].mxu1 }
 0x27c   : > { %4492 = vmatprep.mubr.f32.mxu1 %v7019_v62  ;;  %9474 = vst [vmem:[#allocation165_spill] sm:$0xff] %v7213_v16  ;;  %v7218_v7 = vpop.f32.mrb[83].mxu1 }
 0x27d   : > { %v7171_v35 = vpop.f32.mrb[86].mxu0  ;;  %9475 = vst [vmem:[#allocation166_spill] sm:$0xff] %v7218_v7 }
 0x27e   : > { %v7174_v24 = vpop.f32.mrb[87].mxu0 }
 0x27f   : > { %4493 = vmatmul.mubr.f32.gmra.mrb[136].mxu1 %v7032_v13  ;;  %v7242_v53 = vpop.f32.mrb[84].mxu1 }
 0x280   : > { %4495 = vmatprep.mubr.f32.mxu1 %v7035_v42  ;;  %9482 = vst [vmem:[#allocation173_spill] sm:$0xff] %v7242_v53  ;;  %v7244_v54 = vpop.f32.mrb[85].mxu1  ;;  %v3299_v53 = vld [vmem:[#allocation9 + $0x38] sm:$0xff] }
 0x281   : > { %v7177_v63 = vpop.f32.mrb[88].mxu0  ;;  %9483 = vst [vmem:[#allocation174_spill] sm:$0xff] %v7244_v54 }
 0x282   : > { %v7180_v50 = vpop.f32.mrb[89].mxu0 }
 0x283   : > { %4496 = vmatmul.mubr.f32.gmra.mrb[138].mxu1 %v7048_v21 }
 0x284   : > { %4498 = vmatprep.mubr.f32.mxu1 %v7051_v17 }
 0x285   : > { %v7183_v44 = vpop.f32.mrb[90].mxu0 }
 0x286   : > { %v7186_v8 = vpop.f32.mrb[91].mxu0 }
 0x287   : > { %4499 = vmatmul.mubr.f32.gmra.mrb[140].mxu1 %v7064_v26  ;;  %v3297_v26 = vld [vmem:[#allocation9 + $0x28] sm:$0xff] }
 0x288   : > { %4501 = vmatprep.mubr.f32.mxu1 %v7067_v41  ;;  %v4784_v16 = vpack.c.bf16 %v3297_v26, %v3296_v31 }
 0x289   : > { %v7189_v48 = vpop.f32.mrb[92].mxu0 }
 0x28a   : > { %v7192_v36 = vpop.f32.mrb[93].mxu0  ;;  %4785 = vmatprep.subr.bf16.mxu1 %v4784_v16 }
 0x28b   : > { %4502 = vmatmul.mubr.f32.gmra.mrb[142].mxu1 %v7080_v28 }
 0x28c   : > { %4787 = vmatpush3.bf16.msra.mxu1 %v4784_v16 }
 0x28d   : > { %v7195_v40 = vpop.f32.mrb[94].mxu0 }
 0x28e   : > { %v7200_v56 = vpop.f32.mrb[95].mxu0 }
 0x291   : > { %v7205_v45 = vpop.f32.mrb[96].mxu0 }
 0x292   : > { %v7208_v27 = vpop.f32.mrb[97].mxu0 }
 0x295   : > { %v7211_v62 = vpop.f32.mrb[98].mxu0 }
 0x296   : > { %v7216_v13 = vpop.f32.mrb[99].mxu0 }
 0x299   : > { %v7221_v42 = vpop.f32.mrb[100].mxu0 }
 0x29a   : > { %v7224_v21 = vpop.f32.mrb[101].mxu0 }
 0x29d   : > { %v7226_v46 = vpop.f32.mrb[102].mxu0 }
 0x29e   : > { %v7228_v17 = vpop.f32.mrb[103].mxu0 }
 0x2a1   : > { %v7230_v43 = vpop.f32.mrb[104].mxu0 }
 0x2a2   : > { %9476 = vst [vmem:[#allocation167_spill] sm:$0xff] %v7230_v43  ;;  %v7232_v47 = vpop.f32.mrb[105].mxu0 }
 0x2a3   : > { %9477 = vst [vmem:[#allocation168_spill] sm:$0xff] %v7232_v47 }
 0x2a5   : > { %v7234_v7 = vpop.f32.mrb[106].mxu0 }
 0x2a6   : > { %9478 = vst [vmem:[#allocation169_spill] sm:$0xff] %v7234_v7  ;;  %v7236_v41 = vpop.f32.mrb[107].mxu0 }
 0x2a7   : > { %9479 = vst [vmem:[#allocation170_spill] sm:$0xff] %v7236_v41 }
 0x2a9   : > { %v7238_v28 = vpop.f32.mrb[108].mxu0 }
 0x2aa   : > { %9480 = vst [vmem:[#allocation171_spill] sm:$0xff] %v7238_v28  ;;  %v7240_v20 = vpop.f32.mrb[109].mxu0 }
 0x2ab   : > { %9481 = vst [vmem:[#allocation172_spill] sm:$0xff] %v7240_v20  ;;  %v3298_v20 = vld [vmem:[#allocation9 + $0x30] sm:$0xff] }
 0x2ac   : > { %v4788_v54 = vpack.c.bf16 %v3299_v53, %v3298_v20 }
 0x2ad   : > { %v7246_v29 = vpop.f32.mrb[110].mxu0 }
 0x2ae   : > { %9484 = vst [vmem:[#allocation175_spill] sm:$0xff] %v7246_v29  ;;  %v7248_v51 = vpop.f32.mrb[111].mxu0  ;;  %4789 = vmatprep.subr.bf16.mxu1 %v4788_v54 }
 0x2af   : > { %9485 = vst [vmem:[#allocation176_spill] sm:$0xff] %v7248_v51  ;;  %v7266_v51 = vpop.f32.mrb[86].mxu1  ;;  %4791 = vmatpush3.bf16.msra.mxu1 %v4788_v54 }
 0x2b0   : > { %9494 = vst [vmem:[#allocation185_spill] sm:$0xff] %v7266_v51 }
 0x2b1   : > { %v7250_v1 = vpop.f32.mrb[112].mxu0 }
 0x2b2   : > { %9486 = vst [vmem:[#allocation177_spill] sm:$0xff] %v7250_v1  ;;  %v7252_v31 = vpop.f32.mrb[113].mxu0 }
 0x2b3   : > { %9487 = vst [vmem:[#allocation178_spill] sm:$0xff] %v7252_v31  ;;  %v7268_v31 = vpop.f32.mrb[87].mxu1 }
 0x2b4   : > { %9495 = vst [vmem:[#allocation186_spill] sm:$0xff] %v7268_v31 }
 0x2b5   : > { %v7254_v26 = vpop.f32.mrb[114].mxu0 }
 0x2b6   : > { %9488 = vst [vmem:[#allocation179_spill] sm:$0xff] %v7254_v26  ;;  %v7256_v16 = vpop.f32.mrb[115].mxu0  ;;  %v7278_v26 = vpop.f32.mrb[88].mxu1 }
 0x2b7   : > { %9489 = vst [vmem:[#allocation180_spill] sm:$0xff] %v7256_v16  ;;  %9500 = vst [vmem:[#allocation191_spill] sm:$0xff] %v7278_v26 }
 0x2b9   : > { %v7258_v47 = vpop.f32.mrb[116].mxu0 }
 0x2ba   : > { %9490 = vst [vmem:[#allocation181_spill] sm:$0xff] %v7258_v47  ;;  %v7260_v28 = vpop.f32.mrb[117].mxu0 }
 0x2bb   : > { %9491 = vst [vmem:[#allocation182_spill] sm:$0xff] %v7260_v28 }
 0x2bd   : > { %v7262_v43 = vpop.f32.mrb[118].mxu0 }
 0x2be   : > { %9492 = vst [vmem:[#allocation183_spill] sm:$0xff] %v7262_v43  ;;  %v7264_v29 = vpop.f32.mrb[119].mxu0  ;;  %v7280_v43 = vpop.f32.mrb[89].mxu1 }
 0x2bf   : > { %9493 = vst [vmem:[#allocation184_spill] sm:$0xff] %v7264_v29  ;;  %9501 = vst [vmem:[#allocation192_spill] sm:$0xff] %v7280_v43 }
 0x2c1   : > { %v7270_v1 = vpop.f32.mrb[120].mxu0 }
 0x2c2   : > { %9496 = vst [vmem:[#allocation187_spill] sm:$0xff] %v7270_v1  ;;  %v7272_v16 = vpop.f32.mrb[121].mxu0 }
 0x2c3   : > { %9497 = vst [vmem:[#allocation188_spill] sm:$0xff] %v7272_v16 }
 0x2c5   : > { %v7274_v47 = vpop.f32.mrb[122].mxu0 }
 0x2c6   : > { %9498 = vst [vmem:[#allocation189_spill] sm:$0xff] %v7274_v47  ;;  %v7276_v28 = vpop.f32.mrb[123].mxu0  ;;  %v3300_v47 = vld [vmem:[#allocation9 + $0x40] sm:$0xff] }
 0x2c7   : > { %9499 = vst [vmem:[#allocation190_spill] sm:$0xff] %v7276_v28  ;;  %v3301_v28 = vld [vmem:[#allocation9 + $0x48] sm:$0xff] }
 0x2c8   : > { %v4792_v26 = vpack.c.bf16 %v3301_v28, %v3300_v47 }
 0x2c9   : > { %v7282_v53 = vpop.f32.mrb[124].mxu0 }
 0x2ca   : > { %9502 = vst [vmem:[#allocation193_spill] sm:$0xff] %v7282_v53  ;;  %v7284_v20 = vpop.f32.mrb[125].mxu0  ;;  %4793 = vmatprep.subr.bf16.mxu1 %v4792_v26  ;;  %v7302_v53 = vpop.f32.mrb[90].mxu1 }
 0x2cb   : > { %9503 = vst [vmem:[#allocation194_spill] sm:$0xff] %v7284_v20  ;;  %4795 = vmatpush3.bf16.msra.mxu1 %v4792_v26  ;;  %9512 = vst [vmem:[#allocation203_spill] sm:$0xff] %v7302_v53 }
 0x2cd   : > { %v7286_v51 = vpop.f32.mrb[126].mxu0 }
 0x2ce   : > { %9504 = vst [vmem:[#allocation195_spill] sm:$0xff] %v7286_v51  ;;  %v7288_v54 = vpop.f32.mrb[127].mxu0 }
 0x2cf   : > { %9505 = vst [vmem:[#allocation196_spill] sm:$0xff] %v7288_v54 }
 0x2d1   : > { %v7290_v31 = vpop.f32.mrb[128].mxu0 }
 0x2d2   : > { %9506 = vst [vmem:[#allocation197_spill] sm:$0xff] %v7290_v31  ;;  %v7292_v1 = vpop.f32.mrb[129].mxu0  ;;  %v7306_v31 = vpop.f32.mrb[91].mxu1 }
 0x2d3   : > { %9507 = vst [vmem:[#allocation198_spill] sm:$0xff] %v7292_v1  ;;  %9514 = vst [vmem:[#allocation205_spill] sm:$0xff] %v7306_v31 }
 0x2d5   : > { %v7294_v16 = vpop.f32.mrb[130].mxu0 }
 0x2d6   : > { %9508 = vst [vmem:[#allocation199_spill] sm:$0xff] %v7294_v16  ;;  %v7296_v29 = vpop.f32.mrb[131].mxu0 }
 0x2d7   : > { %9509 = vst [vmem:[#allocation200_spill] sm:$0xff] %v7296_v29  ;;  %v7314_v29 = vpop.f32.mrb[92].mxu1 }
 0x2d8   : > { %9518 = vst [vmem:[#allocation209_spill] sm:$0xff] %v7314_v29  ;;  %v7318_v28 = vpop.f32.mrb[93].mxu1 }
 0x2d9   : > { %v7298_v43 = vpop.f32.mrb[132].mxu0  ;;  %9520 = vst [vmem:[#allocation211_spill] sm:$0xff] %v7318_v28 }
 0x2da   : > { %9510 = vst [vmem:[#allocation201_spill] sm:$0xff] %v7298_v43  ;;  %v7300_v20 = vpop.f32.mrb[133].mxu0 }
 0x2db   : > { %9511 = vst [vmem:[#allocation202_spill] sm:$0xff] %v7300_v20 }
 0x2dd   : > { %v7304_v54 = vpop.f32.mrb[134].mxu0 }
 0x2de   : > { %9513 = vst [vmem:[#allocation204_spill] sm:$0xff] %v7304_v54  ;;  %v7308_v1 = vpop.f32.mrb[135].mxu0 }
 0x2df   : > { %9515 = vst [vmem:[#allocation206_spill] sm:$0xff] %v7308_v1  ;;  %v3302_v1 = vld [vmem:[#allocation9 + $0x50] sm:$0xff] }
 0x2e1   : > { %v7310_v16 = vpop.f32.mrb[136].mxu0 }
 0x2e2   : > { %9516 = vst [vmem:[#allocation207_spill] sm:$0xff] %v7310_v16  ;;  %v7312_v51 = vpop.f32.mrb[137].mxu0  ;;  %v3303_v16 = vld [vmem:[#allocation9 + $0x58] sm:$0xff] }
 0x2e3   : > { %9517 = vst [vmem:[#allocation208_spill] sm:$0xff] %v7312_v51  ;;  %v7333_v51 = vld [vmem:[%s9134_s4] ss:$0 sm:$0xff] }
 0x2e5   : > { %v7316_v47 = vpop.f32.mrb[138].mxu0 }
 0x2e6   : > { %9519 = vst [vmem:[#allocation210_spill] sm:$0xff] %v7316_v47  ;;  %v7320_v26 = vpop.f32.mrb[139].mxu0  ;;  %v4796_v47 = vpack.c.bf16 %v3303_v16, %v3302_v1 }
 0x2e7   : > { %9521 = vst [vmem:[#allocation212_spill] sm:$0xff] %v7320_v26 }
 0x2e8   : > { %4797 = vmatprep.subr.bf16.mxu1 %v4796_v47 }
 0x2e9   : > { %v7322_v20 = vpop.f32.mrb[140].mxu0  ;;  %4799 = vmatpush3.bf16.msra.mxu1 %v4796_v47 }
 0x2ea   : > { %9522 = vst [vmem:[#allocation213_spill] sm:$0xff] %v7322_v20  ;;  %v7324_v43 = vpop.f32.mrb[141].mxu0 }
 0x2eb   : > { %9523 = vst [vmem:[#allocation214_spill] sm:$0xff] %v7324_v43 }
 0x2ed   : > { %v7326_v54 = vpop.f32.mrb[142].mxu0 }
 0x2ee   : > { %9524 = vst [vmem:[#allocation215_spill] sm:$0xff] %v7326_v54  ;;  %v7328_v31 = vpop.f32.mrb[143].mxu0 }
 0x2ef   : > { %9525 = vst [vmem:[#allocation216_spill] sm:$0xff] %v7328_v31 }
 0x2f1   : > { %v4378_v29 = vpop.f32.mrb[144].mxu0 }
 0x2f2   : > { %v1763_v26 = vadd.f32 %v4378_v29, %v7333_v51  ;;  %v1757_v28 = vpop.f32.mrb[145].mxu0 }
 0x2f3   : > { %v1758_v43 = vadd.f32 %v7333_v51, %v1757_v28 }
 0x2f4   : > { %v1917_v20 = vsub.f32 %v1763_v26, %v7153_v12  ;;  %v2237_v31 = vsub.f32 %v1763_v26, %v7158_v23  ;;  %v2557_v54 = vsub.f32 %v1763_v26, %v6989_v22  ;;  %v2877_v53 = vsub.f32 %v1763_v26, %v6993_v37 }
 0x2f5   : > { %v1916_v49 = vsub.f32 %v1758_v43, %v7143_v38  ;;  %v2236_v1 = vsub.f32 %v1758_v43, %v7148_v0  ;;  %v2556_v16 = vsub.f32 %v1758_v43, %v6973_v52  ;;  %v2876_v29 = vsub.f32 %v1758_v43, %v6977_v19  ;;  %v4381_v59 = vpop.f32.mrb[146].mxu0  ;;  %v7350_v38 = vpop.f32.mrb[94].mxu1 }
 0x2f6   : > { %v4064_v47 = vmul.f32 -1.442695, %v1917_v20  ;;  %v4096_v41 = vmul.f32 -1.442695, %v2237_v31  ;;  %v4128_v28 = vmul.f32 -1.442695, %v2557_v54  ;;  %v1773_v12 = vadd.f32 %v4381_v59, %v7333_v51 }
 0x2f7   : > { %v4160_v7 = vmul.f32 -1.442695, %v2877_v53  ;;  %v4063_v23 = vmul.f32 -1.442695, %v1916_v49  ;;  %v4095_v22 = vmul.f32 -1.442695, %v2236_v1 }
 0x2f8   : > { %4971 = vpow2.f32 %v4064_v47  ;;  %v1919_v37 = vsub.f32 %v1773_v12, %v7171_v35  ;;  %v1767_v26 = vpop.f32.mrb[147].mxu0  ;;  %v2239_v0 = vsub.f32 %v1773_v12, %v7174_v24  ;;  %v2559_v52 = vsub.f32 %v1773_v12, %v7021_v61  ;;  %9526 = vst [vmem:[#allocation217_spill] sm:$0xff] %v7350_v38  ;;  %v7358_v53 = vpop.f32.mrb[95].mxu1  ;;  %v9652_v38 = vld [vmem:[#allocation193_spill] sm:$0xff] }
 0x2f9   : > { %4973 = vpow2.f32 %v4096_v41  ;;  %v2879_v43 = vsub.f32 %v1773_v12, %v7025_v34  ;;  %v4384_v19 = vpop.f32.mrb[148].mxu0  ;;  %v4127_v31 = vmul.f32 -1.442695, %v2556_v16  ;;  %v7353_v59 = vadd.f32 %v7333_v51, %v1767_v26  ;;  %9527 = vst [vmem:[#allocation218_spill] sm:$0xff] %v7358_v53  ;;  %v9568_v53 = vld [vmem:[#allocation161_spill] sm:$0xff] }
 0x2fa   : > { %4975 = vpow2.f32 %v4128_v28  ;;  %v7356_v49 = vadd.f32 %v4384_v19, %v7333_v51  ;;  %v1777_v35 = vpop.f32.mrb[149].mxu0  ;;  %v4159_v24 = vmul.f32 -1.442695, %v2876_v29  ;;  %v4066_v41 = vmul.f32 -1.442695, %v1919_v37 }
 0x2fb   : > { %4977 = vpow2.f32 %v4160_v7  ;;  %v4098_v61 = vmul.f32 -1.442695, %v2239_v0  ;;  %v1918_v34 = vsub.f32 %v7353_v59, %v7163_v33  ;;  %v2238_v20 = vsub.f32 %v7353_v59, %v7168_v58 }
 0x2fc   : > { %4979 = vpow2.f32 %v4063_v23  ;;  %v2558_v54 = vsub.f32 %v7353_v59, %v7005_v30  ;;  %v2878_v1 = vsub.f32 %v7353_v59, %v7009_v5  ;;  %v4130_v47 = vmul.f32 -1.442695, %v2559_v52  ;;  %v7439_v30 = vpop.f32.mrb[96].mxu1 }
 0x2fd   : > { %4981 = vpow2.f32 %v4095_v22  ;;  %v4387_v29 = vpop.f32.mrb[150].mxu0  ;;  %v4162_v33 = vmul.f32 -1.442695, %v2879_v43  ;;  %v4065_v28 = vmul.f32 -1.442695, %v1918_v34  ;;  %v7377_v22 = vadd.f32 %v7333_v51, %v1777_v35  ;;  %9529 = vst [vmem:[#allocation219_spill] sm:$0xff] %v7439_v30 }
 0x2fe   : > { %4983 = vpow2.f32 %v4127_v31  ;;  %v1787_v37 = vpop.f32.mrb[151].mxu0  ;;  %v7384_v43 = vadd.f32 %v4387_v29, %v7333_v51 }
 0x2ff   : > { %4985 = vpow2.f32 %v4159_v24  ;;  %v7397_v35 = vadd.f32 %v7333_v51, %v1787_v37 }
 0x300   : > { %4987 = vpow2.f32 %v4066_v41 }
 0x301   : > { %4989 = vpow2.f32 %v4098_v61  ;;  %v7379_v26 = vpop.f32.mrb[152].mxu0 }
 0x302   : > { %v4972_v0 = vpop.eup %4971  ;;  %4991 = vpow2.f32 %v4130_v47  ;;  %v7386_v19 = vpop.f32.mrb[153].mxu0 }
 0x303   : > { %v4974_v31 = vpop.eup %4973  ;;  %v2045_v24 = vadd.f32 1.0, %v4972_v0  ;;  %4993 = vpow2.f32 %v4162_v33  ;;  %v7445_v59 = vadd.f32 %v7333_v51, %v7386_v19 }
 0x304   : > { %v4976_v61 = vpop.eup %4975  ;;  %v2365_v34 = vadd.f32 1.0, %v4974_v31  ;;  %4995 = vpow2.f32 %v4065_v28 }
 0x305   : > { %v4978_v52 = vpop.eup %4977  ;;  %4997 = vrcp.f32 %v2045_v24  ;;  %v2685_v29 = vadd.f32 1.0, %v4976_v61  ;;  %v4393_v23 = vpop.f32.mrb[154].mxu0 }
 0x306   : > { %v4980_v12 = vpop.eup %4979  ;;  %4999 = vrcp.f32 %v2365_v34  ;;  %v3005_v0 = vadd.f32 1.0, %v4978_v52  ;;  %v7399_v41 = vpop.f32.mrb[155].mxu0 }
 0x307   : > { %v4982_v31 = vpop.eup %4981  ;;  %5001 = vrcp.f32 %v2685_v29  ;;  %v2044_v28 = vadd.f32 1.0, %v4980_v12 }
 0x308   : > { %v4984_v61 = vpop.eup %4983  ;;  %5003 = vrcp.f32 %v3005_v0  ;;  %v2364_v52 = vadd.f32 1.0, %v4982_v31  ;;  %v9536_v31 = vsub.f32 %v7356_v49, %v7053_v10 }
 0x309   : > { %v4986_v33 = vpop.eup %4985  ;;  %5005 = vrcp.f32 %v2044_v28  ;;  %v2684_v37 = vadd.f32 1.0, %v4984_v61  ;;  %v7407_v16 = vpop.f32.mrb[156].mxu0  ;;  %v4161_v28 = vmul.f32 -1.442695, %v2878_v1  ;;  %v7448_v1 = vadd.f32 %v4393_v23, %v7333_v51 }
 0x30a   : > { %v4988_v7 = vpop.eup %4987  ;;  %5007 = vrcp.f32 %v2364_v52  ;;  %v3004_v12 = vadd.f32 1.0, %v4986_v33  ;;  %v7411_v47 = vpop.f32.mrb[157].mxu0  ;;  %v4097_v33 = vmul.f32 -1.442695, %v2238_v20  ;;  %v9528_v20 = vsub.f32 %v7356_v49, %v7183_v44 }
 0x30b   : > { %v4990_v24 = vpop.eup %4989  ;;  %5009 = vrcp.f32 %v2684_v37  ;;  %v2047_v0 = vadd.f32 1.0, %v4988_v7  ;;  %v4129_v7 = vmul.f32 -1.442695, %v2558_v54  ;;  %v7450_v44 = vpop.f32.mrb[97].mxu1 }
 0x30c   : > { %v4992_v61 = vpop.eup %4991  ;;  %5011 = vrcp.f32 %v3004_v12  ;;  %v2367_v34 = vadd.f32 1.0, %v4990_v24  ;;  %v4068_v52 = vmul.f32 -1.442695, %v9528_v20  ;;  %9531 = vst [vmem:[#allocation221_spill] sm:$0xff] %v7450_v44 }
 0x30d   : > { %v4994_v29 = vpop.eup %4993  ;;  %5013 = vrcp.f32 %v2047_v0  ;;  %v2687_v37 = vadd.f32 1.0, %v4992_v61  ;;  %v7428_v12 = vpop.f32.mrb[158].mxu0  ;;  %v7435_v0 = vadd.f32 %v7379_v26, %v7333_v51 }
 0x30e   : > { %v4996_v24 = vpop.eup %4995  ;;  %5015 = vrcp.f32 %v2367_v34  ;;  %v3007_v58 = vadd.f32 1.0, %v4994_v29  ;;  %v7437_v61 = vpop.f32.mrb[159].mxu0 }
 0x30f   : > { %v7441_v54 = vpop.eup %4997  ;;  %5017 = vrcp.f32 %v2687_v37  ;;  %v2046_v5 = vadd.f32 1.0, %v4996_v24  ;;  %v9535_v37 = vsub.f32 %v7356_v49, %v7186_v8 }
 0x310   : > { %9530 = vst [vmem:[#allocation220_spill] sm:$0xff] %v7441_v54  ;;  %v7452_v34 = vpop.eup %4999  ;;  %5019 = vrcp.f32 %v3007_v58  ;;  %v9538_v58 = vsub.f32 %v7356_v49, %v7057_v25 }
 0x311   : > { %9532 = vst [vmem:[#allocation222_spill] sm:$0xff] %v7452_v34  ;;  %v7460_v24 = vpop.eup %5001  ;;  %v2525_v23 = vadd.f32 %v7452_v34, %v7441_v54  ;;  %5021 = vrcp.f32 %v2046_v5  ;;  %v7468_v20 = vpop.f32.mrb[160].mxu0  ;;  %v4100_v29 = vmul.f32 -1.442695, %v9535_v37  ;;  %v4132_v34 = vmul.f32 -1.442695, %v9536_v31 }
 0x312   : > { %9533 = vst [vmem:[#allocation223_spill] sm:$0xff] %v7460_v24  ;;  %v7470_v26 = vpop.eup %5003  ;;  %5023 = vpow2.f32 %v4097_v33  ;;  %v4164_v54 = vmul.f32 -1.442695, %v9538_v58  ;;  %v9539_v33 = vsub.f32 %v7377_v22, %v7177_v63  ;;  %v7487_v30 = vpop.f32.mrb[161].mxu0  ;;  %v9544_v58 = vsub.f32 %v7377_v22, %v7180_v50 }
 0x313   : > { %9534 = vst [vmem:[#allocation224_spill] sm:$0xff] %v7470_v26  ;;  %v7478_v5 = vpop.eup %5005  ;;  %v2845_v19 = vadd.f32 %v7460_v24, %v2525_v23  ;;  %5025 = vpow2.f32 %v4129_v7  ;;  %v9547_v63 = vsub.f32 %v7377_v22, %v7041_v57  ;;  %v7537_v57 = vadd.f32 %v7407_v16, %v7333_v51  ;;  %v9557_v16 = vld [vmem:[#allocation170_spill] sm:$0xff] }
 0x314   : > { %9537 = vst [vmem:[#allocation225_spill] sm:$0xff] %v7478_v5  ;;  %v4067_v44 = vmul.f32 -1.442695, %v9539_v33  ;;  %v7489_v8 = vpop.eup %5007  ;;  %5027 = vpow2.f32 %v4161_v28  ;;  %v4099_v33 = vmul.f32 -1.442695, %v9544_v58  ;;  %v9552_v58 = vsub.f32 %v7384_v43, %v7195_v40 }
 0x315   : > { %9540 = vst [vmem:[#allocation226_spill] sm:$0xff] %v7489_v8  ;;  %v7497_v25 = vpop.eup %5009  ;;  %v7500_v49 = vadd.f32 %v7470_v26, %v2845_v19  ;;  %5029 = vpow2.f32 %v4068_v52  ;;  %v7506_v37 = vpop.f32.mrb[162].mxu0  ;;  %v9546_v52 = vsub.f32 %v7377_v22, %v7037_v15  ;;  %v4163_v28 = vmul.f32 -1.442695, %v9547_v63 }
 0x316   : > { %9541 = vst [vmem:[#allocation227_spill] sm:$0xff] %v7497_v25  ;;  %v7508_v23 = vpop.eup %5011  ;;  %5031 = vpow2.f32 %v4100_v29  ;;  %v7523_v10 = vpop.f32.mrb[163].mxu0  ;;  %v7533_v15 = vadd.f32 %v7333_v51, %v7399_v41  ;;  %v9554_v41 = vsub.f32 %v7384_v43, %v7200_v56  ;;  %v7577_v56 = vadd.f32 %v7428_v12, %v7333_v51 }
 0x317   : > { %9542 = vst [vmem:[#allocation228_spill] sm:$0xff] %v7500_v49  ;;  %9543 = vst [vmem:[#allocation229_spill] sm:$0xff] %v7508_v23  ;;  %v7513_v7 = vpop.eup %5013  ;;  %5033 = vpow2.f32 %v4132_v34  ;;  %v4131_v19 = vmul.f32 -1.442695, %v9546_v52  ;;  %v7525_v29 = vpop.f32.mrb[98].mxu1  ;;  %v7571_v49 = vadd.f32 %v7333_v51, %v7411_v47  ;;  %v9559_v47 = vld [vmem:[#allocation158_spill] sm:$0xff]  ;;  %v9566_v24 = vsub.f32 %v7384_v43, %v7082_v18 }
 0x318   : > { %9545 = vst [vmem:[#allocation230_spill] sm:$0xff] %v7513_v7  ;;  %9548 = vst [vmem:[#allocation231_spill] sm:$0xff] %v7525_v29  ;;  %v7527_v50 = vpop.eup %5015  ;;  %5035 = vpow2.f32 %v4164_v54  ;;  %v7539_v22 = vpop.f32.mrb[99].mxu1  ;;  %v4070_v54 = vmul.f32 -1.442695, %v9552_v58  ;;  %v9556_v58 = vld [vmem:[#allocation169_spill] sm:$0xff]  ;;  %v7607_v18 = vadd.f32 %v7333_v51, %v7437_v61 }
 0x319   : > { %9549 = vst [vmem:[#allocation232_spill] sm:$0xff] %v7527_v50  ;;  %9550 = vst [vmem:[#allocation233_spill] sm:$0xff] %v7539_v22  ;;  %v7541_v63 = vpop.eup %5017  ;;  %5037 = vpow2.f32 %v4067_v44  ;;  %v7546_v52 = vpop.f32.mrb[164].mxu0  ;;  %v4102_v31 = vmul.f32 -1.442695, %v9554_v41  ;;  %v9560_v23 = vld [vmem:[#allocation167_spill] sm:$0xff] }
 0x31a   : > { %9551 = vst [vmem:[#allocation234_spill] sm:$0xff] %v7541_v63  ;;  %v7548_v34 = vpop.eup %5019  ;;  %5039 = vpow2.f32 %v4099_v33  ;;  %v7557_v44 = vpop.f32.mrb[165].mxu0  ;;  %v4134_v22 = vmul.f32 -1.442695, %v9566_v24 }
 0x31b   : > { %9553 = vst [vmem:[#allocation235_spill] sm:$0xff] %v7548_v34  ;;  %v7559_v63 = vpop.eup %5021  ;;  %5041 = vpow2.f32 %v4131_v19  ;;  %v9558_v34 = vld [vmem:[#allocation157_spill] sm:$0xff] }
 0x31c   : > { %9555 = vst [vmem:[#allocation236_spill] sm:$0xff] %v7559_v63  ;;  %v5024_v41 = vpop.eup %5023  ;;  %5043 = vpow2.f32 %v4163_v28 }
 0x31d   : > { %v5026_v50 = vpop.eup %5025  ;;  %v2366_v19 = vadd.f32 1.0, %v5024_v41  ;;  %5045 = vpow2.f32 %v4070_v54  ;;  %v7573_v7 = vpop.f32.mrb[166].mxu0 }
 0x31e   : > { %v5028_v40 = vpop.eup %5027  ;;  %v2686_v63 = vadd.f32 1.0, %v5026_v50  ;;  %5047 = vpow2.f32 %v4102_v31  ;;  %v9561_v31 = vld [vmem:[#allocation168_spill] sm:$0xff] }
 0x31f   : > { %v5030_v28 = vpop.eup %5029  ;;  %5049 = vrcp.f32 %v2366_v19  ;;  %v3006_v33 = vadd.f32 1.0, %v5028_v40 }
 0x320   : > { %v5032_v41 = vpop.eup %5031  ;;  %5051 = vrcp.f32 %v2686_v63  ;;  %v2049_v54 = vadd.f32 1.0, %v5030_v28  ;;  %v9563_v63 = vld [vmem:[#allocation155_spill] sm:$0xff] }
 0x321   : > { %v5034_v12 = vpop.eup %5033  ;;  %5053 = vrcp.f32 %v3006_v33  ;;  %v2369_v8 = vadd.f32 1.0, %v5032_v41  ;;  %v7639_v33 = vpop.f32.mrb[100].mxu1 }
 0x322   : > { %v5036_v19 = vpop.eup %5035  ;;  %5055 = vrcp.f32 %v2049_v54  ;;  %v2689_v40 = vadd.f32 1.0, %v5034_v12  ;;  %9581 = vst [vmem:[#allocation158_spill] sm:$0xff] %v7639_v33 }
 0x323   : > { %v5038_v5 = vpop.eup %5037  ;;  %5057 = vrcp.f32 %v2369_v8  ;;  %v3009_v26 = vadd.f32 1.0, %v5036_v19 }
 0x324   : > { %v5040_v29 = vpop.eup %5039  ;;  %5059 = vrcp.f32 %v2689_v40  ;;  %v2048_v50 = vadd.f32 1.0, %v5038_v5  ;;  %v9567_v40 = vsub.f32 %v7384_v43, %v7086_v11  ;;  %v7611_v11 = vadd.f32 %v7468_v20, %v7333_v51  ;;  %v7613_v43 = vpop.f32.mrb[167].mxu0 }
 0x325   : > { %v5042_v54 = vpop.eup %5041  ;;  %5061 = vrcp.f32 %v3009_v26  ;;  %v2368_v12 = vadd.f32 1.0, %v5040_v29  ;;  %v9575_v26 = vld [vmem:[#allocation172_spill] sm:$0xff] }
 0x326   : > { %v5044_v8 = vpop.eup %5043  ;;  %5063 = vrcp.f32 %v2048_v50  ;;  %v2688_v19 = vadd.f32 1.0, %v5042_v54  ;;  %v4166_v5 = vmul.f32 -1.442695, %v9567_v40  ;;  %v9574_v40 = vld [vmem:[#allocation171_spill] sm:$0xff] }
 0x327   : > { %v5046_v28 = vpop.eup %5045  ;;  %5065 = vrcp.f32 %v2368_v12  ;;  %v3008_v25 = vadd.f32 1.0, %v5044_v8  ;;  %v9571_v12 = vsub.f32 %v7397_v35, %v7189_v48  ;;  %v9578_v48 = vld [vmem:[#allocation160_spill] sm:$0xff] }
 0x328   : > { %v5048_v29 = vpop.eup %5047  ;;  %5067 = vrcp.f32 %v2688_v19  ;;  %v2051_v50 = vadd.f32 1.0, %v5046_v28  ;;  %v9572_v28 = vsub.f32 %v7397_v35, %v7192_v36  ;;  %v9579_v36 = vld [vmem:[#allocation179_spill] sm:$0xff] }
 0x329   : > { %v7615_v24 = vpop.eup %5049  ;;  %5069 = vrcp.f32 %v3008_v25  ;;  %v2371_v54 = vadd.f32 1.0, %v5048_v29  ;;  %v4069_v8 = vmul.f32 -1.442695, %v9571_v12  ;;  %v9583_v25 = vsub.f32 %v7397_v35, %v7069_v2  ;;  %v9589_v2 = vld [vmem:[#allocation165_spill] sm:$0xff] }
 0x32a   : > { %9570 = vst [vmem:[#allocation169_spill] sm:$0xff] %v7615_v24  ;;  %v4101_v19 = vmul.f32 -1.442695, %v9572_v28  ;;  %v7623_v61 = vpop.eup %5051  ;;  %5071 = vrcp.f32 %v2051_v50  ;;  %v9585_v28 = vsub.f32 %v7397_v35, %v7073_v39  ;;  %v9586_v50 = vsub.f32 %v7435_v0, %v7211_v62  ;;  %v7667_v35 = vpop.f32.mrb[101].mxu1 }
 0x32b   : > { %9573 = vst [vmem:[#allocation170_spill] sm:$0xff] %v7623_v61  ;;  %v7631_v29 = vpop.eup %5053  ;;  %5073 = vrcp.f32 %v2371_v54  ;;  %v4133_v41 = vmul.f32 -1.442695, %v9583_v25  ;;  %v3305_v54 = vld [vmem:[#allocation9 + $0x68] sm:$0xff]  ;;  %v7665_v39 = vadd.f32 %v7333_v51, %v7487_v30  ;;  %9591 = vst [vmem:[#allocation161_spill] sm:$0xff] %v7667_v35  ;;  %v7669_v62 = vpop.f32.mrb[168].mxu0  ;;  %v9595_v30 = vsub.f32 %v7435_v0, %v7105_v9 }
 0x32c   : > { %9577 = vst [vmem:[#allocation157_spill] sm:$0xff] %v7631_v29  ;;  %v7641_v20 = vpop.eup %5055  ;;  %5075 = vpow2.f32 %v4134_v22  ;;  %v3304_v29 = vld [vmem:[#allocation9 + $0x60] sm:$0xff]  ;;  %v4165_v12 = vmul.f32 -1.442695, %v9585_v28  ;;  %v4072_v33 = vmul.f32 -1.442695, %v9586_v50  ;;  %v9587_v22 = vsub.f32 %v7435_v0, %v7216_v13 }
 0x32d   : > { %9582 = vst [vmem:[#allocation167_spill] sm:$0xff] %v7641_v20  ;;  %v7646_v24 = vpop.eup %5057  ;;  %5077 = vpow2.f32 %v4166_v5  ;;  %v9593_v13 = vsub.f32 %v7435_v0, %v7101_v32  ;;  %v7678_v50 = vadd.f32 %v7506_v37, %v7333_v51  ;;  %v4168_v25 = vmul.f32 -1.442695, %v9595_v30  ;;  %v7691_v32 = vpop.f32.mrb[169].mxu0  ;;  %v9599_v37 = vld [vmem:[#allocation178_spill] sm:$0xff]  ;;  %v9601_v9 = vld [vmem:[#allocation164_spill] sm:$0xff] }
 0x32e   : > { %9584 = vst [vmem:[#allocation168_spill] sm:$0xff] %v7646_v24  ;;  %v4104_v20 = vmul.f32 -1.442695, %v9587_v22  ;;  %v7657_v61 = vpop.eup %5059  ;;  %5079 = vpow2.f32 %v4069_v8  ;;  %v9590_v24 = vld [vmem:[#allocation166_spill] sm:$0xff]  ;;  %v4800_v22 = vpack.c.bf16 %v3305_v54, %v3304_v29  ;;  %v9607_v0 = vsub.f32 %v7445_v59, %v7208_v27  ;;  %v7748_v27 = vpop.f32.mrb[170].mxu0 }
 0x32f   : > { %9588 = vst [vmem:[#allocation155_spill] sm:$0xff] %v7657_v61  ;;  %v7671_v28 = vpop.eup %5061  ;;  %5081 = vpow2.f32 %v4101_v19  ;;  %v4136_v8 = vmul.f32 -1.442695, %v9593_v13  ;;  %v9596_v61 = vld [vmem:[#allocation177_spill] sm:$0xff]  ;;  %v7689_v19 = vadd.f32 %v7333_v51, %v7523_v10  ;;  %v9603_v10 = vsub.f32 %v7445_v59, %v7205_v45 }
 0x330   : > { %9592 = vst [vmem:[#allocation171_spill] sm:$0xff] %v7671_v28  ;;  %v7680_v5 = vpop.eup %5063  ;;  %5083 = vpow2.f32 %v4133_v41  ;;  %v9600_v41 = vld [vmem:[#allocation163_spill] sm:$0xff]  ;;  %4801 = vmatprep.subr.bf16.mxu1 %v4800_v22  ;;  %v4103_v54 = vmul.f32 -1.442695, %v9607_v0  ;;  %v9609_v45 = vsub.f32 %v7445_v59, %v7091_v6 }
 0x331   : > { %9594 = vst [vmem:[#allocation172_spill] sm:$0xff] %v7680_v5  ;;  %9597 = vst [vmem:[#allocation160_spill] sm:$0xff] %v7689_v19  ;;  %v7693_v13 = vpop.eup %5065  ;;  %5085 = vpow2.f32 %v4165_v12  ;;  %v4071_v28 = vmul.f32 -1.442695, %v9603_v10  ;;  %v9604_v5 = vld [vmem:[#allocation183_spill] sm:$0xff]  ;;  %4803 = vmatpush3.bf16.msra.mxu1 %v4800_v22  ;;  %v9610_v10 = vsub.f32 %v7445_v59, %v7095_v55 }
 0x332   : > { %9598 = vst [vmem:[#allocation179_spill] sm:$0xff] %v7693_v13  ;;  %v7701_v30 = vpop.eup %5067  ;;  %5087 = vpow2.f32 %v4072_v33  ;;  %v4135_v33 = vmul.f32 -1.442695, %v9609_v45 }
 0x333   : > { %9602 = vst [vmem:[#allocation165_spill] sm:$0xff] %v7701_v30  ;;  %v7710_v35 = vpop.eup %5069  ;;  %5089 = vpow2.f32 %v4104_v20  ;;  %v7723_v12 = vmul.f32 -1.442695, %v9610_v10  ;;  %v7727_v20 = vpop.f32.mrb[102].mxu1  ;;  %v9618_v10 = vsub.f32 %v7448_v1, %v7226_v46  ;;  %v9622_v46 = vsub.f32 %v7448_v1, %v7121_v4 }
 0x334   : > { %9606 = vst [vmem:[#allocation166_spill] sm:$0xff] %v7710_v35  ;;  %v7715_v30 = vpop.eup %5071  ;;  %5091 = vpow2.f32 %v4136_v8  ;;  %9612 = vst [vmem:[#allocation178_spill] sm:$0xff] %v7727_v20  ;;  %v7737_v55 = vpop.f32.mrb[103].mxu1  ;;  %v9623_v8 = vsub.f32 %v7448_v1, %v7125_v14  ;;  %v9625_v4 = vsub.f32 %v7533_v15, %v7224_v21 }
 0x335   : > { %9608 = vst [vmem:[#allocation177_spill] sm:$0xff] %v7715_v30  ;;  %v7729_v35 = vpop.eup %5073  ;;  %5093 = vpow2.f32 %v4168_v25  ;;  %9617 = vst [vmem:[#allocation164_spill] sm:$0xff] %v7737_v55  ;;  %v7742_v29 = vmul.f32 -1.442695, %v9618_v10  ;;  %v9621_v30 = vsub.f32 %v7448_v1, %v7228_v17  ;;  %v7758_v10 = vmul.f32 -1.442695, %v9622_v46 }
 0x336   : > { %9613 = vst [vmem:[#allocation163_spill] sm:$0xff] %v7729_v35  ;;  %v5076_v59 = vpop.eup %5075  ;;  %5095 = vpow2.f32 %v4071_v28  ;;  %v7763_v22 = vmul.f32 -1.442695, %v9623_v8  ;;  %v7773_v46 = vmul.f32 -1.442695, %v9625_v4  ;;  %v9632_v4 = vsub.f32 %v7537_v57, %v9556_v58 }
 0x337   : > { %v5078_v6 = vpop.eup %5077  ;;  %v2691_v0 = vadd.f32 1.0, %v5076_v59  ;;  %5097 = vpow2.f32 %v4103_v54  ;;  %v7753_v28 = vmul.f32 -1.442695, %v9621_v30  ;;  %v9624_v54 = vsub.f32 %v7533_v15, %v7221_v42 }
 0x338   : > { %v5080_v45 = vpop.eup %5079  ;;  %v3011_v25 = vadd.f32 1.0, %v5078_v6  ;;  %5099 = vpow2.f32 %v4135_v33  ;;  %v7777_v33 = vadd.f32 %v7546_v52, %v7333_v51  ;;  %v9626_v42 = vsub.f32 %v7533_v15, %v7111_v60 }
 0x339   : > { %v7768_v59 = vmul.f32 -1.442695, %v9624_v54  ;;  %v5082_v17 = vpop.eup %5081  ;;  %5101 = vrcp.f32 %v2691_v0  ;;  %v2050_v30 = vadd.f32 1.0, %v5080_v45  ;;  %v7786_v0 = vadd.f32 %v7333_v51, %v7557_v44  ;;  %v9627_v45 = vld [vmem:[#allocation189_spill] sm:$0xff] }
 0x33a   : > { %v5084_v14 = vpop.eup %5083  ;;  %5103 = vrcp.f32 %v3011_v25  ;;  %v2370_v1 = vadd.f32 1.0, %v5082_v17  ;;  %v7782_v8 = vmul.f32 -1.442695, %v9626_v42  ;;  %v7804_v54 = vmul.f32 -1.442695, %v9632_v4  ;;  %v9635_v4 = vld [vmem:[#allocation188_spill] sm:$0xff] }
 0x33b   : > { %v5086_v6 = vpop.eup %5085  ;;  %5105 = vrcp.f32 %v2050_v30  ;;  %v2690_v21 = vadd.f32 1.0, %v5084_v14  ;;  %v9631_v30 = vsub.f32 %v7533_v15, %v7115_v3  ;;  %v9633_v60 = vsub.f32 %v7537_v57, %v9557_v16 }
 0x33c   : > { %v5088_v25 = vpop.eup %5087  ;;  %5107 = vrcp.f32 %v2370_v1  ;;  %v3010_v17 = vadd.f32 1.0, %v5086_v6  ;;  %v9640_v16 = vsub.f32 %v7571_v49, %v9560_v23 }
 0x33d   : > { %v5090_v44 = vpop.eup %5089  ;;  %5109 = vrcp.f32 %v2690_v21  ;;  %v2053_v13 = vadd.f32 1.0, %v5088_v25  ;;  %v7799_v14 = vmul.f32 -1.442695, %v9631_v30  ;;  %v7809_v19 = vmul.f32 -1.442695, %v9633_v60  ;;  %v9634_v25 = vld [vmem:[#allocation187_spill] sm:$0xff] }
 0x33e   : > { %v5092_v1 = vpop.eup %5091  ;;  %5111 = vrcp.f32 %v3010_v17  ;;  %v2373_v6 = vadd.f32 1.0, %v5090_v44  ;;  %v7813_v21 = vadd.f32 %v7573_v7, %v7333_v51  ;;  %v9639_v30 = vsub.f32 %v7537_v57, %v9559_v47 }
 0x33f   : > { %v5094_v3 = vpop.eup %5093  ;;  %5113 = vrcp.f32 %v2053_v13  ;;  %v2693_v15 = vadd.f32 1.0, %v5092_v1  ;;  %v9638_v13 = vsub.f32 %v7537_v57, %v9558_v34  ;;  %v7836_v35 = vmul.f32 -1.442695, %v9640_v16  ;;  %v9643_v57 = vld [vmem:[#allocation196_spill] sm:$0xff] }
 0x340   : > { %v5096_v17 = vpop.eup %5095  ;;  %5115 = vrcp.f32 %v2373_v6  ;;  %v3013_v44 = vadd.f32 1.0, %v5094_v3  ;;  %v7831_v58 = vmul.f32 -1.442695, %v9639_v30 }
 0x341   : > { %v5098_v7 = vpop.eup %5097  ;;  %5117 = vrcp.f32 %v2693_v15  ;;  %v2052_v52 = vadd.f32 1.0, %v5096_v17  ;;  %v7826_v1 = vmul.f32 -1.442695, %v9638_v13  ;;  %v3306_v15 = vld [vmem:[#allocation9 + $0x70] sm:$0xff]  ;;  %v3307_v17 = vld [vmem:[#allocation9 + $0x78] sm:$0xff]  ;;  %v9642_v13 = vld [vmem:[#allocation195_spill] sm:$0xff] }
 0x342   : > { %v5100_v6 = vpop.eup %5099  ;;  %5119 = vrcp.f32 %v3013_v44  ;;  %v2372_v3 = vadd.f32 1.0, %v5098_v7  ;;  %v7852_v7 = vadd.f32 %v7333_v51, %v7613_v43  ;;  %v4804_v23 = vpack.c.bf16 %v3307_v17, %v3306_v15  ;;  %v9654_v15 = vld [vmem:[#allocation194_spill] sm:$0xff] }
 0x343   : > { %v7838_v60 = vpop.eup %5101  ;;  %5121 = vrcp.f32 %v2052_v52  ;;  %v2692_v34 = vadd.f32 1.0, %v5100_v6  ;;  %v9646_v6 = vsub.f32 %v7571_v49, %v9561_v31  ;;  %v9649_v43 = vsub.f32 %v7571_v49, %v9563_v63  ;;  %v9650_v31 = vld [vmem:[#allocation175_spill] sm:$0xff] }
 0x344   : > { %9641 = vst [vmem:[#allocation183_spill] sm:$0xff] %v7838_v60  ;;  %v7844_v30 = vpop.eup %5103  ;;  %5123 = vrcp.f32 %v2372_v3  ;;  %v9647_v3 = vld [vmem:[#allocation153_spill] sm:$0xff]  ;;  %v1887_v60 = vpop.f32.mrb[171].mxu0  ;;  %4805 = vmatprep.subr.bf16.mxu1 %v4804_v23 }
 0x345   : > { %9644 = vst [vmem:[#allocation189_spill] sm:$0xff] %v7844_v30  ;;  %v7854_v52 = vpop.eup %5105  ;;  %5125 = vrcp.f32 %v2692_v34  ;;  %v7859_v47 = vmul.f32 -1.442695, %v9646_v6  ;;  %v9648_v42 = vsub.f32 %v7571_v49, %v9647_v3  ;;  %v7872_v34 = vmul.f32 -1.442695, %v9649_v43  ;;  %4807 = vmatpush3.bf16.msra.mxu1 %v4804_v23 }
 0x346   : > { %v7866_v16 = vpop.eup %5107  ;;  %5127 = vpow2.f32 %v7723_v12  ;;  %v9651_v6 = vsub.f32 %v7577_v56, %v9650_v31  ;;  %v7904_v49 = vadd.f32 %v7333_v51, %v7691_v32 }
 0x347   : > { %v7864_v30 = vmul.f32 -1.442695, %v9648_v42  ;;  %v7881_v3 = vpop.eup %5109  ;;  %5129 = vpow2.f32 %v7742_v29  ;;  %v7900_v29 = vadd.f32 %v7669_v62, %v7333_v51  ;;  %v9665_v62 = vsub.f32 %v7607_v18, %v9574_v40  ;;  %v9723_v40 = vld [vmem:[#allocation29_spill] sm:$0xff] }
 0x348   : > { %v7877_v44 = vmul.f32 -1.442695, %v9651_v6  ;;  %9653 = vst [vmem:[#allocation187_spill] sm:$0xff] %v7881_v3  ;;  %v7890_v31 = vpop.eup %5111  ;;  %5131 = vpow2.f32 %v7753_v28  ;;  %v9658_v6 = vld [vmem:[#allocation176_spill] sm:$0xff]  ;;  %9660 = vst [vmem:[#allocation195_spill] sm:$0xff] %v7904_v49  ;;  %v9662_v28 = vsub.f32 %v7577_v56, %v9568_v53 }
 0x349   : > { %9657 = vst [vmem:[#allocation188_spill] sm:$0xff] %v7890_v31  ;;  %v9659_v42 = vsub.f32 %v7577_v56, %v9658_v6  ;;  %v7906_v43 = vpop.eup %5113  ;;  %5133 = vpow2.f32 %v7758_v10  ;;  %v7922_v31 = vmul.f32 -1.442695, %v9665_v62  ;;  %v9667_v10 = vld [vmem:[#allocation199_spill] sm:$0xff]  ;;  %v9668_v53 = vld [vmem:[#allocation200_spill] sm:$0xff] }
 0x34a   : > { %9661 = vst [vmem:[#allocation196_spill] sm:$0xff] %v7906_v43  ;;  %v7912_v12 = vmul.f32 -1.442695, %v9662_v28  ;;  %v7924_v32 = vpop.eup %5115  ;;  %5135 = vpow2.f32 %v7763_v22  ;;  %v9691_v22 = vld [vmem:[#allocation225_spill] sm:$0xff] }
 0x34b   : > { %v7896_v3 = vmul.f32 -1.442695, %v9659_v42  ;;  %v9663_v42 = vld [vmem:[#allocation162_spill] sm:$0xff]  ;;  %9666 = vst [vmem:[#allocation153_spill] sm:$0xff] %v7924_v32  ;;  %5137 = vpow2.f32 %v7768_v59  ;;  %v9676_v59 = vld [vmem:[#allocation159_spill] sm:$0xff]  ;;  %v9678_v32 = vsub.f32 %v7607_v18, %v9578_v48 }
 0x34c   : > { %v9664_v23 = vsub.f32 %v7577_v56, %v9663_v42  ;;  %v7933_v42 = vpop.eup %5117  ;;  %5139 = vpow2.f32 %v7773_v46  ;;  %v9675_v56 = vsub.f32 %v7607_v18, %v9575_v26  ;;  %v9680_v46 = vsub.f32 %v7611_v11, %v9579_v36 }
 0x34d   : > { %9670 = vst [vmem:[#allocation175_spill] sm:$0xff] %v7933_v42  ;;  %v7942_v43 = vpop.eup %5119  ;;  %v9677_v42 = vsub.f32 %v7607_v18, %v9676_v59  ;;  %5141 = vpow2.f32 %v7782_v8  ;;  %v9693_v8 = vld [vmem:[#allocation226_spill] sm:$0xff] }
 0x34e   : > { %v7917_v6 = vmul.f32 -1.442695, %v9664_v23  ;;  %9674 = vst [vmem:[#allocation193_spill] sm:$0xff] %v7942_v43  ;;  %v7948_v28 = vmul.f32 -1.442695, %v9675_v56  ;;  %v7960_v17 = vpop.eup %5121  ;;  %v9681_v56 = vld [vmem:[#allocation180_spill] sm:$0xff]  ;;  %5143 = vpow2.f32 %v7799_v14 }
 0x34f   : > { %v7953_v63 = vmul.f32 -1.442695, %v9677_v42  ;;  %v7958_v23 = vmul.f32 -1.442695, %v9678_v32  ;;  %9679 = vst [vmem:[#allocation194_spill] sm:$0xff] %v7960_v17  ;;  %v9682_v43 = vsub.f32 %v7611_v11, %v9681_v56  ;;  %v9683_v42 = vsub.f32 %v7611_v11, %v9589_v2  ;;  %v7978_v48 = vpop.eup %5123  ;;  %v9690_v14 = vld [vmem:[#allocation27_spill] sm:$0xff] }
 0x350   : > { %v7966_v26 = vmul.f32 -1.442695, %v9680_v46  ;;  %9684 = vst [vmem:[#allocation176_spill] sm:$0xff] %v7978_v48  ;;  %v7987_v56 = vadd.f32 %v7748_v27, %v7333_v51  ;;  %5145 = vpow2.f32 %v7804_v54  ;;  %v9689_v2 = vsub.f32 %v7611_v11, %v9590_v24  ;;  %v9692_v32 = vld [vmem:[#allocation28_spill] sm:$0xff]  ;;  %v9716_v54 = vld [vmem:[#allocation181_spill] sm:$0xff] }
 0x351   : > { %v7971_v59 = vmul.f32 -1.442695, %v9682_v43  ;;  %v7976_v18 = vmul.f32 -1.442695, %v9683_v42  ;;  %v7989_v43 = vpop.eup %5125  ;;  %v2140_v62 = vmul.f32 %v9691_v22, %v9690_v14  ;;  %v2460_v48 = vmul.f32 %v9693_v8, %v9692_v32 }
 0x352   : > { %9687 = vst [vmem:[#allocation162_spill] sm:$0xff] %v7987_v56  ;;  %9688 = vst [vmem:[#allocation199_spill] sm:$0xff] %v7989_v43  ;;  %v7995_v42 = vmul.f32 -1.442695, %v9689_v2  ;;  %v5128_v46 = vpop.eup %5127  ;;  %5147 = vpow2.f32 %v7809_v19  ;;  %v9694_v27 = vsub.f32 %v7665_v39, %v9596_v61  ;;  %v8010_v11 = vadd.f32 %v7333_v51, %v1887_v60 }
 0x353   : > { %v5130_v24 = vpop.eup %5129  ;;  %v3012_v2 = vadd.f32 1.0, %v5128_v46  ;;  %5149 = vpow2.f32 %v7826_v1  ;;  %v9699_v46 = vsub.f32 %v7665_v39, %v9600_v41 }
 0x354   : > { %v8005_v36 = vmul.f32 -1.442695, %v9694_v27  ;;  %9696 = vst [vmem:[#allocation200_spill] sm:$0xff] %v8010_v11  ;;  %v5132_v49 = vpop.eup %5131  ;;  %v2055_v61 = vadd.f32 1.0, %v5130_v24  ;;  %5151 = vpow2.f32 %v7831_v58  ;;  %v9698_v27 = vsub.f32 %v7665_v39, %v9599_v37  ;;  %v9720_v11 = vld [vmem:[#allocation227_spill] sm:$0xff] }
 0x355   : > { %v5134_v60 = vpop.eup %5133  ;;  %5153 = vrcp.f32 %v3012_v2  ;;  %v2375_v1 = vadd.f32 1.0, %v5132_v49  ;;  %v8028_v32 = vmul.f32 -1.442695, %v9699_v46  ;;  %v9700_v24 = vsub.f32 %v7665_v39, %v9601_v9  ;;  %v9712_v9 = vld [vmem:[#allocation186_spill] sm:$0xff] }
 0x356   : > { %v8021_v43 = vmul.f32 -1.442695, %v9698_v27  ;;  %v5136_v19 = vpop.eup %5135  ;;  %5155 = vrcp.f32 %v2055_v61  ;;  %v2695_v37 = vadd.f32 1.0, %v5134_v60  ;;  %v9701_v27 = vsub.f32 %v7678_v50, %v9604_v5  ;;  %v9705_v60 = vld [vmem:[#allocation184_spill] sm:$0xff] }
 0x357   : > { %v8033_v58 = vmul.f32 -1.442695, %v9700_v24  ;;  %v5138_v55 = vpop.eup %5137  ;;  %5157 = vrcp.f32 %v2375_v1  ;;  %v3015_v41 = vadd.f32 1.0, %v5136_v19  ;;  %v9706_v5 = vsub.f32 %v7678_v50, %v9705_v60  ;;  %v9709_v1 = vld [vmem:[#allocation185_spill] sm:$0xff] }
 0x358   : > { %v8038_v51 = vmul.f32 -1.442695, %v9701_v27  ;;  %v5140_v24 = vpop.eup %5139  ;;  %5159 = vrcp.f32 %v2695_v37  ;;  %v2054_v61 = vadd.f32 1.0, %v5138_v55  ;;  %v9710_v20 = vsub.f32 %v7678_v50, %v9709_v1  ;;  %v9719_v1 = vld [vmem:[#allocation139_spill] sm:$0xff] }
 0x359   : > { %v8049_v27 = vmul.f32 -1.442695, %v9706_v5  ;;  %v5142_v2 = vpop.eup %5141  ;;  %5161 = vrcp.f32 %v3015_v41  ;;  %v2374_v19 = vadd.f32 1.0, %v5140_v24  ;;  %v9713_v37 = vsub.f32 %v7678_v50, %v9712_v9  ;;  %v9715_v5 = vld [vmem:[#allocation160_spill] sm:$0xff] }
 0x35a   : > { %v8056_v46 = vmul.f32 -1.442695, %v9710_v20  ;;  %v5144_v39 = vpop.eup %5143  ;;  %5163 = vrcp.f32 %v2054_v61  ;;  %v2694_v60 = vadd.f32 1.0, %v5142_v2  ;;  %v9717_v56 = vsub.f32 %v9715_v5, %v9716_v54  ;;  %v9721_v61 = vld [vmem:[#allocation140_spill] sm:$0xff]  ;;  %v9722_v2 = vld [vmem:[#allocation229_spill] sm:$0xff] }
 0x35b   : > { %9707 = vst [vmem:[#allocation159_spill] sm:$0xff] %v8049_v27  ;;  %v8061_v55 = vmul.f32 -1.442695, %v9713_v37  ;;  %v2492_v41 = vadd.f32 %v2460_v48, %v2140_v62  ;;  %v5146_v24 = vpop.eup %5145  ;;  %5165 = vrcp.f32 %v2374_v19  ;;  %v3014_v14 = vadd.f32 1.0, %v5144_v39  ;;  %v9724_v54 = vld [vmem:[#allocation220_spill] sm:$0xff] }
 0x35c   : > { %9711 = vst [vmem:[#allocation180_spill] sm:$0xff] %v8056_v46  ;;  %v8066_v49 = vmul.f32 -1.442695, %v9717_v56  ;;  %v2524_v20 = vadd.f32 %v9693_v8, %v9691_v22  ;;  %v2780_v50 = vmul.f32 %v9720_v11, %v9719_v1  ;;  %v5148_v9 = vpop.eup %5147  ;;  %5167 = vrcp.f32 %v2694_v60  ;;  %v9725_v8 = vld [vmem:[#allocation30_spill] sm:$0xff]  ;;  %v9727_v60 = vld [vmem:[#allocation141_spill] sm:$0xff] }
 0x35d   : > { %9714 = vst [vmem:[#allocation27_spill] sm:$0xff] %v8061_v55  ;;  %v2057_v37 = vadd.f32 1.0, %v5146_v24  ;;  %v3100_v17 = vmul.f32 %v9722_v2, %v9721_v61  ;;  %v2141_v56 = vmul.f32 %v9724_v54, %v9723_v40  ;;  %5169 = vrcp.f32 %v3014_v14  ;;  %v9726_v1 = vld [vmem:[#allocation222_spill] sm:$0xff]  ;;  %v9728_v24 = vld [vmem:[#allocation223_spill] sm:$0xff]  ;;  %v9735_v54 = vld [vmem:[#allocation224_spill] sm:$0xff] }
 0x35e   : > { %9718 = vst [vmem:[#allocation225_spill] sm:$0xff] %v8066_v49  ;;  %v5150_v49 = vpop.eup %5149  ;;  %v2377_v62 = vadd.f32 1.0, %v5148_v9  ;;  %v2812_v48 = vadd.f32 %v2780_v50, %v2492_v41  ;;  %v2844_v39 = vadd.f32 %v9720_v11, %v2524_v20  ;;  %v2461_v55 = vmul.f32 %v9726_v1, %v9725_v8  ;;  %v8088_v41 = vpop.f32.mrb[104].mxu1  ;;  %v9741_v1 = vld [vmem:[#allocation236_spill] sm:$0xff] }
 0x35f   : > { %v5152_v19 = vpop.eup %5151  ;;  %5171 = vrcp.f32 %v2057_v37  ;;  %v2697_v22 = vadd.f32 1.0, %v5150_v49  ;;  %v2781_v46 = vmul.f32 %v9728_v24, %v9727_v60  ;;  %9731 = vst [vmem:[#allocation184_spill] sm:$0xff] %v8088_v41  ;;  %v9732_v49 = vld [vmem:[#allocation182_spill] sm:$0xff] }
 0x360   : > { %v8081_v27 = vpop.eup %5153  ;;  %5173 = vrcp.f32 %v2377_v62  ;;  %v3017_v61 = vadd.f32 1.0, %v5152_v19  ;;  %v8083_v40 = vadd.f32 %v3100_v17, %v2812_v48  ;;  %v8086_v14 = vadd.f32 %v9722_v2, %v2844_v39  ;;  %v9734_v37 = vld [vmem:[#allocation142_spill] sm:$0xff]  ;;  %v8099_v19 = vpop.f32.mrb[105].mxu1  ;;  %v9737_v2 = vld [vmem:[#allocation173_spill] sm:$0xff] }
 0x361   : > { %v8090_v11 = vpop.eup %5155  ;;  %5175 = vrcp.f32 %v2697_v22  ;;  %v9733_v20 = vsub.f32 %v9715_v5, %v9732_v49  ;;  %v2493_v9 = vadd.f32 %v2461_v55, %v2141_v56  ;;  %v3101_v62 = vmul.f32 %v9735_v54, %v9734_v37  ;;  %9736 = vst [vmem:[#allocation185_spill] sm:$0xff] %v8099_v19  ;;  %v4420_v17 = vpop.f32.mrb[172].mxu0  ;;  %v8111_v22 = vld [vmem:[%s9134_s4] ss:$0 sm:$0xff]  ;;  %v9745_v37 = vld [vmem:[#allocation169_spill] sm:$0xff]  ;;  %v9782_v19 = vld [vmem:[#allocation146_spill] sm:$0xff] }
 0x362   : > { %9729 = vst [vmem:[#allocation28_spill] sm:$0xff] %v8083_v40  ;;  %9730 = vst [vmem:[#allocation226_spill] sm:$0xff] %v8086_v14  ;;  %v8101_v48 = vpop.eup %5157  ;;  %5177 = vrcp.f32 %v3017_v61  ;;  %v9738_v39 = vsub.f32 %v9715_v5, %v9737_v2  ;;  %v8114_v55 = vadd.f32 %v8111_v22, %v4420_v17  ;;  %v9740_v56 = vld [vmem:[#allocation31_spill] sm:$0xff]  ;;  %v8121_v49 = vpop.f32.mrb[106].mxu1  ;;  %v2526_v2 = vadd.f32 %v9745_v37, %v9741_v1 }
 0x363   : > { %v8095_v50 = vmul.f32 -1.442695, %v9733_v20  ;;  %v2142_v60 = vmul.f32 %v9741_v1, %v9740_v56  ;;  %v8118_v24 = vpop.eup %5159  ;;  %5179 = vpow2.f32 %v7836_v35  ;;  %v2813_v61 = vadd.f32 %v2781_v46, %v2493_v9  ;;  %9743 = vst [vmem:[#allocation181_spill] sm:$0xff] %v8121_v49  ;;  %v9744_v20 = vld [vmem:[#allocation32_spill] sm:$0xff]  ;;  %v9749_v35 = vld [vmem:[#allocation143_spill] sm:$0xff]  ;;  %v9750_v46 = vld [vmem:[#allocation170_spill] sm:$0xff] }
 0x364   : > { %v8106_v8 = vmul.f32 -1.442695, %v9738_v39  ;;  %9739 = vst [vmem:[#allocation186_spill] sm:$0xff] %v8114_v55  ;;  %9742 = vst [vmem:[#allocation160_spill] sm:$0xff] %v8118_v24  ;;  %v2462_v54 = vmul.f32 %v9745_v37, %v9744_v20  ;;  %v8127_v39 = vpop.eup %5161  ;;  %5181 = vpow2.f32 %v7859_v47  ;;  %v2782_v9 = vmul.f32 %v9750_v46, %v9749_v35  ;;  %v9752_v47 = vld [vmem:[#allocation174_spill] sm:$0xff] }
 0x365   : > { %9746 = vst [vmem:[#allocation139_spill] sm:$0xff] %v8127_v39  ;;  %v8136_v24 = vpop.eup %5163  ;;  %5183 = vpow2.f32 %v7864_v30  ;;  %v8139_v20 = vadd.f32 %v3101_v62, %v2813_v61  ;;  %v2846_v37 = vadd.f32 %v9750_v46, %v2526_v2  ;;  %v9753_v56 = vsub.f32 %v9715_v5, %v9752_v47  ;;  %v1897_v30 = vpop.f32.mrb[173].mxu0  ;;  %v9755_v62 = vld [vmem:[#allocation144_spill] sm:$0xff]  ;;  %v9756_v61 = vld [vmem:[#allocation157_spill] sm:$0xff]  ;;  %v9759_v46 = vld [vmem:[#allocation34_spill] sm:$0xff] }
 0x366   : > { %v2494_v1 = vadd.f32 %v2462_v54, %v2142_v60  ;;  %v8142_v39 = vpop.eup %5165  ;;  %5185 = vpow2.f32 %v7872_v34  ;;  %v9754_v35 = vsub.f32 %v7777_v33, %v9627_v45  ;;  %v3102_v60 = vmul.f32 %v9756_v61, %v9755_v62  ;;  %v9760_v47 = vld [vmem:[#allocation230_spill] sm:$0xff]  ;;  %v9761_v62 = vld [vmem:[#allocation36_spill] sm:$0xff] }
 0x367   : > { %9751 = vst [vmem:[#allocation227_spill] sm:$0xff] %v8139_v20  ;;  %v8148_v14 = vmul.f32 -1.442695, %v9753_v56  ;;  %v8157_v54 = vpop.eup %5167  ;;  %5187 = vpow2.f32 %v7877_v44  ;;  %v8161_v34 = vadd.f32 %v8111_v22, %v1897_v30  ;;  %v8164_v5 = vadd.f32 %v9756_v61, %v2846_v37  ;;  %v9762_v20 = vld [vmem:[#allocation232_spill] sm:$0xff] }
 0x368   : > { %v8153_v40 = vmul.f32 -1.442695, %v9754_v35  ;;  %v2814_v2 = vadd.f32 %v2782_v9, %v2494_v1  ;;  %v8166_v56 = vpop.eup %5169  ;;  %5189 = vpow2.f32 %v7896_v3  ;;  %v2143_v35 = vmul.f32 %v9760_v47, %v9759_v46  ;;  %v9766_v46 = vld [vmem:[#allocation190_spill] sm:$0xff]  ;;  %v9770_v3 = vld [vmem:[#allocation203_spill] sm:$0xff] }
 0x369   : > { %9757 = vst [vmem:[#allocation140_spill] sm:$0xff] %v8161_v34  ;;  %9758 = vst [vmem:[#allocation229_spill] sm:$0xff] %v8164_v5  ;;  %v2463_v44 = vmul.f32 %v9762_v20, %v9761_v62  ;;  %v8175_v17 = vpop.eup %5171  ;;  %5191 = vpow2.f32 %v7912_v12  ;;  %v9767_v62 = vsub.f32 %v7777_v33, %v9766_v46  ;;  %v9771_v30 = vsub.f32 %v7777_v33, %v9770_v3  ;;  %v9783_v9 = vld [vmem:[#allocation235_spill] sm:$0xff] }
 0x36a   : > { %v8184_v61 = vpop.eup %5173  ;;  %5193 = vpow2.f32 %v7917_v6  ;;  %v8194_v5 = vadd.f32 %v3102_v60, %v2814_v2  ;;  %v9772_v6 = vld [vmem:[#allocation205_spill] sm:$0xff] }
 0x36b   : > { %9765 = vst [vmem:[#allocation29_spill] sm:$0xff] %v8184_v61  ;;  %v8190_v45 = vmul.f32 -1.442695, %v9767_v62  ;;  %v8196_v1 = vpop.eup %5175  ;;  %5195 = vpow2.f32 %v7922_v31  ;;  %v8202_v41 = vmul.f32 -1.442695, %v9771_v30  ;;  %v9773_v37 = vsub.f32 %v7777_v33, %v9772_v6  ;;  %v9777_v30 = vld [vmem:[#allocation191_spill] sm:$0xff] }
 0x36c   : > { %9768 = vst [vmem:[#allocation220_spill] sm:$0xff] %v8194_v5  ;;  %9769 = vst [vmem:[#allocation30_spill] sm:$0xff] %v8196_v1  ;;  %v9774_v62 = vsub.f32 %v7786_v0, %v9634_v25  ;;  %v8214_v60 = vpop.eup %5177  ;;  %5197 = vpow2.f32 %v7948_v28  ;;  %v9776_v31 = vsub.f32 %v7786_v0, %v9635_v4  ;;  %v9778_v3 = vsub.f32 %v7786_v0, %v9777_v30  ;;  %v9781_v5 = vld [vmem:[#allocation234_spill] sm:$0xff] }
 0x36d   : > { %v8207_v46 = vmul.f32 -1.442695, %v9773_v37  ;;  %9775 = vst [vmem:[#allocation222_spill] sm:$0xff] %v8214_v60  ;;  %v2495_v37 = vadd.f32 %v2463_v44, %v2143_v35  ;;  %v5180_v6 = vpop.eup %5179  ;;  %5199 = vpow2.f32 %v7953_v63  ;;  %v2527_v25 = vadd.f32 %v9762_v20, %v9760_v47  ;;  %v9784_v30 = vld [vmem:[#allocation38_spill] sm:$0xff]  ;;  %v9786_v35 = vld [vmem:[#allocation40_spill] sm:$0xff]  ;;  %v9787_v44 = vld [vmem:[#allocation179_spill] sm:$0xff] }
 0x36e   : > { %v8212_v12 = vmul.f32 -1.442695, %v9774_v62  ;;  %v8220_v2 = vmul.f32 -1.442695, %v9776_v31  ;;  %v8225_v33 = vmul.f32 -1.442695, %v9778_v3  ;;  %v3103_v4 = vmul.f32 %v9783_v9, %v9782_v19  ;;  %v5182_v31 = vpop.eup %5181 }
 0x36f   : > { %v9780_v62 = vld [vmem:[#allocation145_spill] sm:$0xff]  ;;  %v2056_v34 = vadd.f32 1.0, %v5180_v6  ;;  %5201 = vpow2.f32 %v7958_v23  ;;  %v9785_v3 = vld [vmem:[#allocation172_spill] sm:$0xff]  ;;  %v2464_v60 = vmul.f32 %v9787_v44, %v9786_v35  ;;  %v5184_v63 = vpop.eup %5183  ;;  %v2376_v1 = vadd.f32 1.0, %v5182_v31 }
 0x370   : > { %9779 = vst [vmem:[#allocation141_spill] sm:$0xff] %v8225_v33  ;;  %v2783_v28 = vmul.f32 %v9781_v5, %v9780_v62  ;;  %v2144_v49 = vmul.f32 %v9785_v3, %v9784_v30  ;;  %5203 = vpow2.f32 %v7966_v26  ;;  %v2847_v47 = vadd.f32 %v9781_v5, %v2527_v25  ;;  %v5186_v62 = vpop.eup %5185  ;;  %v9791_v5 = vld [vmem:[#allocation165_spill] sm:$0xff] }
 0x371   : > { %5205 = vrcp.f32 %v2056_v34  ;;  %v2696_v19 = vadd.f32 1.0, %v5184_v63  ;;  %v2528_v23 = vadd.f32 %v9787_v44, %v9785_v3  ;;  %v5188_v6 = vpop.eup %5187  ;;  %v3016_v30 = vadd.f32 1.0, %v5186_v62  ;;  %v9795_v44 = vld [vmem:[#allocation166_spill] sm:$0xff] }
 0x372   : > { %v2815_v20 = vadd.f32 %v2783_v28, %v2495_v37  ;;  %v2496_v61 = vadd.f32 %v2464_v60, %v2144_v49  ;;  %5207 = vrcp.f32 %v2376_v1  ;;  %v8246_v35 = vadd.f32 %v9783_v9, %v2847_v47  ;;  %v5190_v31 = vpop.eup %5189  ;;  %v9790_v37 = vld [vmem:[#allocation147_spill] sm:$0xff]  ;;  %v9792_v28 = vld [vmem:[#allocation192_spill] sm:$0xff]  ;;  %v8258_v47 = vpop.f32.mrb[107].mxu1 }
 0x373   : > { %5209 = vrcp.f32 %v2696_v19  ;;  %v2059_v26 = vadd.f32 1.0, %v5188_v6  ;;  %v2784_v25 = vmul.f32 %v9791_v5, %v9790_v37  ;;  %v2848_v34 = vadd.f32 %v9791_v5, %v2528_v23  ;;  %v5192_v49 = vpop.eup %5191  ;;  %9796 = vst [vmem:[#allocation142_spill] sm:$0xff] %v8258_v47 }
 0x374   : > { %v8243_v33 = vadd.f32 %v3103_v4, %v2815_v20  ;;  %9789 = vst [vmem:[#allocation182_spill] sm:$0xff] %v8246_v35  ;;  %5211 = vrcp.f32 %v3016_v30  ;;  %v2379_v60 = vadd.f32 1.0, %v5190_v31  ;;  %v9793_v1 = vsub.f32 %v7786_v0, %v9792_v28  ;;  %v9794_v4 = vld [vmem:[#allocation148_spill] sm:$0xff]  ;;  %v5194_v63 = vpop.eup %5193  ;;  %v9798_v30 = vld [vmem:[#allocation42_spill] sm:$0xff]  ;;  %v9799_v31 = vld [vmem:[#allocation167_spill] sm:$0xff] }
 0x375   : > { %v3104_v9 = vmul.f32 %v9795_v44, %v9794_v4  ;;  %5213 = vrcp.f32 %v2059_v26  ;;  %v2699_v20 = vadd.f32 1.0, %v5192_v49  ;;  %v2816_v62 = vadd.f32 %v2784_v25, %v2496_v61  ;;  %v5196_v23 = vpop.eup %5195  ;;  %v9803_v4 = vld [vmem:[#allocation44_spill] sm:$0xff]  ;;  %v9809_v0 = vld [vmem:[#allocation171_spill] sm:$0xff] }
 0x376   : > { %9788 = vst [vmem:[#allocation223_spill] sm:$0xff] %v8243_v33  ;;  %v8254_v3 = vmul.f32 -1.442695, %v9793_v1  ;;  %v8261_v19 = vadd.f32 %v9795_v44, %v2848_v34  ;;  %5215 = vrcp.f32 %v2379_v60  ;;  %v3019_v6 = vadd.f32 1.0, %v5194_v63  ;;  %v5198_v5 = vpop.eup %5197  ;;  %v9804_v44 = vld [vmem:[#allocation168_spill] sm:$0xff] }
 0x377   : > { %v2145_v37 = vmul.f32 %v9799_v31, %v9798_v30  ;;  %5217 = vrcp.f32 %v2699_v20  ;;  %v2058_v28 = vadd.f32 1.0, %v5196_v23  ;;  %v9800_v26 = vsub.f32 %v7813_v21, %v9642_v13  ;;  %v5200_v25 = vpop.eup %5199  ;;  %v9805_v30 = vld [vmem:[#allocation149_spill] sm:$0xff] }
 0x378   : > { %9797 = vst [vmem:[#allocation224_spill] sm:$0xff] %v8261_v19  ;;  %v8272_v61 = vadd.f32 %v3104_v9, %v2816_v62  ;;  %5219 = vrcp.f32 %v3019_v6  ;;  %v2378_v34 = vadd.f32 1.0, %v5198_v5  ;;  %v9802_v60 = vsub.f32 %v7813_v21, %v9643_v57  ;;  %v9806_v9 = vld [vmem:[#allocation155_spill] sm:$0xff]  ;;  %v8285_v5 = vpop.f32.mrb[108].mxu1 }
 0x379   : > { %v8270_v49 = vmul.f32 -1.442695, %v9800_v26  ;;  %v2465_v63 = vmul.f32 %v9804_v44, %v9803_v4  ;;  %v5202_v20 = vpop.eup %5201  ;;  %5221 = vrcp.f32 %v2058_v28  ;;  %v2698_v23 = vadd.f32 1.0, %v5200_v25  ;;  %9807 = vst [vmem:[#allocation31_spill] sm:$0xff] %v8285_v5  ;;  %v8291_v25 = vpop.f32.mrb[109].mxu1 }
 0x37a   : > { %9801 = vst [vmem:[#allocation173_spill] sm:$0xff] %v8272_v61  ;;  %v8277_v1 = vmul.f32 -1.442695, %v9802_v60  ;;  %v2529_v13 = vadd.f32 %v9804_v44, %v9799_v31  ;;  %v2785_v62 = vmul.f32 %v9806_v9, %v9805_v30  ;;  %v5204_v26 = vpop.eup %5203  ;;  %5223 = vrcp.f32 %v2378_v34  ;;  %v9808_v60 = vld [vmem:[#allocation150_spill] sm:$0xff]  ;;  %9810 = vst [vmem:[#allocation236_spill] sm:$0xff] %v8291_v25  ;;  %v4423_v4 = vpop.f32.mrb[174].mxu0 }
 0x37b   : > { %v3018_v6 = vadd.f32 1.0, %v5202_v20  ;;  %v2497_v57 = vadd.f32 %v2465_v63, %v2145_v37  ;;  %v3105_v61 = vmul.f32 %v9809_v0, %v9808_v60  ;;  %v8289_v33 = vpop.eup %5205  ;;  %5225 = vrcp.f32 %v2698_v23  ;;  %v9811_v44 = vld [vmem:[#allocation46_spill] sm:$0xff]  ;;  %v8301_v63 = vpop.f32.mrb[110].mxu1  ;;  %v9814_v23 = vld [vmem:[#allocation48_spill] sm:$0xff] }
 0x37c   : > { %v2061_v28 = vadd.f32 1.0, %v5204_v26  ;;  %v2849_v31 = vadd.f32 %v9806_v9, %v2529_v13  ;;  %v2146_v30 = vmul.f32 %v7854_v52, %v9811_v44  ;;  %v8296_v34 = vpop.eup %5207  ;;  %v8299_v37 = vadd.f32 %v8111_v22, %v4423_v4  ;;  %9813 = vst [vmem:[#allocation169_spill] sm:$0xff] %v8301_v63  ;;  %v1907_v20 = vpop.f32.mrb[175].mxu0  ;;  %v9846_v44 = vld [vmem:[#allocation183_spill] sm:$0xff] }
 0x37d   : > { %5227 = vrcp.f32 %v3018_v6  ;;  %v2817_v60 = vadd.f32 %v2785_v62, %v2497_v57  ;;  %v2466_v26 = vmul.f32 %v7866_v16, %v9814_v23  ;;  %v8305_v19 = vpop.eup %5209  ;;  %v8308_v13 = vadd.f32 %v8111_v22, %v1907_v20  ;;  %v9821_v23 = vld [vmem:[#allocation217_spill] sm:$0xff] }
 0x37e   : > { %9812 = vst [vmem:[#allocation32_spill] sm:$0xff] %v8299_v37  ;;  %5229 = vrcp.f32 %v2061_v28  ;;  %v8311_v9 = vadd.f32 %v9809_v0, %v2849_v31  ;;  %v2530_v6 = vadd.f32 %v7866_v16, %v7854_v52  ;;  %v8315_v4 = vpop.eup %5211  ;;  %v9822_v22 = vsub.f32 %v7813_v21, %v9821_v23  ;;  %v9856_v37 = vld [vmem:[#allocation156_spill] sm:$0xff] }
 0x37f   : > { %9815 = vst [vmem:[#allocation143_spill] sm:$0xff] %v8308_v13  ;;  %5231 = vpow2.f32 %v7971_v59  ;;  %v8324_v28 = vpop.eup %5213  ;;  %v9825_v31 = vsub.f32 %v7852_v7, %v9652_v38  ;;  %v9844_v13 = vld [vmem:[#allocation159_spill] sm:$0xff] }
 0x380   : > { %9816 = vst [vmem:[#allocation170_spill] sm:$0xff] %v8311_v9  ;;  %5233 = vpow2.f32 %v7976_v18  ;;  %v8333_v20 = vpop.eup %5215  ;;  %v8339_v57 = vmul.f32 -1.442695, %v9822_v22  ;;  %v9823_v18 = vld [vmem:[#allocation218_spill] sm:$0xff]  ;;  %v9827_v22 = vld [vmem:[#allocation209_spill] sm:$0xff] }
 0x381   : > { %5235 = vpow2.f32 %v7995_v42  ;;  %v9824_v9 = vsub.f32 %v7813_v21, %v9823_v18  ;;  %v8349_v16 = vmul.f32 -1.442695, %v9825_v31  ;;  %v8351_v59 = vpop.eup %5217  ;;  %v9826_v42 = vsub.f32 %v7852_v7, %v9654_v15 }
 0x382   : > { %5237 = vpow2.f32 %v8005_v36  ;;  %v9828_v5 = vsub.f32 %v7852_v7, %v9827_v22  ;;  %v8369_v31 = vpop.eup %5219  ;;  %v9831_v36 = vsub.f32 %v7900_v29, %v9667_v10  ;;  %v8379_v22 = vadd.f32 %v3105_v61, %v2817_v60  ;;  %v9836_v61 = vld [vmem:[#allocation152_spill] sm:$0xff] }
 0x383   : > { %v8344_v63 = vmul.f32 -1.442695, %v9824_v9  ;;  %v8357_v23 = vmul.f32 -1.442695, %v9826_v42  ;;  %v9829_v9 = vld [vmem:[#allocation211_spill] sm:$0xff]  ;;  %5239 = vpow2.f32 %v8021_v43  ;;  %v9835_v10 = vsub.f32 %v7900_v29, %v9668_v53  ;;  %v9837_v60 = vld [vmem:[#allocation188_spill] sm:$0xff] }
 0x384   : > { %v8362_v21 = vmul.f32 -1.442695, %v9828_v5  ;;  %v9830_v18 = vsub.f32 %v7852_v7, %v9829_v9  ;;  %v8375_v15 = vmul.f32 -1.442695, %v9831_v36  ;;  %9832 = vst [vmem:[#allocation174_spill] sm:$0xff] %v8379_v22  ;;  %v8381_v5 = vpop.eup %5221  ;;  %5241 = vpow2.f32 %v8028_v32  ;;  %v9833_v9 = vld [vmem:[#allocation151_spill] sm:$0xff] }
 0x385   : > { %v2498_v7 = vadd.f32 %v2466_v26, %v2146_v30  ;;  %v8387_v0 = vpop.eup %5223  ;;  %5243 = vpow2.f32 %v8033_v58  ;;  %v8393_v36 = vmul.f32 -1.442695, %v9835_v10  ;;  %v3106_v42 = vmul.f32 %v9837_v60, %v9836_v61  ;;  %v9838_v22 = vld [vmem:[#allocation50_spill] sm:$0xff]  ;;  %v9839_v32 = vld [vmem:[#allocation177_spill] sm:$0xff]  ;;  %v9843_v53 = vld [vmem:[#allocation163_spill] sm:$0xff] }
 0x386   : > { %v8367_v38 = vmul.f32 -1.442695, %v9830_v18  ;;  %v9834_v18 = vld [vmem:[#allocation187_spill] sm:$0xff]  ;;  %v2147_v30 = vmul.f32 %v9839_v32, %v9838_v22  ;;  %v8399_v26 = vpop.eup %5225  ;;  %5245 = vpow2.f32 %v8038_v51  ;;  %v2531_v61 = vadd.f32 %v9843_v53, %v9839_v32  ;;  %v9845_v51 = vld [vmem:[#allocation154_spill] sm:$0xff]  ;;  %v9853_v32 = vld [vmem:[#allocation233_spill] sm:$0xff] }
 0x387   : > { %v2786_v52 = vmul.f32 %v9834_v18, %v9833_v9  ;;  %v2850_v43 = vadd.f32 %v9834_v18, %v2530_v6  ;;  %v8402_v6 = vpop.f32.mrb[111].mxu1  ;;  %v9842_v18 = vld [vmem:[#allocation52_spill] sm:$0xff]  ;;  %v8409_v25 = vpop.eup %5227  ;;  %5247 = vpow2.f32 %v9844_v13  ;;  %v2787_v62 = vmul.f32 %v9846_v44, %v9845_v51  ;;  %v9852_v22 = vld [vmem:[#allocation27_spill] sm:$0xff] }
 0x388   : > { %9840 = vst [vmem:[#allocation144_spill] sm:$0xff] %v8402_v6  ;;  %v2467_v10 = vmul.f32 %v9843_v53, %v9842_v18  ;;  %v9854_v53 = vsub.f32 %v7900_v29, %v9853_v32  ;;  %v2851_v51 = vadd.f32 %v9846_v44, %v2531_v61  ;;  %v9862_v32 = vld [vmem:[#allocation56_spill] sm:$0xff] }
 0x389   : > { %v2818_v9 = vadd.f32 %v2786_v52, %v2498_v7  ;;  %v8405_v58 = vadd.f32 %v9837_v60, %v2850_v43  ;;  %v8418_v52 = vpop.eup %5229  ;;  %v9847_v7 = vld [vmem:[#allocation180_spill] sm:$0xff]  ;;  %v9848_v43 = vld [vmem:[#allocation231_spill] sm:$0xff] }
 0x38a   : > { %5249 = vpow2.f32 %v9847_v7  ;;  %v9849_v60 = vsub.f32 %v7900_v29, %v9848_v43  ;;  %v2499_v13 = vadd.f32 %v2467_v10, %v2147_v30  ;;  %v5232_v35 = vpop.eup %5231  ;;  %v8432_v6 = vmul.f32 -1.442695, %v9854_v53  ;;  %v9857_v7 = vld [vmem:[#allocation189_spill] sm:$0xff]  ;;  %v9860_v30 = vld [vmem:[#allocation194_spill] sm:$0xff]  ;;  %v9863_v44 = vld [vmem:[#allocation176_spill] sm:$0xff] }
 0x38b   : > { %9841 = vst [vmem:[#allocation157_spill] sm:$0xff] %v8405_v58  ;;  %v8426_v58 = vadd.f32 %v3106_v42, %v2818_v9  ;;  %5251 = vpow2.f32 %v9852_v22  ;;  %v3107_v47 = vmul.f32 %v9857_v7, %v9856_v37  ;;  %v5234_v55 = vpop.eup %5233  ;;  %v2381_v43 = vadd.f32 1.0, %v5232_v35  ;;  %v9859_v9 = vld [vmem:[#allocation54_spill] sm:$0xff] }
 0x38c   : > { %v8424_v18 = vmul.f32 -1.442695, %v9849_v60  ;;  %9855 = vst [vmem:[#allocation36_spill] sm:$0xff] %v8432_v6  ;;  %v9858_v60 = vld [vmem:[#allocation225_spill] sm:$0xff]  ;;  %v2819_v42 = vadd.f32 %v2787_v62, %v2499_v13  ;;  %v2148_v10 = vmul.f32 %v9860_v30, %v9859_v9  ;;  %v2701_v22 = vadd.f32 1.0, %v5234_v55  ;;  %v9865_v55 = vld [vmem:[#allocation195_spill] sm:$0xff] }
 0x38d   : > { %9851 = vst [vmem:[#allocation230_spill] sm:$0xff] %v8426_v58  ;;  %5253 = vpow2.f32 %v9858_v60  ;;  %v5236_v58 = vpop.eup %5235  ;;  %v8442_v29 = vadd.f32 %v9857_v7, %v2851_v51  ;;  %v2468_v61 = vmul.f32 %v9863_v44, %v9862_v32  ;;  %v2532_v62 = vadd.f32 %v9863_v44, %v9860_v30  ;;  %v9866_v9 = vld [vmem:[#allocation197_spill] sm:$0xff]  ;;  %v9871_v44 = vld [vmem:[#allocation35_spill] sm:$0xff] }
 0x38e   : > { %9850 = vst [vmem:[#allocation34_spill] sm:$0xff] %v8424_v18  ;;  %5255 = vpow2.f32 %v8095_v50  ;;  %v5238_v53 = vpop.eup %5237  ;;  %v3021_v37 = vadd.f32 1.0, %v5236_v58  ;;  %v8446_v35 = vadd.f32 %v3107_v47, %v2819_v42  ;;  %v9867_v50 = vsub.f32 %v9865_v55, %v9866_v9 }
 0x38f   : > { %9861 = vst [vmem:[#allocation232_spill] sm:$0xff] %v8442_v29  ;;  %5257 = vrcp.f32 %v2381_v43  ;;  %v5240_v13 = vpop.eup %5239  ;;  %v2060_v60 = vadd.f32 1.0, %v5238_v53  ;;  %v2500_v51 = vadd.f32 %v2468_v61, %v2148_v10  ;;  %v9869_v29 = vld [vmem:[#allocation33_spill] sm:$0xff]  ;;  %v9870_v43 = vld [vmem:[#allocation199_spill] sm:$0xff]  ;;  %v9872_v53 = vld [vmem:[#allocation58_spill] sm:$0xff] }
 0x390   : > { %9864 = vst [vmem:[#allocation190_spill] sm:$0xff] %v8446_v35  ;;  %5259 = vrcp.f32 %v2701_v22  ;;  %v8453_v6 = vmul.f32 -1.442695, %v9867_v50  ;;  %v5242_v7 = vpop.eup %5241  ;;  %v2380_v32 = vadd.f32 1.0, %v5240_v13  ;;  %v2788_v58 = vmul.f32 %v9870_v43, %v9869_v29  ;;  %v9873_v35 = vld [vmem:[#allocation196_spill] sm:$0xff] }
 0x391   : > { %5261 = vrcp.f32 %v3021_v37  ;;  %v2852_v47 = vadd.f32 %v9870_v43, %v2532_v62  ;;  %v5244_v42 = vpop.eup %5243  ;;  %v2700_v30 = vadd.f32 1.0, %v5242_v7  ;;  %v3108_v22 = vmul.f32 %v8081_v27, %v9871_v44  ;;  %v9875_v62 = vld [vmem:[#allocation60_spill] sm:$0xff]  ;;  %v9876_v43 = vld [vmem:[#allocation153_spill] sm:$0xff] }
 0x392   : > { %9868 = vst [vmem:[#allocation203_spill] sm:$0xff] %v8453_v6  ;;  %5263 = vrcp.f32 %v2060_v60  ;;  %v2149_v9 = vmul.f32 %v9873_v35, %v9872_v53  ;;  %v5246_v50 = vpop.eup %5245  ;;  %v3020_v10 = vadd.f32 1.0, %v5244_v42  ;;  %v2820_v61 = vadd.f32 %v2788_v58, %v2500_v51  ;;  %v9877_v53 = vld [vmem:[#allocation198_spill] sm:$0xff] }
 0x393   : > { %5265 = vrcp.f32 %v2380_v32  ;;  %v8463_v37 = vadd.f32 %v8081_v27, %v2852_v47  ;;  %v5248_v13 = vpop.eup %5247  ;;  %v2063_v29 = vadd.f32 1.0, %v5246_v50  ;;  %v2469_v60 = vmul.f32 %v9876_v43, %v9875_v62  ;;  %v9880_v50 = vld [vmem:[#allocation175_spill] sm:$0xff] }
 0x394   : > { %5267 = vrcp.f32 %v2700_v30  ;;  %v2533_v7 = vadd.f32 %v9876_v43, %v9873_v35  ;;  %v5250_v44 = vpop.eup %5249  ;;  %v2383_v6 = vadd.f32 1.0, %v5248_v13  ;;  %v9878_v32 = vsub.f32 %v9865_v55, %v9877_v53  ;;  %v9879_v30 = vld [vmem:[#allocation37_spill] sm:$0xff]  ;;  %v9881_v13 = vld [vmem:[#allocation39_spill] sm:$0xff] }
 0x395   : > { %9874 = vst [vmem:[#allocation205_spill] sm:$0xff] %v8463_v37  ;;  %5269 = vrcp.f32 %v3020_v10  ;;  %v8474_v51 = vadd.f32 %v3108_v22, %v2820_v61  ;;  %v5252_v27 = vpop.eup %5251  ;;  %v2703_v58 = vadd.f32 1.0, %v5250_v44  ;;  %v2501_v47 = vadd.f32 %v2469_v60, %v2149_v9  ;;  %v9882_v43 = vld [vmem:[#allocation193_spill] sm:$0xff]  ;;  %v9883_v61 = vld [vmem:[#allocation62_spill] sm:$0xff] }
 0x396   : > { %v8472_v42 = vmul.f32 -1.442695, %v9878_v32  ;;  %5271 = vrcp.f32 %v2063_v29  ;;  %v2789_v62 = vmul.f32 %v9880_v50, %v9879_v30  ;;  %v3023_v35 = vadd.f32 1.0, %v5252_v27 }
 0x397   : > { %v5254_v37 = vpop.eup %5253  ;;  %5273 = vrcp.f32 %v2383_v6  ;;  %v2853_v10 = vadd.f32 %v9880_v50, %v2533_v7  ;;  %v3109_v18 = vmul.f32 %v9882_v43, %v9881_v13  ;;  %v2150_v29 = vmul.f32 %v8136_v24, %v9883_v61  ;;  %v9884_v6 = vld [vmem:[#allocation64_spill] sm:$0xff] }
 0x398   : > { %v5256_v53 = vpop.eup %5255  ;;  %5275 = vrcp.f32 %v2703_v58  ;;  %v2062_v32 = vadd.f32 1.0, %v5254_v37  ;;  %v2821_v22 = vadd.f32 %v2789_v62, %v2501_v47  ;;  %v2470_v7 = vmul.f32 %v8142_v39, %v9884_v6  ;;  %v9886_v58 = vld [vmem:[#allocation41_spill] sm:$0xff]  ;;  %v9887_v62 = vld [vmem:[#allocation219_spill] sm:$0xff] }
 0x399   : > { %v8483_v44 = vpop.eup %5257  ;;  %5277 = vrcp.f32 %v3023_v35  ;;  %v2382_v9 = vadd.f32 1.0, %v5256_v53  ;;  %v8486_v60 = vadd.f32 %v9882_v43, %v2853_v10  ;;  %v2534_v37 = vadd.f32 %v8142_v39, %v8136_v24  ;;  %v9889_v43 = vld [vmem:[#allocation43_spill] sm:$0xff]  ;;  %v9890_v39 = vld [vmem:[#allocation66_spill] sm:$0xff] }
 0x39a   : > { %v8490_v27 = vpop.eup %5259  ;;  %5279 = vrcp.f32 %v2062_v32  ;;  %v8492_v30 = vadd.f32 %v3109_v18, %v2821_v22  ;;  %v2790_v47 = vmul.f32 %v8157_v54, %v9886_v58  ;;  %v9888_v35 = vsub.f32 %v9865_v55, %v9887_v62  ;;  %v9891_v22 = vld [vmem:[#allocation68_spill] sm:$0xff] }
 0x39b   : > { %v8498_v50 = vpop.eup %5261  ;;  %5281 = vrcp.f32 %v2382_v9  ;;  %v2502_v13 = vadd.f32 %v2470_v7, %v2150_v29  ;;  %v3110_v53 = vmul.f32 %v8166_v56, %v9889_v43  ;;  %v2854_v24 = vadd.f32 %v8157_v54, %v2534_v37  ;;  %v9892_v7 = vld [vmem:[#allocation45_spill] sm:$0xff]  ;;  %v9893_v58 = vld [vmem:[#allocation160_spill] sm:$0xff]  ;;  %v9895_v43 = vld [vmem:[#allocation139_spill] sm:$0xff] }
 0x39c   : > { %9885 = vst [vmem:[#allocation191_spill] sm:$0xff] %v8492_v30  ;;  %v8503_v10 = vmul.f32 -1.442695, %v9888_v35  ;;  %v8507_v18 = vpop.eup %5263  ;;  %5283 = vpow2.f32 %v8106_v8  ;;  %v2151_v32 = vmul.f32 %v8090_v11, %v9890_v39  ;;  %v2471_v61 = vmul.f32 %v8101_v48, %v9891_v22  ;;  %v9894_v35 = vld [vmem:[#allocation47_spill] sm:$0xff] }
 0x39d   : > { %v8515_v9 = vpop.eup %5265  ;;  %5285 = vpow2.f32 %v8148_v14  ;;  %v2822_v29 = vadd.f32 %v2790_v47, %v2502_v13  ;;  %v2535_v6 = vadd.f32 %v8101_v48, %v8090_v11  ;;  %v2791_v62 = vmul.f32 %v9893_v58, %v9892_v7  ;;  %v9897_v48 = vld [vmem:[#allocation70_spill] sm:$0xff] }
 0x39e   : > { %v8522_v8 = vpop.eup %5267  ;;  %5287 = vpow2.f32 %v8153_v40  ;;  %v8526_v54 = vadd.f32 %v8166_v56, %v2854_v24  ;;  %v2503_v37 = vadd.f32 %v2471_v61, %v2151_v32  ;;  %v3111_v39 = vmul.f32 %v9895_v43, %v9894_v35  ;;  %v9898_v40 = vld [vmem:[#allocation221_spill] sm:$0xff]  ;;  %v9900_v61 = vld [vmem:[#allocation72_spill] sm:$0xff] }
 0x39f   : > { %v8530_v22 = vpop.eup %5269  ;;  %5289 = vpow2.f32 %v8190_v45  ;;  %v8533_v14 = vadd.f32 %v3110_v53, %v2822_v29  ;;  %v2855_v11 = vadd.f32 %v9893_v58, %v2535_v6  ;;  %v2152_v47 = vmul.f32 %v8289_v33, %v9897_v48 }
 0x3a0   : > { %v8538_v13 = vpop.eup %5271  ;;  %5291 = vpow2.f32 %v8202_v41  ;;  %v9899_v56 = vsub.f32 %v9865_v55, %v9898_v40  ;;  %v2823_v32 = vadd.f32 %v2791_v62, %v2503_v37  ;;  %v2472_v45 = vmul.f32 %v8296_v34, %v9900_v61  ;;  %v9901_v41 = vld [vmem:[#allocation49_spill] sm:$0xff]  ;;  %v9903_v37 = vld [vmem:[#allocation51_spill] sm:$0xff]  ;;  %v9907_v40 = vld [vmem:[#allocation74_spill] sm:$0xff] }
 0x3a1   : > { %9896 = vst [vmem:[#allocation145_spill] sm:$0xff] %v8533_v14  ;;  %v8548_v53 = vpop.eup %5273  ;;  %5293 = vpow2.f32 %v8207_v46  ;;  %v8552_v29 = vadd.f32 %v9895_v43, %v2855_v11  ;;  %v2536_v6 = vadd.f32 %v8296_v34, %v8289_v33  ;;  %v2792_v7 = vmul.f32 %v8305_v19, %v9901_v41  ;;  %v9904_v43 = vld [vmem:[#allocation162_spill] sm:$0xff]  ;;  %v9905_v11 = vld [vmem:[#allocation204_spill] sm:$0xff]  ;;  %v9910_v61 = vld [vmem:[#allocation29_spill] sm:$0xff] }
 0x3a2   : > { %v8544_v24 = vmul.f32 -1.442695, %v9899_v56  ;;  %v8558_v55 = vpop.eup %5275  ;;  %5295 = vpow2.f32 %v8212_v12  ;;  %v8561_v58 = vadd.f32 %v3111_v39, %v2823_v32  ;;  %v2504_v62 = vadd.f32 %v2472_v45, %v2152_v47  ;;  %v9908_v47 = vld [vmem:[#allocation141_spill] sm:$0xff]  ;;  %v9909_v32 = vld [vmem:[#allocation76_spill] sm:$0xff] }
 0x3a3   : > { %v3112_v35 = vmul.f32 %v8315_v4, %v9903_v37  ;;  %v8565_v46 = vpop.eup %5277  ;;  %5297 = vpow2.f32 %v8220_v2  ;;  %v9906_v33 = vsub.f32 %v9904_v43, %v9905_v11  ;;  %v2856_v48 = vadd.f32 %v8305_v19, %v2536_v6  ;;  %v9911_v6 = vld [vmem:[#allocation53_spill] sm:$0xff]  ;;  %v9912_v37 = vld [vmem:[#allocation30_spill] sm:$0xff] }
 0x3a4   : > { %9902 = vst [vmem:[#allocation234_spill] sm:$0xff] %v8561_v58  ;;  %v2153_v12 = vmul.f32 %v8175_v17, %v9907_v40  ;;  %v8576_v39 = vpop.eup %5279  ;;  %5299 = vpow2.f32 %v9908_v47  ;;  %v2824_v56 = vadd.f32 %v2792_v7, %v2504_v62  ;;  %v2473_v45 = vmul.f32 %v9910_v61, %v9909_v32  ;;  %v9914_v40 = vld [vmem:[#allocation222_spill] sm:$0xff] }
 0x3a5   : > { %v8571_v34 = vmul.f32 -1.442695, %v9906_v33  ;;  %v2537_v2 = vadd.f32 %v9910_v61, %v8175_v17  ;;  %v8583_v41 = vpop.eup %5281  ;;  %5301 = vpow2.f32 %v8254_v3  ;;  %v8587_v19 = vadd.f32 %v8315_v4, %v2856_v48  ;;  %v9913_v33 = vld [vmem:[#allocation55_spill] sm:$0xff]  ;;  %v9915_v3 = vld [vmem:[#allocation206_spill] sm:$0xff] }
 0x3a6   : > { %v2793_v11 = vmul.f32 %v9912_v37, %v9911_v6  ;;  %v3113_v47 = vmul.f32 %v9914_v40, %v9913_v33  ;;  %v5284_v7 = vpop.eup %5283  ;;  %5303 = vpow2.f32 %v8270_v49  ;;  %v8594_v62 = vadd.f32 %v3112_v35, %v2824_v56  ;;  %v9917_v6 = vld [vmem:[#allocation78_spill] sm:$0xff] }
 0x3a7   : > { %v2505_v32 = vadd.f32 %v2473_v45, %v2153_v12  ;;  %v2857_v17 = vadd.f32 %v9912_v37, %v2537_v2  ;;  %v5286_v61 = vpop.eup %5285  ;;  %v2702_v58 = vadd.f32 1.0, %v5284_v7  ;;  %5305 = vpow2.f32 %v8277_v1  ;;  %v9918_v1 = vld [vmem:[#allocation80_spill] sm:$0xff] }
 0x3a8   : > { %v9916_v4 = vsub.f32 %v9904_v43, %v9915_v3  ;;  %v2154_v33 = vmul.f32 %v8381_v5, %v9917_v6  ;;  %v5288_v14 = vpop.eup %5287  ;;  %v3022_v30 = vadd.f32 1.0, %v5286_v61  ;;  %5307 = vpow2.f32 %v8339_v57  ;;  %v9919_v61 = vld [vmem:[#allocation178_spill] sm:$0xff] }
 0x3a9   : > { %v2825_v49 = vadd.f32 %v2793_v11, %v2505_v32  ;;  %v8607_v35 = vadd.f32 %v9914_v40, %v2857_v17  ;;  %v5290_v12 = vpop.eup %5289  ;;  %5309 = vrcp.f32 %v2702_v58  ;;  %v2065_v56 = vadd.f32 1.0, %v5288_v14  ;;  %v9921_v32 = vld [vmem:[#allocation57_spill] sm:$0xff] }
 0x3aa   : > { %v8601_v48 = vmul.f32 -1.442695, %v9916_v4  ;;  %v2474_v45 = vmul.f32 %v8387_v0, %v9918_v1  ;;  %v2538_v2 = vadd.f32 %v8387_v0, %v8381_v5  ;;  %v5292_v37 = vpop.eup %5291  ;;  %5311 = vrcp.f32 %v3022_v30  ;;  %v9922_v30 = vld [vmem:[#allocation59_spill] sm:$0xff] }
 0x3ab   : > { %v2385_v7 = vadd.f32 1.0, %v5290_v12  ;;  %v9920_v3 = vsub.f32 %v9904_v43, %v9919_v61  ;;  %v8618_v11 = vadd.f32 %v3113_v47, %v2825_v49  ;;  %v5294_v40 = vpop.eup %5293  ;;  %5313 = vrcp.f32 %v2065_v56  ;;  %v9923_v49 = vld [vmem:[#allocation82_spill] sm:$0xff] }
 0x3ac   : > { %v2705_v58 = vadd.f32 1.0, %v5292_v37  ;;  %v2506_v14 = vadd.f32 %v2474_v45, %v2154_v33  ;;  %v2794_v17 = vmul.f32 %v8399_v26, %v9921_v32  ;;  %v5296_v4 = vpop.eup %5295  ;;  %v3025_v0 = vadd.f32 1.0, %v5294_v40  ;;  %v9925_v32 = vld [vmem:[#allocation164_spill] sm:$0xff] }
 0x3ad   : > { %v8616_v57 = vmul.f32 -1.442695, %v9920_v3  ;;  %5315 = vrcp.f32 %v2385_v7  ;;  %v2858_v5 = vadd.f32 %v8399_v26, %v2538_v2  ;;  %v3114_v6 = vmul.f32 %v8409_v25, %v9922_v30  ;;  %v5298_v12 = vpop.eup %5297  ;;  %v9924_v7 = vld [vmem:[#allocation84_spill] sm:$0xff]  ;;  %v9927_v30 = vld [vmem:[#allocation61_spill] sm:$0xff] }
 0x3ae   : > { %5317 = vrcp.f32 %v2705_v58  ;;  %v2064_v1 = vadd.f32 1.0, %v5296_v4  ;;  %v2826_v47 = vadd.f32 %v2794_v17, %v2506_v14  ;;  %v2155_v56 = vmul.f32 %v8324_v28, %v9923_v49  ;;  %v5300_v37 = vpop.eup %5299  ;;  %v9929_v49 = vld [vmem:[#allocation86_spill] sm:$0xff] }
 0x3af   : > { %5319 = vrcp.f32 %v3025_v0  ;;  %v2384_v33 = vadd.f32 1.0, %v5298_v12  ;;  %v8628_v45 = vadd.f32 %v8409_v25, %v2858_v5  ;;  %v2475_v61 = vmul.f32 %v8333_v20, %v9924_v7  ;;  %v5302_v26 = vpop.eup %5301 }
 0x3b0   : > { %5321 = vrcp.f32 %v2064_v1  ;;  %v2704_v2 = vadd.f32 1.0, %v5300_v37  ;;  %v8632_v3 = vadd.f32 %v3114_v6, %v2826_v47  ;;  %v2539_v40 = vadd.f32 %v8333_v20, %v8324_v28  ;;  %v5304_v58 = vpop.eup %5303  ;;  %v9928_v20 = vld [vmem:[#allocation63_spill] sm:$0xff] }
 0x3b1   : > { %5323 = vrcp.f32 %v2384_v33  ;;  %v3024_v14 = vadd.f32 1.0, %v5302_v26  ;;  %v9926_v17 = vsub.f32 %v9904_v43, %v9925_v32  ;;  %v2507_v25 = vadd.f32 %v2475_v61, %v2155_v56  ;;  %v5306_v0 = vpop.eup %5305  ;;  %v9930_v26 = vld [vmem:[#allocation88_spill] sm:$0xff] }
 0x3b2   : > { %5325 = vrcp.f32 %v2704_v2  ;;  %v2067_v5 = vadd.f32 1.0, %v5304_v58  ;;  %v2795_v12 = vmul.f32 %v8351_v59, %v9927_v30  ;;  %v2859_v6 = vadd.f32 %v8351_v59, %v2539_v40  ;;  %v5308_v1 = vpop.eup %5307  ;;  %v9931_v40 = vld [vmem:[#allocation65_spill] sm:$0xff]  ;;  %v9932_v32 = vld [vmem:[#allocation200_spill] sm:$0xff] }
 0x3b3   : > { %v8639_v4 = vmul.f32 -1.442695, %v9926_v17  ;;  %5327 = vrcp.f32 %v3024_v14  ;;  %v2387_v28 = vadd.f32 1.0, %v5306_v0  ;;  %v3115_v47 = vmul.f32 %v8369_v31, %v9928_v20  ;;  %v5310_v37 = vpop.eup %5309  ;;  %v9933_v17 = vld [vmem:[#allocation201_spill] sm:$0xff]  ;;  %v9937_v20 = vld [vmem:[#allocation92_spill] sm:$0xff] }
 0x3b4   : > { %v2156_v43 = vmul.f32 %v8507_v18, %v9929_v49  ;;  %5329 = vrcp.f32 %v2067_v5  ;;  %v2707_v56 = vadd.f32 1.0, %v5308_v1  ;;  %v2827_v33 = vadd.f32 %v2795_v12, %v2507_v25  ;;  %v5312_v61 = vpop.eup %5311  ;;  %v9935_v5 = vld [vmem:[#allocation67_spill] sm:$0xff] }
 0x3b5   : > { %v8649_v7 = vadd.f32 %v8369_v31, %v2859_v6  ;;  %5331 = vrcp.f32 %v2387_v28  ;;  %v2476_v59 = vmul.f32 %v8515_v9, %v9930_v26  ;;  %v2540_v2 = vadd.f32 %v8515_v9, %v8507_v18  ;;  %v8657_v14 = vpop.eup %5313  ;;  %v9936_v6 = vld [vmem:[#allocation90_spill] sm:$0xff]  ;;  %v9939_v26 = vld [vmem:[#allocation71_spill] sm:$0xff] }
 0x3b6   : > { %v2796_v58 = vmul.f32 %v8522_v8, %v9931_v40  ;;  %5333 = vrcp.f32 %v2707_v56  ;;  %v9934_v25 = vsub.f32 %v9932_v32, %v9933_v17  ;;  %v8664_v31 = vadd.f32 %v3115_v47, %v2827_v33  ;;  %v9938_v56 = vld [vmem:[#allocation69_spill] sm:$0xff] }
 0x3b7   : > { %v3116_v30 = vmul.f32 %v8530_v22, %v9935_v5  ;;  %v8668_v12 = vpop.eup %5315  ;;  %5335 = vpow2.f32 %v8344_v63  ;;  %v2508_v18 = vadd.f32 %v2476_v59, %v2156_v43  ;;  %v2860_v9 = vadd.f32 %v8522_v8, %v2540_v2  ;;  %v9943_v5 = vld [vmem:[#allocation96_spill] sm:$0xff] }
 0x3b8   : > { %v8662_v0 = vmul.f32 -1.442695, %v9934_v25  ;;  %v2157_v1 = vmul.f32 %v8418_v52, %v9936_v6  ;;  %v8674_v28 = vpop.eup %5317  ;;  %5337 = vpow2.f32 %v8349_v16  ;;  %v2477_v47 = vmul.f32 %v8483_v44, %v9937_v20 }
 0x3b9   : > { %v2541_v49 = vadd.f32 %v8483_v44, %v8418_v52  ;;  %v2797_v33 = vmul.f32 %v8490_v27, %v9938_v56  ;;  %v8683_v63 = vpop.eup %5319  ;;  %5339 = vpow2.f32 %v8357_v23  ;;  %v2828_v8 = vadd.f32 %v2796_v58, %v2508_v18  ;;  %v9940_v44 = vld [vmem:[#allocation94_spill] sm:$0xff] }
 0x3ba   : > { %v8687_v43 = vadd.f32 %v8530_v22, %v2860_v9  ;;  %v3117_v16 = vmul.f32 %v8498_v50, %v9939_v26  ;;  %v5322_v59 = vpop.eup %5321  ;;  %5341 = vpow2.f32 %v8362_v21  ;;  %v2509_v2 = vadd.f32 %v2477_v47, %v2157_v1  ;;  %v9941_v23 = vld [vmem:[#allocation202_spill] sm:$0xff]  ;;  %v9945_v47 = vld [vmem:[#allocation75_spill] sm:$0xff] }
 0x3bb   : > { %v2861_v52 = vadd.f32 %v8490_v27, %v2541_v49  ;;  %v2158_v40 = vmul.f32 %v8576_v39, %v9940_v44  ;;  %v5324_v17 = vpop.eup %5323  ;;  %5343 = vpow2.f32 %v8367_v38  ;;  %v9942_v58 = vsub.f32 %v9932_v32, %v9941_v23 }
 0x3bc   : > { %v8701_v25 = vadd.f32 %v3116_v30, %v2828_v8  ;;  %v2478_v18 = vmul.f32 %v8583_v41, %v9943_v5  ;;  %v5326_v21 = vpop.eup %5325  ;;  %5345 = vpow2.f32 %v8375_v15  ;;  %v2829_v27 = vadd.f32 %v2797_v33, %v2509_v2  ;;  %v9944_v30 = vld [vmem:[#allocation73_spill] sm:$0xff]  ;;  %v9946_v8 = vld [vmem:[#allocation34_spill] sm:$0xff]  ;;  %v9952_v5 = vld [vmem:[#allocation203_spill] sm:$0xff] }
 0x3bd   : > { %v8699_v22 = vmul.f32 -1.442695, %v9942_v58  ;;  %v8707_v9 = vadd.f32 %v8498_v50, %v2861_v52  ;;  %v2542_v38 = vadd.f32 %v8583_v41, %v8576_v39  ;;  %v8711_v6 = vpop.eup %5327  ;;  %5347 = vpow2.f32 %v8393_v36  ;;  %v9947_v15 = vld [vmem:[#allocation158_spill] sm:$0xff]  ;;  %v9949_v36 = vld [vmem:[#allocation36_spill] sm:$0xff] }
 0x3be   : > { %v2510_v1 = vadd.f32 %v2478_v18, %v2158_v40  ;;  %v2798_v20 = vmul.f32 %v5310_v37, %v9944_v30  ;;  %v3118_v49 = vmul.f32 %v5312_v61, %v9945_v47  ;;  %v8716_v56 = vpop.eup %5329  ;;  %5349 = vpow2.f32 %v9946_v8  ;;  %v9950_v52 = vld [vmem:[#allocation98_spill] sm:$0xff]  ;;  %v9951_v40 = vld [vmem:[#allocation100_spill] sm:$0xff] }
 0x3bf   : > { %v9948_v50 = vsub.f32 %v9932_v32, %v9947_v15  ;;  %v8724_v26 = vadd.f32 %v3117_v16, %v2829_v27  ;;  %v2862_v39 = vadd.f32 %v5310_v37, %v2542_v38  ;;  %v8726_v41 = vpop.eup %5331  ;;  %5351 = vpow2.f32 %v9949_v36  ;;  %v9953_v16 = vld [vmem:[#allocation77_spill] sm:$0xff] }
 0x3c0   : > { %v2830_v2 = vadd.f32 %v2798_v20, %v2510_v1  ;;  %v2159_v44 = vmul.f32 %v8538_v13, %v9950_v52  ;;  %v2479_v23 = vmul.f32 %v8548_v53, %v9951_v40  ;;  %v8733_v58 = vpop.eup %5333  ;;  %5353 = vpow2.f32 %v9952_v5  ;;  %v9954_v20 = vld [vmem:[#allocation79_spill] sm:$0xff] }
 0x3c1   : > { %v8722_v33 = vmul.f32 -1.442695, %v9948_v50  ;;  %v8736_v18 = vadd.f32 %v5312_v61, %v2862_v39  ;;  %v2543_v37 = vadd.f32 %v8548_v53, %v8538_v13  ;;  %v2799_v27 = vmul.f32 %v8558_v55, %v9953_v16  ;;  %v5336_v38 = vpop.eup %5335  ;;  %v9955_v61 = vld [vmem:[#allocation161_spill] sm:$0xff] }
 0x3c2   : > { %5355 = vpow2.f32 %v8472_v42  ;;  %v8743_v1 = vadd.f32 %v3118_v49, %v2830_v2  ;;  %v2511_v30 = vadd.f32 %v2479_v23, %v2159_v44  ;;  %v3119_v47 = vmul.f32 %v8565_v46, %v9954_v20  ;;  %v5338_v8 = vpop.eup %5337  ;;  %v9957_v49 = vld [vmem:[#allocation102_spill] sm:$0xff] }
 0x3c3   : > { %v3027_v15 = vadd.f32 1.0, %v5336_v38  ;;  %5357 = vpow2.f32 %v8503_v10  ;;  %v9956_v50 = vsub.f32 %v9932_v32, %v9955_v61  ;;  %v2863_v53 = vadd.f32 %v8558_v55, %v2543_v37  ;;  %v5340_v39 = vpop.eup %5339  ;;  %v9958_v10 = vld [vmem:[#allocation104_spill] sm:$0xff] }
 0x3c4   : > { %v2066_v36 = vadd.f32 1.0, %v5338_v8  ;;  %5359 = vpow2.f32 %v8544_v24  ;;  %v2831_v42 = vadd.f32 %v2799_v27, %v2511_v30  ;;  %v2160_v2 = vmul.f32 %v5322_v59, %v9957_v49  ;;  %v5342_v52 = vpop.eup %5341  ;;  %v9959_v27 = vld [vmem:[#allocation228_spill] sm:$0xff] }
 0x3c5   : > { %v8751_v13 = vmul.f32 -1.442695, %v9956_v50  ;;  %5361 = vrcp.f32 %v3027_v15  ;;  %v2386_v44 = vadd.f32 1.0, %v5340_v39  ;;  %v8757_v40 = vadd.f32 %v8565_v46, %v2863_v53  ;;  %v5344_v32 = vpop.eup %5343  ;;  %v9960_v46 = vld [vmem:[#allocation81_spill] sm:$0xff]  ;;  %v9961_v39 = vld [vmem:[#allocation83_spill] sm:$0xff] }
 0x3c6   : > { %v2480_v23 = vmul.f32 %v5324_v17, %v9958_v10  ;;  %5363 = vrcp.f32 %v2066_v36  ;;  %v2706_v5 = vadd.f32 1.0, %v5342_v52  ;;  %v8760_v16 = vadd.f32 %v3119_v47, %v2831_v42  ;;  %v5346_v37 = vpop.eup %5345 }
 0x3c7   : > { %v2544_v55 = vadd.f32 %v5324_v17, %v5322_v59  ;;  %5365 = vrcp.f32 %v2386_v44  ;;  %v3026_v24 = vadd.f32 1.0, %v5344_v32  ;;  %v8763_v38 = vadd.f32 1e-06, %v9959_v27  ;;  %v5348_v20 = vpop.eup %5347  ;;  %v9962_v59 = vld [vmem:[#allocation106_spill] sm:$0xff] }
 0x3c8   : > { %v2512_v30 = vadd.f32 %v2480_v23, %v2160_v2  ;;  %5367 = vrcp.f32 %v2706_v5  ;;  %v2069_v8 = vadd.f32 1.0, %v5346_v37  ;;  %v2800_v15 = vmul.f32 %v5326_v21, %v9960_v46  ;;  %v5350_v50 = vpop.eup %5349 }
 0x3c9   : > { %v2864_v61 = vadd.f32 %v5326_v21, %v2544_v55  ;;  %5369 = vrcp.f32 %v3026_v24  ;;  %v2389_v53 = vadd.f32 1.0, %v5348_v20  ;;  %v3120_v47 = vmul.f32 %v8711_v6, %v9961_v39  ;;  %v5352_v36 = vpop.eup %5351  ;;  %v9963_v21 = vld [vmem:[#allocation108_spill] sm:$0xff]  ;;  %v9964_v55 = vld [vmem:[#allocation226_spill] sm:$0xff]  ;;  %v9965_v20 = vld [vmem:[#allocation85_spill] sm:$0xff] }
 0x3ca   : > { %v2161_v17 = vmul.f32 %v8657_v14, %v9962_v59  ;;  %5371 = vrcp.f32 %v2069_v8  ;;  %v2709_v42 = vadd.f32 1.0, %v5350_v50  ;;  %v2832_v49 = vadd.f32 %v2800_v15, %v2512_v30  ;;  %v5354_v52 = vpop.eup %5353 }
 0x3cb   : > { %v8771_v2 = vadd.f32 %v8711_v6, %v2864_v61  ;;  %5373 = vrcp.f32 %v2389_v53  ;;  %v3029_v44 = vadd.f32 1.0, %v5352_v36  ;;  %v2481_v10 = vmul.f32 %v8668_v12, %v9963_v21  ;;  %v9969_v21 = vld [vmem:[#allocation110_spill] sm:$0xff] }
 0x3cc   : > { %v2545_v23 = vadd.f32 %v8668_v12, %v8657_v14  ;;  %v5356_v32 = vpop.eup %5355  ;;  %5375 = vrcp.f32 %v2709_v42  ;;  %v2068_v5 = vadd.f32 1.0, %v5354_v52  ;;  %v8778_v37 = vadd.f32 1e-06, %v9964_v55  ;;  %v9966_v12 = vld [vmem:[#allocation87_spill] sm:$0xff]  ;;  %v9968_v42 = vld [vmem:[#allocation116_spill] sm:$0xff]  ;;  %v9972_v55 = vld [vmem:[#allocation210_spill] sm:$0xff] }
 0x3cd   : > { %v8780_v24 = vadd.f32 %v3120_v47, %v2832_v49  ;;  %v5358_v27 = vpop.eup %5357  ;;  %5377 = vrcp.f32 %v3029_v44  ;;  %v2388_v6 = vadd.f32 1.0, %v5356_v32  ;;  %v2513_v30 = vadd.f32 %v2481_v10, %v2161_v17  ;;  %v9967_v47 = vld [vmem:[#allocation114_spill] sm:$0xff] }
 0x3ce   : > { %v2801_v8 = vmul.f32 %v8674_v28, %v9965_v20  ;;  %v5360_v46 = vpop.eup %5359  ;;  %5379 = vrcp.f32 %v2068_v5  ;;  %v2708_v15 = vadd.f32 1.0, %v5358_v27  ;;  %v2865_v14 = vadd.f32 %v8674_v28, %v2545_v23  ;;  %v9970_v23 = vld [vmem:[#allocation93_spill] sm:$0xff] }
 0x3cf   : > { %v3121_v61 = vmul.f32 %v8683_v63, %v9966_v12  ;;  %v5362_v50 = vpop.eup %5361  ;;  %5381 = vrcp.f32 %v2388_v6  ;;  %v3028_v53 = vadd.f32 1.0, %v5360_v46  ;;  %v2163_v59 = vmul.f32 %v8716_v56, %v9967_v47 }
 0x3d0   : > { %v2833_v39 = vadd.f32 %v2801_v8, %v2513_v30  ;;  %v5364_v36 = vpop.eup %5363  ;;  %5383 = vrcp.f32 %v2708_v15  ;;  %v8790_v17 = vadd.f32 %v8683_v63, %v2865_v14  ;;  %v2483_v49 = vmul.f32 %v8726_v41, %v9968_v42  ;;  %v9971_v63 = vld [vmem:[#allocation186_spill] sm:$0xff]  ;;  %v9974_v30 = vld [vmem:[#allocation112_spill] sm:$0xff] }
 0x3d1   : > { %v2547_v28 = vadd.f32 %v8726_v41, %v8716_v56  ;;  %v5366_v52 = vpop.eup %5365  ;;  %5385 = vrcp.f32 %v3028_v53  ;;  %v2162_v10 = vmul.f32 %v5364_v36, %v9969_v21  ;;  %v2803_v32 = vmul.f32 %v8733_v58, %v9970_v23  ;;  %v9975_v41 = vld [vmem:[#allocation89_spill] sm:$0xff]  ;;  %v9976_v53 = vld [vmem:[#allocation91_spill] sm:$0xff] }
 0x3d2   : > { %v8796_v44 = vadd.f32 %v3121_v61, %v2833_v39  ;;  %v5368_v5 = vpop.eup %5367  ;;  %5387 = vpow2.f32 %v8571_v34  ;;  %v9973_v27 = vsub.f32 %v9971_v63, %v9972_v55  ;;  %v2482_v20 = vmul.f32 %v5366_v52, %v9974_v30 }
 0x3d3   : > { %v2546_v8 = vadd.f32 %v5366_v52, %v5364_v36  ;;  %v5370_v56 = vpop.eup %5369  ;;  %5389 = vpow2.f32 %v8601_v48  ;;  %v2802_v46 = vmul.f32 %v5368_v5, %v9975_v41  ;;  %v2515_v15 = vadd.f32 %v2483_v49, %v2163_v59  ;;  %v9977_v36 = vld [vmem:[#allocation95_spill] sm:$0xff]  ;;  %v9978_v49 = vld [vmem:[#allocation122_spill] sm:$0xff] }
 0x3d4   : > { %v4092_v6 = vmul.f32 -1.442695, %v9973_v27  ;;  %v2867_v14 = vadd.f32 %v8733_v58, %v2547_v28  ;;  %v5372_v12 = vpop.eup %5371  ;;  %5391 = vpow2.f32 %v8616_v57  ;;  %v2514_v61 = vadd.f32 %v2482_v20, %v2162_v10  ;;  %v9979_v10 = vld [vmem:[#allocation212_spill] sm:$0xff] }
 0x3d5   : > { %v2866_v34 = vadd.f32 %v5368_v5, %v2546_v8  ;;  %v3122_v39 = vmul.f32 %v5370_v56, %v9976_v53  ;;  %v5374_v47 = vpop.eup %5373  ;;  %5393 = vpow2.f32 %v8639_v4  ;;  %v2835_v42 = vadd.f32 %v2803_v32, %v2515_v15  ;;  %v9981_v5 = vld [vmem:[#allocation124_spill] sm:$0xff]  ;;  %v9985_v15 = vld [vmem:[#allocation101_spill] sm:$0xff] }
 0x3d6   : > { %v3123_v52 = vmul.f32 %v5362_v50, %v9977_v36  ;;  %v8813_v21 = vadd.f32 %v5362_v50, %v2867_v14  ;;  %v5376_v48 = vpop.eup %5375  ;;  %5395 = vpow2.f32 %v8662_v0  ;;  %v2834_v59 = vadd.f32 %v2802_v46, %v2514_v61  ;;  %v9982_v0 = vld [vmem:[#allocation181_spill] sm:$0xff] }
 0x3d7   : > { %v8816_v58 = vadd.f32 %v5370_v56, %v2866_v34  ;;  %v2165_v57 = vmul.f32 %v5372_v12, %v9978_v49  ;;  %v5378_v28 = vpop.eup %5377  ;;  %5397 = vpow2.f32 %v8699_v22  ;;  %v9980_v23 = vsub.f32 %v9971_v63, %v9979_v10  ;;  %v9984_v22 = vld [vmem:[#allocation118_spill] sm:$0xff]  ;;  %v9986_v34 = vld [vmem:[#allocation120_spill] sm:$0xff]  ;;  %v9989_v10 = vld [vmem:[#allocation99_spill] sm:$0xff] }
 0x3d8   : > { %v8823_v32 = vadd.f32 %v3123_v52, %v2835_v42  ;;  %v2485_v50 = vmul.f32 %v5374_v47, %v9981_v5  ;;  %v5380_v55 = vpop.eup %5379  ;;  %5399 = vpow2.f32 %v8722_v33  ;;  %v9983_v27 = vsub.f32 %v9971_v63, %v9982_v0  ;;  %v9988_v52 = vld [vmem:[#allocation103_spill] sm:$0xff] }
 0x3d9   : > { %v4124_v4 = vmul.f32 -1.442695, %v9980_v23  ;;  %v8830_v20 = vadd.f32 %v3122_v39, %v2834_v59  ;;  %v2549_v8 = vadd.f32 %v5374_v47, %v5372_v12  ;;  %v5382_v56 = vpop.eup %5381  ;;  %5401 = vpow2.f32 %v8751_v13  ;;  %v9987_v39 = vld [vmem:[#allocation97_spill] sm:$0xff] }
 0x3da   : > { %v4156_v30 = vmul.f32 -1.442695, %v9983_v27  ;;  %v2164_v41 = vmul.f32 %v5380_v55, %v9984_v22  ;;  %v2517_v46 = vadd.f32 %v2485_v50, %v2165_v57  ;;  %v2805_v14 = vmul.f32 %v5376_v48, %v9985_v15  ;;  %v5384_v61 = vpop.eup %5383 }
 0x3db   : > { %5403 = vrcp.f32 %v8778_v37  ;;  %v2484_v33 = vmul.f32 %v5382_v56, %v9986_v34  ;;  %v2548_v53 = vadd.f32 %v5382_v56, %v5380_v55  ;;  %v2869_v42 = vadd.f32 %v5376_v48, %v2549_v8  ;;  %v5386_v36 = vpop.eup %5385  ;;  %v9991_v34 = vld [vmem:[#allocation207_spill] sm:$0xff] }
 0x3dc   : > { %5405 = vrcp.f32 %v8763_v38  ;;  %v2804_v12 = vmul.f32 %v5384_v61, %v9987_v39  ;;  %v2837_v47 = vadd.f32 %v2805_v14, %v2517_v46  ;;  %v3125_v13 = vmul.f32 %v5378_v28, %v9988_v52  ;;  %v5388_v59 = vpop.eup %5387  ;;  %v9993_v39 = vld [vmem:[#allocation208_spill] sm:$0xff] }
 0x3dd   : > { %5407 = vpow2.f32 %v4092_v6  ;;  %v2516_v49 = vadd.f32 %v2484_v33, %v2164_v41  ;;  %v2868_v57 = vadd.f32 %v5384_v61, %v2548_v53  ;;  %v3124_v23 = vmul.f32 %v5386_v36, %v9989_v10  ;;  %v5390_v5 = vpop.eup %5389  ;;  %v9990_v61 = vld [vmem:[#allocation140_spill] sm:$0xff] }
 0x3de   : > { %v2071_v37 = vadd.f32 1.0, %v5388_v59  ;;  %5409 = vpow2.f32 %v4124_v4  ;;  %v8841_v50 = vadd.f32 %v3125_v13, %v2837_v47  ;;  %v8843_v48 = vadd.f32 %v5378_v28, %v2869_v42  ;;  %v5392_v55 = vpop.eup %5391  ;;  %v9995_v13 = vld [vmem:[#allocation28_spill] sm:$0xff] }
 0x3df   : > { %v2391_v38 = vadd.f32 1.0, %v5390_v5  ;;  %5411 = vpow2.f32 %v4156_v30  ;;  %v2836_v0 = vadd.f32 %v2804_v12, %v2516_v49  ;;  %v8845_v27 = vadd.f32 %v5386_v36, %v2868_v57  ;;  %v5394_v8 = vpop.eup %5393  ;;  %v9996_v57 = vld [vmem:[#allocation227_spill] sm:$0xff] }
 0x3e0   : > { %5413 = vrcp.f32 %v2071_v37  ;;  %v2711_v6 = vadd.f32 1.0, %v5392_v55  ;;  %v5396_v56 = vpop.eup %5395  ;;  %v3031_v22 = vadd.f32 1.0, %v5394_v8  ;;  %v9992_v33 = vsub.f32 %v9990_v61, %v9991_v34 }
 0x3e1   : > { %5415 = vrcp.f32 %v2391_v38  ;;  %v8847_v41 = vadd.f32 %v3124_v23, %v2836_v0  ;;  %v5398_v46 = vpop.eup %5397  ;;  %v2070_v4 = vadd.f32 1.0, %v5396_v56  ;;  %v9994_v12 = vsub.f32 %v9990_v61, %v9993_v39  ;;  %v9997_v38 = vld [vmem:[#allocation184_spill] sm:$0xff]  ;;  %v10005_v39 = vld [vmem:[#allocation130_spill] sm:$0xff] }
 0x3e2   : > { %5417 = vrcp.f32 %v2711_v6  ;;  %v5400_v15 = vpop.eup %5399  ;;  %v2390_v28 = vadd.f32 1.0, %v5398_v46  ;;  %v4091_v53 = vmul.f32 -1.442695, %v9992_v33  ;;  %v9998_v0 = vsub.f32 %v9990_v61, %v9997_v38 }
 0x3e3   : > { %5419 = vrcp.f32 %v3031_v22  ;;  %v5402_v14 = vpop.eup %5401  ;;  %v2710_v30 = vadd.f32 1.0, %v5400_v15  ;;  %v4123_v47 = vmul.f32 -1.442695, %v9994_v12  ;;  %v9999_v22 = vld [vmem:[#allocation185_spill] sm:$0xff] }
 0x3e4   : > { %5421 = vrcp.f32 %v2070_v4  ;;  %v3030_v36 = vadd.f32 1.0, %v5402_v14  ;;  %v4155_v8 = vmul.f32 -1.442695, %v9998_v0  ;;  %v10000_v46 = vsub.f32 %v9990_v61, %v9999_v22  ;;  %v10011_v0 = vld [vmem:[#allocation111_spill] sm:$0xff] }
 0x3e5   : > { %v5404_v42 = vpop.eup %5403  ;;  %5423 = vrcp.f32 %v2390_v28  ;;  %v10001_v28 = vld [vmem:[#allocation229_spill] sm:$0xff] }
 0x3e6   : > { %v5406_v52 = vpop.eup %5405  ;;  %5425 = vrcp.f32 %v2710_v30  ;;  %v3229_v59 = vmul.f32 %v5404_v42, %v9995_v13  ;;  %v4187_v4 = vmul.f32 -1.442695, %v10000_v46  ;;  %v3198_v14 = vadd.f32 1e-06, %v10001_v28  ;;  %v10002_v30 = vld [vmem:[#allocation129_spill] sm:$0xff]  ;;  %v10006_v13 = vld [vmem:[#allocation182_spill] sm:$0xff] }
 0x3e7   : > { %v5408_v49 = vpop.eup %5407  ;;  %5427 = vrcp.f32 %v3030_v36  ;;  %v3231_v10 = vmul.f32 %v5406_v52, %v9996_v57  ;;  %v3199_v61 = vadd.f32 1e-06, %v10006_v13  ;;  %v10014_v46 = vld [vmem:[#allocation169_spill] sm:$0xff] }
 0x3e8   : > { %v5410_v23 = vpop.eup %5409  ;;  %4536 = vmatprep.mubr.f32.mxu1 %v3229_v59  ;;  %v2073_v5 = vadd.f32 1.0, %v5408_v49  ;;  %5429 = vpow2.f32 %v4091_v53  ;;  %v10003_v53 = vld [vmem:[#allocation142_spill] sm:$0xff]  ;;  %v10007_v59 = vld [vmem:[#allocation32_spill] sm:$0xff]  ;;  %v10008_v49 = vld [vmem:[#allocation215_spill] sm:$0xff] }
 0x3e9   : > { %v5412_v37 = vpop.eup %5411  ;;  %4537 = vmatmul.mubr.f32.vlgmr.msra.gmra.mrb[112].mxu1 %v3231_v10  ;;  %v2393_v55 = vadd.f32 1.0, %v5410_v23  ;;  %5431 = vpow2.f32 %v4123_v47  ;;  %v10004_v42 = vsub.f32 %v9971_v63, %v10003_v53  ;;  %v10009_v57 = vsub.f32 %v10007_v59, %v10008_v49  ;;  %v10010_v23 = vld [vmem:[#allocation109_spill] sm:$0xff] }
 0x3ea   : > { %v5414_v6 = vpop.eup %5413  ;;  %5433 = vrcp.f32 %v2073_v5  ;;  %v2713_v56 = vadd.f32 1.0, %v5412_v37 }
 0x3eb   : > { %v5416_v15 = vpop.eup %5415  ;;  %5435 = vrcp.f32 %v2393_v55  ;;  %v2167_v34 = vmul.f32 %v5414_v6, %v10002_v30  ;;  %v4188_v36 = vmul.f32 -1.442695, %v10004_v42  ;;  %v4094_v10 = vmul.f32 -1.442695, %v10009_v57  ;;  %v10016_v30 = vld [vmem:[#allocation126_spill] sm:$0xff]  ;;  %v10021_v57 = vld [vmem:[#allocation105_spill] sm:$0xff] }
 0x3ec   : > { %v5418_v33 = vpop.eup %5417  ;;  %5437 = vrcp.f32 %v2713_v56  ;;  %v2487_v12 = vmul.f32 %v5416_v15, %v10005_v39  ;;  %v2551_v47 = vadd.f32 %v5416_v15, %v5414_v6  ;;  %v10012_v6 = vld [vmem:[#allocation216_spill] sm:$0xff]  ;;  %v10015_v15 = vsub.f32 %v10007_v59, %v10014_v46 }
 0x3ed   : > { %v5420_v52 = vpop.eup %5419  ;;  %5439 = vpow2.f32 %v4155_v8  ;;  %v2807_v5 = vmul.f32 %v5418_v33, %v10010_v23  ;;  %v10013_v22 = vsub.f32 %v10007_v59, %v10012_v6  ;;  %v10017_v39 = vld [vmem:[#allocation128_spill] sm:$0xff] }
 0x3ee   : > { %v5422_v37 = vpop.eup %5421  ;;  %5441 = vpow2.f32 %v4187_v4  ;;  %v2519_v55 = vadd.f32 %v2487_v12, %v2167_v34  ;;  %v2871_v38 = vadd.f32 %v5418_v33, %v2551_v47  ;;  %v3127_v63 = vmul.f32 %v5420_v52, %v10011_v0  ;;  %v10018_v47 = vld [vmem:[#allocation143_spill] sm:$0xff] }
 0x3ef   : > { %v5424_v56 = vpop.eup %5423  ;;  %5443 = vrcp.f32 %v3198_v14  ;;  %v4126_v8 = vmul.f32 -1.442695, %v10013_v22  ;;  %v4158_v28 = vmul.f32 -1.442695, %v10015_v15  ;;  %v2166_v53 = vmul.f32 %v5422_v37, %v10016_v30  ;;  %v10019_v14 = vld [vmem:[#allocation213_spill] sm:$0xff]  ;;  %v10022_v15 = vld [vmem:[#allocation107_spill] sm:$0xff] }
 0x3f0   : > { %v5426_v42 = vpop.eup %5425  ;;  %5445 = vpow2.f32 %v4188_v36  ;;  %v2486_v4 = vmul.f32 %v5424_v56, %v10017_v39  ;;  %v2550_v34 = vadd.f32 %v5424_v56, %v5422_v37  ;;  %v2839_v33 = vadd.f32 %v2807_v5, %v2519_v55  ;;  %v10023_v5 = vld [vmem:[#allocation214_spill] sm:$0xff] }
 0x3f1   : > { %v5428_v12 = vpop.eup %5427  ;;  %5447 = vrcp.f32 %v3199_v61  ;;  %v10020_v13 = vsub.f32 %v10018_v47, %v10019_v14  ;;  %v2806_v23 = vmul.f32 %v5426_v42, %v10021_v57  ;;  %v8887_v0 = vadd.f32 %v5420_v52, %v2871_v38 }
 0x3f2   : > { %v5430_v6 = vpop.eup %5429  ;;  %5449 = vpow2.f32 %v4094_v10  ;;  %v2518_v22 = vadd.f32 %v2486_v4, %v2166_v53  ;;  %v2870_v46 = vadd.f32 %v5426_v42, %v2550_v34  ;;  %v3126_v36 = vmul.f32 %v5428_v12, %v10022_v15  ;;  %v10025_v53 = vld [vmem:[#allocation31_spill] sm:$0xff]  ;;  %v10027_v34 = vld [vmem:[#allocation133_spill] sm:$0xff] }
 0x3f3   : > { %v4093_v49 = vmul.f32 -1.442695, %v10020_v13  ;;  %v5432_v30 = vpop.eup %5431  ;;  %v2072_v39 = vadd.f32 1.0, %v5430_v6  ;;  %5451 = vpow2.f32 %v4126_v8  ;;  %v10024_v61 = vsub.f32 %v10018_v47, %v10023_v5 }
 0x3f4   : > { %v8893_v55 = vadd.f32 %v3127_v63, %v2839_v33  ;;  %v5434_v56 = vpop.eup %5433  ;;  %v2392_v14 = vadd.f32 1.0, %v5432_v30  ;;  %5453 = vpow2.f32 %v4158_v28  ;;  %v2838_v52 = vadd.f32 %v2806_v23, %v2518_v22  ;;  %v10028_v33 = vld [vmem:[#allocation134_spill] sm:$0xff]  ;;  %v10029_v23 = vld [vmem:[#allocation117_spill] sm:$0xff]  ;;  %v10030_v30 = vld [vmem:[#allocation236_spill] sm:$0xff] }
 0x3f5   : > { %v4125_v37 = vmul.f32 -1.442695, %v10024_v61  ;;  %v8895_v38 = vadd.f32 %v5428_v12, %v2870_v46  ;;  %v5436_v10 = vpop.eup %5435  ;;  %5455 = vrcp.f32 %v2072_v39  ;;  %v10026_v42 = vsub.f32 %v10018_v47, %v10025_v53 }
 0x3f6   : > { %v2169_v8 = vmul.f32 %v5434_v56, %v10027_v34  ;;  %v5438_v13 = vpop.eup %5437  ;;  %v2553_v57 = vadd.f32 %v5436_v10, %v5434_v56  ;;  %5457 = vrcp.f32 %v2392_v14  ;;  %v8901_v6 = vadd.f32 %v3126_v36, %v2838_v52 }
 0x3f7   : > { %v4157_v4 = vmul.f32 -1.442695, %v10026_v42  ;;  %v5440_v63 = vpop.eup %5439  ;;  %5459 = vpow2.f32 %v4093_v49  ;;  %v2489_v28 = vmul.f32 %v5436_v10, %v10028_v33  ;;  %v2809_v12 = vmul.f32 %v5438_v13, %v10029_v23  ;;  %v10032_v49 = vld [vmem:[#allocation220_spill] sm:$0xff] }
 0x3f8   : > { %v5442_v22 = vpop.eup %5441  ;;  %v8905_v46 = vadd.f32 %v5438_v13, %v2553_v57  ;;  %v2712_v15 = vadd.f32 1.0, %v5440_v63  ;;  %5461 = vpow2.f32 %v4125_v37  ;;  %v10031_v39 = vsub.f32 %v10018_v47, %v10030_v30  ;;  %v10033_v10 = vld [vmem:[#allocation224_spill] sm:$0xff]  ;;  %v10034_v57 = vld [vmem:[#allocation223_spill] sm:$0xff]  ;;  %v10037_v30 = vld [vmem:[#allocation170_spill] sm:$0xff] }
 0x3f9   : > { %v5444_v61 = vpop.eup %5443  ;;  %v3032_v56 = vadd.f32 1.0, %v5442_v22  ;;  %5463 = vpow2.f32 %v4157_v4  ;;  %v2521_v36 = vadd.f32 %v2489_v28, %v2169_v8  ;;  %v3200_v53 = vadd.f32 1e-06, %v10033_v10  ;;  %v10035_v28 = vld [vmem:[#allocation144_spill] sm:$0xff] }
 0x3fa   : > { %v4189_v5 = vmul.f32 -1.442695, %v10031_v39  ;;  %v5446_v14 = vpop.eup %5445  ;;  %5465 = vrcp.f32 %v2712_v15  ;;  %v3233_v52 = vmul.f32 %v5444_v61, %v10032_v49  ;;  %v10036_v23 = vsub.f32 %v10007_v59, %v10035_v28  ;;  %v10042_v28 = vld [vmem:[#allocation113_spill] sm:$0xff] }
 0x3fb   : > { %v5448_v42 = vpop.eup %5447  ;;  %5467 = vrcp.f32 %v3032_v56  ;;  %v3033_v34 = vadd.f32 1.0, %v5446_v14  ;;  %v8912_v13 = vadd.f32 %v2809_v12, %v2521_v36  ;;  %v3201_v39 = vadd.f32 1e-06, %v10037_v30  ;;  %v10038_v56 = vld [vmem:[#allocation131_spill] sm:$0xff]  ;;  %v10039_v14 = vld [vmem:[#allocation132_spill] sm:$0xff]  ;;  %v10043_v30 = vld [vmem:[#allocation205_spill] sm:$0xff] }
 0x3fc   : > { %v5450_v37 = vpop.eup %5449  ;;  %4539 = vmatprep.mubr.f32.mxu1 %v3233_v52  ;;  %v3235_v47 = vmul.f32 %v5448_v42, %v10034_v57  ;;  %5469 = vpow2.f32 %v4189_v5  ;;  %v4190_v22 = vmul.f32 -1.442695, %v10036_v23 }
 0x3fd   : > { %v5452_v63 = vpop.eup %5451  ;;  %5471 = vrcp.f32 %v3033_v34  ;;  %v2075_v4 = vadd.f32 1.0, %v5450_v37  ;;  %v10040_v34 = vld [vmem:[#allocation157_spill] sm:$0xff] }
 0x3fe   : > { %v5454_v8 = vpop.eup %5453  ;;  %4540 = vmatmul.mubr.f32.gmra.mrb[114].mxu1 %v3235_v47  ;;  %v2395_v33 = vadd.f32 1.0, %v5452_v63  ;;  %5473 = vrcp.f32 %v3200_v53  ;;  %v3202_v37 = vadd.f32 1e-06, %v10040_v34 }
 0x3ff   : > { %v5456_v15 = vpop.eup %5455  ;;  %5475 = vrcp.f32 %v2075_v4  ;;  %v2715_v12 = vadd.f32 1.0, %v5454_v8  ;;  %v10041_v4 = vld [vmem:[#allocation232_spill] sm:$0xff] }
 0x400   : > { %v5458_v61 = vpop.eup %5457  ;;  %5477 = vrcp.f32 %v2395_v33  ;;  %v2168_v5 = vmul.f32 %v5456_v15, %v10038_v56  ;;  %v3203_v8 = vadd.f32 1e-06, %v10041_v4 }
 0x401   : > { %v5460_v36 = vpop.eup %5459  ;;  %5479 = vrcp.f32 %v2715_v12  ;;  %v2488_v49 = vmul.f32 %v5458_v61, %v10039_v14  ;;  %v2552_v52 = vadd.f32 %v5458_v61, %v5456_v15  ;;  %v3205_v61 = vadd.f32 1e-06, %v8486_v60  ;;  %v10046_v60 = vld [vmem:[#allocation173_spill] sm:$0xff] }
 0x402   : > { %v5462_v10 = vpop.eup %5461  ;;  %v2074_v53 = vadd.f32 1.0, %v5460_v36  ;;  %5481 = vpow2.f32 %v4190_v22  ;;  %v3204_v22 = vadd.f32 1e-06, %v10043_v30  ;;  %v3210_v30 = vadd.f32 1e-06, %v8628_v45 }
 0x403   : > { %v5464_v42 = vpop.eup %5463  ;;  %v2394_v59 = vadd.f32 1.0, %v5462_v10  ;;  %5483 = vrcp.f32 %v3201_v39  ;;  %v2520_v57 = vadd.f32 %v2488_v49, %v2168_v5  ;;  %v10044_v39 = vld [vmem:[#allocation115_spill] sm:$0xff] }
 0x404   : > { %v5466_v47 = vpop.eup %5465  ;;  %5485 = vrcp.f32 %v2074_v53  ;;  %v2714_v63 = vadd.f32 1.0, %v5464_v42  ;;  %v10045_v42 = vld [vmem:[#allocation119_spill] sm:$0xff] }
 0x405   : > { %v5468_v33 = vpop.eup %5467  ;;  %5487 = vrcp.f32 %v2394_v59  ;;  %v2808_v23 = vmul.f32 %v5466_v47, %v10042_v28  ;;  %v2872_v12 = vadd.f32 %v5466_v47, %v2552_v52  ;;  %v3206_v52 = vadd.f32 1e-06, %v8526_v54 }
 0x406   : > { %v5470_v15 = vpop.eup %5469  ;;  %5489 = vrcp.f32 %v2714_v63  ;;  %v3128_v56 = vmul.f32 %v5468_v33, %v10044_v39  ;;  %v3207_v63 = vadd.f32 1e-06, %v8552_v29  ;;  %v3209_v29 = vadd.f32 1e-06, %v8607_v35 }
 0x407   : > { %v5472_v36 = vpop.eup %5471  ;;  %v3034_v5 = vadd.f32 1.0, %v5470_v15  ;;  %5491 = vrcp.f32 %v3202_v37  ;;  %v2840_v14 = vadd.f32 %v2808_v23, %v2520_v57  ;;  %v8927_v49 = vadd.f32 %v5468_v33, %v2872_v12  ;;  %v10048_v23 = vld [vmem:[#allocation138_spill] sm:$0xff] }
 0x408   : > { %v5474_v10 = vpop.eup %5473  ;;  %v8930_v53 = vadd.f32 %v5472_v36, %v8905_v46  ;;  %5493 = vrcp.f32 %v3203_v8  ;;  %v3129_v59 = vmul.f32 %v5472_v36, %v10045_v42  ;;  %v3208_v57 = vadd.f32 1e-06, %v8587_v19  ;;  %v10047_v8 = vld [vmem:[#allocation137_spill] sm:$0xff] }
 0x409   : > { %v5476_v34 = vpop.eup %5475  ;;  %5495 = vrcp.f32 %v3034_v5  ;;  %v3237_v47 = vmul.f32 %v5474_v10, %v10046_v60  ;;  %v8936_v4 = vadd.f32 %v3128_v56, %v2840_v14  ;;  %v10050_v14 = vld [vmem:[#allocation174_spill] sm:$0xff]  ;;  %v3212_v35 = vadd.f32 1e-06, %v8687_v43 }
 0x40a   : > { %v5478_v37 = vpop.eup %5477  ;;  %5497 = vrcp.f32 %v3204_v22  ;;  %v8940_v46 = vadd.f32 %v3129_v59, %v8912_v13  ;;  %v2171_v33 = vmul.f32 %v5476_v34, %v10047_v8  ;;  %v10049_v22 = vld [vmem:[#allocation125_spill] sm:$0xff]  ;;  %v3213_v60 = vadd.f32 1e-06, %v8707_v9 }
 0x40b   : > { %v5480_v54 = vpop.eup %5479  ;;  %v2555_v28 = vadd.f32 %v5478_v37, %v5476_v34  ;;  %4542 = vmatprep.mubr.f32.mxu1 %v3237_v47  ;;  %5499 = vrcp.f32 %v3205_v61  ;;  %v2491_v12 = vmul.f32 %v5478_v37, %v10048_v23  ;;  %v3211_v61 = vadd.f32 1e-06, %v8649_v7  ;;  %v10052_v47 = vld [vmem:[#allocation136_spill] sm:$0xff] }
 0x40c   : > { %v5482_v15 = vpop.eup %5481  ;;  %5501 = vrcp.f32 %v3206_v52  ;;  %v2811_v39 = vmul.f32 %v5480_v54, %v10049_v22  ;;  %v10051_v52 = vld [vmem:[#allocation135_spill] sm:$0xff]  ;;  %v3214_v7 = vadd.f32 1e-06, %v8736_v18  ;;  %v10055_v22 = vld [vmem:[#allocation190_spill] sm:$0xff] }
 0x40d   : > { %v5484_v19 = vpop.eup %5483  ;;  %v8947_v56 = vadd.f32 %v5480_v54, %v2555_v28  ;;  %v3035_v13 = vadd.f32 1.0, %v5482_v15  ;;  %5503 = vrcp.f32 %v3207_v63  ;;  %v2523_v36 = vadd.f32 %v2491_v12, %v2171_v33  ;;  %v10053_v33 = vld [vmem:[#allocation121_spill] sm:$0xff]  ;;  %v10054_v28 = vld [vmem:[#allocation230_spill] sm:$0xff] }
 0x40e   : > { %v5486_v5 = vpop.eup %5485  ;;  %v3239_v10 = vmul.f32 %v5484_v19, %v10050_v14  ;;  %5505 = vrcp.f32 %v3208_v57  ;;  %v3215_v57 = vadd.f32 1e-06, %v8757_v40  ;;  %v10056_v40 = vld [vmem:[#allocation123_spill] sm:$0xff] }
 0x40f   : > { %v5488_v42 = vpop.eup %5487  ;;  %5507 = vrcp.f32 %v3035_v13  ;;  %v2170_v45 = vmul.f32 %v5486_v5, %v10051_v52  ;;  %v8953_v59 = vadd.f32 %v2811_v39, %v2523_v36  ;;  %v3216_v39 = vadd.f32 1e-06, %v8771_v2 }
 0x410   : > { %v5490_v34 = vpop.eup %5489  ;;  %4543 = vmatmul.mubr.f32.gmra.mrb[116].mxu1 %v3239_v10  ;;  %5509 = vrcp.f32 %v3209_v29  ;;  %v2490_v63 = vmul.f32 %v5488_v42, %v10052_v47  ;;  %v2554_v37 = vadd.f32 %v5488_v42, %v5486_v5  ;;  %v3218_v10 = vadd.f32 1e-06, %v8816_v58  ;;  %v10057_v42 = vld [vmem:[#allocation191_spill] sm:$0xff] }
 0x411   : > { %v5492_v8 = vpop.eup %5491  ;;  %5511 = vrcp.f32 %v3210_v30  ;;  %v2810_v43 = vmul.f32 %v5490_v34, %v10053_v33  ;;  %v3217_v30 = vadd.f32 1e-06, %v8790_v17  ;;  %v3219_v2 = vadd.f32 1e-06, %v8813_v21  ;;  %v10060_v33 = vld [vmem:[#allocation127_spill] sm:$0xff] }
 0x412   : > { %v5494_v54 = vpop.eup %5493  ;;  %v3241_v23 = vmul.f32 %v5492_v8, %v10054_v28  ;;  %5513 = vrcp.f32 %v3211_v61  ;;  %v2522_v12 = vadd.f32 %v2490_v63, %v2170_v45  ;;  %v2874_v15 = vadd.f32 %v5490_v34, %v2554_v37  ;;  %v10058_v45 = vld [vmem:[#allocation145_spill] sm:$0xff] }
 0x413   : > { %v5496_v29 = vpop.eup %5495  ;;  %v3243_v9 = vmul.f32 %v5494_v54, %v10055_v22  ;;  %5515 = vrcp.f32 %v3212_v35  ;;  %v3221_v58 = vadd.f32 1e-06, %v8843_v48  ;;  %v3222_v21 = vadd.f32 1e-06, %v8895_v38 }
 0x414   : > { %v5498_v19 = vpop.eup %5497  ;;  %4545 = vmatprep.mubr.f32.mxu1 %v3241_v23  ;;  %5517 = vrcp.f32 %v3213_v60  ;;  %v2842_v18 = vadd.f32 %v2810_v43, %v2522_v12  ;;  %v3130_v13 = vmul.f32 %v5496_v29, %v10056_v40  ;;  %v3194_v36 = vadd.f32 %v5496_v29, %v2874_v15 }
 0x415   : > { %v5500_v5 = vpop.eup %5499  ;;  %4546 = vmatmul.mubr.f32.gmra.mrb[118].mxu1 %v3243_v9  ;;  %v3245_v14 = vmul.f32 %v5498_v19, %v8474_v51  ;;  %5519 = vrcp.f32 %v3214_v7  ;;  %v3220_v60 = vadd.f32 1e-06, %v8845_v27  ;;  %v10059_v51 = vld [vmem:[#allocation234_spill] sm:$0xff]  ;;  %v3223_v27 = vadd.f32 1e-06, %v8887_v0 }
 0x416   : > { %v5502_v61 = vpop.eup %5501  ;;  %v3247_v35 = vmul.f32 %v5500_v5, %v10057_v42  ;;  %5521 = vrcp.f32 %v3215_v57  ;;  %v8969_v17 = vadd.f32 %v3130_v13, %v2842_v18  ;;  %v3224_v48 = vadd.f32 1e-06, %v8927_v49 }
 0x417   : > { %v5504_v52 = vpop.eup %5503  ;;  %4548 = vmatprep.mubr.f32.mxu1 %v3245_v14  ;;  %v3249_v34 = vmul.f32 %v5502_v61, %v10058_v45  ;;  %5523 = vrcp.f32 %v3216_v39  ;;  %v3225_v38 = vadd.f32 1e-06, %v8930_v53  ;;  %v3226_v15 = vadd.f32 1e-06, %v3194_v36 }
 0x418   : > { %v5506_v47 = vpop.eup %5505  ;;  %v3251_v63 = vmul.f32 %v5504_v52, %v10059_v51  ;;  %5525 = vrcp.f32 %v3217_v30 }
 0x419   : > { %v5508_v37 = vpop.eup %5507  ;;  %4549 = vmatmul.mubr.f32.gmra.mrb[120].mxu1 %v3247_v35  ;;  %v3253_v8 = vmul.f32 %v5506_v47, %v8594_v62  ;;  %5527 = vrcp.f32 %v3218_v10 }
 0x41a   : > { %v5510_v7 = vpop.eup %5509  ;;  %v3195_v57 = vadd.f32 %v5508_v37, %v8947_v56  ;;  %4551 = vmatprep.mubr.f32.mxu1 %v3249_v34  ;;  %5529 = vrcp.f32 %v3219_v2  ;;  %v3131_v43 = vmul.f32 %v5508_v37, %v10060_v33 }
 0x41b   : > { %v5512_v54 = vpop.eup %5511  ;;  %v3255_v28 = vmul.f32 %v5510_v7, %v8618_v11  ;;  %5531 = vrcp.f32 %v3220_v60 }
 0x41c   : > { %v5514_v23 = vpop.eup %5513  ;;  %v3257_v62 = vmul.f32 %v5512_v54, %v8632_v3  ;;  %5533 = vrcp.f32 %v3221_v58  ;;  %v3163_v56 = vadd.f32 %v3131_v43, %v8953_v59  ;;  %v3227_v49 = vadd.f32 1e-06, %v3195_v57 }
 0x41d   : > { %v5516_v12 = vpop.eup %5515  ;;  %4552 = vmatmul.mubr.f32.gmra.mrb[122].mxu1 %v3251_v63  ;;  %v3259_v0 = vmul.f32 %v5514_v23, %v8664_v31  ;;  %5535 = vrcp.f32 %v3222_v21 }
 0x41e   : > { %v5518_v29 = vpop.eup %5517  ;;  %4554 = vmatprep.mubr.f32.mxu1 %v3253_v8  ;;  %v3261_v11 = vmul.f32 %v5516_v12, %v8701_v25  ;;  %5537 = vrcp.f32 %v3223_v27 }
 0x41f   : > { %v5520_v22 = vpop.eup %5519  ;;  %v3263_v3 = vmul.f32 %v5518_v29, %v8724_v26  ;;  %5539 = vrcp.f32 %v3224_v48 }
 0x420   : > { %v5522_v9 = vpop.eup %5521  ;;  %v3265_v53 = vmul.f32 %v5520_v22, %v8743_v1  ;;  %5541 = vrcp.f32 %v3225_v38 }
 0x421   : > { %v5524_v59 = vpop.eup %5523  ;;  %4555 = vmatmul.mubr.f32.gmra.mrb[124].mxu1 %v3255_v28  ;;  %v3267_v31 = vmul.f32 %v5522_v9, %v8760_v16  ;;  %5543 = vrcp.f32 %v3226_v15 }
 0x422   : > { %v5526_v39 = vpop.eup %5525  ;;  %4557 = vmatprep.mubr.f32.mxu1 %v3257_v62  ;;  %v3269_v30 = vmul.f32 %v5524_v59, %v8780_v24  ;;  %5545 = vrcp.f32 %v3227_v49 }
 0x423   : > { %v5528_v25 = vpop.eup %5527  ;;  %v3271_v19 = vmul.f32 %v5526_v39, %v8796_v44 }
 0x424   : > { %v5530_v18 = vpop.eup %5529  ;;  %v3273_v26 = vmul.f32 %v5528_v25, %v8830_v20 }
 0x425   : > { %v5532_v40 = vpop.eup %5531  ;;  %4558 = vmatmul.mubr.f32.gmra.mrb[126].mxu1 %v3259_v0  ;;  %v3275_v1 = vmul.f32 %v5530_v18, %v8823_v32 }
 0x426   : > { %v5534_v13 = vpop.eup %5533  ;;  %4560 = vmatprep.mubr.f32.mxu1 %v3261_v11  ;;  %v3277_v16 = vmul.f32 %v5532_v40, %v8847_v41 }
 0x427   : > { %v5536_v36 = vpop.eup %5535  ;;  %v3279_v5 = vmul.f32 %v5534_v13, %v8841_v50  ;;  %v9004_v50 = vld [vmem:[%s9137_s7] ss:$0 sm:$0xff] }
 0x428   : > { %v5538_v14 = vpop.eup %5537  ;;  %v3281_v24 = vmul.f32 %v5536_v36, %v8901_v6 }
 0x429   : > { %v5540_v10 = vpop.eup %5539  ;;  %4561 = vmatmul.mubr.f32.gmra.mrb[128].mxu1 %v3263_v3  ;;  %v3283_v44 = vmul.f32 %v5538_v14, %v8893_v55 }
 0x42a   : > { %v5542_v61 = vpop.eup %5541  ;;  %4563 = vmatprep.mubr.f32.mxu1 %v3265_v53  ;;  %v3285_v20 = vmul.f32 %v5540_v10, %v8936_v4 }
 0x42b   : > { %v5544_v42 = vpop.eup %5543  ;;  %v3287_v32 = vmul.f32 %v5542_v61, %v8940_v46 }
 0x42c   : > { %v5546_v35 = vpop.eup %5545  ;;  %v3289_v41 = vmul.f32 %v5544_v42, %v8969_v17 }
 0x42d   : > { %4564 = vmatmul.mubr.f32.gmra.mrb[130].mxu1 %v3267_v31  ;;  %v3291_v2 = vmul.f32 %v5546_v35, %v3163_v56 }
 0x42e   : > { %4566 = vmatprep.mubr.f32.mxu1 %v3269_v30 }
 0x431   : > { %4567 = vmatmul.mubr.f32.gmra.mrb[132].mxu1 %v3271_v19 }
 0x432   : > { %4569 = vmatprep.mubr.f32.mxu1 %v3273_v26 }
 0x435   : > { %4570 = vmatmul.mubr.f32.gmra.mrb[134].mxu1 %v3275_v1 }
 0x436   : > { %4572 = vmatprep.mubr.f32.mxu1 %v3277_v16 }
 0x439   : > { %4573 = vmatmul.mubr.f32.gmra.mrb[136].mxu1 %v3279_v5 }
 0x43a   : > { %4575 = vmatprep.mubr.f32.mxu1 %v3281_v24 }
 0x43d   : > { %4576 = vmatmul.mubr.f32.gmra.mrb[138].mxu1 %v3283_v44 }
 0x43e   : > { %4578 = vmatprep.mubr.f32.mxu1 %v3285_v20 }
 0x441   : > { %4579 = vmatmul.mubr.f32.gmra.mrb[140].mxu1 %v3287_v32 }
 0x442   : > { %4581 = vmatprep.mubr.f32.mxu1 %v3289_v41 }
 0x445   : > { %4582 = vmatmul.mubr.f32.gmra.mrb[142].mxu1 %v3291_v2 }
 0x4bc   : > { %v4538_v55 = vpop.f32.mrb[112].mxu1 }
 0x4bd   : > { %v3782_v6 = vadd.f32 %v4538_v55, %v9004_v50  ;;  %v3615_v4 = vpop.f32.mrb[113].mxu1 }
 0x4be   : > { %v3781_v46 = vadd.f32 %v9004_v50, %v3615_v4 }
 0x4bf   : > { %v3814_v17 = vmax.f32 %v3782_v6, 0.0 }
 0x4c0   : > { %v3813_v52 = vmax.f32 %v3781_v46, 0.0 }
 0x4c1   : > { %3846 = vst [vmem:[%s9010_s18 + $0x8] sm:$0xff] %v3814_v17 }
 0x4c2   : > { %3845 = vst [vmem:[%s9010_s18] sm:$0xff] %v3813_v52 }
 0x4d1   : > { %v4541_v45 = vpop.f32.mrb[114].mxu1 }
 0x4d2   : > { %v3784_v34 = vadd.f32 %v4541_v45, %v9004_v50  ;;  %v3625_v60 = vpop.f32.mrb[115].mxu1 }
 0x4d3   : > { %v3783_v47 = vadd.f32 %v9004_v50, %v3625_v60 }
 0x4d4   : > { %v3816_v51 = vmax.f32 %v3784_v34, 0.0 }
 0x4d5   : > { %v3815_v63 = vmax.f32 %v3783_v47, 0.0 }
 0x4d6   : > { %3848 = vst [vmem:[%s9010_s18 + $0x18] sm:$0xff] %v3816_v51 }
 0x4d7   : > { %3847 = vst [vmem:[%s9010_s18 + $0x10] sm:$0xff] %v3815_v63 }
 0x4e3   : > { %v4544_v58 = vpop.f32.mrb[116].mxu1 }
 0x4e4   : > { %v3786_v37 = vadd.f32 %v4544_v58, %v9004_v50  ;;  %v3635_v8 = vpop.f32.mrb[117].mxu1 }
 0x4e5   : > { %v3785_v21 = vadd.f32 %v9004_v50, %v3635_v8 }
 0x4e6   : > { %v3818_v7 = vmax.f32 %v3786_v37, 0.0 }
 0x4e7   : > { %v3817_v57 = vmax.f32 %v3785_v21, 0.0 }
 0x4e8   : > { %3850 = vst [vmem:[%s9010_s18 + $0x28] sm:$0xff] %v3818_v7  ;;  %v4547_v27 = vpop.f32.mrb[118].mxu1 }
 0x4e9   : > { %3849 = vst [vmem:[%s9010_s18 + $0x20] sm:$0xff] %v3817_v57  ;;  %v3788_v33 = vadd.f32 %v4547_v27, %v9004_v50  ;;  %v3645_v43 = vpop.f32.mrb[119].mxu1 }
 0x4ea   : > { %v3787_v54 = vadd.f32 %v9004_v50, %v3645_v43 }
 0x4eb   : > { %v3820_v28 = vmax.f32 %v3788_v33, 0.0 }
 0x4ec   : > { %v3819_v48 = vmax.f32 %v3787_v54, 0.0  ;;  %v4550_v23 = vpop.f32.mrb[120].mxu1 }
 0x4ed   : > { %3852 = vst [vmem:[%s9010_s18 + $0x38] sm:$0xff] %v3820_v28  ;;  %v3790_v62 = vadd.f32 %v4550_v23, %v9004_v50  ;;  %v3655_v38 = vpop.f32.mrb[121].mxu1 }
 0x4ee   : > { %3851 = vst [vmem:[%s9010_s18 + $0x30] sm:$0xff] %v3819_v48  ;;  %v3789_v56 = vadd.f32 %v9004_v50, %v3655_v38 }
 0x4ef   : > { %v3822_v12 = vmax.f32 %v3790_v62, 0.0 }
 0x4f0   : > { %v3821_v0 = vmax.f32 %v3789_v56, 0.0  ;;  %v4553_v15 = vpop.f32.mrb[122].mxu1 }
 0x4f1   : > { %3854 = vst [vmem:[%s9010_s18 + $0x48] sm:$0xff] %v3822_v12  ;;  %v3792_v29 = vadd.f32 %v4553_v15, %v9004_v50  ;;  %v3665_v11 = vpop.f32.mrb[123].mxu1 }
 0x4f2   : > { %3853 = vst [vmem:[%s9010_s18 + $0x40] sm:$0xff] %v3821_v0  ;;  %v3791_v49 = vadd.f32 %v9004_v50, %v3665_v11 }
 0x4f3   : > { %v3824_v22 = vmax.f32 %v3792_v29, 0.0 }
 0x4f4   : > { %v3823_v3 = vmax.f32 %v3791_v49, 0.0  ;;  %v4556_v9 = vpop.f32.mrb[124].mxu1 }
 0x4f5   : > { %3856 = vst [vmem:[%s9010_s18 + $0x58] sm:$0xff] %v3824_v22  ;;  %v3794_v53 = vadd.f32 %v4556_v9, %v9004_v50  ;;  %v3675_v59 = vpop.f32.mrb[125].mxu1 }
 0x4f6   : > { %3855 = vst [vmem:[%s9010_s18 + $0x50] sm:$0xff] %v3823_v3  ;;  %v3793_v31 = vadd.f32 %v9004_v50, %v3675_v59 }
 0x4f7   : > { %v3826_v39 = vmax.f32 %v3794_v53, 0.0 }
 0x4f8   : > { %v3825_v30 = vmax.f32 %v3793_v31, 0.0  ;;  %v4559_v25 = vpop.f32.mrb[126].mxu1 }
 0x4f9   : > { %3858 = vst [vmem:[%s9010_s18 + $0x68] sm:$0xff] %v3826_v39  ;;  %v3796_v19 = vadd.f32 %v4559_v25, %v9004_v50  ;;  %v3685_v18 = vpop.f32.mrb[127].mxu1 }
 0x4fa   : > { %3857 = vst [vmem:[%s9010_s18 + $0x60] sm:$0xff] %v3825_v30  ;;  %v3795_v26 = vadd.f32 %v9004_v50, %v3685_v18 }
 0x4fb   : > { %v3828_v40 = vmax.f32 %v3796_v19, 0.0 }
 0x4fc   : > { %v3827_v1 = vmax.f32 %v3795_v26, 0.0  ;;  %v4562_v13 = vpop.f32.mrb[128].mxu1 }
 0x4fd   : > { %3860 = vst [vmem:[%s9010_s18 + $0x78] sm:$0xff] %v3828_v40  ;;  %v3798_v16 = vadd.f32 %v4562_v13, %v9004_v50  ;;  %v3695_v36 = vpop.f32.mrb[129].mxu1 }
 0x4fe   : > { %3859 = vst [vmem:[%s9010_s18 + $0x70] sm:$0xff] %v3827_v1  ;;  %v3797_v5 = vadd.f32 %v9004_v50, %v3695_v36 }
 0x4ff   : > { %v3830_v14 = vmax.f32 %v3798_v16, 0.0 }
 0x500   : > { %v3829_v24 = vmax.f32 %v3797_v5, 0.0  ;;  %v4565_v10 = vpop.f32.mrb[130].mxu1 }
 0x501   : > { %3862 = vst [vmem:[%s9010_s18 + $0x88] sm:$0xff] %v3830_v14  ;;  %v3800_v44 = vadd.f32 %v4565_v10, %v9004_v50  ;;  %v3705_v61 = vpop.f32.mrb[131].mxu1 }
 0x502   : > { %3861 = vst [vmem:[%s9010_s18 + $0x80] sm:$0xff] %v3829_v24  ;;  %v3799_v20 = vadd.f32 %v9004_v50, %v3705_v61 }
 0x503   : > { %v3832_v42 = vmax.f32 %v3800_v44, 0.0 }
 0x504   : > { %v3831_v32 = vmax.f32 %v3799_v20, 0.0  ;;  %v4568_v35 = vpop.f32.mrb[132].mxu1 }
 0x505   : > { %3864 = vst [vmem:[%s9010_s18 + $0x98] sm:$0xff] %v3832_v42  ;;  %v3802_v41 = vadd.f32 %v4568_v35, %v9004_v50  ;;  %v3715_v2 = vpop.f32.mrb[133].mxu1 }
 0x506   : > { %3863 = vst [vmem:[%s9010_s18 + $0x90] sm:$0xff] %v3831_v32  ;;  %v3801_v55 = vadd.f32 %v9004_v50, %v3715_v2 }
 0x507   : > { %v3834_v6 = vmax.f32 %v3802_v41, 0.0 }
 0x508   : > { %v3833_v4 = vmax.f32 %v3801_v55, 0.0  ;;  %v4571_v46 = vpop.f32.mrb[134].mxu1 }
 0x509   : > { %3866 = vst [vmem:[%s9010_s18 + $0xa8] sm:$0xff] %v3834_v6  ;;  %v3804_v17 = vadd.f32 %v4571_v46, %v9004_v50  ;;  %v3725_v52 = vpop.f32.mrb[135].mxu1 }
 0x50a   : > { %3865 = vst [vmem:[%s9010_s18 + $0xa0] sm:$0xff] %v3833_v4  ;;  %v3803_v45 = vadd.f32 %v9004_v50, %v3725_v52 }
 0x50b   : > { %v3836_v34 = vmax.f32 %v3804_v17, 0.0 }
 0x50c   : > { %v3835_v60 = vmax.f32 %v3803_v45, 0.0  ;;  %v4574_v47 = vpop.f32.mrb[136].mxu1 }
 0x50d   : > { %3868 = vst [vmem:[%s9010_s18 + $0xb8] sm:$0xff] %v3836_v34  ;;  %v3806_v51 = vadd.f32 %v4574_v47, %v9004_v50  ;;  %v3735_v63 = vpop.f32.mrb[137].mxu1 }
 0x50e   : > { %3867 = vst [vmem:[%s9010_s18 + $0xb0] sm:$0xff] %v3835_v60  ;;  %v3805_v58 = vadd.f32 %v9004_v50, %v3735_v63 }
 0x50f   : > { %v3838_v37 = vmax.f32 %v3806_v51, 0.0 }
 0x510   : > { %v3837_v8 = vmax.f32 %v3805_v58, 0.0  ;;  %v4577_v21 = vpop.f32.mrb[138].mxu1 }
 0x511   : > { %3870 = vst [vmem:[%s9010_s18 + $0xc8] sm:$0xff] %v3838_v37  ;;  %v3808_v7 = vadd.f32 %v4577_v21, %v9004_v50  ;;  %v3745_v57 = vpop.f32.mrb[139].mxu1 }
 0x512   : > { %3869 = vst [vmem:[%s9010_s18 + $0xc0] sm:$0xff] %v3837_v8  ;;  %v3807_v27 = vadd.f32 %v9004_v50, %v3745_v57 }
 0x513   : > { %v3840_v33 = vmax.f32 %v3808_v7, 0.0 }
 0x514   : > { %v3839_v43 = vmax.f32 %v3807_v27, 0.0  ;;  %v4580_v54 = vpop.f32.mrb[140].mxu1 }
 0x515   : > { %3872 = vst [vmem:[%s9010_s18 + $0xd8] sm:$0xff] %v3840_v33  ;;  %v3810_v28 = vadd.f32 %v4580_v54, %v9004_v50  ;;  %v3755_v48 = vpop.f32.mrb[141].mxu1 }
 0x516   : > { %3871 = vst [vmem:[%s9010_s18 + $0xd0] sm:$0xff] %v3839_v43  ;;  %v3809_v23 = vadd.f32 %v9004_v50, %v3755_v48 }
 0x517   : > { %v3842_v62 = vmax.f32 %v3810_v28, 0.0 }
 0x518   : > { %v3841_v38 = vmax.f32 %v3809_v23, 0.0  ;;  %v4583_v56 = vpop.f32.mrb[142].mxu1 }
 0x519   : > { %3874 = vst [vmem:[%s9010_s18 + $0xe8] sm:$0xff] %v3842_v62  ;;  %v3812_v12 = vadd.f32 %v4583_v56, %v9004_v50  ;;  %v3765_v0 = vpop.f32.mrb[143].mxu1 }
 0x51a   : > { %3873 = vst [vmem:[%s9010_s18 + $0xe0] sm:$0xff] %v3841_v38  ;;  %v3811_v15 = vadd.f32 %v9004_v50, %v3765_v0 }
 0x51b   : > { %v3844_v29 = vmax.f32 %v3812_v12, 0.0 }
 0x51c   : > { %v3843_v11 = vmax.f32 %v3811_v15, 0.0 }
 0x51d   : > { %3876 = vst [vmem:[%s9010_s18 + $0xf8] sm:$0xff] %v3844_v29 }
 0x51e   : > { %3875 = vst [vmem:[%s9010_s18 + $0xf0] sm:$0xff] %v3843_v11 }
 0x51f   : > { %5733 = shalt.err (!%p5730_p0)
}
 0x520   : > { %s5734_s10 = scalar_lea.hbm %s9077_s12, 4096  ;;  %s5738_s11 = scalar_lea.hbm %s10063_s21, 8192 }
 0x521   : > { %p5735_p1 = scmp.ne.s32.totalorder %s9077_s12, %s5734_s10  ;;  %p5739_p10 = scmp.lt.u32.totalorder %s9077_s12, %s10063_s21 }
 0x522   : > { %p5740_p5 = scmp.lt.u32.totalorder %s5738_s11, %s5734_s10  ;;  %p5742_p9 = scmp.lt.u32.totalorder %s5734_s10, %s9077_s12 }
 0x523   : > { %p5736_p2 = pnand %p5735_p1, %p10064_p13 }
 0x524   : > { %p5741_p7 = por %p5740_p5, %p5739_p10 }
 0x525   : > { %p5737_p4 = pneg %p5736_p2 }
 0x526   : > { %p5743_p6 = por %p5742_p9, %p5741_p7 }
 0x528   : > { %p5744_p8 = pnand %p5743_p6, %p5737_p4 }
 0x52a   : > { %5747 = shalt.err (!%p5744_p8)
}
 0x52b   : > { %s5832_s25 = smov 128   ;;  %s5833_s17 = smov 8  }
 0x52c   : > { %4876 = dma.vmem_to_hbm [thread:$0]  (%p10064_p13), %s9079_s16, 4096, %s9077_s12, %s3878_s27, %s5832_s25, %s5832_s25, %s5833_s17  }
 0x52d PF: > { %s10065_s26 = sld [smem:[#allocation19_spill]]  ;;  %s10066_s18 = sld [smem:[#allocation23_spill]] }
 0x52e   : > { %s10067_s24 = sld [smem:[#allocation22_spill]] }
 0x533   : > { %s3908_s19 = sand.u32 1, %s10065_s26   ;;  %p10068_p12 = scmp.ne.s32.totalorder %s10066_s18, 0 }
 0x534   : > { %p10069_p3 = scmp.ge.s32.totalorder %s10067_s24, 2  ;;  %s3909_s14 = scalar_lea.sflag [#allocation4], %s3908_s19 }
 0x536   : > { %p4899_p11 = pnand %p10069_p3, %p10068_p12 }
 0x538   : > { %5793 = dma.done.wait (!%p4899_p11), %s3909_s14, 4096  }
 0x539   : > { %5795 = vsyncadd (!%p4899_p11), %s3909_s14, 4294963200  ;;  %s26_s10 = sadd.s32 1, %s10067_s24   ;;  %s10070_s20 = sld [smem:[#allocation20_spill]] }
 0x53a   : > { %p23_p0 = scmp.ge.s32.totalorder %s26_s10, 4   ;;  %s10071_s29 = sld [smem:[#allocation26_spill]] }
 0x53b   : > { %s10072_s23 = sld [smem:[#allocation24_spill]]  ;;  %s10073_s27 = smov %s5802_s28 }
 0x53c   : > { %s10075_s30 = smov %s5814_s9  ;;  %25 = sbr.rel (!%p23_p0) target bundleno = 13 (0xd), region = 125 }
 0x53f   : > { %s10074_s28 = smov %s10070_s20 }
 0x541   : > { %s10076_s9 = smov %s10072_s23 }
 0x543   :  { %3914 = vsyncpa [#allocation3], 1 }
 0x544   :  { %3916 = vsyncpa [#allocation3 + $0x1], 1 }
 0x545   :  { %3917 = vsyncpa [#allocation6], 1 }
 0x546   :  { %3918 = vsyncpa [#allocation10], 1 }
 0x547   :  { %3919 = vsyncpa [#allocation4], 1 }
 0x548   :  { %3921 = vsyncpa [#allocation4 + $0x1], 1 }

</bundles_post_ra>
